<compile_context>
chip_gen: v6e
topology: v6e:2x2x1
jax: 0.10.0
libtpu: 0.0.40
codegen_flags: <defaults>
</compile_context>

<pallas_src>
import functools

import jax
import jax.numpy as jnp
from jax.experimental import pallas as pl
from jax.experimental.pallas import tpu as pltpu

# ---- model hyper-parameters (from the PyTorch script) ----------------------
EMBEDDING_DIM = 128
HIDDEN_DIM = 128
NUM_LAYERS = 2
INPUT_DIM = 50      # len(vocab) -- synthetic vocab size
OUTPUT_DIM = 16     # output_dim -- synthetic number of classes
OPAD = 128          # lane-padded FC output width


# ---- Pallas kernel ----------------------------------------------------------
def _lstm_cell(gates, c_prev, H):
    """PyTorch gate order i, f, g, o. gates: (B, 4H)."""
    i = jax.nn.sigmoid(gates[:, 0 * H:1 * H])
    f = jax.nn.sigmoid(gates[:, 1 * H:2 * H])
    g = jnp.tanh(gates[:, 2 * H:3 * H])
    o = jax.nn.sigmoid(gates[:, 3 * H:4 * H])
    c = f * c_prev + i * g
    h = o * jnp.tanh(c)
    return h, c


def bilstm_fused_kernel(seq_len, batch,
                        xpf0_ref, xpb0_ref,        # (S*B, 4H) pre-projected L0 inputs
                        whh0f_ref, whh0b_ref,      # (H, 4H)
                        wih1_ref, b1_ref,          # (2H, 8H), (1, 8H)
                        whh1f_ref, whh1b_ref,      # (H, 4H)
                        wfc_ref, bfc_ref,          # (2H, OPAD), (1, OPAD)
                        out_ref,                   # (S*B, OPAD) padded log-probs
                        h0_scr, xp1_scr, h1_scr):  # VMEM scratch
    S, B = seq_len, batch
    H = whh0f_ref.shape[0]
    f32 = jnp.float32
    zero = jnp.zeros((B, H), f32)

    # ---- layer 0: fused bidirectional recurrence ---------------------------
    # Input projection + biases were pre-folded into the embedding tables, so
    # only h @ W_hh sits on the serialized per-step critical path.
    hf = hb = zero
    cf = cb = zero
    for t in range(S):                  # fully unrolled: S is small and static
        r = S - 1 - t
        gf = xpf0_ref[t * B:(t + 1) * B, :] + jnp.dot(
            hf, whh0f_ref[...], preferred_element_type=f32)
        gb = xpb0_ref[r * B:(r + 1) * B, :] + jnp.dot(
            hb, whh0b_ref[...], preferred_element_type=f32)
        hf, cf = _lstm_cell(gf, cf, H)
        hb, cb = _lstm_cell(gb, cb, H)
        h0_scr[t * B:(t + 1) * B, 0:H] = hf          # fwd half at position t
        h0_scr[r * B:(r + 1) * B, H:2 * H] = hb      # bwd half at position r

    # ---- layer-1 input projection, hoisted out of the recurrence -----------
    # One (S*B, 2H) @ (2H, 8H) matmul: W_ih of both directions streams through
    # the MXU exactly once, bias folded in here (no in-loop broadcasts).
    xp1_scr[...] = (
        jnp.dot(h0_scr[...], wih1_ref[...], preferred_element_type=f32)
        + b1_ref[...])

    # ---- layer 1: fused bidirectional recurrence ---------------------------
    hf = hb = zero
    cf = cb = zero
    for t in range(S):
        r = S - 1 - t
        gf = xp1_scr[t * B:(t + 1) * B, 0:4 * H] + jnp.dot(
            hf, whh1f_ref[...], preferred_element_type=f32)
        gb = xp1_scr[r * B:(r + 1) * B, 4 * H:8 * H] + jnp.dot(
            hb, whh1b_ref[...], preferred_element_type=f32)
        hf, cf = _lstm_cell(gf, cf, H)
        hb, cb = _lstm_cell(gb, cb, H)
        h1_scr[t * B:(t + 1) * B, 0:H] = hf
        h1_scr[r * B:(r + 1) * B, H:2 * H] = hb

    # ---- FC + log_softmax, lane/sublane-dense (S*B, OPAD) output -----------
    # Padded columns have weight 0 and bias -1e30 -> exp underflows to 0, so
    # the log-sum-exp equals the one over the real O columns.
    logits = (jnp.dot(h1_scr[...], wfc_ref[...], preferred_element_type=f32)
              + bfc_ref[...])
    m = jnp.max(logits, axis=-1, keepdims=True)
    z = logits - m
    lse = jnp.log(jnp.sum(jnp.exp(z), axis=-1, keepdims=True))
    out_ref[...] = z - lse


# ---- wrappers ---------------------------------------------------------------
_VMEM = pl.BlockSpec(memory_space=pltpu.MemorySpace.VMEM)


def bilstm_pallas(xpf0, xpb0, params, seq_len, batch):
    H = HIDDEN_DIM
    SB = seq_len * batch
    return pl.pallas_call(
        functools.partial(bilstm_fused_kernel, seq_len, batch),
        out_shape=jax.ShapeDtypeStruct((SB, OPAD), jnp.float32),
        in_specs=[_VMEM] * 10,
        out_specs=_VMEM,
        scratch_shapes=[
            pltpu.VMEM((SB, 2 * H), jnp.float32),   # layer-0 hidden states
            pltpu.VMEM((SB, 8 * H), jnp.float32),   # layer-1 pre-projected inputs
            pltpu.VMEM((SB, 2 * H), jnp.float32),   # layer-1 hidden states
        ],
    )(xpf0, xpb0,
      params["whh0_f"], params["whh0_b"],
      params["wih1"], params["b1"],
      params["whh1_f"], params["whh1_b"],
      params["w_fc"], params["b_fc"])


@jax.jit
def bilstm_forward(x_ids, params):
    B, S = x_ids.shape
    # Time-major flat token ids (row index = t*B + b).
    ids_tm = x_ids.T.reshape(-1)
    # Embedding gather on pre-projected tables == embed(x) @ W_ih0 + b (exact).
    xpf0 = jnp.take(params["t0_fwd"], ids_tm, axis=0)   # (S*B, 4H)
    xpb0 = jnp.take(params["t0_bwd"], ids_tm, axis=0)   # (S*B, 4H)
    out_flat = bilstm_pallas(xpf0, xpb0, params, S, B)  # (S*B, OPAD)
    out = out_flat.reshape(S, B, OPAD)[:, :, :OUTPUT_DIM]
    return jnp.transpose(out, (1, 0, 2))                # (B, S, O)


def init_params(key):
    """Deterministic synthetic parameters matching the nn.Module shapes,
    pre-transformed into the kernel's layout."""
    keys = iter(jax.random.split(key, 64))
    H = HIDDEN_DIM
    scale = 1.0 / jnp.sqrt(jnp.float32(H))

    emb = 0.1 * jax.random.normal(next(keys), (INPUT_DIM, EMBEDDING_DIM), jnp.float32)
    emb = emb.at[0].set(0.0)   # padding_idx=0

    def lstm_dir(in_size):
        w_ih = jax.random.uniform(next(keys), (4 * H, in_size), jnp.float32, -scale, scale)
        w_hh = jax.random.uniform(next(keys), (4 * H, H), jnp.float32, -scale, scale)
        b_ih = jax.random.uniform(next(keys), (4 * H,), jnp.float32, -scale, scale)
        b_hh = jax.random.uniform(next(keys), (4 * H,), jnp.float32, -scale, scale)
        return w_ih, w_hh, b_ih, b_hh

    params = {}

    # Layer 0: fold embedding -> input-projection -> bias into lookup tables.
    w_ih0f, w_hh0f, b_ih0f, b_hh0f = lstm_dir(EMBEDDING_DIM)
    w_ih0b, w_hh0b, b_ih0b, b_hh0b = lstm_dir(EMBEDDING_DIM)
    params["t0_fwd"] = emb @ w_ih0f.T + (b_ih0f + b_hh0f)[None, :]   # (vocab, 4H)
    params["t0_bwd"] = emb @ w_ih0b.T + (b_ih0b + b_hh0b)[None, :]
    params["whh0_f"] = w_hh0f.T                                       # (H, 4H)
    params["whh0_b"] = w_hh0b.T

    # Layer 1: concatenated fwd|bwd input-projection weights and biases.
    w_ih1f, w_hh1f, b_ih1f, b_hh1f = lstm_dir(2 * H)
    w_ih1b, w_hh1b, b_ih1b, b_hh1b = lstm_dir(2 * H)
    params["wih1"] = jnp.concatenate([w_ih1f.T, w_ih1b.T], axis=1)    # (2H, 8H)
    params["b1"] = jnp.concatenate(
        [b_ih1f + b_hh1f, b_ih1b + b_hh1b])[None, :]                  # (1, 8H)
    params["whh1_f"] = w_hh1f.T                                       # (H, 4H)
    params["whh1_b"] = w_hh1b.T

    # FC, lane-padded to OPAD output columns (-1e30 bias kills padded columns).
    fc_scale = 1.0 / jnp.sqrt(jnp.float32(2 * H))
    w_fc = jax.random.uniform(next(keys), (OUTPUT_DIM, 2 * H), jnp.float32,
                              -fc_scale, fc_scale)
    b_fc = jax.random.uniform(next(keys), (OUTPUT_DIM,), jnp.float32,
                              -fc_scale, fc_scale)
    params["w_fc"] = jnp.zeros((2 * H, OPAD), jnp.float32).at[:, :OUTPUT_DIM].set(w_fc.T)
    params["b_fc"] = jnp.full((1, OPAD), -1e30, jnp.float32).at[0, :OUTPUT_DIM].set(b_fc)
    return params


if __name__ == "__main__":
    key = jax.random.PRNGKey(0)
    k_x, k_p = jax.random.split(key)

    BATCH, SEQ = 2, 8
    x = jax.random.randint(k_x, (BATCH, SEQ), 0, INPUT_DIM, dtype=jnp.int32)
    params = init_params(k_p)

    out = bilstm_forward(x, params)
    out = jax.block_until_ready(out)

    assert out.shape == (BATCH, SEQ, OUTPUT_DIM), out.shape
    # log_softmax rows should sum to ~1 after exp
    row_sums = jnp.exp(out).sum(-1)
    assert bool(jnp.all(jnp.abs(row_sums - 1.0) < 1e-4)), row_sums
    print("KERNEL_OK")
</pallas_src>

<mosaic_0001>
module attributes {stable_mosaic.version = 11 : i64} {
  func.func @bilstm_fused_kernel(%arg0: memref<16x512xf32, #tpu.memory_space<vmem>>, %arg1: memref<16x512xf32, #tpu.memory_space<vmem>>, %arg2: memref<128x512xf32, #tpu.memory_space<vmem>>, %arg3: memref<128x512xf32, #tpu.memory_space<vmem>>, %arg4: memref<256x1024xf32, #tpu.memory_space<vmem>>, %arg5: memref<1x1024xf32, #tpu.memory_space<vmem>>, %arg6: memref<128x512xf32, #tpu.memory_space<vmem>>, %arg7: memref<128x512xf32, #tpu.memory_space<vmem>>, %arg8: memref<256x128xf32, #tpu.memory_space<vmem>>, %arg9: memref<1x128xf32, #tpu.memory_space<vmem>>, %arg10: memref<16x128xf32, #tpu.memory_space<vmem>>, %arg11: memref<16x256xf32, #tpu.memory_space<vmem>>, %arg12: memref<16x1024xf32, #tpu.memory_space<vmem>>, %arg13: memref<16x256xf32, #tpu.memory_space<vmem>>) attributes {dimension_semantics = [], scalar_prefetch = 0 : i64, scratch_operands = 3 : i64, tpu.core_type = #tpu.core_type<tc>} {
    %cst = arith.constant 0.000000e+00 : f32
    %0 = vector.broadcast %cst : f32 to vector<2x128xf32>
    %c0 = arith.constant 0 : index
    %c0_0 = arith.constant 0 : index
    %1 = vector.load %arg0[%c0, %c0_0] : memref<16x512xf32, #tpu.memory_space<vmem>>, vector<2x512xf32>
    %c0_1 = arith.constant 0 : index
    %c0_2 = arith.constant 0 : index
    %2 = vector.load %arg2[%c0_1, %c0_2] : memref<128x512xf32, #tpu.memory_space<vmem>>, vector<128x512xf32>
    %cst_3 = arith.constant dense<0.000000e+00> : vector<2x512xf32>
    %3 = tpu.matmul %0, %2, %cst_3 {dimension_numbers = #tpu.dot_dimension_numbers<[1], [0], [0], [1], [0, 0, 1, 1], [], []>} : vector<2x128xf32>, vector<128x512xf32>, vector<2x512xf32> -> vector<2x512xf32>
    %4 = arith.addf %1, %3 : vector<2x512xf32>
    %c14 = arith.constant 14 : index
    %c0_4 = arith.constant 0 : index
    %5 = vector.load %arg1[%c14, %c0_4] : memref<16x512xf32, #tpu.memory_space<vmem>>, vector<2x512xf32>
    %c0_5 = arith.constant 0 : index
    %c0_6 = arith.constant 0 : index
    %6 = vector.load %arg3[%c0_5, %c0_6] : memref<128x512xf32, #tpu.memory_space<vmem>>, vector<128x512xf32>
    %cst_7 = arith.constant dense<0.000000e+00> : vector<2x512xf32>
    %7 = tpu.matmul %0, %6, %cst_7 {dimension_numbers = #tpu.dot_dimension_numbers<[1], [0], [0], [1], [0, 0, 1, 1], [], []>} : vector<2x128xf32>, vector<128x512xf32>, vector<2x512xf32> -> vector<2x512xf32>
    %8 = arith.addf %5, %7 : vector<2x512xf32>
    %9 = vector.extract_strided_slice %4 {offsets = [0, 0], sizes = [2, 128], strides = [1, 1]} : vector<2x512xf32> to vector<2x128xf32>
    %10 = arith.negf %9 : vector<2x128xf32>
    %11 = math.exp %10 : vector<2x128xf32>
    %cst_8 = arith.constant 1.000000e+00 : f32
    %12 = vector.broadcast %cst_8 : f32 to vector<2x128xf32>
    %13 = arith.addf %12, %11 : vector<2x128xf32>
    %14 = arith.divf %12, %13 : vector<2x128xf32>
    %15 = vector.extract_strided_slice %4 {offsets = [0, 128], sizes = [2, 128], strides = [1, 1]} : vector<2x512xf32> to vector<2x128xf32>
    %16 = arith.negf %15 : vector<2x128xf32>
    %17 = math.exp %16 : vector<2x128xf32>
    %cst_9 = arith.constant 1.000000e+00 : f32
    %18 = vector.broadcast %cst_9 : f32 to vector<2x128xf32>
    %19 = arith.addf %18, %17 : vector<2x128xf32>
    %20 = arith.divf %18, %19 : vector<2x128xf32>
    %21 = vector.extract_strided_slice %4 {offsets = [0, 256], sizes = [2, 128], strides = [1, 1]} : vector<2x512xf32> to vector<2x128xf32>
    %22 = math.tanh %21 : vector<2x128xf32>
    %23 = vector.extract_strided_slice %4 {offsets = [0, 384], sizes = [2, 128], strides = [1, 1]} : vector<2x512xf32> to vector<2x128xf32>
    %24 = arith.negf %23 : vector<2x128xf32>
    %25 = math.exp %24 : vector<2x128xf32>
    %cst_10 = arith.constant 1.000000e+00 : f32
    %26 = vector.broadcast %cst_10 : f32 to vector<2x128xf32>
    %27 = arith.addf %26, %25 : vector<2x128xf32>
    %28 = arith.divf %26, %27 : vector<2x128xf32>
    %29 = arith.mulf %20, %0 : vector<2x128xf32>
    %30 = arith.mulf %14, %22 : vector<2x128xf32>
    %31 = arith.addf %29, %30 : vector<2x128xf32>
    %32 = math.tanh %31 : vector<2x128xf32>
    %33 = arith.mulf %28, %32 : vector<2x128xf32>
    %34 = vector.extract_strided_slice %8 {offsets = [0, 0], sizes = [2, 128], strides = [1, 1]} : vector<2x512xf32> to vector<2x128xf32>
    %35 = arith.negf %34 : vector<2x128xf32>
    %36 = math.exp %35 : vector<2x128xf32>
    %cst_11 = arith.constant 1.000000e+00 : f32
    %37 = vector.broadcast %cst_11 : f32 to vector<2x128xf32>
    %38 = arith.addf %37, %36 : vector<2x128xf32>
    %39 = arith.divf %37, %38 : vector<2x128xf32>
    %40 = vector.extract_strided_slice %8 {offsets = [0, 128], sizes = [2, 128], strides = [1, 1]} : vector<2x512xf32> to vector<2x128xf32>
    %41 = arith.negf %40 : vector<2x128xf32>
    %42 = math.exp %41 : vector<2x128xf32>
    %cst_12 = arith.constant 1.000000e+00 : f32
    %43 = vector.broadcast %cst_12 : f32 to vector<2x128xf32>
    %44 = arith.addf %43, %42 : vector<2x128xf32>
    %45 = arith.divf %43, %44 : vector<2x128xf32>
    %46 = vector.extract_strided_slice %8 {offsets = [0, 256], sizes = [2, 128], strides = [1, 1]} : vector<2x512xf32> to vector<2x128xf32>
    %47 = math.tanh %46 : vector<2x128xf32>
    %48 = vector.extract_strided_slice %8 {offsets = [0, 384], sizes = [2, 128], strides = [1, 1]} : vector<2x512xf32> to vector<2x128xf32>
    %49 = arith.negf %48 : vector<2x128xf32>
    %50 = math.exp %49 : vector<2x128xf32>
    %cst_13 = arith.constant 1.000000e+00 : f32
    %51 = vector.broadcast %cst_13 : f32 to vector<2x128xf32>
    %52 = arith.addf %51, %50 : vector<2x128xf32>
    %53 = arith.divf %51, %52 : vector<2x128xf32>
    %54 = arith.mulf %45, %0 : vector<2x128xf32>
    %55 = arith.mulf %39, %47 : vector<2x128xf32>
    %56 = arith.addf %54, %55 : vector<2x128xf32>
    %57 = math.tanh %56 : vector<2x128xf32>
    %58 = arith.mulf %53, %57 : vector<2x128xf32>
    %c0_14 = arith.constant 0 : index
    %c0_15 = arith.constant 0 : index
    %59 = vector.load %arg11[%c0_14, %c0_15] : memref<16x256xf32, #tpu.memory_space<vmem>>, vector<2x128xf32>
    tpu.vector_store %arg11[%c0_14, %c0_15], %33 {strides = array<i32>} : memref<16x256xf32, #tpu.memory_space<vmem>>, vector<2x128xf32>,
    %c14_16 = arith.constant 14 : index
    %c128 = arith.constant 128 : index
    %60 = vector.load %arg11[%c14_16, %c128] : memref<16x256xf32, #tpu.memory_space<vmem>>, vector<2x128xf32>
    tpu.vector_store %arg11[%c14_16, %c128], %58 {strides = array<i32>} : memref<16x256xf32, #tpu.memory_space<vmem>>, vector<2x128xf32>,
    %c2 = arith.constant 2 : index
    %c0_17 = arith.constant 0 : index
    %61 = vector.load %arg0[%c2, %c0_17] : memref<16x512xf32, #tpu.memory_space<vmem>>, vector<2x512xf32>
    %c0_18 = arith.constant 0 : index
    %c0_19 = arith.constant 0 : index
    %62 = vector.load %arg2[%c0_18, %c0_19] : memref<128x512xf32, #tpu.memory_space<vmem>>, vector<128x512xf32>
    %cst_20 = arith.constant dense<0.000000e+00> : vector<2x512xf32>
    %63 = tpu.matmul %33, %62, %cst_20 {dimension_numbers = #tpu.dot_dimension_numbers<[1], [0], [0], [1], [0, 0, 1, 1], [], []>} : vector<2x128xf32>, vector<128x512xf32>, vector<2x512xf32> -> vector<2x512xf32>
    %64 = arith.addf %61, %63 : vector<2x512xf32>
    %c12 = arith.constant 12 : index
    %c0_21 = arith.constant 0 : index
    %65 = vector.load %arg1[%c12, %c0_21] : memref<16x512xf32, #tpu.memory_space<vmem>>, vector<2x512xf32>
    %c0_22 = arith.constant 0 : index
    %c0_23 = arith.constant 0 : index
    %66 = vector.load %arg3[%c0_22, %c0_23] : memref<128x512xf32, #tpu.memory_space<vmem>>, vector<128x512xf32>
    %cst_24 = arith.constant dense<0.000000e+00> : vector<2x512xf32>
    %67 = tpu.matmul %58, %66, %cst_24 {dimension_numbers = #tpu.dot_dimension_numbers<[1], [0], [0], [1], [0, 0, 1, 1], [], []>} : vector<2x128xf32>, vector<128x512xf32>, vector<2x512xf32> -> vector<2x512xf32>
    %68 = arith.addf %65, %67 : vector<2x512xf32>
    %69 = vector.extract_strided_slice %64 {offsets = [0, 0], sizes = [2, 128], strides = [1, 1]} : vector<2x512xf32> to vector<2x128xf32>
    %70 = arith.negf %69 : vector<2x128xf32>
    %71 = math.exp %70 : vector<2x128xf32>
    %cst_25 = arith.constant 1.000000e+00 : f32
    %72 = vector.broadcast %cst_25 : f32 to vector<2x128xf32>
    %73 = arith.addf %72, %71 : vector<2x128xf32>
    %74 = arith.divf %72, %73 : vector<2x128xf32>
    %75 = vector.extract_strided_slice %64 {offsets = [0, 128], sizes = [2, 128], strides = [1, 1]} : vector<2x512xf32> to vector<2x128xf32>
    %76 = arith.negf %75 : vector<2x128xf32>
    %77 = math.exp %76 : vector<2x128xf32>
    %cst_26 = arith.constant 1.000000e+00 : f32
    %78 = vector.broadcast %cst_26 : f32 to vector<2x128xf32>
    %79 = arith.addf %78, %77 : vector<2x128xf32>
    %80 = arith.divf %78, %79 : vector<2x128xf32>
    %81 = vector.extract_strided_slice %64 {offsets = [0, 256], sizes = [2, 128], strides = [1, 1]} : vector<2x512xf32> to vector<2x128xf32>
    %82 = math.tanh %81 : vector<2x128xf32>
    %83 = vector.extract_strided_slice %64 {offsets = [0, 384], sizes = [2, 128], strides = [1, 1]} : vector<2x512xf32> to vector<2x128xf32>
    %84 = arith.negf %83 : vector<2x128xf32>
    %85 = math.exp %84 : vector<2x128xf32>
    %cst_27 = arith.constant 1.000000e+00 : f32
    %86 = vector.broadcast %cst_27 : f32 to vector<2x128xf32>
    %87 = arith.addf %86, %85 : vector<2x128xf32>
    %88 = arith.divf %86, %87 : vector<2x128xf32>
    %89 = arith.mulf %80, %31 : vector<2x128xf32>
    %90 = arith.mulf %74, %82 : vector<2x128xf32>
    %91 = arith.addf %89, %90 : vector<2x128xf32>
    %92 = math.tanh %91 : vector<2x128xf32>
    %93 = arith.mulf %88, %92 : vector<2x128xf32>
    %94 = vector.extract_strided_slice %68 {offsets = [0, 0], sizes = [2, 128], strides = [1, 1]} : vector<2x512xf32> to vector<2x128xf32>
    %95 = arith.negf %94 : vector<2x128xf32>
    %96 = math.exp %95 : vector<2x128xf32>
    %cst_28 = arith.constant 1.000000e+00 : f32
    %97 = vector.broadcast %cst_28 : f32 to vector<2x128xf32>
    %98 = arith.addf %97, %96 : vector<2x128xf32>
    %99 = arith.divf %97, %98 : vector<2x128xf32>
    %100 = vector.extract_strided_slice %68 {offsets = [0, 128], sizes = [2, 128], strides = [1, 1]} : vector<2x512xf32> to vector<2x128xf32>
    %101 = arith.negf %100 : vector<2x128xf32>
    %102 = math.exp %101 : vector<2x128xf32>
    %cst_29 = arith.constant 1.000000e+00 : f32
    %103 = vector.broadcast %cst_29 : f32 to vector<2x128xf32>
    %104 = arith.addf %103, %102 : vector<2x128xf32>
    %105 = arith.divf %103, %104 : vector<2x128xf32>
    %106 = vector.extract_strided_slice %68 {offsets = [0, 256], sizes = [2, 128], strides = [1, 1]} : vector<2x512xf32> to vector<2x128xf32>
    %107 = math.tanh %106 : vector<2x128xf32>
    %108 = vector.extract_strided_slice %68 {offsets = [0, 384], sizes = [2, 128], strides = [1, 1]} : vector<2x512xf32> to vector<2x128xf32>
    %109 = arith.negf %108 : vector<2x128xf32>
    %110 = math.exp %109 : vector<2x128xf32>
    %cst_30 = arith.constant 1.000000e+00 : f32
    %111 = vector.broadcast %cst_30 : f32 to vector<2x128xf32>
    %112 = arith.addf %111, %110 : vector<2x128xf32>
    %113 = arith.divf %111, %112 : vector<2x128xf32>
    %114 = arith.mulf %105, %56 : vector<2x128xf32>
    %115 = arith.mulf %99, %107 : vector<2x128xf32>
    %116 = arith.addf %114, %115 : vector<2x128xf32>
    %117 = math.tanh %116 : vector<2x128xf32>
    %118 = arith.mulf %113, %117 : vector<2x128xf32>
    %c2_31 = arith.constant 2 : index
    %c0_32 = arith.constant 0 : index
    %119 = vector.load %arg11[%c2_31, %c0_32] : memref<16x256xf32, #tpu.memory_space<vmem>>, vector<2x128xf32>
    tpu.vector_store %arg11[%c2_31, %c0_32], %93 {strides = array<i32>} : memref<16x256xf32, #tpu.memory_space<vmem>>, vector<2x128xf32>,
    %c12_33 = arith.constant 12 : index
    %c128_34 = arith.constant 128 : index
    %120 = vector.load %arg11[%c12_33, %c128_34] : memref<16x256xf32, #tpu.memory_space<vmem>>, vector<2x128xf32>
    tpu.vector_store %arg11[%c12_33, %c128_34], %118 {strides = array<i32>} : memref<16x256xf32, #tpu.memory_space<vmem>>, vector<2x128xf32>,
    %c4 = arith.constant 4 : index
    %c0_35 = arith.constant 0 : index
    %121 = vector.load %arg0[%c4, %c0_35] : memref<16x512xf32, #tpu.memory_space<vmem>>, vector<2x512xf32>
    %c0_36 = arith.constant 0 : index
    %c0_37 = arith.constant 0 : index
    %122 = vector.load %arg2[%c0_36, %c0_37] : memref<128x512xf32, #tpu.memory_space<vmem>>, vector<128x512xf32>
    %cst_38 = arith.constant dense<0.000000e+00> : vector<2x512xf32>
    %123 = tpu.matmul %93, %122, %cst_38 {dimension_numbers = #tpu.dot_dimension_numbers<[1], [0], [0], [1], [0, 0, 1, 1], [], []>} : vector<2x128xf32>, vector<128x512xf32>, vector<2x512xf32> -> vector<2x512xf32>
    %124 = arith.addf %121, %123 : vector<2x512xf32>
    %c10 = arith.constant 10 : index
    %c0_39 = arith.constant 0 : index
    %125 = vector.load %arg1[%c10, %c0_39] : memref<16x512xf32, #tpu.memory_space<vmem>>, vector<2x512xf32>
    %c0_40 = arith.constant 0 : index
    %c0_41 = arith.constant 0 : index
    %126 = vector.load %arg3[%c0_40, %c0_41] : memref<128x512xf32, #tpu.memory_space<vmem>>, vector<128x512xf32>
    %cst_42 = arith.constant dense<0.000000e+00> : vector<2x512xf32>
    %127 = tpu.matmul %118, %126, %cst_42 {dimension_numbers = #tpu.dot_dimension_numbers<[1], [0], [0], [1], [0, 0, 1, 1], [], []>} : vector<2x128xf32>, vector<128x512xf32>, vector<2x512xf32> -> vector<2x512xf32>
    %128 = arith.addf %125, %127 : vector<2x512xf32>
    %129 = vector.extract_strided_slice %124 {offsets = [0, 0], sizes = [2, 128], strides = [1, 1]} : vector<2x512xf32> to vector<2x128xf32>
    %130 = arith.negf %129 : vector<2x128xf32>
    %131 = math.exp %130 : vector<2x128xf32>
    %cst_43 = arith.constant 1.000000e+00 : f32
    %132 = vector.broadcast %cst_43 : f32 to vector<2x128xf32>
    %133 = arith.addf %132, %131 : vector<2x128xf32>
    %134 = arith.divf %132, %133 : vector<2x128xf32>
    %135 = vector.extract_strided_slice %124 {offsets = [0, 128], sizes = [2, 128], strides = [1, 1]} : vector<2x512xf32> to vector<2x128xf32>
    %136 = arith.negf %135 : vector<2x128xf32>
    %137 = math.exp %136 : vector<2x128xf32>
    %cst_44 = arith.constant 1.000000e+00 : f32
    %138 = vector.broadcast %cst_44 : f32 to vector<2x128xf32>
    %139 = arith.addf %138, %137 : vector<2x128xf32>
    %140 = arith.divf %138, %139 : vector<2x128xf32>
    %141 = vector.extract_strided_slice %124 {offsets = [0, 256], sizes = [2, 128], strides = [1, 1]} : vector<2x512xf32> to vector<2x128xf32>
    %142 = math.tanh %141 : vector<2x128xf32>
    %143 = vector.extract_strided_slice %124 {offsets = [0, 384], sizes = [2, 128], strides = [1, 1]} : vector<2x512xf32> to vector<2x128xf32>
    %144 = arith.negf %143 : vector<2x128xf32>
    %145 = math.exp %144 : vector<2x128xf32>
    %cst_45 = arith.constant 1.000000e+00 : f32
    %146 = vector.broadcast %cst_45 : f32 to vector<2x128xf32>
    %147 = arith.addf %146, %145 : vector<2x128xf32>
    %148 = arith.divf %146, %147 : vector<2x128xf32>
    %149 = arith.mulf %140, %91 : vector<2x128xf32>
    %150 = arith.mulf %134, %142 : vector<2x128xf32>
    %151 = arith.addf %149, %150 : vector<2x128xf32>
    %152 = math.tanh %151 : vector<2x128xf32>
    %153 = arith.mulf %148, %152 : vector<2x128xf32>
    %154 = vector.extract_strided_slice %128 {offsets = [0, 0], sizes = [2, 128], strides = [1, 1]} : vector<2x512xf32> to vector<2x128xf32>
    %155 = arith.negf %154 : vector<2x128xf32>
    %156 = math.exp %155 : vector<2x128xf32>
    %cst_46 = arith.constant 1.000000e+00 : f32
    %157 = vector.broadcast %cst_46 : f32 to vector<2x128xf32>
    %158 = arith.addf %157, %156 : vector<2x128xf32>
    %159 = arith.divf %157, %158 : vector<2x128xf32>
    %160 = vector.extract_strided_slice %128 {offsets = [0, 128], sizes = [2, 128], strides = [1, 1]} : vector<2x512xf32> to vector<2x128xf32>
    %161 = arith.negf %160 : vector<2x128xf32>
    %162 = math.exp %161 : vector<2x128xf32>
    %cst_47 = arith.constant 1.000000e+00 : f32
    %163 = vector.broadcast %cst_47 : f32 to vector<2x128xf32>
    %164 = arith.addf %163, %162 : vector<2x128xf32>
    %165 = arith.divf %163, %164 : vector<2x128xf32>
    %166 = vector.extract_strided_slice %128 {offsets = [0, 256], sizes = [2, 128], strides = [1, 1]} : vector<2x512xf32> to vector<2x128xf32>
    %167 = math.tanh %166 : vector<2x128xf32>
    %168 = vector.extract_strided_slice %128 {offsets = [0, 384], sizes = [2, 128], strides = [1, 1]} : vector<2x512xf32> to vector<2x128xf32>
    %169 = arith.negf %168 : vector<2x128xf32>
    %170 = math.exp %169 : vector<2x128xf32>
    %cst_48 = arith.constant 1.000000e+00 : f32
    %171 = vector.broadcast %cst_48 : f32 to vector<2x128xf32>
    %172 = arith.addf %171, %170 : vector<2x128xf32>
    %173 = arith.divf %171, %172 : vector<2x128xf32>
    %174 = arith.mulf %165, %116 : vector<2x128xf32>
    %175 = arith.mulf %159, %167 : vector<2x128xf32>
    %176 = arith.addf %174, %175 : vector<2x128xf32>
    %177 = math.tanh %176 : vector<2x128xf32>
    %178 = arith.mulf %173, %177 : vector<2x128xf32>
    %c4_49 = arith.constant 4 : index
    %c0_50 = arith.constant 0 : index
    %179 = vector.load %arg11[%c4_49, %c0_50] : memref<16x256xf32, #tpu.memory_space<vmem>>, vector<2x128xf32>
    tpu.vector_store %arg11[%c4_49, %c0_50], %153 {strides = array<i32>} : memref<16x256xf32, #tpu.memory_space<vmem>>, vector<2x128xf32>,
    %c10_51 = arith.constant 10 : index
    %c128_52 = arith.constant 128 : index
    %180 = vector.load %arg11[%c10_51, %c128_52] : memref<16x256xf32, #tpu.memory_space<vmem>>, vector<2x128xf32>
    tpu.vector_store %arg11[%c10_51, %c128_52], %178 {strides = array<i32>} : memref<16x256xf32, #tpu.memory_space<vmem>>, vector<2x128xf32>,
    %c6 = arith.constant 6 : index
    %c0_53 = arith.constant 0 : index
    %181 = vector.load %arg0[%c6, %c0_53] : memref<16x512xf32, #tpu.memory_space<vmem>>, vector<2x512xf32>
    %c0_54 = arith.constant 0 : index
    %c0_55 = arith.constant 0 : index
    %182 = vector.load %arg2[%c0_54, %c0_55] : memref<128x512xf32, #tpu.memory_space<vmem>>, vector<128x512xf32>
    %cst_56 = arith.constant dense<0.000000e+00> : vector<2x512xf32>
    %183 = tpu.matmul %153, %182, %cst_56 {dimension_numbers = #tpu.dot_dimension_numbers<[1], [0], [0], [1], [0, 0, 1, 1], [], []>} : vector<2x128xf32>, vector<128x512xf32>, vector<2x512xf32> -> vector<2x512xf32>
    %184 = arith.addf %181, %183 : vector<2x512xf32>
    %c8 = arith.constant 8 : index
    %c0_57 = arith.constant 0 : index
    %185 = vector.load %arg1[%c8, %c0_57] : memref<16x512xf32, #tpu.memory_space<vmem>>, vector<2x512xf32>
    %c0_58 = arith.constant 0 : index
    %c0_59 = arith.constant 0 : index
    %186 = vector.load %arg3[%c0_58, %c0_59] : memref<128x512xf32, #tpu.memory_space<vmem>>, vector<128x512xf32>
    %cst_60 = arith.constant dense<0.000000e+00> : vector<2x512xf32>
    %187 = tpu.matmul %178, %186, %cst_60 {dimension_numbers = #tpu.dot_dimension_numbers<[1], [0], [0], [1], [0, 0, 1, 1], [], []>} : vector<2x128xf32>, vector<128x512xf32>, vector<2x512xf32> -> vector<2x512xf32>
    %188 = arith.addf %185, %187 : vector<2x512xf32>
    %189 = vector.extract_strided_slice %184 {offsets = [0, 0], sizes = [2, 128], strides = [1, 1]} : vector<2x512xf32> to vector<2x128xf32>
    %190 = arith.negf %189 : vector<2x128xf32>
    %191 = math.exp %190 : vector<2x128xf32>
    %cst_61 = arith.constant 1.000000e+00 : f32
    %192 = vector.broadcast %cst_61 : f32 to vector<2x128xf32>
    %193 = arith.addf %192, %191 : vector<2x128xf32>
    %194 = arith.divf %192, %193 : vector<2x128xf32>
    %195 = vector.extract_strided_slice %184 {offsets = [0, 128], sizes = [2, 128], strides = [1, 1]} : vector<2x512xf32> to vector<2x128xf32>
    %196 = arith.negf %195 : vector<2x128xf32>
    %197 = math.exp %196 : vector<2x128xf32>
    %cst_62 = arith.constant 1.000000e+00 : f32
    %198 = vector.broadcast %cst_62 : f32 to vector<2x128xf32>
    %199 = arith.addf %198, %197 : vector<2x128xf32>
    %200 = arith.divf %198, %199 : vector<2x128xf32>
    %201 = vector.extract_strided_slice %184 {offsets = [0, 256], sizes = [2, 128], strides = [1, 1]} : vector<2x512xf32> to vector<2x128xf32>
    %202 = math.tanh %201 : vector<2x128xf32>
    %203 = vector.extract_strided_slice %184 {offsets = [0, 384], sizes = [2, 128], strides = [1, 1]} : vector<2x512xf32> to vector<2x128xf32>
    %204 = arith.negf %203 : vector<2x128xf32>
    %205 = math.exp %204 : vector<2x128xf32>
    %cst_63 = arith.constant 1.000000e+00 : f32
    %206 = vector.broadcast %cst_63 : f32 to vector<2x128xf32>
    %207 = arith.addf %206, %205 : vector<2x128xf32>
    %208 = arith.divf %206, %207 : vector<2x128xf32>
    %209 = arith.mulf %200, %151 : vector<2x128xf32>
    %210 = arith.mulf %194, %202 : vector<2x128xf32>
    %211 = arith.addf %209, %210 : vector<2x128xf32>
    %212 = math.tanh %211 : vector<2x128xf32>
    %213 = arith.mulf %208, %212 : vector<2x128xf32>
    %214 = vector.extract_strided_slice %188 {offsets = [0, 0], sizes = [2, 128], strides = [1, 1]} : vector<2x512xf32> to vector<2x128xf32>
    %215 = arith.negf %214 : vector<2x128xf32>
    %216 = math.exp %215 : vector<2x128xf32>
    %cst_64 = arith.constant 1.000000e+00 : f32
    %217 = vector.broadcast %cst_64 : f32 to vector<2x128xf32>
    %218 = arith.addf %217, %216 : vector<2x128xf32>
    %219 = arith.divf %217, %218 : vector<2x128xf32>
    %220 = vector.extract_strided_slice %188 {offsets = [0, 128], sizes = [2, 128], strides = [1, 1]} : vector<2x512xf32> to vector<2x128xf32>
    %221 = arith.negf %220 : vector<2x128xf32>
    %222 = math.exp %221 : vector<2x128xf32>
    %cst_65 = arith.constant 1.000000e+00 : f32
    %223 = vector.broadcast %cst_65 : f32 to vector<2x128xf32>
    %224 = arith.addf %223, %222 : vector<2x128xf32>
    %225 = arith.divf %223, %224 : vector<2x128xf32>
    %226 = vector.extract_strided_slice %188 {offsets = [0, 256], sizes = [2, 128], strides = [1, 1]} : vector<2x512xf32> to vector<2x128xf32>
    %227 = math.tanh %226 : vector<2x128xf32>
    %228 = vector.extract_strided_slice %188 {offsets = [0, 384], sizes = [2, 128], strides = [1, 1]} : vector<2x512xf32> to vector<2x128xf32>
    %229 = arith.negf %228 : vector<2x128xf32>
    %230 = math.exp %229 : vector<2x128xf32>
    %cst_66 = arith.constant 1.000000e+00 : f32
    %231 = vector.broadcast %cst_66 : f32 to vector<2x128xf32>
    %232 = arith.addf %231, %230 : vector<2x128xf32>
    %233 = arith.divf %231, %232 : vector<2x128xf32>
    %234 = arith.mulf %225, %176 : vector<2x128xf32>
    %235 = arith.mulf %219, %227 : vector<2x128xf32>
    %236 = arith.addf %234, %235 : vector<2x128xf32>
    %237 = math.tanh %236 : vector<2x128xf32>
    %238 = arith.mulf %233, %237 : vector<2x128xf32>
    %c6_67 = arith.constant 6 : index
    %c0_68 = arith.constant 0 : index
    %239 = vector.load %arg11[%c6_67, %c0_68] : memref<16x256xf32, #tpu.memory_space<vmem>>, vector<2x128xf32>
    tpu.vector_store %arg11[%c6_67, %c0_68], %213 {strides = array<i32>} : memref<16x256xf32, #tpu.memory_space<vmem>>, vector<2x128xf32>,
    %c8_69 = arith.constant 8 : index
    %c128_70 = arith.constant 128 : index
    %240 = vector.load %arg11[%c8_69, %c128_70] : memref<16x256xf32, #tpu.memory_space<vmem>>, vector<2x128xf32>
    tpu.vector_store %arg11[%c8_69, %c128_70], %238 {strides = array<i32>} : memref<16x256xf32, #tpu.memory_space<vmem>>, vector<2x128xf32>,
    %c8_71 = arith.constant 8 : index
    %c0_72 = arith.constant 0 : index
    %241 = vector.load %arg0[%c8_71, %c0_72] : memref<16x512xf32, #tpu.memory_space<vmem>>, vector<2x512xf32>
    %c0_73 = arith.constant 0 : index
    %c0_74 = arith.constant 0 : index
    %242 = vector.load %arg2[%c0_73, %c0_74] : memref<128x512xf32, #tpu.memory_space<vmem>>, vector<128x512xf32>
    %cst_75 = arith.constant dense<0.000000e+00> : vector<2x512xf32>
    %243 = tpu.matmul %213, %242, %cst_75 {dimension_numbers = #tpu.dot_dimension_numbers<[1], [0], [0], [1], [0, 0, 1, 1], [], []>} : vector<2x128xf32>, vector<128x512xf32>, vector<2x512xf32> -> vector<2x512xf32>
    %244 = arith.addf %241, %243 : vector<2x512xf32>
    %c6_76 = arith.constant 6 : index
    %c0_77 = arith.constant 0 : index
    %245 = vector.load %arg1[%c6_76, %c0_77] : memref<16x512xf32, #tpu.memory_space<vmem>>, vector<2x512xf32>
    %c0_78 = arith.constant 0 : index
    %c0_79 = arith.constant 0 : index
    %246 = vector.load %arg3[%c0_78, %c0_79] : memref<128x512xf32, #tpu.memory_space<vmem>>, vector<128x512xf32>
    %cst_80 = arith.constant dense<0.000000e+00> : vector<2x512xf32>
    %247 = tpu.matmul %238, %246, %cst_80 {dimension_numbers = #tpu.dot_dimension_numbers<[1], [0], [0], [1], [0, 0, 1, 1], [], []>} : vector<2x128xf32>, vector<128x512xf32>, vector<2x512xf32> -> vector<2x512xf32>
    %248 = arith.addf %245, %247 : vector<2x512xf32>
    %249 = vector.extract_strided_slice %244 {offsets = [0, 0], sizes = [2, 128], strides = [1, 1]} : vector<2x512xf32> to vector<2x128xf32>
    %250 = arith.negf %249 : vector<2x128xf32>
    %251 = math.exp %250 : vector<2x128xf32>
    %cst_81 = arith.constant 1.000000e+00 : f32
    %252 = vector.broadcast %cst_81 : f32 to vector<2x128xf32>
    %253 = arith.addf %252, %251 : vector<2x128xf32>
    %254 = arith.divf %252, %253 : vector<2x128xf32>
    %255 = vector.extract_strided_slice %244 {offsets = [0, 128], sizes = [2, 128], strides = [1, 1]} : vector<2x512xf32> to vector<2x128xf32>
    %256 = arith.negf %255 : vector<2x128xf32>
    %257 = math.exp %256 : vector<2x128xf32>
    %cst_82 = arith.constant 1.000000e+00 : f32
    %258 = vector.broadcast %cst_82 : f32 to vector<2x128xf32>
    %259 = arith.addf %258, %257 : vector<2x128xf32>
    %260 = arith.divf %258, %259 : vector<2x128xf32>
    %261 = vector.extract_strided_slice %244 {offsets = [0, 256], sizes = [2, 128], strides = [1, 1]} : vector<2x512xf32> to vector<2x128xf32>
    %262 = math.tanh %261 : vector<2x128xf32>
    %263 = vector.extract_strided_slice %244 {offsets = [0, 384], sizes = [2, 128], strides = [1, 1]} : vector<2x512xf32> to vector<2x128xf32>
    %264 = arith.negf %263 : vector<2x128xf32>
    %265 = math.exp %264 : vector<2x128xf32>
    %cst_83 = arith.constant 1.000000e+00 : f32
    %266 = vector.broadcast %cst_83 : f32 to vector<2x128xf32>
    %267 = arith.addf %266, %265 : vector<2x128xf32>
    %268 = arith.divf %266, %267 : vector<2x128xf32>
    %269 = arith.mulf %260, %211 : vector<2x128xf32>
    %270 = arith.mulf %254, %262 : vector<2x128xf32>
    %271 = arith.addf %269, %270 : vector<2x128xf32>
    %272 = math.tanh %271 : vector<2x128xf32>
    %273 = arith.mulf %268, %272 : vector<2x128xf32>
    %274 = vector.extract_strided_slice %248 {offsets = [0, 0], sizes = [2, 128], strides = [1, 1]} : vector<2x512xf32> to vector<2x128xf32>
    %275 = arith.negf %274 : vector<2x128xf32>
    %276 = math.exp %275 : vector<2x128xf32>
    %cst_84 = arith.constant 1.000000e+00 : f32
    %277 = vector.broadcast %cst_84 : f32 to vector<2x128xf32>
    %278 = arith.addf %277, %276 : vector<2x128xf32>
    %279 = arith.divf %277, %278 : vector<2x128xf32>
    %280 = vector.extract_strided_slice %248 {offsets = [0, 128], sizes = [2, 128], strides = [1, 1]} : vector<2x512xf32> to vector<2x128xf32>
    %281 = arith.negf %280 : vector<2x128xf32>
    %282 = math.exp %281 : vector<2x128xf32>
    %cst_85 = arith.constant 1.000000e+00 : f32
    %283 = vector.broadcast %cst_85 : f32 to vector<2x128xf32>
    %284 = arith.addf %283, %282 : vector<2x128xf32>
    %285 = arith.divf %283, %284 : vector<2x128xf32>
    %286 = vector.extract_strided_slice %248 {offsets = [0, 256], sizes = [2, 128], strides = [1, 1]} : vector<2x512xf32> to vector<2x128xf32>
    %287 = math.tanh %286 : vector<2x128xf32>
    %288 = vector.extract_strided_slice %248 {offsets = [0, 384], sizes = [2, 128], strides = [1, 1]} : vector<2x512xf32> to vector<2x128xf32>
    %289 = arith.negf %288 : vector<2x128xf32>
    %290 = math.exp %289 : vector<2x128xf32>
    %cst_86 = arith.constant 1.000000e+00 : f32
    %291 = vector.broadcast %cst_86 : f32 to vector<2x128xf32>
    %292 = arith.addf %291, %290 : vector<2x128xf32>
    %293 = arith.divf %291, %292 : vector<2x128xf32>
    %294 = arith.mulf %285, %236 : vector<2x128xf32>
    %295 = arith.mulf %279, %287 : vector<2x128xf32>
    %296 = arith.addf %294, %295 : vector<2x128xf32>
    %297 = math.tanh %296 : vector<2x128xf32>
    %298 = arith.mulf %293, %297 : vector<2x128xf32>
    %c8_87 = arith.constant 8 : index
    %c0_88 = arith.constant 0 : index
    %299 = vector.load %arg11[%c8_87, %c0_88] : memref<16x256xf32, #tpu.memory_space<vmem>>, vector<2x128xf32>
    tpu.vector_store %arg11[%c8_87, %c0_88], %273 {strides = array<i32>} : memref<16x256xf32, #tpu.memory_space<vmem>>, vector<2x128xf32>,
    %c6_89 = arith.constant 6 : index
    %c128_90 = arith.constant 128 : index
    %300 = vector.load %arg11[%c6_89, %c128_90] : memref<16x256xf32, #tpu.memory_space<vmem>>, vector<2x128xf32>
    tpu.vector_store %arg11[%c6_89, %c128_90], %298 {strides = array<i32>} : memref<16x256xf32, #tpu.memory_space<vmem>>, vector<2x128xf32>,
    %c10_91 = arith.constant 10 : index
    %c0_92 = arith.constant 0 : index
    %301 = vector.load %arg0[%c10_91, %c0_92] : memref<16x512xf32, #tpu.memory_space<vmem>>, vector<2x512xf32>
    %c0_93 = arith.constant 0 : index
    %c0_94 = arith.constant 0 : index
    %302 = vector.load %arg2[%c0_93, %c0_94] : memref<128x512xf32, #tpu.memory_space<vmem>>, vector<128x512xf32>
    %cst_95 = arith.constant dense<0.000000e+00> : vector<2x512xf32>
    %303 = tpu.matmul %273, %302, %cst_95 {dimension_numbers = #tpu.dot_dimension_numbers<[1], [0], [0], [1], [0, 0, 1, 1], [], []>} : vector<2x128xf32>, vector<128x512xf32>, vector<2x512xf32> -> vector<2x512xf32>
    %304 = arith.addf %301, %303 : vector<2x512xf32>
    %c4_96 = arith.constant 4 : index
    %c0_97 = arith.constant 0 : index
    %305 = vector.load %arg1[%c4_96, %c0_97] : memref<16x512xf32, #tpu.memory_space<vmem>>, vector<2x512xf32>
    %c0_98 = arith.constant 0 : index
    %c0_99 = arith.constant 0 : index
    %306 = vector.load %arg3[%c0_98, %c0_99] : memref<128x512xf32, #tpu.memory_space<vmem>>, vector<128x512xf32>
    %cst_100 = arith.constant dense<0.000000e+00> : vector<2x512xf32>
    %307 = tpu.matmul %298, %306, %cst_100 {dimension_numbers = #tpu.dot_dimension_numbers<[1], [0], [0], [1], [0, 0, 1, 1], [], []>} : vector<2x128xf32>, vector<128x512xf32>, vector<2x512xf32> -> vector<2x512xf32>
    %308 = arith.addf %305, %307 : vector<2x512xf32>
    %309 = vector.extract_strided_slice %304 {offsets = [0, 0], sizes = [2, 128], strides = [1, 1]} : vector<2x512xf32> to vector<2x128xf32>
    %310 = arith.negf %309 : vector<2x128xf32>
    %311 = math.exp %310 : vector<2x128xf32>
    %cst_101 = arith.constant 1.000000e+00 : f32
    %312 = vector.broadcast %cst_101 : f32 to vector<2x128xf32>
    %313 = arith.addf %312, %311 : vector<2x128xf32>
    %314 = arith.divf %312, %313 : vector<2x128xf32>
    %315 = vector.extract_strided_slice %304 {offsets = [0, 128], sizes = [2, 128], strides = [1, 1]} : vector<2x512xf32> to vector<2x128xf32>
    %316 = arith.negf %315 : vector<2x128xf32>
    %317 = math.exp %316 : vector<2x128xf32>
    %cst_102 = arith.constant 1.000000e+00 : f32
    %318 = vector.broadcast %cst_102 : f32 to vector<2x128xf32>
    %319 = arith.addf %318, %317 : vector<2x128xf32>
    %320 = arith.divf %318, %319 : vector<2x128xf32>
    %321 = vector.extract_strided_slice %304 {offsets = [0, 256], sizes = [2, 128], strides = [1, 1]} : vector<2x512xf32> to vector<2x128xf32>
    %322 = math.tanh %321 : vector<2x128xf32>
    %323 = vector.extract_strided_slice %304 {offsets = [0, 384], sizes = [2, 128], strides = [1, 1]} : vector<2x512xf32> to vector<2x128xf32>
    %324 = arith.negf %323 : vector<2x128xf32>
    %325 = math.exp %324 : vector<2x128xf32>
    %cst_103 = arith.constant 1.000000e+00 : f32
    %326 = vector.broadcast %cst_103 : f32 to vector<2x128xf32>
    %327 = arith.addf %326, %325 : vector<2x128xf32>
    %328 = arith.divf %326, %327 : vector<2x128xf32>
    %329 = arith.mulf %320, %271 : vector<2x128xf32>
    %330 = arith.mulf %314, %322 : vector<2x128xf32>
    %331 = arith.addf %329, %330 : vector<2x128xf32>
    %332 = math.tanh %331 : vector<2x128xf32>
    %333 = arith.mulf %328, %332 : vector<2x128xf32>
    %334 = vector.extract_strided_slice %308 {offsets = [0, 0], sizes = [2, 128], strides = [1, 1]} : vector<2x512xf32> to vector<2x128xf32>
    %335 = arith.negf %334 : vector<2x128xf32>
    %336 = math.exp %335 : vector<2x128xf32>
    %cst_104 = arith.constant 1.000000e+00 : f32
    %337 = vector.broadcast %cst_104 : f32 to vector<2x128xf32>
    %338 = arith.addf %337, %336 : vector<2x128xf32>
    %339 = arith.divf %337, %338 : vector<2x128xf32>
    %340 = vector.extract_strided_slice %308 {offsets = [0, 128], sizes = [2, 128], strides = [1, 1]} : vector<2x512xf32> to vector<2x128xf32>
    %341 = arith.negf %340 : vector<2x128xf32>
    %342 = math.exp %341 : vector<2x128xf32>
    %cst_105 = arith.constant 1.000000e+00 : f32
    %343 = vector.broadcast %cst_105 : f32 to vector<2x128xf32>
    %344 = arith.addf %343, %342 : vector<2x128xf32>
    %345 = arith.divf %343, %344 : vector<2x128xf32>
    %346 = vector.extract_strided_slice %308 {offsets = [0, 256], sizes = [2, 128], strides = [1, 1]} : vector<2x512xf32> to vector<2x128xf32>
    %347 = math.tanh %346 : vector<2x128xf32>
    %348 = vector.extract_strided_slice %308 {offsets = [0, 384], sizes = [2, 128], strides = [1, 1]} : vector<2x512xf32> to vector<2x128xf32>
    %349 = arith.negf %348 : vector<2x128xf32>
    %350 = math.exp %349 : vector<2x128xf32>
    %cst_106 = arith.constant 1.000000e+00 : f32
    %351 = vector.broadcast %cst_106 : f32 to vector<2x128xf32>
    %352 = arith.addf %351, %350 : vector<2x128xf32>
    %353 = arith.divf %351, %352 : vector<2x128xf32>
    %354 = arith.mulf %345, %296 : vector<2x128xf32>
    %355 = arith.mulf %339, %347 : vector<2x128xf32>
    %356 = arith.addf %354, %355 : vector<2x128xf32>
    %357 = math.tanh %356 : vector<2x128xf32>
    %358 = arith.mulf %353, %357 : vector<2x128xf32>
    %c10_107 = arith.constant 10 : index
    %c0_108 = arith.constant 0 : index
    %359 = vector.load %arg11[%c10_107, %c0_108] : memref<16x256xf32, #tpu.memory_space<vmem>>, vector<2x128xf32>
    tpu.vector_store %arg11[%c10_107, %c0_108], %333 {strides = array<i32>} : memref<16x256xf32, #tpu.memory_space<vmem>>, vector<2x128xf32>,
    %c4_109 = arith.constant 4 : index
    %c128_110 = arith.constant 128 : index
    %360 = vector.load %arg11[%c4_109, %c128_110] : memref<16x256xf32, #tpu.memory_space<vmem>>, vector<2x128xf32>
    tpu.vector_store %arg11[%c4_109, %c128_110], %358 {strides = array<i32>} : memref<16x256xf32, #tpu.memory_space<vmem>>, vector<2x128xf32>,
    %c12_111 = arith.constant 12 : index
    %c0_112 = arith.constant 0 : index
    %361 = vector.load %arg0[%c12_111, %c0_112] : memref<16x512xf32, #tpu.memory_space<vmem>>, vector<2x512xf32>
    %c0_113 = arith.constant 0 : index
    %c0_114 = arith.constant 0 : index
    %362 = vector.load %arg2[%c0_113, %c0_114] : memref<128x512xf32, #tpu.memory_space<vmem>>, vector<128x512xf32>
    %cst_115 = arith.constant dense<0.000000e+00> : vector<2x512xf32>
    %363 = tpu.matmul %333, %362, %cst_115 {dimension_numbers = #tpu.dot_dimension_numbers<[1], [0], [0], [1], [0, 0, 1, 1], [], []>} : vector<2x128xf32>, vector<128x512xf32>, vector<2x512xf32> -> vector<2x512xf32>
    %364 = arith.addf %361, %363 : vector<2x512xf32>
    %c2_116 = arith.constant 2 : index
    %c0_117 = arith.constant 0 : index
    %365 = vector.load %arg1[%c2_116, %c0_117] : memref<16x512xf32, #tpu.memory_space<vmem>>, vector<2x512xf32>
    %c0_118 = arith.constant 0 : index
    %c0_119 = arith.constant 0 : index
    %366 = vector.load %arg3[%c0_118, %c0_119] : memref<128x512xf32, #tpu.memory_space<vmem>>, vector<128x512xf32>
    %cst_120 = arith.constant dense<0.000000e+00> : vector<2x512xf32>
    %367 = tpu.matmul %358, %366, %cst_120 {dimension_numbers = #tpu.dot_dimension_numbers<[1], [0], [0], [1], [0, 0, 1, 1], [], []>} : vector<2x128xf32>, vector<128x512xf32>, vector<2x512xf32> -> vector<2x512xf32>
    %368 = arith.addf %365, %367 : vector<2x512xf32>
    %369 = vector.extract_strided_slice %364 {offsets = [0, 0], sizes = [2, 128], strides = [1, 1]} : vector<2x512xf32> to vector<2x128xf32>
    %370 = arith.negf %369 : vector<2x128xf32>
    %371 = math.exp %370 : vector<2x128xf32>
    %cst_121 = arith.constant 1.000000e+00 : f32
    %372 = vector.broadcast %cst_121 : f32 to vector<2x128xf32>
    %373 = arith.addf %372, %371 : vector<2x128xf32>
    %374 = arith.divf %372, %373 : vector<2x128xf32>
    %375 = vector.extract_strided_slice %364 {offsets = [0, 128], sizes = [2, 128], strides = [1, 1]} : vector<2x512xf32> to vector<2x128xf32>
    %376 = arith.negf %375 : vector<2x128xf32>
    %377 = math.exp %376 : vector<2x128xf32>
    %cst_122 = arith.constant 1.000000e+00 : f32
    %378 = vector.broadcast %cst_122 : f32 to vector<2x128xf32>
    %379 = arith.addf %378, %377 : vector<2x128xf32>
    %380 = arith.divf %378, %379 : vector<2x128xf32>
    %381 = vector.extract_strided_slice %364 {offsets = [0, 256], sizes = [2, 128], strides = [1, 1]} : vector<2x512xf32> to vector<2x128xf32>
    %382 = math.tanh %381 : vector<2x128xf32>
    %383 = vector.extract_strided_slice %364 {offsets = [0, 384], sizes = [2, 128], strides = [1, 1]} : vector<2x512xf32> to vector<2x128xf32>
    %384 = arith.negf %383 : vector<2x128xf32>
    %385 = math.exp %384 : vector<2x128xf32>
    %cst_123 = arith.constant 1.000000e+00 : f32
    %386 = vector.broadcast %cst_123 : f32 to vector<2x128xf32>
    %387 = arith.addf %386, %385 : vector<2x128xf32>
    %388 = arith.divf %386, %387 : vector<2x128xf32>
    %389 = arith.mulf %380, %331 : vector<2x128xf32>
    %390 = arith.mulf %374, %382 : vector<2x128xf32>
    %391 = arith.addf %389, %390 : vector<2x128xf32>
    %392 = math.tanh %391 : vector<2x128xf32>
    %393 = arith.mulf %388, %392 : vector<2x128xf32>
    %394 = vector.extract_strided_slice %368 {offsets = [0, 0], sizes = [2, 128], strides = [1, 1]} : vector<2x512xf32> to vector<2x128xf32>
    %395 = arith.negf %394 : vector<2x128xf32>
    %396 = math.exp %395 : vector<2x128xf32>
    %cst_124 = arith.constant 1.000000e+00 : f32
    %397 = vector.broadcast %cst_124 : f32 to vector<2x128xf32>
    %398 = arith.addf %397, %396 : vector<2x128xf32>
    %399 = arith.divf %397, %398 : vector<2x128xf32>
    %400 = vector.extract_strided_slice %368 {offsets = [0, 128], sizes = [2, 128], strides = [1, 1]} : vector<2x512xf32> to vector<2x128xf32>
    %401 = arith.negf %400 : vector<2x128xf32>
    %402 = math.exp %401 : vector<2x128xf32>
    %cst_125 = arith.constant 1.000000e+00 : f32
    %403 = vector.broadcast %cst_125 : f32 to vector<2x128xf32>
    %404 = arith.addf %403, %402 : vector<2x128xf32>
    %405 = arith.divf %403, %404 : vector<2x128xf32>
    %406 = vector.extract_strided_slice %368 {offsets = [0, 256], sizes = [2, 128], strides = [1, 1]} : vector<2x512xf32> to vector<2x128xf32>
    %407 = math.tanh %406 : vector<2x128xf32>
    %408 = vector.extract_strided_slice %368 {offsets = [0, 384], sizes = [2, 128], strides = [1, 1]} : vector<2x512xf32> to vector<2x128xf32>
    %409 = arith.negf %408 : vector<2x128xf32>
    %410 = math.exp %409 : vector<2x128xf32>
    %cst_126 = arith.constant 1.000000e+00 : f32
    %411 = vector.broadcast %cst_126 : f32 to vector<2x128xf32>
    %412 = arith.addf %411, %410 : vector<2x128xf32>
    %413 = arith.divf %411, %412 : vector<2x128xf32>
    %414 = arith.mulf %405, %356 : vector<2x128xf32>
    %415 = arith.mulf %399, %407 : vector<2x128xf32>
    %416 = arith.addf %414, %415 : vector<2x128xf32>
    %417 = math.tanh %416 : vector<2x128xf32>
    %418 = arith.mulf %413, %417 : vector<2x128xf32>
    %c12_127 = arith.constant 12 : index
    %c0_128 = arith.constant 0 : index
    %419 = vector.load %arg11[%c12_127, %c0_128] : memref<16x256xf32, #tpu.memory_space<vmem>>, vector<2x128xf32>
    tpu.vector_store %arg11[%c12_127, %c0_128], %393 {strides = array<i32>} : memref<16x256xf32, #tpu.memory_space<vmem>>, vector<2x128xf32>,
    %c2_129 = arith.constant 2 : index
    %c128_130 = arith.constant 128 : index
    %420 = vector.load %arg11[%c2_129, %c128_130] : memref<16x256xf32, #tpu.memory_space<vmem>>, vector<2x128xf32>
    tpu.vector_store %arg11[%c2_129, %c128_130], %418 {strides = array<i32>} : memref<16x256xf32, #tpu.memory_space<vmem>>, vector<2x128xf32>,
    %c14_131 = arith.constant 14 : index
    %c0_132 = arith.constant 0 : index
    %421 = vector.load %arg0[%c14_131, %c0_132] : memref<16x512xf32, #tpu.memory_space<vmem>>, vector<2x512xf32>
    %c0_133 = arith.constant 0 : index
    %c0_134 = arith.constant 0 : index
    %422 = vector.load %arg2[%c0_133, %c0_134] : memref<128x512xf32, #tpu.memory_space<vmem>>, vector<128x512xf32>
    %cst_135 = arith.constant dense<0.000000e+00> : vector<2x512xf32>
    %423 = tpu.matmul %393, %422, %cst_135 {dimension_numbers = #tpu.dot_dimension_numbers<[1], [0], [0], [1], [0, 0, 1, 1], [], []>} : vector<2x128xf32>, vector<128x512xf32>, vector<2x512xf32> -> vector<2x512xf32>
    %424 = arith.addf %421, %423 : vector<2x512xf32>
    %c0_136 = arith.constant 0 : index
    %c0_137 = arith.constant 0 : index
    %425 = vector.load %arg1[%c0_136, %c0_137] : memref<16x512xf32, #tpu.memory_space<vmem>>, vector<2x512xf32>
    %c0_138 = arith.constant 0 : index
    %c0_139 = arith.constant 0 : index
    %426 = vector.load %arg3[%c0_138, %c0_139] : memref<128x512xf32, #tpu.memory_space<vmem>>, vector<128x512xf32>
    %cst_140 = arith.constant dense<0.000000e+00> : vector<2x512xf32>
    %427 = tpu.matmul %418, %426, %cst_140 {dimension_numbers = #tpu.dot_dimension_numbers<[1], [0], [0], [1], [0, 0, 1, 1], [], []>} : vector<2x128xf32>, vector<128x512xf32>, vector<2x512xf32> -> vector<2x512xf32>
    %428 = arith.addf %425, %427 : vector<2x512xf32>
    %429 = vector.extract_strided_slice %424 {offsets = [0, 0], sizes = [2, 128], strides = [1, 1]} : vector<2x512xf32> to vector<2x128xf32>
    %430 = arith.negf %429 : vector<2x128xf32>
    %431 = math.exp %430 : vector<2x128xf32>
    %cst_141 = arith.constant 1.000000e+00 : f32
    %432 = vector.broadcast %cst_141 : f32 to vector<2x128xf32>
    %433 = arith.addf %432, %431 : vector<2x128xf32>
    %434 = arith.divf %432, %433 : vector<2x128xf32>
    %435 = vector.extract_strided_slice %424 {offsets = [0, 128], sizes = [2, 128], strides = [1, 1]} : vector<2x512xf32> to vector<2x128xf32>
    %436 = arith.negf %435 : vector<2x128xf32>
    %437 = math.exp %436 : vector<2x128xf32>
    %cst_142 = arith.constant 1.000000e+00 : f32
    %438 = vector.broadcast %cst_142 : f32 to vector<2x128xf32>
    %439 = arith.addf %438, %437 : vector<2x128xf32>
    %440 = arith.divf %438, %439 : vector<2x128xf32>
    %441 = vector.extract_strided_slice %424 {offsets = [0, 256], sizes = [2, 128], strides = [1, 1]} : vector<2x512xf32> to vector<2x128xf32>
    %442 = math.tanh %441 : vector<2x128xf32>
    %443 = vector.extract_strided_slice %424 {offsets = [0, 384], sizes = [2, 128], strides = [1, 1]} : vector<2x512xf32> to vector<2x128xf32>
    %444 = arith.negf %443 : vector<2x128xf32>
    %445 = math.exp %444 : vector<2x128xf32>
    %cst_143 = arith.constant 1.000000e+00 : f32
    %446 = vector.broadcast %cst_143 : f32 to vector<2x128xf32>
    %447 = arith.addf %446, %445 : vector<2x128xf32>
    %448 = arith.divf %446, %447 : vector<2x128xf32>
    %449 = arith.mulf %440, %391 : vector<2x128xf32>
    %450 = arith.mulf %434, %442 : vector<2x128xf32>
    %451 = arith.addf %449, %450 : vector<2x128xf32>
    %452 = math.tanh %451 : vector<2x128xf32>
    %453 = arith.mulf %448, %452 : vector<2x128xf32>
    %454 = vector.extract_strided_slice %428 {offsets = [0, 0], sizes = [2, 128], strides = [1, 1]} : vector<2x512xf32> to vector<2x128xf32>
    %455 = arith.negf %454 : vector<2x128xf32>
    %456 = math.exp %455 : vector<2x128xf32>
    %cst_144 = arith.constant 1.000000e+00 : f32
    %457 = vector.broadcast %cst_144 : f32 to vector<2x128xf32>
    %458 = arith.addf %457, %456 : vector<2x128xf32>
    %459 = arith.divf %457, %458 : vector<2x128xf32>
    %460 = vector.extract_strided_slice %428 {offsets = [0, 128], sizes = [2, 128], strides = [1, 1]} : vector<2x512xf32> to vector<2x128xf32>
    %461 = arith.negf %460 : vector<2x128xf32>
    %462 = math.exp %461 : vector<2x128xf32>
    %cst_145 = arith.constant 1.000000e+00 : f32
    %463 = vector.broadcast %cst_145 : f32 to vector<2x128xf32>
    %464 = arith.addf %463, %462 : vector<2x128xf32>
    %465 = arith.divf %463, %464 : vector<2x128xf32>
    %466 = vector.extract_strided_slice %428 {offsets = [0, 256], sizes = [2, 128], strides = [1, 1]} : vector<2x512xf32> to vector<2x128xf32>
    %467 = math.tanh %466 : vector<2x128xf32>
    %468 = vector.extract_strided_slice %428 {offsets = [0, 384], sizes = [2, 128], strides = [1, 1]} : vector<2x512xf32> to vector<2x128xf32>
    %469 = arith.negf %468 : vector<2x128xf32>
    %470 = math.exp %469 : vector<2x128xf32>
    %cst_146 = arith.constant 1.000000e+00 : f32
    %471 = vector.broadcast %cst_146 : f32 to vector<2x128xf32>
    %472 = arith.addf %471, %470 : vector<2x128xf32>
    %473 = arith.divf %471, %472 : vector<2x128xf32>
    %474 = arith.mulf %465, %416 : vector<2x128xf32>
    %475 = arith.mulf %459, %467 : vector<2x128xf32>
    %476 = arith.addf %474, %475 : vector<2x128xf32>
    %477 = math.tanh %476 : vector<2x128xf32>
    %478 = arith.mulf %473, %477 : vector<2x128xf32>
    %c14_147 = arith.constant 14 : index
    %c0_148 = arith.constant 0 : index
    %479 = vector.load %arg11[%c14_147, %c0_148] : memref<16x256xf32, #tpu.memory_space<vmem>>, vector<2x128xf32>
    tpu.vector_store %arg11[%c14_147, %c0_148], %453 {strides = array<i32>} : memref<16x256xf32, #tpu.memory_space<vmem>>, vector<2x128xf32>,
    %c0_149 = arith.constant 0 : index
    %c128_150 = arith.constant 128 : index
    %480 = vector.load %arg11[%c0_149, %c128_150] : memref<16x256xf32, #tpu.memory_space<vmem>>, vector<2x128xf32>
    tpu.vector_store %arg11[%c0_149, %c128_150], %478 {strides = array<i32>} : memref<16x256xf32, #tpu.memory_space<vmem>>, vector<2x128xf32>,
    %c0_151 = arith.constant 0 : index
    %c0_152 = arith.constant 0 : index
    %481 = vector.load %arg11[%c0_151, %c0_152] : memref<16x256xf32, #tpu.memory_space<vmem>>, vector<16x256xf32>
    %c0_153 = arith.constant 0 : index
    %c0_154 = arith.constant 0 : index
    %482 = vector.load %arg4[%c0_153, %c0_154] : memref<256x1024xf32, #tpu.memory_space<vmem>>, vector<256x1024xf32>
    %cst_155 = arith.constant dense<0.000000e+00> : vector<16x1024xf32>
    %483 = tpu.matmul %481, %482, %cst_155 {dimension_numbers = #tpu.dot_dimension_numbers<[1], [0], [0], [1], [0, 0, 1, 1], [], []>} : vector<16x256xf32>, vector<256x1024xf32>, vector<16x1024xf32> -> vector<16x1024xf32>
    %c0_156 = arith.constant 0 : index
    %c0_157 = arith.constant 0 : index
    %484 = vector.load %arg5[%c0_156, %c0_157] : memref<1x1024xf32, #tpu.memory_space<vmem>>, vector<1x1024xf32>
    %485 = vector.broadcast %484 : vector<1x1024xf32> to vector<16x1024xf32>
    %486 = arith.addf %483, %485 : vector<16x1024xf32>
    %c0_158 = arith.constant 0 : index
    %c0_159 = arith.constant 0 : index
    %487 = vector.load %arg12[%c0_158, %c0_159] : memref<16x1024xf32, #tpu.memory_space<vmem>>, vector<16x1024xf32>
    tpu.vector_store %arg12[%c0_158, %c0_159], %486 {strides = array<i32>} : memref<16x1024xf32, #tpu.memory_space<vmem>>, vector<16x1024xf32>,
    %c0_160 = arith.constant 0 : index
    %c0_161 = arith.constant 0 : index
    %488 = vector.load %arg12[%c0_160, %c0_161] : memref<16x1024xf32, #tpu.memory_space<vmem>>, vector<2x512xf32>
    %c0_162 = arith.constant 0 : index
    %c0_163 = arith.constant 0 : index
    %489 = vector.load %arg6[%c0_162, %c0_163] : memref<128x512xf32, #tpu.memory_space<vmem>>, vector<128x512xf32>
    %cst_164 = arith.constant dense<0.000000e+00> : vector<2x512xf32>
    %490 = tpu.matmul %0, %489, %cst_164 {dimension_numbers = #tpu.dot_dimension_numbers<[1], [0], [0], [1], [0, 0, 1, 1], [], []>} : vector<2x128xf32>, vector<128x512xf32>, vector<2x512xf32> -> vector<2x512xf32>
    %491 = arith.addf %488, %490 : vector<2x512xf32>
    %c14_165 = arith.constant 14 : index
    %c512 = arith.constant 512 : index
    %492 = vector.load %arg12[%c14_165, %c512] : memref<16x1024xf32, #tpu.memory_space<vmem>>, vector<2x512xf32>
    %c0_166 = arith.constant 0 : index
    %c0_167 = arith.constant 0 : index
    %493 = vector.load %arg7[%c0_166, %c0_167] : memref<128x512xf32, #tpu.memory_space<vmem>>, vector<128x512xf32>
    %cst_168 = arith.constant dense<0.000000e+00> : vector<2x512xf32>
    %494 = tpu.matmul %0, %493, %cst_168 {dimension_numbers = #tpu.dot_dimension_numbers<[1], [0], [0], [1], [0, 0, 1, 1], [], []>} : vector<2x128xf32>, vector<128x512xf32>, vector<2x512xf32> -> vector<2x512xf32>
    %495 = arith.addf %492, %494 : vector<2x512xf32>
    %496 = vector.extract_strided_slice %491 {offsets = [0, 0], sizes = [2, 128], strides = [1, 1]} : vector<2x512xf32> to vector<2x128xf32>
    %497 = arith.negf %496 : vector<2x128xf32>
    %498 = math.exp %497 : vector<2x128xf32>
    %cst_169 = arith.constant 1.000000e+00 : f32
    %499 = vector.broadcast %cst_169 : f32 to vector<2x128xf32>
    %500 = arith.addf %499, %498 : vector<2x128xf32>
    %501 = arith.divf %499, %500 : vector<2x128xf32>
    %502 = vector.extract_strided_slice %491 {offsets = [0, 128], sizes = [2, 128], strides = [1, 1]} : vector<2x512xf32> to vector<2x128xf32>
    %503 = arith.negf %502 : vector<2x128xf32>
    %504 = math.exp %503 : vector<2x128xf32>
    %cst_170 = arith.constant 1.000000e+00 : f32
    %505 = vector.broadcast %cst_170 : f32 to vector<2x128xf32>
    %506 = arith.addf %505, %504 : vector<2x128xf32>
    %507 = arith.divf %505, %506 : vector<2x128xf32>
    %508 = vector.extract_strided_slice %491 {offsets = [0, 256], sizes = [2, 128], strides = [1, 1]} : vector<2x512xf32> to vector<2x128xf32>
    %509 = math.tanh %508 : vector<2x128xf32>
    %510 = vector.extract_strided_slice %491 {offsets = [0, 384], sizes = [2, 128], strides = [1, 1]} : vector<2x512xf32> to vector<2x128xf32>
    %511 = arith.negf %510 : vector<2x128xf32>
    %512 = math.exp %511 : vector<2x128xf32>
    %cst_171 = arith.constant 1.000000e+00 : f32
    %513 = vector.broadcast %cst_171 : f32 to vector<2x128xf32>
    %514 = arith.addf %513, %512 : vector<2x128xf32>
    %515 = arith.divf %513, %514 : vector<2x128xf32>
    %516 = arith.mulf %507, %0 : vector<2x128xf32>
    %517 = arith.mulf %501, %509 : vector<2x128xf32>
    %518 = arith.addf %516, %517 : vector<2x128xf32>
    %519 = math.tanh %518 : vector<2x128xf32>
    %520 = arith.mulf %515, %519 : vector<2x128xf32>
    %521 = vector.extract_strided_slice %495 {offsets = [0, 0], sizes = [2, 128], strides = [1, 1]} : vector<2x512xf32> to vector<2x128xf32>
    %522 = arith.negf %521 : vector<2x128xf32>
    %523 = math.exp %522 : vector<2x128xf32>
    %cst_172 = arith.constant 1.000000e+00 : f32
    %524 = vector.broadcast %cst_172 : f32 to vector<2x128xf32>
    %525 = arith.addf %524, %523 : vector<2x128xf32>
    %526 = arith.divf %524, %525 : vector<2x128xf32>
    %527 = vector.extract_strided_slice %495 {offsets = [0, 128], sizes = [2, 128], strides = [1, 1]} : vector<2x512xf32> to vector<2x128xf32>
    %528 = arith.negf %527 : vector<2x128xf32>
    %529 = math.exp %528 : vector<2x128xf32>
    %cst_173 = arith.constant 1.000000e+00 : f32
    %530 = vector.broadcast %cst_173 : f32 to vector<2x128xf32>
    %531 = arith.addf %530, %529 : vector<2x128xf32>
    %532 = arith.divf %530, %531 : vector<2x128xf32>
    %533 = vector.extract_strided_slice %495 {offsets = [0, 256], sizes = [2, 128], strides = [1, 1]} : vector<2x512xf32> to vector<2x128xf32>
    %534 = math.tanh %533 : vector<2x128xf32>
    %535 = vector.extract_strided_slice %495 {offsets = [0, 384], sizes = [2, 128], strides = [1, 1]} : vector<2x512xf32> to vector<2x128xf32>
    %536 = arith.negf %535 : vector<2x128xf32>
    %537 = math.exp %536 : vector<2x128xf32>
    %cst_174 = arith.constant 1.000000e+00 : f32
    %538 = vector.broadcast %cst_174 : f32 to vector<2x128xf32>
    %539 = arith.addf %538, %537 : vector<2x128xf32>
    %540 = arith.divf %538, %539 : vector<2x128xf32>
    %541 = arith.mulf %532, %0 : vector<2x128xf32>
    %542 = arith.mulf %526, %534 : vector<2x128xf32>
    %543 = arith.addf %541, %542 : vector<2x128xf32>
    %544 = math.tanh %543 : vector<2x128xf32>
    %545 = arith.mulf %540, %544 : vector<2x128xf32>
    %c0_175 = arith.constant 0 : index
    %c0_176 = arith.constant 0 : index
    %546 = vector.load %arg13[%c0_175, %c0_176] : memref<16x256xf32, #tpu.memory_space<vmem>>, vector<2x128xf32>
    tpu.vector_store %arg13[%c0_175, %c0_176], %520 {strides = array<i32>} : memref<16x256xf32, #tpu.memory_space<vmem>>, vector<2x128xf32>,
    %c14_177 = arith.constant 14 : index
    %c128_178 = arith.constant 128 : index
    %547 = vector.load %arg13[%c14_177, %c128_178] : memref<16x256xf32, #tpu.memory_space<vmem>>, vector<2x128xf32>
    tpu.vector_store %arg13[%c14_177, %c128_178], %545 {strides = array<i32>} : memref<16x256xf32, #tpu.memory_space<vmem>>, vector<2x128xf32>,
    %c2_179 = arith.constant 2 : index
    %c0_180 = arith.constant 0 : index
    %548 = vector.load %arg12[%c2_179, %c0_180] : memref<16x1024xf32, #tpu.memory_space<vmem>>, vector<2x512xf32>
    %c0_181 = arith.constant 0 : index
    %c0_182 = arith.constant 0 : index
    %549 = vector.load %arg6[%c0_181, %c0_182] : memref<128x512xf32, #tpu.memory_space<vmem>>, vector<128x512xf32>
    %cst_183 = arith.constant dense<0.000000e+00> : vector<2x512xf32>
    %550 = tpu.matmul %520, %549, %cst_183 {dimension_numbers = #tpu.dot_dimension_numbers<[1], [0], [0], [1], [0, 0, 1, 1], [], []>} : vector<2x128xf32>, vector<128x512xf32>, vector<2x512xf32> -> vector<2x512xf32>
    %551 = arith.addf %548, %550 : vector<2x512xf32>
    %c12_184 = arith.constant 12 : index
    %c512_185 = arith.constant 512 : index
    %552 = vector.load %arg12[%c12_184, %c512_185] : memref<16x1024xf32, #tpu.memory_space<vmem>>, vector<2x512xf32>
    %c0_186 = arith.constant 0 : index
    %c0_187 = arith.constant 0 : index
    %553 = vector.load %arg7[%c0_186, %c0_187] : memref<128x512xf32, #tpu.memory_space<vmem>>, vector<128x512xf32>
    %cst_188 = arith.constant dense<0.000000e+00> : vector<2x512xf32>
    %554 = tpu.matmul %545, %553, %cst_188 {dimension_numbers = #tpu.dot_dimension_numbers<[1], [0], [0], [1], [0, 0, 1, 1], [], []>} : vector<2x128xf32>, vector<128x512xf32>, vector<2x512xf32> -> vector<2x512xf32>
    %555 = arith.addf %552, %554 : vector<2x512xf32>
    %556 = vector.extract_strided_slice %551 {offsets = [0, 0], sizes = [2, 128], strides = [1, 1]} : vector<2x512xf32> to vector<2x128xf32>
    %557 = arith.negf %556 : vector<2x128xf32>
    %558 = math.exp %557 : vector<2x128xf32>
    %cst_189 = arith.constant 1.000000e+00 : f32
    %559 = vector.broadcast %cst_189 : f32 to vector<2x128xf32>
    %560 = arith.addf %559, %558 : vector<2x128xf32>
    %561 = arith.divf %559, %560 : vector<2x128xf32>
    %562 = vector.extract_strided_slice %551 {offsets = [0, 128], sizes = [2, 128], strides = [1, 1]} : vector<2x512xf32> to vector<2x128xf32>
    %563 = arith.negf %562 : vector<2x128xf32>
    %564 = math.exp %563 : vector<2x128xf32>
    %cst_190 = arith.constant 1.000000e+00 : f32
    %565 = vector.broadcast %cst_190 : f32 to vector<2x128xf32>
    %566 = arith.addf %565, %564 : vector<2x128xf32>
    %567 = arith.divf %565, %566 : vector<2x128xf32>
    %568 = vector.extract_strided_slice %551 {offsets = [0, 256], sizes = [2, 128], strides = [1, 1]} : vector<2x512xf32> to vector<2x128xf32>
    %569 = math.tanh %568 : vector<2x128xf32>
    %570 = vector.extract_strided_slice %551 {offsets = [0, 384], sizes = [2, 128], strides = [1, 1]} : vector<2x512xf32> to vector<2x128xf32>
    %571 = arith.negf %570 : vector<2x128xf32>
    %572 = math.exp %571 : vector<2x128xf32>
    %cst_191 = arith.constant 1.000000e+00 : f32
    %573 = vector.broadcast %cst_191 : f32 to vector<2x128xf32>
    %574 = arith.addf %573, %572 : vector<2x128xf32>
    %575 = arith.divf %573, %574 : vector<2x128xf32>
    %576 = arith.mulf %567, %518 : vector<2x128xf32>
    %577 = arith.mulf %561, %569 : vector<2x128xf32>
    %578 = arith.addf %576, %577 : vector<2x128xf32>
    %579 = math.tanh %578 : vector<2x128xf32>
    %580 = arith.mulf %575, %579 : vector<2x128xf32>
    %581 = vector.extract_strided_slice %555 {offsets = [0, 0], sizes = [2, 128], strides = [1, 1]} : vector<2x512xf32> to vector<2x128xf32>
    %582 = arith.negf %581 : vector<2x128xf32>
    %583 = math.exp %582 : vector<2x128xf32>
    %cst_192 = arith.constant 1.000000e+00 : f32
    %584 = vector.broadcast %cst_192 : f32 to vector<2x128xf32>
    %585 = arith.addf %584, %583 : vector<2x128xf32>
    %586 = arith.divf %584, %585 : vector<2x128xf32>
    %587 = vector.extract_strided_slice %555 {offsets = [0, 128], sizes = [2, 128], strides = [1, 1]} : vector<2x512xf32> to vector<2x128xf32>
    %588 = arith.negf %587 : vector<2x128xf32>
    %589 = math.exp %588 : vector<2x128xf32>
    %cst_193 = arith.constant 1.000000e+00 : f32
    %590 = vector.broadcast %cst_193 : f32 to vector<2x128xf32>
    %591 = arith.addf %590, %589 : vector<2x128xf32>
    %592 = arith.divf %590, %591 : vector<2x128xf32>
    %593 = vector.extract_strided_slice %555 {offsets = [0, 256], sizes = [2, 128], strides = [1, 1]} : vector<2x512xf32> to vector<2x128xf32>
    %594 = math.tanh %593 : vector<2x128xf32>
    %595 = vector.extract_strided_slice %555 {offsets = [0, 384], sizes = [2, 128], strides = [1, 1]} : vector<2x512xf32> to vector<2x128xf32>
    %596 = arith.negf %595 : vector<2x128xf32>
    %597 = math.exp %596 : vector<2x128xf32>
    %cst_194 = arith.constant 1.000000e+00 : f32
    %598 = vector.broadcast %cst_194 : f32 to vector<2x128xf32>
    %599 = arith.addf %598, %597 : vector<2x128xf32>
    %600 = arith.divf %598, %599 : vector<2x128xf32>
    %601 = arith.mulf %592, %543 : vector<2x128xf32>
    %602 = arith.mulf %586, %594 : vector<2x128xf32>
    %603 = arith.addf %601, %602 : vector<2x128xf32>
    %604 = math.tanh %603 : vector<2x128xf32>
    %605 = arith.mulf %600, %604 : vector<2x128xf32>
    %c2_195 = arith.constant 2 : index
    %c0_196 = arith.constant 0 : index
    %606 = vector.load %arg13[%c2_195, %c0_196] : memref<16x256xf32, #tpu.memory_space<vmem>>, vector<2x128xf32>
    tpu.vector_store %arg13[%c2_195, %c0_196], %580 {strides = array<i32>} : memref<16x256xf32, #tpu.memory_space<vmem>>, vector<2x128xf32>,
    %c12_197 = arith.constant 12 : index
    %c128_198 = arith.constant 128 : index
    %607 = vector.load %arg13[%c12_197, %c128_198] : memref<16x256xf32, #tpu.memory_space<vmem>>, vector<2x128xf32>
    tpu.vector_store %arg13[%c12_197, %c128_198], %605 {strides = array<i32>} : memref<16x256xf32, #tpu.memory_space<vmem>>, vector<2x128xf32>,
    %c4_199 = arith.constant 4 : index
    %c0_200 = arith.constant 0 : index
    %608 = vector.load %arg12[%c4_199, %c0_200] : memref<16x1024xf32, #tpu.memory_space<vmem>>, vector<2x512xf32>
    %c0_201 = arith.constant 0 : index
    %c0_202 = arith.constant 0 : index
    %609 = vector.load %arg6[%c0_201, %c0_202] : memref<128x512xf32, #tpu.memory_space<vmem>>, vector<128x512xf32>
    %cst_203 = arith.constant dense<0.000000e+00> : vector<2x512xf32>
    %610 = tpu.matmul %580, %609, %cst_203 {dimension_numbers = #tpu.dot_dimension_numbers<[1], [0], [0], [1], [0, 0, 1, 1], [], []>} : vector<2x128xf32>, vector<128x512xf32>, vector<2x512xf32> -> vector<2x512xf32>
    %611 = arith.addf %608, %610 : vector<2x512xf32>
    %c10_204 = arith.constant 10 : index
    %c512_205 = arith.constant 512 : index
    %612 = vector.load %arg12[%c10_204, %c512_205] : memref<16x1024xf32, #tpu.memory_space<vmem>>, vector<2x512xf32>
    %c0_206 = arith.constant 0 : index
    %c0_207 = arith.constant 0 : index
    %613 = vector.load %arg7[%c0_206, %c0_207] : memref<128x512xf32, #tpu.memory_space<vmem>>, vector<128x512xf32>
    %cst_208 = arith.constant dense<0.000000e+00> : vector<2x512xf32>
    %614 = tpu.matmul %605, %613, %cst_208 {dimension_numbers = #tpu.dot_dimension_numbers<[1], [0], [0], [1], [0, 0, 1, 1], [], []>} : vector<2x128xf32>, vector<128x512xf32>, vector<2x512xf32> -> vector<2x512xf32>
    %615 = arith.addf %612, %614 : vector<2x512xf32>
    %616 = vector.extract_strided_slice %611 {offsets = [0, 0], sizes = [2, 128], strides = [1, 1]} : vector<2x512xf32> to vector<2x128xf32>
    %617 = arith.negf %616 : vector<2x128xf32>
    %618 = math.exp %617 : vector<2x128xf32>
    %cst_209 = arith.constant 1.000000e+00 : f32
    %619 = vector.broadcast %cst_209 : f32 to vector<2x128xf32>
    %620 = arith.addf %619, %618 : vector<2x128xf32>
    %621 = arith.divf %619, %620 : vector<2x128xf32>
    %622 = vector.extract_strided_slice %611 {offsets = [0, 128], sizes = [2, 128], strides = [1, 1]} : vector<2x512xf32> to vector<2x128xf32>
    %623 = arith.negf %622 : vector<2x128xf32>
    %624 = math.exp %623 : vector<2x128xf32>
    %cst_210 = arith.constant 1.000000e+00 : f32
    %625 = vector.broadcast %cst_210 : f32 to vector<2x128xf32>
    %626 = arith.addf %625, %624 : vector<2x128xf32>
    %627 = arith.divf %625, %626 : vector<2x128xf32>
    %628 = vector.extract_strided_slice %611 {offsets = [0, 256], sizes = [2, 128], strides = [1, 1]} : vector<2x512xf32> to vector<2x128xf32>
    %629 = math.tanh %628 : vector<2x128xf32>
    %630 = vector.extract_strided_slice %611 {offsets = [0, 384], sizes = [2, 128], strides = [1, 1]} : vector<2x512xf32> to vector<2x128xf32>
    %631 = arith.negf %630 : vector<2x128xf32>
    %632 = math.exp %631 : vector<2x128xf32>
    %cst_211 = arith.constant 1.000000e+00 : f32
    %633 = vector.broadcast %cst_211 : f32 to vector<2x128xf32>
    %634 = arith.addf %633, %632 : vector<2x128xf32>
    %635 = arith.divf %633, %634 : vector<2x128xf32>
    %636 = arith.mulf %627, %578 : vector<2x128xf32>
    %637 = arith.mulf %621, %629 : vector<2x128xf32>
    %638 = arith.addf %636, %637 : vector<2x128xf32>
    %639 = math.tanh %638 : vector<2x128xf32>
    %640 = arith.mulf %635, %639 : vector<2x128xf32>
    %641 = vector.extract_strided_slice %615 {offsets = [0, 0], sizes = [2, 128], strides = [1, 1]} : vector<2x512xf32> to vector<2x128xf32>
    %642 = arith.negf %641 : vector<2x128xf32>
    %643 = math.exp %642 : vector<2x128xf32>
    %cst_212 = arith.constant 1.000000e+00 : f32
    %644 = vector.broadcast %cst_212 : f32 to vector<2x128xf32>
    %645 = arith.addf %644, %643 : vector<2x128xf32>
    %646 = arith.divf %644, %645 : vector<2x128xf32>
    %647 = vector.extract_strided_slice %615 {offsets = [0, 128], sizes = [2, 128], strides = [1, 1]} : vector<2x512xf32> to vector<2x128xf32>
    %648 = arith.negf %647 : vector<2x128xf32>
    %649 = math.exp %648 : vector<2x128xf32>
    %cst_213 = arith.constant 1.000000e+00 : f32
    %650 = vector.broadcast %cst_213 : f32 to vector<2x128xf32>
    %651 = arith.addf %650, %649 : vector<2x128xf32>
    %652 = arith.divf %650, %651 : vector<2x128xf32>
    %653 = vector.extract_strided_slice %615 {offsets = [0, 256], sizes = [2, 128], strides = [1, 1]} : vector<2x512xf32> to vector<2x128xf32>
    %654 = math.tanh %653 : vector<2x128xf32>
    %655 = vector.extract_strided_slice %615 {offsets = [0, 384], sizes = [2, 128], strides = [1, 1]} : vector<2x512xf32> to vector<2x128xf32>
    %656 = arith.negf %655 : vector<2x128xf32>
    %657 = math.exp %656 : vector<2x128xf32>
    %cst_214 = arith.constant 1.000000e+00 : f32
    %658 = vector.broadcast %cst_214 : f32 to vector<2x128xf32>
    %659 = arith.addf %658, %657 : vector<2x128xf32>
    %660 = arith.divf %658, %659 : vector<2x128xf32>
    %661 = arith.mulf %652, %603 : vector<2x128xf32>
    %662 = arith.mulf %646, %654 : vector<2x128xf32>
    %663 = arith.addf %661, %662 : vector<2x128xf32>
    %664 = math.tanh %663 : vector<2x128xf32>
    %665 = arith.mulf %660, %664 : vector<2x128xf32>
    %c4_215 = arith.constant 4 : index
    %c0_216 = arith.constant 0 : index
    %666 = vector.load %arg13[%c4_215, %c0_216] : memref<16x256xf32, #tpu.memory_space<vmem>>, vector<2x128xf32>
    tpu.vector_store %arg13[%c4_215, %c0_216], %640 {strides = array<i32>} : memref<16x256xf32, #tpu.memory_space<vmem>>, vector<2x128xf32>,
    %c10_217 = arith.constant 10 : index
    %c128_218 = arith.constant 128 : index
    %667 = vector.load %arg13[%c10_217, %c128_218] : memref<16x256xf32, #tpu.memory_space<vmem>>, vector<2x128xf32>
    tpu.vector_store %arg13[%c10_217, %c128_218], %665 {strides = array<i32>} : memref<16x256xf32, #tpu.memory_space<vmem>>, vector<2x128xf32>,
    %c6_219 = arith.constant 6 : index
    %c0_220 = arith.constant 0 : index
    %668 = vector.load %arg12[%c6_219, %c0_220] : memref<16x1024xf32, #tpu.memory_space<vmem>>, vector<2x512xf32>
    %c0_221 = arith.constant 0 : index
    %c0_222 = arith.constant 0 : index
    %669 = vector.load %arg6[%c0_221, %c0_222] : memref<128x512xf32, #tpu.memory_space<vmem>>, vector<128x512xf32>
    %cst_223 = arith.constant dense<0.000000e+00> : vector<2x512xf32>
    %670 = tpu.matmul %640, %669, %cst_223 {dimension_numbers = #tpu.dot_dimension_numbers<[1], [0], [0], [1], [0, 0, 1, 1], [], []>} : vector<2x128xf32>, vector<128x512xf32>, vector<2x512xf32> -> vector<2x512xf32>
    %671 = arith.addf %668, %670 : vector<2x512xf32>
    %c8_224 = arith.constant 8 : index
    %c512_225 = arith.constant 512 : index
    %672 = vector.load %arg12[%c8_224, %c512_225] : memref<16x1024xf32, #tpu.memory_space<vmem>>, vector<2x512xf32>
    %c0_226 = arith.constant 0 : index
    %c0_227 = arith.constant 0 : index
    %673 = vector.load %arg7[%c0_226, %c0_227] : memref<128x512xf32, #tpu.memory_space<vmem>>, vector<128x512xf32>
    %cst_228 = arith.constant dense<0.000000e+00> : vector<2x512xf32>
    %674 = tpu.matmul %665, %673, %cst_228 {dimension_numbers = #tpu.dot_dimension_numbers<[1], [0], [0], [1], [0, 0, 1, 1], [], []>} : vector<2x128xf32>, vector<128x512xf32>, vector<2x512xf32> -> vector<2x512xf32>
    %675 = arith.addf %672, %674 : vector<2x512xf32>
    %676 = vector.extract_strided_slice %671 {offsets = [0, 0], sizes = [2, 128], strides = [1, 1]} : vector<2x512xf32> to vector<2x128xf32>
    %677 = arith.negf %676 : vector<2x128xf32>
    %678 = math.exp %677 : vector<2x128xf32>
    %cst_229 = arith.constant 1.000000e+00 : f32
    %679 = vector.broadcast %cst_229 : f32 to vector<2x128xf32>
    %680 = arith.addf %679, %678 : vector<2x128xf32>
    %681 = arith.divf %679, %680 : vector<2x128xf32>
    %682 = vector.extract_strided_slice %671 {offsets = [0, 128], sizes = [2, 128], strides = [1, 1]} : vector<2x512xf32> to vector<2x128xf32>
    %683 = arith.negf %682 : vector<2x128xf32>
    %684 = math.exp %683 : vector<2x128xf32>
    %cst_230 = arith.constant 1.000000e+00 : f32
    %685 = vector.broadcast %cst_230 : f32 to vector<2x128xf32>
    %686 = arith.addf %685, %684 : vector<2x128xf32>
    %687 = arith.divf %685, %686 : vector<2x128xf32>
    %688 = vector.extract_strided_slice %671 {offsets = [0, 256], sizes = [2, 128], strides = [1, 1]} : vector<2x512xf32> to vector<2x128xf32>
    %689 = math.tanh %688 : vector<2x128xf32>
    %690 = vector.extract_strided_slice %671 {offsets = [0, 384], sizes = [2, 128], strides = [1, 1]} : vector<2x512xf32> to vector<2x128xf32>
    %691 = arith.negf %690 : vector<2x128xf32>
    %692 = math.exp %691 : vector<2x128xf32>
    %cst_231 = arith.constant 1.000000e+00 : f32
    %693 = vector.broadcast %cst_231 : f32 to vector<2x128xf32>
    %694 = arith.addf %693, %692 : vector<2x128xf32>
    %695 = arith.divf %693, %694 : vector<2x128xf32>
    %696 = arith.mulf %687, %638 : vector<2x128xf32>
    %697 = arith.mulf %681, %689 : vector<2x128xf32>
    %698 = arith.addf %696, %697 : vector<2x128xf32>
    %699 = math.tanh %698 : vector<2x128xf32>
    %700 = arith.mulf %695, %699 : vector<2x128xf32>
    %701 = vector.extract_strided_slice %675 {offsets = [0, 0], sizes = [2, 128], strides = [1, 1]} : vector<2x512xf32> to vector<2x128xf32>
    %702 = arith.negf %701 : vector<2x128xf32>
    %703 = math.exp %702 : vector<2x128xf32>
    %cst_232 = arith.constant 1.000000e+00 : f32
    %704 = vector.broadcast %cst_232 : f32 to vector<2x128xf32>
    %705 = arith.addf %704, %703 : vector<2x128xf32>
    %706 = arith.divf %704, %705 : vector<2x128xf32>
    %707 = vector.extract_strided_slice %675 {offsets = [0, 128], sizes = [2, 128], strides = [1, 1]} : vector<2x512xf32> to vector<2x128xf32>
    %708 = arith.negf %707 : vector<2x128xf32>
    %709 = math.exp %708 : vector<2x128xf32>
    %cst_233 = arith.constant 1.000000e+00 : f32
    %710 = vector.broadcast %cst_233 : f32 to vector<2x128xf32>
    %711 = arith.addf %710, %709 : vector<2x128xf32>
    %712 = arith.divf %710, %711 : vector<2x128xf32>
    %713 = vector.extract_strided_slice %675 {offsets = [0, 256], sizes = [2, 128], strides = [1, 1]} : vector<2x512xf32> to vector<2x128xf32>
    %714 = math.tanh %713 : vector<2x128xf32>
    %715 = vector.extract_strided_slice %675 {offsets = [0, 384], sizes = [2, 128], strides = [1, 1]} : vector<2x512xf32> to vector<2x128xf32>
    %716 = arith.negf %715 : vector<2x128xf32>
    %717 = math.exp %716 : vector<2x128xf32>
    %cst_234 = arith.constant 1.000000e+00 : f32
    %718 = vector.broadcast %cst_234 : f32 to vector<2x128xf32>
    %719 = arith.addf %718, %717 : vector<2x128xf32>
    %720 = arith.divf %718, %719 : vector<2x128xf32>
    %721 = arith.mulf %712, %663 : vector<2x128xf32>
    %722 = arith.mulf %706, %714 : vector<2x128xf32>
    %723 = arith.addf %721, %722 : vector<2x128xf32>
    %724 = math.tanh %723 : vector<2x128xf32>
    %725 = arith.mulf %720, %724 : vector<2x128xf32>
    %c6_235 = arith.constant 6 : index
    %c0_236 = arith.constant 0 : index
    %726 = vector.load %arg13[%c6_235, %c0_236] : memref<16x256xf32, #tpu.memory_space<vmem>>, vector<2x128xf32>
    tpu.vector_store %arg13[%c6_235, %c0_236], %700 {strides = array<i32>} : memref<16x256xf32, #tpu.memory_space<vmem>>, vector<2x128xf32>,
    %c8_237 = arith.constant 8 : index
    %c128_238 = arith.constant 128 : index
    %727 = vector.load %arg13[%c8_237, %c128_238] : memref<16x256xf32, #tpu.memory_space<vmem>>, vector<2x128xf32>
    tpu.vector_store %arg13[%c8_237, %c128_238], %725 {strides = array<i32>} : memref<16x256xf32, #tpu.memory_space<vmem>>, vector<2x128xf32>,
    %c8_239 = arith.constant 8 : index
    %c0_240 = arith.constant 0 : index
    %728 = vector.load %arg12[%c8_239, %c0_240] : memref<16x1024xf32, #tpu.memory_space<vmem>>, vector<2x512xf32>
    %c0_241 = arith.constant 0 : index
    %c0_242 = arith.constant 0 : index
    %729 = vector.load %arg6[%c0_241, %c0_242] : memref<128x512xf32, #tpu.memory_space<vmem>>, vector<128x512xf32>
    %cst_243 = arith.constant dense<0.000000e+00> : vector<2x512xf32>
    %730 = tpu.matmul %700, %729, %cst_243 {dimension_numbers = #tpu.dot_dimension_numbers<[1], [0], [0], [1], [0, 0, 1, 1], [], []>} : vector<2x128xf32>, vector<128x512xf32>, vector<2x512xf32> -> vector<2x512xf32>
    %731 = arith.addf %728, %730 : vector<2x512xf32>
    %c6_244 = arith.constant 6 : index
    %c512_245 = arith.constant 512 : index
    %732 = vector.load %arg12[%c6_244, %c512_245] : memref<16x1024xf32, #tpu.memory_space<vmem>>, vector<2x512xf32>
    %c0_246 = arith.constant 0 : index
    %c0_247 = arith.constant 0 : index
    %733 = vector.load %arg7[%c0_246, %c0_247] : memref<128x512xf32, #tpu.memory_space<vmem>>, vector<128x512xf32>
    %cst_248 = arith.constant dense<0.000000e+00> : vector<2x512xf32>
    %734 = tpu.matmul %725, %733, %cst_248 {dimension_numbers = #tpu.dot_dimension_numbers<[1], [0], [0], [1], [0, 0, 1, 1], [], []>} : vector<2x128xf32>, vector<128x512xf32>, vector<2x512xf32> -> vector<2x512xf32>
    %735 = arith.addf %732, %734 : vector<2x512xf32>
    %736 = vector.extract_strided_slice %731 {offsets = [0, 0], sizes = [2, 128], strides = [1, 1]} : vector<2x512xf32> to vector<2x128xf32>
    %737 = arith.negf %736 : vector<2x128xf32>
    %738 = math.exp %737 : vector<2x128xf32>
    %cst_249 = arith.constant 1.000000e+00 : f32
    %739 = vector.broadcast %cst_249 : f32 to vector<2x128xf32>
    %740 = arith.addf %739, %738 : vector<2x128xf32>
    %741 = arith.divf %739, %740 : vector<2x128xf32>
    %742 = vector.extract_strided_slice %731 {offsets = [0, 128], sizes = [2, 128], strides = [1, 1]} : vector<2x512xf32> to vector<2x128xf32>
    %743 = arith.negf %742 : vector<2x128xf32>
    %744 = math.exp %743 : vector<2x128xf32>
    %cst_250 = arith.constant 1.000000e+00 : f32
    %745 = vector.broadcast %cst_250 : f32 to vector<2x128xf32>
    %746 = arith.addf %745, %744 : vector<2x128xf32>
    %747 = arith.divf %745, %746 : vector<2x128xf32>
    %748 = vector.extract_strided_slice %731 {offsets = [0, 256], sizes = [2, 128], strides = [1, 1]} : vector<2x512xf32> to vector<2x128xf32>
    %749 = math.tanh %748 : vector<2x128xf32>
    %750 = vector.extract_strided_slice %731 {offsets = [0, 384], sizes = [2, 128], strides = [1, 1]} : vector<2x512xf32> to vector<2x128xf32>
    %751 = arith.negf %750 : vector<2x128xf32>
    %752 = math.exp %751 : vector<2x128xf32>
    %cst_251 = arith.constant 1.000000e+00 : f32
    %753 = vector.broadcast %cst_251 : f32 to vector<2x128xf32>
    %754 = arith.addf %753, %752 : vector<2x128xf32>
    %755 = arith.divf %753, %754 : vector<2x128xf32>
    %756 = arith.mulf %747, %698 : vector<2x128xf32>
    %757 = arith.mulf %741, %749 : vector<2x128xf32>
    %758 = arith.addf %756, %757 : vector<2x128xf32>
    %759 = math.tanh %758 : vector<2x128xf32>
    %760 = arith.mulf %755, %759 : vector<2x128xf32>
    %761 = vector.extract_strided_slice %735 {offsets = [0, 0], sizes = [2, 128], strides = [1, 1]} : vector<2x512xf32> to vector<2x128xf32>
    %762 = arith.negf %761 : vector<2x128xf32>
    %763 = math.exp %762 : vector<2x128xf32>
    %cst_252 = arith.constant 1.000000e+00 : f32
    %764 = vector.broadcast %cst_252 : f32 to vector<2x128xf32>
    %765 = arith.addf %764, %763 : vector<2x128xf32>
    %766 = arith.divf %764, %765 : vector<2x128xf32>
    %767 = vector.extract_strided_slice %735 {offsets = [0, 128], sizes = [2, 128], strides = [1, 1]} : vector<2x512xf32> to vector<2x128xf32>
    %768 = arith.negf %767 : vector<2x128xf32>
    %769 = math.exp %768 : vector<2x128xf32>
    %cst_253 = arith.constant 1.000000e+00 : f32
    %770 = vector.broadcast %cst_253 : f32 to vector<2x128xf32>
    %771 = arith.addf %770, %769 : vector<2x128xf32>
    %772 = arith.divf %770, %771 : vector<2x128xf32>
    %773 = vector.extract_strided_slice %735 {offsets = [0, 256], sizes = [2, 128], strides = [1, 1]} : vector<2x512xf32> to vector<2x128xf32>
    %774 = math.tanh %773 : vector<2x128xf32>
    %775 = vector.extract_strided_slice %735 {offsets = [0, 384], sizes = [2, 128], strides = [1, 1]} : vector<2x512xf32> to vector<2x128xf32>
    %776 = arith.negf %775 : vector<2x128xf32>
    %777 = math.exp %776 : vector<2x128xf32>
    %cst_254 = arith.constant 1.000000e+00 : f32
    %778 = vector.broadcast %cst_254 : f32 to vector<2x128xf32>
    %779 = arith.addf %778, %777 : vector<2x128xf32>
    %780 = arith.divf %778, %779 : vector<2x128xf32>
    %781 = arith.mulf %772, %723 : vector<2x128xf32>
    %782 = arith.mulf %766, %774 : vector<2x128xf32>
    %783 = arith.addf %781, %782 : vector<2x128xf32>
    %784 = math.tanh %783 : vector<2x128xf32>
    %785 = arith.mulf %780, %784 : vector<2x128xf32>
    %c8_255 = arith.constant 8 : index
    %c0_256 = arith.constant 0 : index
    %786 = vector.load %arg13[%c8_255, %c0_256] : memref<16x256xf32, #tpu.memory_space<vmem>>, vector<2x128xf32>
    tpu.vector_store %arg13[%c8_255, %c0_256], %760 {strides = array<i32>} : memref<16x256xf32, #tpu.memory_space<vmem>>, vector<2x128xf32>,
    %c6_257 = arith.constant 6 : index
    %c128_258 = arith.constant 128 : index
    %787 = vector.load %arg13[%c6_257, %c128_258] : memref<16x256xf32, #tpu.memory_space<vmem>>, vector<2x128xf32>
    tpu.vector_store %arg13[%c6_257, %c128_258], %785 {strides = array<i32>} : memref<16x256xf32, #tpu.memory_space<vmem>>, vector<2x128xf32>,
    %c10_259 = arith.constant 10 : index
    %c0_260 = arith.constant 0 : index
    %788 = vector.load %arg12[%c10_259, %c0_260] : memref<16x1024xf32, #tpu.memory_space<vmem>>, vector<2x512xf32>
    %c0_261 = arith.constant 0 : index
    %c0_262 = arith.constant 0 : index
    %789 = vector.load %arg6[%c0_261, %c0_262] : memref<128x512xf32, #tpu.memory_space<vmem>>, vector<128x512xf32>
    %cst_263 = arith.constant dense<0.000000e+00> : vector<2x512xf32>
    %790 = tpu.matmul %760, %789, %cst_263 {dimension_numbers = #tpu.dot_dimension_numbers<[1], [0], [0], [1], [0, 0, 1, 1], [], []>} : vector<2x128xf32>, vector<128x512xf32>, vector<2x512xf32> -> vector<2x512xf32>
    %791 = arith.addf %788, %790 : vector<2x512xf32>
    %c4_264 = arith.constant 4 : index
    %c512_265 = arith.constant 512 : index
    %792 = vector.load %arg12[%c4_264, %c512_265] : memref<16x1024xf32, #tpu.memory_space<vmem>>, vector<2x512xf32>
    %c0_266 = arith.constant 0 : index
    %c0_267 = arith.constant 0 : index
    %793 = vector.load %arg7[%c0_266, %c0_267] : memref<128x512xf32, #tpu.memory_space<vmem>>, vector<128x512xf32>
    %cst_268 = arith.constant dense<0.000000e+00> : vector<2x512xf32>
    %794 = tpu.matmul %785, %793, %cst_268 {dimension_numbers = #tpu.dot_dimension_numbers<[1], [0], [0], [1], [0, 0, 1, 1], [], []>} : vector<2x128xf32>, vector<128x512xf32>, vector<2x512xf32> -> vector<2x512xf32>
    %795 = arith.addf %792, %794 : vector<2x512xf32>
    %796 = vector.extract_strided_slice %791 {offsets = [0, 0], sizes = [2, 128], strides = [1, 1]} : vector<2x512xf32> to vector<2x128xf32>
    %797 = arith.negf %796 : vector<2x128xf32>
    %798 = math.exp %797 : vector<2x128xf32>
    %cst_269 = arith.constant 1.000000e+00 : f32
    %799 = vector.broadcast %cst_269 : f32 to vector<2x128xf32>
    %800 = arith.addf %799, %798 : vector<2x128xf32>
    %801 = arith.divf %799, %800 : vector<2x128xf32>
    %802 = vector.extract_strided_slice %791 {offsets = [0, 128], sizes = [2, 128], strides = [1, 1]} : vector<2x512xf32> to vector<2x128xf32>
    %803 = arith.negf %802 : vector<2x128xf32>
    %804 = math.exp %803 : vector<2x128xf32>
    %cst_270 = arith.constant 1.000000e+00 : f32
    %805 = vector.broadcast %cst_270 : f32 to vector<2x128xf32>
    %806 = arith.addf %805, %804 : vector<2x128xf32>
    %807 = arith.divf %805, %806 : vector<2x128xf32>
    %808 = vector.extract_strided_slice %791 {offsets = [0, 256], sizes = [2, 128], strides = [1, 1]} : vector<2x512xf32> to vector<2x128xf32>
    %809 = math.tanh %808 : vector<2x128xf32>
    %810 = vector.extract_strided_slice %791 {offsets = [0, 384], sizes = [2, 128], strides = [1, 1]} : vector<2x512xf32> to vector<2x128xf32>
    %811 = arith.negf %810 : vector<2x128xf32>
    %812 = math.exp %811 : vector<2x128xf32>
    %cst_271 = arith.constant 1.000000e+00 : f32
    %813 = vector.broadcast %cst_271 : f32 to vector<2x128xf32>
    %814 = arith.addf %813, %812 : vector<2x128xf32>
    %815 = arith.divf %813, %814 : vector<2x128xf32>
    %816 = arith.mulf %807, %758 : vector<2x128xf32>
    %817 = arith.mulf %801, %809 : vector<2x128xf32>
    %818 = arith.addf %816, %817 : vector<2x128xf32>
    %819 = math.tanh %818 : vector<2x128xf32>
    %820 = arith.mulf %815, %819 : vector<2x128xf32>
    %821 = vector.extract_strided_slice %795 {offsets = [0, 0], sizes = [2, 128], strides = [1, 1]} : vector<2x512xf32> to vector<2x128xf32>
    %822 = arith.negf %821 : vector<2x128xf32>
    %823 = math.exp %822 : vector<2x128xf32>
    %cst_272 = arith.constant 1.000000e+00 : f32
    %824 = vector.broadcast %cst_272 : f32 to vector<2x128xf32>
    %825 = arith.addf %824, %823 : vector<2x128xf32>
    %826 = arith.divf %824, %825 : vector<2x128xf32>
    %827 = vector.extract_strided_slice %795 {offsets = [0, 128], sizes = [2, 128], strides = [1, 1]} : vector<2x512xf32> to vector<2x128xf32>
    %828 = arith.negf %827 : vector<2x128xf32>
    %829 = math.exp %828 : vector<2x128xf32>
    %cst_273 = arith.constant 1.000000e+00 : f32
    %830 = vector.broadcast %cst_273 : f32 to vector<2x128xf32>
    %831 = arith.addf %830, %829 : vector<2x128xf32>
    %832 = arith.divf %830, %831 : vector<2x128xf32>
    %833 = vector.extract_strided_slice %795 {offsets = [0, 256], sizes = [2, 128], strides = [1, 1]} : vector<2x512xf32> to vector<2x128xf32>
    %834 = math.tanh %833 : vector<2x128xf32>
    %835 = vector.extract_strided_slice %795 {offsets = [0, 384], sizes = [2, 128], strides = [1, 1]} : vector<2x512xf32> to vector<2x128xf32>
    %836 = arith.negf %835 : vector<2x128xf32>
    %837 = math.exp %836 : vector<2x128xf32>
    %cst_274 = arith.constant 1.000000e+00 : f32
    %838 = vector.broadcast %cst_274 : f32 to vector<2x128xf32>
    %839 = arith.addf %838, %837 : vector<2x128xf32>
    %840 = arith.divf %838, %839 : vector<2x128xf32>
    %841 = arith.mulf %832, %783 : vector<2x128xf32>
    %842 = arith.mulf %826, %834 : vector<2x128xf32>
    %843 = arith.addf %841, %842 : vector<2x128xf32>
    %844 = math.tanh %843 : vector<2x128xf32>
    %845 = arith.mulf %840, %844 : vector<2x128xf32>
    %c10_275 = arith.constant 10 : index
    %c0_276 = arith.constant 0 : index
    %846 = vector.load %arg13[%c10_275, %c0_276] : memref<16x256xf32, #tpu.memory_space<vmem>>, vector<2x128xf32>
    tpu.vector_store %arg13[%c10_275, %c0_276], %820 {strides = array<i32>} : memref<16x256xf32, #tpu.memory_space<vmem>>, vector<2x128xf32>,
    %c4_277 = arith.constant 4 : index
    %c128_278 = arith.constant 128 : index
    %847 = vector.load %arg13[%c4_277, %c128_278] : memref<16x256xf32, #tpu.memory_space<vmem>>, vector<2x128xf32>
    tpu.vector_store %arg13[%c4_277, %c128_278], %845 {strides = array<i32>} : memref<16x256xf32, #tpu.memory_space<vmem>>, vector<2x128xf32>,
    %c12_279 = arith.constant 12 : index
    %c0_280 = arith.constant 0 : index
    %848 = vector.load %arg12[%c12_279, %c0_280] : memref<16x1024xf32, #tpu.memory_space<vmem>>, vector<2x512xf32>
    %c0_281 = arith.constant 0 : index
    %c0_282 = arith.constant 0 : index
    %849 = vector.load %arg6[%c0_281, %c0_282] : memref<128x512xf32, #tpu.memory_space<vmem>>, vector<128x512xf32>
    %cst_283 = arith.constant dense<0.000000e+00> : vector<2x512xf32>
    %850 = tpu.matmul %820, %849, %cst_283 {dimension_numbers = #tpu.dot_dimension_numbers<[1], [0], [0], [1], [0, 0, 1, 1], [], []>} : vector<2x128xf32>, vector<128x512xf32>, vector<2x512xf32> -> vector<2x512xf32>
    %851 = arith.addf %848, %850 : vector<2x512xf32>
    %c2_284 = arith.constant 2 : index
    %c512_285 = arith.constant 512 : index
    %852 = vector.load %arg12[%c2_284, %c512_285] : memref<16x1024xf32, #tpu.memory_space<vmem>>, vector<2x512xf32>
    %c0_286 = arith.constant 0 : index
    %c0_287 = arith.constant 0 : index
    %853 = vector.load %arg7[%c0_286, %c0_287] : memref<128x512xf32, #tpu.memory_space<vmem>>, vector<128x512xf32>
    %cst_288 = arith.constant dense<0.000000e+00> : vector<2x512xf32>
    %854 = tpu.matmul %845, %853, %cst_288 {dimension_numbers = #tpu.dot_dimension_numbers<[1], [0], [0], [1], [0, 0, 1, 1], [], []>} : vector<2x128xf32>, vector<128x512xf32>, vector<2x512xf32> -> vector<2x512xf32>
    %855 = arith.addf %852, %854 : vector<2x512xf32>
    %856 = vector.extract_strided_slice %851 {offsets = [0, 0], sizes = [2, 128], strides = [1, 1]} : vector<2x512xf32> to vector<2x128xf32>
    %857 = arith.negf %856 : vector<2x128xf32>
    %858 = math.exp %857 : vector<2x128xf32>
    %cst_289 = arith.constant 1.000000e+00 : f32
    %859 = vector.broadcast %cst_289 : f32 to vector<2x128xf32>
    %860 = arith.addf %859, %858 : vector<2x128xf32>
    %861 = arith.divf %859, %860 : vector<2x128xf32>
    %862 = vector.extract_strided_slice %851 {offsets = [0, 128], sizes = [2, 128], strides = [1, 1]} : vector<2x512xf32> to vector<2x128xf32>
    %863 = arith.negf %862 : vector<2x128xf32>
    %864 = math.exp %863 : vector<2x128xf32>
    %cst_290 = arith.constant 1.000000e+00 : f32
    %865 = vector.broadcast %cst_290 : f32 to vector<2x128xf32>
    %866 = arith.addf %865, %864 : vector<2x128xf32>
    %867 = arith.divf %865, %866 : vector<2x128xf32>
    %868 = vector.extract_strided_slice %851 {offsets = [0, 256], sizes = [2, 128], strides = [1, 1]} : vector<2x512xf32> to vector<2x128xf32>
    %869 = math.tanh %868 : vector<2x128xf32>
    %870 = vector.extract_strided_slice %851 {offsets = [0, 384], sizes = [2, 128], strides = [1, 1]} : vector<2x512xf32> to vector<2x128xf32>
    %871 = arith.negf %870 : vector<2x128xf32>
    %872 = math.exp %871 : vector<2x128xf32>
    %cst_291 = arith.constant 1.000000e+00 : f32
    %873 = vector.broadcast %cst_291 : f32 to vector<2x128xf32>
    %874 = arith.addf %873, %872 : vector<2x128xf32>
    %875 = arith.divf %873, %874 : vector<2x128xf32>
    %876 = arith.mulf %867, %818 : vector<2x128xf32>
    %877 = arith.mulf %861, %869 : vector<2x128xf32>
    %878 = arith.addf %876, %877 : vector<2x128xf32>
    %879 = math.tanh %878 : vector<2x128xf32>
    %880 = arith.mulf %875, %879 : vector<2x128xf32>
    %881 = vector.extract_strided_slice %855 {offsets = [0, 0], sizes = [2, 128], strides = [1, 1]} : vector<2x512xf32> to vector<2x128xf32>
    %882 = arith.negf %881 : vector<2x128xf32>
    %883 = math.exp %882 : vector<2x128xf32>
    %cst_292 = arith.constant 1.000000e+00 : f32
    %884 = vector.broadcast %cst_292 : f32 to vector<2x128xf32>
    %885 = arith.addf %884, %883 : vector<2x128xf32>
    %886 = arith.divf %884, %885 : vector<2x128xf32>
    %887 = vector.extract_strided_slice %855 {offsets = [0, 128], sizes = [2, 128], strides = [1, 1]} : vector<2x512xf32> to vector<2x128xf32>
    %888 = arith.negf %887 : vector<2x128xf32>
    %889 = math.exp %888 : vector<2x128xf32>
    %cst_293 = arith.constant 1.000000e+00 : f32
    %890 = vector.broadcast %cst_293 : f32 to vector<2x128xf32>
    %891 = arith.addf %890, %889 : vector<2x128xf32>
    %892 = arith.divf %890, %891 : vector<2x128xf32>
    %893 = vector.extract_strided_slice %855 {offsets = [0, 256], sizes = [2, 128], strides = [1, 1]} : vector<2x512xf32> to vector<2x128xf32>
    %894 = math.tanh %893 : vector<2x128xf32>
    %895 = vector.extract_strided_slice %855 {offsets = [0, 384], sizes = [2, 128], strides = [1, 1]} : vector<2x512xf32> to vector<2x128xf32>
    %896 = arith.negf %895 : vector<2x128xf32>
    %897 = math.exp %896 : vector<2x128xf32>
    %cst_294 = arith.constant 1.000000e+00 : f32
    %898 = vector.broadcast %cst_294 : f32 to vector<2x128xf32>
    %899 = arith.addf %898, %897 : vector<2x128xf32>
    %900 = arith.divf %898, %899 : vector<2x128xf32>
    %901 = arith.mulf %892, %843 : vector<2x128xf32>
    %902 = arith.mulf %886, %894 : vector<2x128xf32>
    %903 = arith.addf %901, %902 : vector<2x128xf32>
    %904 = math.tanh %903 : vector<2x128xf32>
    %905 = arith.mulf %900, %904 : vector<2x128xf32>
    %c12_295 = arith.constant 12 : index
    %c0_296 = arith.constant 0 : index
    %906 = vector.load %arg13[%c12_295, %c0_296] : memref<16x256xf32, #tpu.memory_space<vmem>>, vector<2x128xf32>
    tpu.vector_store %arg13[%c12_295, %c0_296], %880 {strides = array<i32>} : memref<16x256xf32, #tpu.memory_space<vmem>>, vector<2x128xf32>,
    %c2_297 = arith.constant 2 : index
    %c128_298 = arith.constant 128 : index
    %907 = vector.load %arg13[%c2_297, %c128_298] : memref<16x256xf32, #tpu.memory_space<vmem>>, vector<2x128xf32>
    tpu.vector_store %arg13[%c2_297, %c128_298], %905 {strides = array<i32>} : memref<16x256xf32, #tpu.memory_space<vmem>>, vector<2x128xf32>,
    %c14_299 = arith.constant 14 : index
    %c0_300 = arith.constant 0 : index
    %908 = vector.load %arg12[%c14_299, %c0_300] : memref<16x1024xf32, #tpu.memory_space<vmem>>, vector<2x512xf32>
    %c0_301 = arith.constant 0 : index
    %c0_302 = arith.constant 0 : index
    %909 = vector.load %arg6[%c0_301, %c0_302] : memref<128x512xf32, #tpu.memory_space<vmem>>, vector<128x512xf32>
    %cst_303 = arith.constant dense<0.000000e+00> : vector<2x512xf32>
    %910 = tpu.matmul %880, %909, %cst_303 {dimension_numbers = #tpu.dot_dimension_numbers<[1], [0], [0], [1], [0, 0, 1, 1], [], []>} : vector<2x128xf32>, vector<128x512xf32>, vector<2x512xf32> -> vector<2x512xf32>
    %911 = arith.addf %908, %910 : vector<2x512xf32>
    %c0_304 = arith.constant 0 : index
    %c512_305 = arith.constant 512 : index
    %912 = vector.load %arg12[%c0_304, %c512_305] : memref<16x1024xf32, #tpu.memory_space<vmem>>, vector<2x512xf32>
    %c0_306 = arith.constant 0 : index
    %c0_307 = arith.constant 0 : index
    %913 = vector.load %arg7[%c0_306, %c0_307] : memref<128x512xf32, #tpu.memory_space<vmem>>, vector<128x512xf32>
    %cst_308 = arith.constant dense<0.000000e+00> : vector<2x512xf32>
    %914 = tpu.matmul %905, %913, %cst_308 {dimension_numbers = #tpu.dot_dimension_numbers<[1], [0], [0], [1], [0, 0, 1, 1], [], []>} : vector<2x128xf32>, vector<128x512xf32>, vector<2x512xf32> -> vector<2x512xf32>
    %915 = arith.addf %912, %914 : vector<2x512xf32>
    %916 = vector.extract_strided_slice %911 {offsets = [0, 0], sizes = [2, 128], strides = [1, 1]} : vector<2x512xf32> to vector<2x128xf32>
    %917 = arith.negf %916 : vector<2x128xf32>
    %918 = math.exp %917 : vector<2x128xf32>
    %cst_309 = arith.constant 1.000000e+00 : f32
    %919 = vector.broadcast %cst_309 : f32 to vector<2x128xf32>
    %920 = arith.addf %919, %918 : vector<2x128xf32>
    %921 = arith.divf %919, %920 : vector<2x128xf32>
    %922 = vector.extract_strided_slice %911 {offsets = [0, 128], sizes = [2, 128], strides = [1, 1]} : vector<2x512xf32> to vector<2x128xf32>
    %923 = arith.negf %922 : vector<2x128xf32>
    %924 = math.exp %923 : vector<2x128xf32>
    %cst_310 = arith.constant 1.000000e+00 : f32
    %925 = vector.broadcast %cst_310 : f32 to vector<2x128xf32>
    %926 = arith.addf %925, %924 : vector<2x128xf32>
    %927 = arith.divf %925, %926 : vector<2x128xf32>
    %928 = vector.extract_strided_slice %911 {offsets = [0, 256], sizes = [2, 128], strides = [1, 1]} : vector<2x512xf32> to vector<2x128xf32>
    %929 = math.tanh %928 : vector<2x128xf32>
    %930 = vector.extract_strided_slice %911 {offsets = [0, 384], sizes = [2, 128], strides = [1, 1]} : vector<2x512xf32> to vector<2x128xf32>
    %931 = arith.negf %930 : vector<2x128xf32>
    %932 = math.exp %931 : vector<2x128xf32>
    %cst_311 = arith.constant 1.000000e+00 : f32
    %933 = vector.broadcast %cst_311 : f32 to vector<2x128xf32>
    %934 = arith.addf %933, %932 : vector<2x128xf32>
    %935 = arith.divf %933, %934 : vector<2x128xf32>
    %936 = arith.mulf %927, %878 : vector<2x128xf32>
    %937 = arith.mulf %921, %929 : vector<2x128xf32>
    %938 = arith.addf %936, %937 : vector<2x128xf32>
    %939 = math.tanh %938 : vector<2x128xf32>
    %940 = arith.mulf %935, %939 : vector<2x128xf32>
    %941 = vector.extract_strided_slice %915 {offsets = [0, 0], sizes = [2, 128], strides = [1, 1]} : vector<2x512xf32> to vector<2x128xf32>
    %942 = arith.negf %941 : vector<2x128xf32>
    %943 = math.exp %942 : vector<2x128xf32>
    %cst_312 = arith.constant 1.000000e+00 : f32
    %944 = vector.broadcast %cst_312 : f32 to vector<2x128xf32>
    %945 = arith.addf %944, %943 : vector<2x128xf32>
    %946 = arith.divf %944, %945 : vector<2x128xf32>
    %947 = vector.extract_strided_slice %915 {offsets = [0, 128], sizes = [2, 128], strides = [1, 1]} : vector<2x512xf32> to vector<2x128xf32>
    %948 = arith.negf %947 : vector<2x128xf32>
    %949 = math.exp %948 : vector<2x128xf32>
    %cst_313 = arith.constant 1.000000e+00 : f32
    %950 = vector.broadcast %cst_313 : f32 to vector<2x128xf32>
    %951 = arith.addf %950, %949 : vector<2x128xf32>
    %952 = arith.divf %950, %951 : vector<2x128xf32>
    %953 = vector.extract_strided_slice %915 {offsets = [0, 256], sizes = [2, 128], strides = [1, 1]} : vector<2x512xf32> to vector<2x128xf32>
    %954 = math.tanh %953 : vector<2x128xf32>
    %955 = vector.extract_strided_slice %915 {offsets = [0, 384], sizes = [2, 128], strides = [1, 1]} : vector<2x512xf32> to vector<2x128xf32>
    %956 = arith.negf %955 : vector<2x128xf32>
    %957 = math.exp %956 : vector<2x128xf32>
    %cst_314 = arith.constant 1.000000e+00 : f32
    %958 = vector.broadcast %cst_314 : f32 to vector<2x128xf32>
    %959 = arith.addf %958, %957 : vector<2x128xf32>
    %960 = arith.divf %958, %959 : vector<2x128xf32>
    %961 = arith.mulf %952, %903 : vector<2x128xf32>
    %962 = arith.mulf %946, %954 : vector<2x128xf32>
    %963 = arith.addf %961, %962 : vector<2x128xf32>
    %964 = math.tanh %963 : vector<2x128xf32>
    %965 = arith.mulf %960, %964 : vector<2x128xf32>
    %c14_315 = arith.constant 14 : index
    %c0_316 = arith.constant 0 : index
    %966 = vector.load %arg13[%c14_315, %c0_316] : memref<16x256xf32, #tpu.memory_space<vmem>>, vector<2x128xf32>
    tpu.vector_store %arg13[%c14_315, %c0_316], %940 {strides = array<i32>} : memref<16x256xf32, #tpu.memory_space<vmem>>, vector<2x128xf32>,
    %c0_317 = arith.constant 0 : index
    %c128_318 = arith.constant 128 : index
    %967 = vector.load %arg13[%c0_317, %c128_318] : memref<16x256xf32, #tpu.memory_space<vmem>>, vector<2x128xf32>
    tpu.vector_store %arg13[%c0_317, %c128_318], %965 {strides = array<i32>} : memref<16x256xf32, #tpu.memory_space<vmem>>, vector<2x128xf32>,
    %c0_319 = arith.constant 0 : index
    %c0_320 = arith.constant 0 : index
    %968 = vector.load %arg13[%c0_319, %c0_320] : memref<16x256xf32, #tpu.memory_space<vmem>>, vector<16x256xf32>
    %c0_321 = arith.constant 0 : index
    %c0_322 = arith.constant 0 : index
    %969 = vector.load %arg8[%c0_321, %c0_322] : memref<256x128xf32, #tpu.memory_space<vmem>>, vector<256x128xf32>
    %cst_323 = arith.constant dense<0.000000e+00> : vector<16x128xf32>
    %970 = tpu.matmul %968, %969, %cst_323 {dimension_numbers = #tpu.dot_dimension_numbers<[1], [0], [0], [1], [0, 0, 1, 1], [], []>} : vector<16x256xf32>, vector<256x128xf32>, vector<16x128xf32> -> vector<16x128xf32>
    %c0_324 = arith.constant 0 : index
    %c0_325 = arith.constant 0 : index
    %971 = vector.load %arg9[%c0_324, %c0_325] : memref<1x128xf32, #tpu.memory_space<vmem>>, vector<1x128xf32>
    %972 = vector.broadcast %971 : vector<1x128xf32> to vector<16x128xf32>
    %973 = arith.addf %970, %972 : vector<16x128xf32>
    %cst_326 = arith.constant dense<0xFF800000> : vector<16xf32>
    %974 = vector.multi_reduction <maximumf>, %973, %cst_326 [1] : vector<16x128xf32> to vector<16xf32>
    %975 = vector.shape_cast %974 : vector<16xf32> to vector<16x1xf32>
    %976 = vector.broadcast %975 : vector<16x1xf32> to vector<16x128xf32>
    %977 = arith.subf %973, %976 : vector<16x128xf32>
    %978 = math.exp %977 : vector<16x128xf32>
    %cst_327 = arith.constant dense<0.000000e+00> : vector<16xf32>
    %979 = vector.multi_reduction <add>, %978, %cst_327 [1] : vector<16x128xf32> to vector<16xf32>
    %980 = vector.shape_cast %979 : vector<16xf32> to vector<16x1xf32>
    %981 = math.log %980 : vector<16x1xf32>
    %982 = vector.broadcast %981 : vector<16x1xf32> to vector<16x128xf32>
    %983 = arith.subf %977, %982 : vector<16x128xf32>
    %c0_328 = arith.constant 0 : index
    %c0_329 = arith.constant 0 : index
    %984 = vector.load %arg10[%c0_328, %c0_329] : memref<16x128xf32, #tpu.memory_space<vmem>>, vector<16x128xf32>
    tpu.vector_store %arg10[%c0_328, %c0_329], %983 {strides = array<i32>} : memref<16x128xf32, #tpu.memory_space<vmem>>, vector<16x128xf32>,
    return
  }
}

</mosaic_0001>

<bundles_post_ra>
// kernel: bilstm_forward.1
= control target key start
LH: loop header
LB: loop body
LE: loop exit
PB: predicated region body
PF: predicated region fallthrough
CT: control target
= control target key end

     0   :  { %15 = vsyncpa [#allocation6], 0  ;;  %s15823_s0 = inlined_call_operand.vmem [shape: f32[16,512], index: 0, kind: input, shape index: {}]   ;;  %s15824_s1 = inlined_call_operand.vmem [shape: f32[16,512], index: 1, kind: input, shape index: {}]   ;;  %s15825_s2 = inlined_call_operand.vmem [shape: f32[128,512], index: 2, kind: input, shape index: {}]   ;;  %s15826_s3 = inlined_call_operand.vmem [shape: f32[128,512], index: 3, kind: input, shape index: {}]   ;;  %s15827_s4 = inlined_call_operand.hbm [shape: f32[256,1024], index: 4, kind: input, shape index: {}]   ;;  %s15828_s5 = inlined_call_operand.vmem [shape: f32[1,1024], index: 5, kind: input, shape index: {}]   ;;  %s15829_s6 = inlined_call_operand.hbm [shape: f32[128,512], index: 6, kind: input, shape index: {}]   ;;  %s15830_s7 = inlined_call_operand.hbm [shape: f32[128,512], index: 7, kind: input, shape index: {}]   ;;  %s15831_s8 = inlined_call_operand.hbm [shape: f32[256,128], index: 8, kind: input, shape index: {}]   ;;  %s15832_s9 = inlined_call_operand.vmem [shape: f32[1,128], index: 9, kind: input, shape index: {}]   ;;  %s15833_s10 = inlined_call_operand.vmem [shape: f32[16,128], index: 10, kind: output, shape index: {}]  }
   0x1   :  { %16 = vsyncpa [#allocation8], 0 }
   0x2   :  { %17 = vsyncpa [#allocation11], 0  ;;  %s9701_s13 = smov [#allocation7]  }
   0x3   :  { %s45_s14 = sshll.u32 %s9701_s13, 4  ;;  %s46_s14 = int_to_ptr.vmem [resolvable:$true] %s45_s14 }
   0x4   :  { %s9623_s15 = scalar_lea.vmem %s46_s14, 8192  ;;  %p9628_p1 = scmp.lt.s32.totalorder %s46_s14, %s46_s14 }
   0x5   :  { %p9624_p0 = scmp.ne.s32.totalorder %s46_s14, %s9623_s15  ;;  %p9629_p2 = scmp.lt.s32.totalorder %s9623_s15, %s9623_s15 }
   0x7   :  { %p9630_p3 = por %p9629_p2, %p9628_p1 }
   0x9   :  { %p9631_p4 = pnand %p9630_p3, %p9624_p0 }
   0xb   :  { %9634 = shalt.err (!%p9631_p4)
}
   0xc   :  { %s9702_s16 = smov 512   ;;  %s9703_s17 = smov 32  }
   0xd   :  { %51 = dma.hbm_to_vmem [thread:$0]  %s15829_s6, 8192, %s46_s14, [#allocation8], %s9702_s16, %s9702_s16, %s9703_s17  }
   0xe   :  { %s9704_s20 = smov [#allocation5]  }
   0xf   :  { %s31_s21 = sshll.u32 %s9704_s20, 4  ;;  %s32_s21 = int_to_ptr.vmem [resolvable:$true] %s31_s21 }
  0x10   :  { %s9643_s22 = scalar_lea.vmem %s32_s21, 32768  ;;  %p9648_p6 = scmp.lt.s32.totalorder %s32_s21, %s32_s21 }
  0x11   :  { %p9644_p5 = scmp.ne.s32.totalorder %s32_s21, %s9643_s22  ;;  %p9649_p7 = scmp.lt.s32.totalorder %s9643_s22, %s9643_s22 }
  0x13   :  { %p9650_p8 = por %p9649_p7, %p9648_p6 }
  0x15   :  { %p9651_p9 = pnand %p9650_p8, %p9644_p5 }
  0x17   :  { %9654 = shalt.err (!%p9651_p9)
}
  0x18   :  { %s9705_s23 = smov 1024   ;;  %s9706_s24 = smov 64  }
  0x19   :  { %37 = dma.hbm_to_vmem [thread:$0]  %s15827_s4, 32768, %s32_s21, [#allocation6], %s9705_s23, %s9705_s23, %s9706_s24  }
  0x1a   :  { %s9707_s27 = smov [#allocation9]   ;;  %s9708_s29 = smov [#allocation10]  }
  0x1b   :  { %s57_s28 = sshll.u32 %s9707_s27, 4  ;;  %s69_s6 = sshll.u32 %s9708_s29, 4  ;;  %s58_s28 = int_to_ptr.vmem [resolvable:$true] %s57_s28  ;;  %s70_s6 = int_to_ptr.vmem [resolvable:$true] %s69_s6 }
  0x1c   :  { %s9663_s30 = scalar_lea.vmem %s58_s28, 8192  ;;  %p9668_p11 = scmp.lt.s32.totalorder %s58_s28, %s58_s28 }
  0x1d   :  { %p9664_p10 = scmp.ne.s32.totalorder %s58_s28, %s9663_s30  ;;  %p9669_p12 = scmp.lt.s32.totalorder %s9663_s30, %s9663_s30 }
  0x1f   :  { %p9670_p13 = por %p9669_p12, %p9668_p11 }
  0x21   :  { %p9671_p0 = pnand %p9670_p13, %p9664_p10 }
  0x23   :  { %9674 = shalt.err (!%p9671_p0)
}
  0x24   :  { %63 = dma.hbm_to_vmem [thread:$0]  %s15830_s7, 8192, %s58_s28, [#allocation8], %s9702_s16, %s9702_s16, %s9703_s17  }
  0x25   :  { %s9683_s4 = scalar_lea.vmem %s70_s6, 4096  ;;  %p9688_p2 = scmp.lt.s32.totalorder %s70_s6, %s70_s6 }
  0x26   :  { %p9684_p1 = scmp.ne.s32.totalorder %s70_s6, %s9683_s4  ;;  %p9689_p3 = scmp.lt.s32.totalorder %s9683_s4, %s9683_s4 }
  0x28   :  { %p9690_p4 = por %p9689_p3, %p9688_p2 }
  0x2a   :  { %p9691_p5 = pnand %p9690_p4, %p9684_p1 }
  0x2c   :  { %9694 = shalt.err (!%p9691_p5)
}
  0x2d   :  { %s9709_s13 = smov 128   ;;  %s9710_s14 = smov 8  }
  0x2e   :  { %75 = dma.hbm_to_vmem [thread:$0]  %s15831_s8, 4096, %s70_s6, [#allocation11], %s9709_s13, %s9709_s13, %s9710_s14  }
  0x2f   :  { %9695 = dma.done.wait [#allocation6], 32768  }
  0x30   :  { %9696 = vsyncadd [#allocation6], 4294934528 }
  0x31   :  { %9697 = dma.done.wait [#allocation8], 16384  }
  0x32   :  { %9698 = vsyncadd [#allocation8], 4294950912 }
  0x33   :  { %9699 = dma.done.wait [#allocation11], 4096  }
  0x34   :  { %9700 = vsyncadd [#allocation11], 4294963200  ;;  %v15834_v0 = vmov 0.0   ;;  %v9790_v1 = vld [vmem:[%s15825_s2 + $0x1e8] sm:$0xff]  ;;  %v9795_v2 = vld [vmem:[%s15825_s2 + $0x1e0] sm:$0xff] }
  0x35   :  { %222 = vmatprep.mubr.f32.mxu1 %v15834_v0  ;;  %436 = vmatprep.mubr.f32.mxu0 %v15834_v0  ;;  %v9800_v3 = vld [vmem:[%s15825_s2 + $0x1c8] sm:$0xff]  ;;  %v9806_v4 = vld [vmem:[%s15825_s2 + $0x1c0] sm:$0xff]  ;;  %v10079_v50 = vld [vmem:[%s15825_s2 + $0x1f8] sm:$0xff] }
  0x36   :  { %158 = vmatprep.subr.mxu1 %v9790_v1  ;;  %v9812_v5 = vld [vmem:[%s15825_s2 + $0x1a8] sm:$0xff]  ;;  %v9818_v6 = vld [vmem:[%s15825_s2 + $0x1a0] sm:$0xff]  ;;  %v10086_v51 = vld [vmem:[%s15825_s2 + $0x1f0] sm:$0xff] }
  0x37   :  { %159 = vmatpush1.msra.mxu1 %v9795_v2  ;;  %v9824_v7 = vld [vmem:[%s15825_s2 + $0x188] sm:$0xff]  ;;  %v9830_v8 = vld [vmem:[%s15825_s2 + $0x180] sm:$0xff]  ;;  %v10098_v53 = vld [vmem:[%s15825_s2 + $0x1d8] sm:$0xff] }
  0x38   :  { %160 = vmatprep.subr.mxu1 %v9800_v3  ;;  %v9836_v9 = vld [vmem:[%s15825_s2 + $0x168] sm:$0xff]  ;;  %v9842_v10 = vld [vmem:[%s15825_s2 + $0x160] sm:$0xff]  ;;  %v10111_v55 = vld [vmem:[%s15825_s2 + $0x1d0] sm:$0xff] }
  0x39   :  { %161 = vmatpush1.msra.mxu1 %v9806_v4  ;;  %v9848_v11 = vld [vmem:[%s15825_s2 + $0x148] sm:$0xff]  ;;  %v9854_v12 = vld [vmem:[%s15825_s2 + $0x140] sm:$0xff]  ;;  %v10117_v56 = vld [vmem:[%s15825_s2 + $0x1b8] sm:$0xff] }
  0x3a   :  { %162 = vmatprep.subr.mxu1 %v9812_v5  ;;  %v9860_v13 = vld [vmem:[%s15825_s2 + $0x128] sm:$0xff]  ;;  %v9866_v14 = vld [vmem:[%s15825_s2 + $0x120] sm:$0xff]  ;;  %v10129_v58 = vld [vmem:[%s15825_s2 + $0x1b0] sm:$0xff] }
  0x3b   :  { %163 = vmatpush1.msra.mxu1 %v9818_v6  ;;  %v9872_v15 = vld [vmem:[%s15825_s2 + $0x108] sm:$0xff]  ;;  %v9878_v16 = vld [vmem:[%s15825_s2 + $0x100] sm:$0xff]  ;;  %v10141_v60 = vld [vmem:[%s15825_s2 + $0x198] sm:$0xff] }
  0x3c   :  { %164 = vmatprep.subr.mxu1 %v9824_v7  ;;  %v9884_v17 = vld [vmem:[%s15825_s2 + $0xe8] sm:$0xff]  ;;  %v9890_v18 = vld [vmem:[%s15825_s2 + $0xe0] sm:$0xff]  ;;  %v10153_v62 = vld [vmem:[%s15825_s2 + $0x190] sm:$0xff] }
  0x3d   :  { %165 = vmatpush1.msra.mxu1 %v9830_v8  ;;  %v9895_v19 = vld [vmem:[%s15826_s3 + $0x1e8] sm:$0xff]  ;;  %v9900_v20 = vld [vmem:[%s15826_s3 + $0x1e0] sm:$0xff] }
  0x3e   :  { %166 = vmatprep.subr.mxu1 %v9836_v9  ;;  %v9906_v21 = vld [vmem:[%s15825_s2 + $0xc8] sm:$0xff]  ;;  %372 = vmatprep.subr.mxu0 %v9895_v19  ;;  %v9918_v23 = vld [vmem:[%s15825_s2 + $0xc0] sm:$0xff] }
  0x3f   :  { %167 = vmatpush1.msra.mxu1 %v9842_v10  ;;  %v9912_v22 = vld [vmem:[%s15826_s3 + $0x1c8] sm:$0xff]  ;;  %373 = vmatpush1.msra.mxu0 %v9900_v20  ;;  %v9924_v24 = vld [vmem:[%s15826_s3 + $0x1c0] sm:$0xff] }
  0x40   :  { %168 = vmatprep.subr.mxu1 %v9848_v11  ;;  %v9929_v25 = vld [vmem:[%s15826_s3 + $0x1a8] sm:$0xff]  ;;  %374 = vmatprep.subr.mxu0 %v9912_v22  ;;  %v9941_v27 = vld [vmem:[%s15826_s3 + $0x1a0] sm:$0xff] }
  0x41   :  { %169 = vmatpush1.msra.mxu1 %v9854_v12  ;;  %v9935_v26 = vld [vmem:[%s15825_s2 + $0xa8] sm:$0xff]  ;;  %16357 = vst [vmem:[#allocation15_spill] sm:$0xff] %v9941_v27  ;;  %v9947_v28 = vld [vmem:[%s15825_s2 + $0xa0] sm:$0xff]  ;;  %375 = vmatpush1.msra.mxu0 %v9924_v24 }
  0x42   :  { %170 = vmatprep.subr.mxu1 %v9860_v13  ;;  %v9953_v29 = vld [vmem:[%s15826_s3 + $0x188] sm:$0xff]  ;;  %376 = vmatprep.subr.mxu0 %v9929_v25  ;;  %v9965_v31 = vld [vmem:[%s15826_s3 + $0x180] sm:$0xff] }
  0x43   :  { %171 = vmatpush1.msra.mxu1 %v9866_v14  ;;  %16358 = vst [vmem:[#allocation16_spill] sm:$0xff] %v9953_v29  ;;  %v9959_v30 = vld [vmem:[%s15825_s2 + $0x88] sm:$0xff]  ;;  %16359 = vst [vmem:[#allocation17_spill] sm:$0xff] %v9965_v31  ;;  %v9971_v32 = vld [vmem:[%s15825_s2 + $0x80] sm:$0xff]  ;;  %377 = vmatpush1.msra.mxu0 %v9941_v27 }
  0x44   :  { %172 = vmatprep.subr.mxu1 %v9872_v15  ;;  %v9977_v33 = vld [vmem:[%s15826_s3 + $0x168] sm:$0xff]  ;;  %378 = vmatprep.subr.mxu0 %v9953_v29  ;;  %v9989_v35 = vld [vmem:[%s15826_s3 + $0x160] sm:$0xff]  ;;  %v10420_v29 = vld [vmem:[%s15826_s3 + $0x198] sm:$0xff] }
  0x45   :  { %173 = vmatpush1.msra.mxu1 %v9878_v16  ;;  %16360 = vst [vmem:[#allocation18_spill] sm:$0xff] %v9977_v33  ;;  %v9983_v34 = vld [vmem:[%s15825_s2 + $0x68] sm:$0xff]  ;;  %16361 = vst [vmem:[#allocation19_spill] sm:$0xff] %v9989_v35  ;;  %v9995_v36 = vld [vmem:[%s15825_s2 + $0x60] sm:$0xff]  ;;  %379 = vmatpush1.msra.mxu0 %v9965_v31 }
  0x46   :  { %174 = vmatprep.subr.mxu1 %v9884_v17  ;;  %v10001_v37 = vld [vmem:[%s15826_s3 + $0x148] sm:$0xff]  ;;  %380 = vmatprep.subr.mxu0 %v9977_v33  ;;  %v10013_v39 = vld [vmem:[%s15826_s3 + $0x140] sm:$0xff]  ;;  %v16384_v33 = vmov 0.0   ;;  %v10315_v31 = vld [vmem:[%s15825_s2 + $0x90] sm:$0xff] }
  0x47   :  { %175 = vmatpush1.msra.mxu1 %v9890_v18  ;;  %16362 = vst [vmem:[#allocation20_spill] sm:$0xff] %v10001_v37  ;;  %v10007_v38 = vld [vmem:[%s15825_s2 + $0x48] sm:$0xff]  ;;  %16363 = vst [vmem:[#allocation21_spill] sm:$0xff] %v10013_v39  ;;  %v10019_v40 = vld [vmem:[%s15825_s2 + $0x40] sm:$0xff]  ;;  %381 = vmatpush1.msra.mxu0 %v9989_v35 }
  0x48   :  { %176 = vmatprep.subr.mxu1 %v9906_v21  ;;  %v10025_v41 = vld [vmem:[%s15826_s3 + $0x128] sm:$0xff]  ;;  %382 = vmatprep.subr.mxu0 %v10001_v37  ;;  %v10037_v43 = vld [vmem:[%s15826_s3 + $0x120] sm:$0xff]  ;;  %v10287_v35 = vld [vmem:[%s15825_s2 + $0xd0] sm:$0xff] }
  0x49   :  { %177 = vmatpush1.msra.mxu1 %v9918_v23  ;;  %16364 = vst [vmem:[#allocation22_spill] sm:$0xff] %v10025_v41  ;;  %v10031_v42 = vld [vmem:[%s15825_s2 + $0x28] sm:$0xff]  ;;  %16365 = vst [vmem:[#allocation23_spill] sm:$0xff] %v10037_v43  ;;  %v10043_v44 = vld [vmem:[%s15825_s2 + $0x20] sm:$0xff]  ;;  %383 = vmatpush1.msra.mxu0 %v10013_v39 }
  0x4a   :  { %178 = vmatprep.subr.mxu1 %v9935_v26  ;;  %v10049_v45 = vld [vmem:[%s15826_s3 + $0x108] sm:$0xff]  ;;  %384 = vmatprep.subr.mxu0 %v10025_v41  ;;  %v10061_v47 = vld [vmem:[%s15826_s3 + $0x100] sm:$0xff]  ;;  %v10427_v27 = vld [vmem:[%s15826_s3 + $0x190] sm:$0xff] }
  0x4b   :  { %179 = vmatpush1.msra.mxu1 %v9947_v28  ;;  %16366 = vst [vmem:[#allocation24_spill] sm:$0xff] %v10049_v45  ;;  %v10055_v46 = vld [vmem:[%s15825_s2 + $0x8] sm:$0xff]  ;;  %16367 = vst [vmem:[#allocation25_spill] sm:$0xff] %v10061_v47  ;;  %v10067_v48 = vld [vmem:[%s15825_s2] sm:$0xff]  ;;  %385 = vmatpush1.msra.mxu0 %v10037_v43 }
  0x4c   :  { %180 = vmatprep.subr.mxu1 %v9959_v30  ;;  %v10073_v49 = vld [vmem:[%s15826_s3 + $0xe8] sm:$0xff]  ;;  %386 = vmatprep.subr.mxu0 %v10049_v45  ;;  %v10092_v52 = vld [vmem:[%s15826_s3 + $0xe0] sm:$0xff] }
  0x4d   :  { %181 = vmatpush1.msra.mxu1 %v9971_v32  ;;  %16368 = vst [vmem:[#allocation26_spill] sm:$0xff] %v10073_v49  ;;  %387 = vmatpush1.msra.mxu0 %v10061_v47  ;;  %16369 = vst [vmem:[#allocation27_spill] sm:$0xff] %v10092_v52  ;;  %v10104_v54 = vld [vmem:[%s15826_s3 + $0xc8] sm:$0xff]  ;;  %v10123_v57 = vld [vmem:[%s15826_s3 + $0xc0] sm:$0xff] }
  0x4e   :  { %182 = vmatprep.subr.mxu1 %v9983_v34  ;;  %388 = vmatprep.subr.mxu0 %v10073_v49  ;;  %16370 = vst [vmem:[#allocation28_spill] sm:$0xff] %v10104_v54  ;;  %16371 = vst [vmem:[#allocation29_spill] sm:$0xff] %v10123_v57  ;;  %v10135_v59 = vld [vmem:[%s15826_s3 + $0xa8] sm:$0xff]  ;;  %v10147_v61 = vld [vmem:[%s15826_s3 + $0xa0] sm:$0xff] }
  0x4f   :  { %183 = vmatpush1.msra.mxu1 %v9995_v36  ;;  %389 = vmatpush1.msra.mxu0 %v10092_v52  ;;  %16372 = vst [vmem:[#allocation30_spill] sm:$0xff] %v10135_v59  ;;  %16373 = vst [vmem:[#allocation31_spill] sm:$0xff] %v10147_v61  ;;  %v10159_v63 = vld [vmem:[%s15826_s3 + $0x88] sm:$0xff]  ;;  %v10195_v49 = vld [vmem:[%s15826_s3 + $0x60] sm:$0xff] }
  0x50   :  { %184 = vmatprep.subr.mxu1 %v10007_v38  ;;  %390 = vmatprep.subr.mxu0 %v10104_v54  ;;  %16374 = vst [vmem:[#allocation32_spill] sm:$0xff] %v10159_v63  ;;  %v10171_v54 = vld [vmem:[%s15826_s3 + $0x80] sm:$0xff]  ;;  %v10183_v52 = vld [vmem:[%s15826_s3 + $0x68] sm:$0xff]  ;;  %16377 = vst [vmem:[#allocation35_spill] sm:$0xff] %v10195_v49 }
  0x51   :  { %185 = vmatpush1.msra.mxu1 %v10019_v40  ;;  %391 = vmatpush1.msra.mxu0 %v10123_v57  ;;  %16375 = vst [vmem:[#allocation33_spill] sm:$0xff] %v10171_v54  ;;  %v10177_v57 = vld [vmem:[%s15825_s2 + $0x170] sm:$0xff]  ;;  %16376 = vst [vmem:[#allocation34_spill] sm:$0xff] %v10183_v52  ;;  %v10207_v47 = vld [vmem:[%s15826_s3 + $0x48] sm:$0xff] }
  0x52   :  { %186 = vmatprep.subr.mxu1 %v10031_v42  ;;  %392 = vmatprep.subr.mxu0 %v10135_v59  ;;  %v10189_v59 = vld [vmem:[%s15825_s2 + $0x158] sm:$0xff]  ;;  %16378 = vst [vmem:[#allocation36_spill] sm:$0xff] %v10207_v47  ;;  %v10219_v45 = vld [vmem:[%s15826_s3 + $0x40] sm:$0xff]  ;;  %v10231_v43 = vld [vmem:[%s15826_s3 + $0x28] sm:$0xff] }
  0x53   :  { %187 = vmatpush1.msra.mxu1 %v10043_v44  ;;  %393 = vmatpush1.msra.mxu0 %v10147_v61  ;;  %v10201_v61 = vld [vmem:[%s15825_s2 + $0x150] sm:$0xff]  ;;  %16379 = vst [vmem:[#allocation37_spill] sm:$0xff] %v10219_v45  ;;  %16380 = vst [vmem:[#allocation38_spill] sm:$0xff] %v10231_v43  ;;  %v10243_v41 = vld [vmem:[%s15826_s3 + $0x20] sm:$0xff] }
  0x54   :  { %188 = vmatprep.subr.mxu1 %v10055_v46  ;;  %394 = vmatprep.subr.mxu0 %v10159_v63  ;;  %v10213_v63 = vld [vmem:[%s15825_s2 + $0x138] sm:$0xff]  ;;  %16381 = vst [vmem:[#allocation39_spill] sm:$0xff] %v10243_v41  ;;  %v10255_v39 = vld [vmem:[%s15826_s3 + $0x8] sm:$0xff]  ;;  %v10267_v37 = vld [vmem:[%s15826_s3] sm:$0xff] }
  0x55   :  { %189 = vmatpush1.msra.mxu1 %v10067_v48  ;;  %395 = vmatpush1.msra.mxu0 %v10171_v54  ;;  %v10225_v54 = vld [vmem:[%s15825_s2 + $0x130] sm:$0xff]  ;;  %16382 = vst [vmem:[#allocation40_spill] sm:$0xff] %v10255_v39  ;;  %16383 = vst [vmem:[#allocation41_spill] sm:$0xff] %v10267_v37 }
  0x56   :  { %223 = vmatmul.mubr.f32.vlgmr.msra.gmra.mxu1 %v15834_v0  ;;  %229 = vmatprep.subr.mxu1 %v10079_v50 }
  0x57   :  { %230 = vmatpush1.msra.mxu1 %v10086_v51  ;;  %293 = vmatprep.mubr.f32.mxu1 %v15834_v0  ;;  %v10165_v0 = vld [vmem:[%s15825_s2 + $0x178] sm:$0xff] }
  0x58   :  { %231 = vmatprep.subr.mxu1 %v10098_v53  ;;  %396 = vmatprep.subr.mxu0 %v10183_v52  ;;  %v10237_v52 = vld [vmem:[%s15825_s2 + $0x118] sm:$0xff] }
  0x59   :  { %232 = vmatpush1.msra.mxu1 %v10111_v55  ;;  %397 = vmatpush1.msra.mxu0 %v10195_v49  ;;  %v10249_v49 = vld [vmem:[%s15825_s2 + $0x110] sm:$0xff] }
  0x5a   :  { %233 = vmatprep.subr.mxu1 %v10117_v56  ;;  %398 = vmatprep.subr.mxu0 %v10207_v47  ;;  %v10261_v47 = vld [vmem:[%s15825_s2 + $0xf8] sm:$0xff] }
  0x5b   :  { %234 = vmatpush1.msra.mxu1 %v10129_v58  ;;  %399 = vmatpush1.msra.mxu0 %v10219_v45  ;;  %v10273_v45 = vld [vmem:[%s15825_s2 + $0xf0] sm:$0xff] }
  0x5c   :  { %235 = vmatprep.subr.mxu1 %v10141_v60  ;;  %400 = vmatprep.subr.mxu0 %v10231_v43  ;;  %v10280_v43 = vld [vmem:[%s15825_s2 + $0xd8] sm:$0xff] }
  0x5d   :  { %236 = vmatpush1.msra.mxu1 %v10153_v62  ;;  %401 = vmatpush1.msra.mxu0 %v10243_v41  ;;  %v10294_v41 = vld [vmem:[%s15825_s2 + $0xb8] sm:$0xff] }
  0x5e   :  { %237 = vmatprep.subr.mxu1 %v10165_v0  ;;  %402 = vmatprep.subr.mxu0 %v10255_v39  ;;  %v10301_v39 = vld [vmem:[%s15825_s2 + $0xb0] sm:$0xff] }
  0x5f   :  { %238 = vmatpush1.msra.mxu1 %v10177_v57  ;;  %403 = vmatpush1.msra.mxu0 %v10267_v37  ;;  %v10308_v37 = vld [vmem:[%s15825_s2 + $0x98] sm:$0xff] }
  0x60   :  { %239 = vmatprep.subr.mxu1 %v10189_v59  ;;  %437 = vmatmul.mubr.f32.vlgmr.msra.gmra.mxu0 %v16384_v33 }
  0x61   :  { %240 = vmatpush1.msra.mxu1 %v10201_v61  ;;  %648 = vmatprep.subr.mxu0 %v9790_v1  ;;  %v10322_v1 = vld [vmem:[%s15825_s2 + $0x78] sm:$0xff] }
  0x62   :  { %241 = vmatprep.subr.mxu1 %v10213_v63  ;;  %649 = vmatpush1.msra.mxu0 %v9795_v2  ;;  %v10329_v2 = vld [vmem:[%s15825_s2 + $0x70] sm:$0xff] }
  0x63   :  { %242 = vmatpush1.msra.mxu1 %v10225_v54  ;;  %650 = vmatprep.subr.mxu0 %v9800_v3  ;;  %v10336_v3 = vld [vmem:[%s15825_s2 + $0x58] sm:$0xff] }
  0x64   :  { %243 = vmatprep.subr.mxu1 %v10237_v52  ;;  %651 = vmatpush1.msra.mxu0 %v9806_v4  ;;  %v10343_v4 = vld [vmem:[%s15825_s2 + $0x50] sm:$0xff] }
  0x65   :  { %244 = vmatpush1.msra.mxu1 %v10249_v49  ;;  %652 = vmatprep.subr.mxu0 %v9812_v5  ;;  %v10350_v5 = vld [vmem:[%s15825_s2 + $0x38] sm:$0xff] }
  0x66   :  { %245 = vmatprep.subr.mxu1 %v10261_v47  ;;  %653 = vmatpush1.msra.mxu0 %v9818_v6  ;;  %v10357_v6 = vld [vmem:[%s15825_s2 + $0x30] sm:$0xff] }
  0x67   :  { %246 = vmatpush1.msra.mxu1 %v10273_v45  ;;  %654 = vmatprep.subr.mxu0 %v9824_v7  ;;  %v10364_v7 = vld [vmem:[%s15825_s2 + $0x18] sm:$0xff] }
  0x68   :  { %247 = vmatprep.subr.mxu1 %v10280_v43  ;;  %655 = vmatpush1.msra.mxu0 %v9830_v8  ;;  %v10371_v8 = vld [vmem:[%s15825_s2 + $0x10] sm:$0xff] }
  0x69   :  { %248 = vmatpush1.msra.mxu1 %v10287_v35  ;;  %656 = vmatprep.subr.mxu0 %v9836_v9  ;;  %v10378_v9 = vld [vmem:[%s15826_s3 + $0x1f8] sm:$0xff] }
  0x6a   :  { %249 = vmatprep.subr.mxu1 %v10294_v41  ;;  %657 = vmatpush1.msra.mxu0 %v9842_v10  ;;  %v10385_v10 = vld [vmem:[%s15826_s3 + $0x1f0] sm:$0xff] }
  0x6b   :  { %250 = vmatpush1.msra.mxu1 %v10301_v39  ;;  %658 = vmatprep.subr.mxu0 %v9848_v11  ;;  %v10392_v11 = vld [vmem:[%s15826_s3 + $0x1d8] sm:$0xff] }
  0x6c   :  { %251 = vmatprep.subr.mxu1 %v10308_v37  ;;  %659 = vmatpush1.msra.mxu0 %v9854_v12  ;;  %v10400_v12 = vld [vmem:[%s15826_s3 + $0x1d0] sm:$0xff] }
  0x6d   :  { %252 = vmatpush1.msra.mxu1 %v10315_v31  ;;  %660 = vmatprep.subr.mxu0 %v9860_v13  ;;  %v10406_v13 = vld [vmem:[%s15826_s3 + $0x1b8] sm:$0xff] }
  0x6e   :  { %253 = vmatprep.subr.mxu1 %v10322_v1  ;;  %661 = vmatpush1.msra.mxu0 %v9866_v14  ;;  %v10413_v14 = vld [vmem:[%s15826_s3 + $0x1b0] sm:$0xff] }
  0x6f   :  { %254 = vmatpush1.msra.mxu1 %v10329_v2  ;;  %662 = vmatprep.subr.mxu0 %v9872_v15  ;;  %v10434_v15 = vld [vmem:[%s15826_s3 + $0x178] sm:$0xff] }
  0x70   :  { %255 = vmatprep.subr.mxu1 %v10336_v3  ;;  %663 = vmatpush1.msra.mxu0 %v9878_v16  ;;  %v10441_v16 = vld [vmem:[%s15826_s3 + $0x170] sm:$0xff] }
  0x71   :  { %256 = vmatpush1.msra.mxu1 %v10343_v4  ;;  %664 = vmatprep.subr.mxu0 %v9884_v17  ;;  %v10448_v17 = vld [vmem:[%s15826_s3 + $0x158] sm:$0xff] }
  0x72   :  { %257 = vmatprep.subr.mxu1 %v10350_v5  ;;  %665 = vmatpush1.msra.mxu0 %v9890_v18  ;;  %v10455_v18 = vld [vmem:[%s15826_s3 + $0x150] sm:$0xff] }
  0x73   :  { %258 = vmatpush1.msra.mxu1 %v10357_v6  ;;  %666 = vmatprep.subr.mxu0 %v9906_v21  ;;  %v10462_v21 = vld [vmem:[%s15826_s3 + $0x138] sm:$0xff] }
  0x74   :  { %259 = vmatprep.subr.mxu1 %v10364_v7  ;;  %667 = vmatpush1.msra.mxu0 %v9918_v23  ;;  %v10469_v23 = vld [vmem:[%s15826_s3 + $0x130] sm:$0xff] }
  0x75   :  { %260 = vmatpush1.msra.mxu1 %v10371_v8  ;;  %668 = vmatprep.subr.mxu0 %v9935_v26  ;;  %v10476_v26 = vld [vmem:[%s15826_s3 + $0x118] sm:$0xff] }
  0x76   :  { %294 = vmatmul.mubr.f32.vlgmr.msra.gmra.mxu1 %v16384_v33  ;;  %443 = vmatprep.subr.mxu1 %v10378_v9 }
  0x77   :  { %444 = vmatpush1.msra.mxu1 %v10385_v10  ;;  %507 = vmatprep.mubr.f32.mxu1 %v16384_v33 }
  0x78   :  { %445 = vmatprep.subr.mxu1 %v10392_v11  ;;  %669 = vmatpush1.msra.mxu0 %v9947_v28  ;;  %v10483_v28 = vld [vmem:[%s15826_s3 + $0x110] sm:$0xff] }
  0x79   :  { %446 = vmatpush1.msra.mxu1 %v10400_v12  ;;  %670 = vmatprep.subr.mxu0 %v9959_v30  ;;  %v10490_v30 = vld [vmem:[%s15826_s3 + $0xf8] sm:$0xff] }
  0x7a   :  { %447 = vmatprep.subr.mxu1 %v10406_v13  ;;  %671 = vmatpush1.msra.mxu0 %v9971_v32  ;;  %v10497_v32 = vld [vmem:[%s15826_s3 + $0xf0] sm:$0xff] }
  0x7b   :  { %448 = vmatpush1.msra.mxu1 %v10413_v14  ;;  %672 = vmatprep.subr.mxu0 %v9983_v34  ;;  %v10504_v34 = vld [vmem:[%s15826_s3 + $0xd8] sm:$0xff] }
  0x7c   :  { %449 = vmatprep.subr.mxu1 %v10420_v29  ;;  %673 = vmatpush1.msra.mxu0 %v9995_v36  ;;  %v10511_v36 = vld [vmem:[%s15826_s3 + $0xd0] sm:$0xff] }
  0x7d   :  { %450 = vmatpush1.msra.mxu1 %v10427_v27  ;;  %674 = vmatprep.subr.mxu0 %v10007_v38  ;;  %v10518_v38 = vld [vmem:[%s15826_s3 + $0xb8] sm:$0xff] }
  0x7e   :  { %451 = vmatprep.subr.mxu1 %v10434_v15  ;;  %675 = vmatpush1.msra.mxu0 %v10019_v40  ;;  %v10525_v40 = vld [vmem:[%s15826_s3 + $0xb0] sm:$0xff] }
  0x7f   :  { %452 = vmatpush1.msra.mxu1 %v10441_v16  ;;  %676 = vmatprep.subr.mxu0 %v10031_v42  ;;  %16385 = vst [vmem:[#allocation42_spill] sm:$0xff] %v10525_v40  ;;  %v10532_v42 = vld [vmem:[%s15826_s3 + $0x98] sm:$0xff] }
  0x80   :  { %453 = vmatprep.subr.mxu1 %v10448_v17  ;;  %677 = vmatpush1.msra.mxu0 %v10043_v44  ;;  %16386 = vst [vmem:[#allocation43_spill] sm:$0xff] %v10532_v42  ;;  %v10539_v44 = vld [vmem:[%s15826_s3 + $0x90] sm:$0xff] }
  0x81   :  { %454 = vmatpush1.msra.mxu1 %v10455_v18  ;;  %678 = vmatprep.subr.mxu0 %v10055_v46  ;;  %16387 = vst [vmem:[#allocation44_spill] sm:$0xff] %v10539_v44  ;;  %v10546_v46 = vld [vmem:[%s15826_s3 + $0x78] sm:$0xff] }
  0x82   :  { %455 = vmatprep.subr.mxu1 %v10462_v21  ;;  %679 = vmatpush1.msra.mxu0 %v10067_v48  ;;  %16388 = vst [vmem:[#allocation45_spill] sm:$0xff] %v10546_v46  ;;  %v10553_v48 = vld [vmem:[%s15826_s3 + $0x70] sm:$0xff] }
  0x83   :  { %456 = vmatpush1.msra.mxu1 %v10469_v23  ;;  %712 = vmatprep.mubr.f32.mxu0 %v16384_v33  ;;  %16389 = vst [vmem:[#allocation46_spill] sm:$0xff] %v10553_v48 }
  0x84   :  { %457 = vmatprep.subr.mxu1 %v10476_v26  ;;  %877 = vmatprep.subr.mxu0 %v9895_v19  ;;  %v10565_v19 = vld [vmem:[%s15826_s3 + $0x50] sm:$0xff] }
  0x85   :  { %458 = vmatpush1.msra.mxu1 %v10483_v28 }
  0x86   :  { %459 = vmatprep.subr.mxu1 %v10490_v30 }
  0x87   :  { %460 = vmatpush1.msra.mxu1 %v10497_v32 }
  0x88   :  { %461 = vmatprep.subr.mxu1 %v10504_v34 }
  0x89   :  { %462 = vmatpush1.msra.mxu1 %v10511_v36 }
  0x8a   :  { %463 = vmatprep.subr.mxu1 %v10518_v38 }
  0x8b   :  { %464 = vmatpush1.msra.mxu1 %v10525_v40  ;;  %v10559_v40 = vld [vmem:[%s15826_s3 + $0x58] sm:$0xff] }
  0x8c   :  { %465 = vmatprep.subr.mxu1 %v10532_v42  ;;  %v10571_v42 = vld [vmem:[%s15826_s3 + $0x38] sm:$0xff] }
  0x8d   :  { %466 = vmatpush1.msra.mxu1 %v10539_v44  ;;  %v10577_v44 = vld [vmem:[%s15826_s3 + $0x30] sm:$0xff] }
  0x8e   :  { %467 = vmatprep.subr.mxu1 %v10546_v46  ;;  %v10583_v46 = vld [vmem:[%s15826_s3 + $0x18] sm:$0xff] }
  0x8f   :  { %468 = vmatpush1.msra.mxu1 %v10553_v48  ;;  %v10589_v48 = vld [vmem:[%s15826_s3 + $0x10] sm:$0xff] }
  0x90   :  { %469 = vmatprep.subr.mxu1 %v10559_v40 }
  0x91   :  { %470 = vmatpush1.msra.mxu1 %v10565_v19 }
  0x92   :  { %471 = vmatprep.subr.mxu1 %v10571_v42 }
  0x93   :  { %472 = vmatpush1.msra.mxu1 %v10577_v44 }
  0x94   :  { %473 = vmatprep.subr.mxu1 %v10583_v46 }
  0x95   :  { %474 = vmatpush1.msra.mxu1 %v10589_v48 }
  0x96   :  { %508 = vmatmul.mubr.f32.vlgmr.msra.gmra.mxu1 %v16384_v33  ;;  %719 = vmatprep.subr.mxu1 %v10079_v50 }
  0x97   :  { %720 = vmatpush1.msra.mxu1 %v10086_v51  ;;  %783 = vmatprep.mubr.f32.mxu1 %v16384_v33 }
  0x98   :  { %721 = vmatprep.subr.mxu1 %v10098_v53  ;;  %v92_v53 = vld [vmem:[%s15823_s0 + $0x10] sm:$0x3] }
  0x99   :  { %722 = vmatpush1.msra.mxu1 %v10111_v55 }
  0x9a   :  { %723 = vmatprep.subr.mxu1 %v10117_v56  ;;  %v93_v56 = vld [vmem:[%s15823_s0 + $0x18] sm:$0x3] }
  0x9b   :  { %724 = vmatpush1.msra.mxu1 %v10129_v58 }
  0x9c   :  { %725 = vmatprep.subr.mxu1 %v10141_v60  ;;  %v305_v60 = vld [vmem:[%s15824_s1 + $0x28] sm:$0xc0] }
  0x9d   :  { %726 = vmatpush1.msra.mxu1 %v10153_v62 }
  0x9e   :  { %727 = vmatprep.subr.mxu1 %v10165_v0 }
  0x9f   :  { %728 = vmatpush1.msra.mxu1 %v10177_v57 }
  0xa0   :  { %729 = vmatprep.subr.mxu1 %v10189_v59 }
  0xa1   :  { %730 = vmatpush1.msra.mxu1 %v10201_v61 }
  0xa2   :  { %731 = vmatprep.subr.mxu1 %v10213_v63  ;;  %v304_v63 = vld [vmem:[%s15824_s1 + $0x20] sm:$0xc0] }
  0xa3   :  { %732 = vmatpush1.msra.mxu1 %v10225_v54 }
  0xa4   :  { %733 = vmatprep.subr.mxu1 %v10237_v52 }
  0xa5   :  { %734 = vmatpush1.msra.mxu1 %v10249_v49 }
  0xa6   :  { %735 = vmatprep.subr.mxu1 %v10261_v47 }
  0xa7   :  { %736 = vmatpush1.msra.mxu1 %v10273_v45 }
  0xa8   :  { %737 = vmatprep.subr.mxu1 %v10280_v43 }
  0xa9   :  { %738 = vmatpush1.msra.mxu1 %v10287_v35 }
  0xaa   :  { %739 = vmatprep.subr.mxu1 %v10294_v41 }
  0xab   :  { %740 = vmatpush1.msra.mxu1 %v10301_v39 }
  0xac   :  { %741 = vmatprep.subr.mxu1 %v10308_v37  ;;  %v90_v37 = vld [vmem:[%s15823_s0] sm:$0x3] }
  0xad   :  { %742 = vmatpush1.msra.mxu1 %v10315_v31  ;;  %v91_v31 = vld [vmem:[%s15823_s0 + $0x8] sm:$0x3] }
  0xae   :  { %743 = vmatprep.subr.mxu1 %v10322_v1 }
  0xaf   :  { %744 = vmatpush1.msra.mxu1 %v10329_v2 }
  0xb0   :  { %745 = vmatprep.subr.mxu1 %v10336_v3 }
  0xb1   :  { %746 = vmatpush1.msra.mxu1 %v10343_v4 }
  0xb2   :  { %747 = vmatprep.subr.mxu1 %v10350_v5 }
  0xb3   :  { %748 = vmatpush1.msra.mxu1 %v10357_v6 }
  0xb4   :  { %749 = vmatprep.subr.mxu1 %v10364_v7 }
  0xb5   :  { %750 = vmatpush1.msra.mxu1 %v10371_v8 }
  0xb6   :  { %948 = vmatprep.subr.mxu1 %v10378_v9 }
 0x116   :  { %v224_v0 = vpop.f32.mrf.mxu1 }
 0x117   :  { %v300_v41 = vadd.f32 %v224_v0, %v90_v37 }
 0x118   :  { %v226_v35 = vpop.f32.mrf.mxu1 }
 0x119   :  { %v301_v39 = vadd.f32 %v226_v35, %v91_v31  ;;  %v8949_v45 = vmul.f32 -1.442695, %v300_v41 }
 0x11b   :  { %v8950_v43 = vmul.f32 -1.442695, %v301_v39 }
 0x11d   :  { %9095 = vpow2.f32 %v8950_v43 }
 0x11e   :  { %9097 = vpow2.f32 %v8949_v45 }
 0x120   :  { %v438_v49 = vpop.f32.mrf.mxu0 }
 0x121   :  { %v518_v62 = vrot.slane %v438_v49, 2 }
 0x122   :  { %v440_v54 = vpop.f32.mrf.mxu0 }
 0x123   :  { %v519_v58 = vrot.slane %v440_v54, 2  ;;  %v526_v3 = vadd.f32 %v518_v62, %v304_v63  ;;  %v16399_v62 = vld [vmem:[#allocation24_spill] sm:$0xff]  ;;  %v16400_v63 = vld [vmem:[#allocation25_spill] sm:$0xff] }
 0x125   :  { %v527_v2 = vadd.f32 %v519_v58, %v305_v60  ;;  %v8952_v5 = vmul.f32 -1.442695, %v526_v3  ;;  %v16390_v60 = vld [vmem:[#allocation15_spill] sm:$0xff]  ;;  %v16408_v3 = vld [vmem:[#allocation32_spill] sm:$0xff] }
 0x127   :  { %v8953_v4 = vmul.f32 -1.442695, %v527_v2  ;;  %v16407_v2 = vld [vmem:[#allocation42_spill] sm:$0xff] }
 0x12a   :  { %v9096_v47 = vpop.eup %9095 }
 0x12b   :  { %v9098_v50 = vpop.eup %9097  ;;  %v539_v51 = vadd.f32 1.0, %v9096_v47  ;;  %v306_v47 = vld [vmem:[%s15824_s1 + $0x30] sm:$0xc0] }
 0x12c   :  { %v533_v52 = vadd.f32 1.0, %v9098_v50 }
 0x12d   :  { %9099 = vrcp.f32 %v539_v51  ;;  %v307_v51 = vld [vmem:[%s15824_s1 + $0x38] sm:$0xc0] }
 0x12e   :  { %9101 = vrcp.f32 %v533_v52 }
 0x136   :  { %v295_v55 = vpop.f32.mrf.mxu1 }
 0x137   :  { %v302_v57 = vadd.f32 %v295_v55, %v92_v53 }
 0x138   :  { %v297_v59 = vpop.f32.mrf.mxu1 }
 0x139   :  { %9103 = vtanh.f32 %v302_v57  ;;  %v303_v61 = vadd.f32 %v297_v59, %v93_v56 }
 0x13a   :  { %v9100_v6 = vpop.eup %9099 }
 0x13b   :  { %v8951_v1 = vmul.f32 -1.442695, %v303_v61  ;;  %v9102_v7 = vpop.eup %9101  ;;  %v549_v9 = vmul.f32 0.0, %v9100_v6  ;;  %v16397_v61 = vld [vmem:[#allocation22_spill] sm:$0xff]  ;;  %v16413_v6 = vld [vmem:[#allocation45_spill] sm:$0xff] }
 0x13d   :  { %9105 = vpow2.f32 %v8951_v1  ;;  %v16401_v1 = vld [vmem:[#allocation26_spill] sm:$0xff] }
 0x13e   :  { %9107 = vpow2.f32 %v8953_v4  ;;  %v16410_v4 = vld [vmem:[#allocation33_spill] sm:$0xff] }
 0x13f   :  { %9109 = vpow2.f32 %v8952_v5  ;;  %v16411_v5 = vld [vmem:[#allocation44_spill] sm:$0xff] }
 0x146   :  { %v9104_v8 = vpop.eup %9103 }
 0x147   :  { %v550_v0 = vmul.f32 %v9104_v8, %v9102_v7  ;;  %v16415_v7 = vld [vmem:[#allocation46_spill] sm:$0xff]  ;;  %v16417_v8 = vld [vmem:[#allocation37_spill] sm:$0xff] }
 0x149   :  { %v10647_v31 = vadd.f32 %v550_v0, %v549_v9  ;;  %v16418_v9 = vld [vmem:[#allocation38_spill] sm:$0xff]  ;;  %v16419_v0 = vld [vmem:[#allocation39_spill] sm:$0xff] }
 0x14a   :  { %v9106_v35 = vpop.eup %9105 }
 0x14b   :  { %v546_v37 = vadd.f32 1.0, %v9106_v35  ;;  %9111 = vtanh.f32 %v10647_v31  ;;  %v9108_v39 = vpop.eup %9107 }
 0x14c   :  { %v9110_v41 = vpop.eup %9109  ;;  %v563_v43 = vadd.f32 1.0, %v9108_v39 }
 0x14d   :  { %9113 = vrcp.f32 %v546_v37  ;;  %v557_v45 = vadd.f32 1.0, %v9110_v41  ;;  %v16420_v37 = vld [vmem:[#allocation40_spill] sm:$0xff]  ;;  %v16421_v41 = vld [vmem:[#allocation41_spill] sm:$0xff] }
 0x14e   :  { %9115 = vrcp.f32 %v563_v43  ;;  %v10752_v43 = vld [vmem:[%s15825_s2 + $0x1c8] sm:$0xff] }
 0x14f   :  { %9117 = vrcp.f32 %v557_v45  ;;  %v10757_v45 = vld [vmem:[%s15825_s2 + $0x1d8] sm:$0xff] }
 0x156   :  { %v509_v49 = vpop.f32.mrf.mxu1 }
 0x157   :  { %v520_v50 = vrot.slane %v509_v49, 2  ;;  %v10769_v49 = vld [vmem:[%s15825_s2 + $0x1d0] sm:$0xff] }
 0x158   :  { %v511_v52 = vpop.f32.mrf.mxu1  ;;  %v9112_v53 = vpop.eup %9111 }
 0x159   :  { %v528_v54 = vadd.f32 %v520_v50, %v306_v47  ;;  %v521_v55 = vrot.slane %v511_v52, 2  ;;  %v10764_v47 = vld [vmem:[%s15825_s2 + $0x1c0] sm:$0xff]  ;;  %v10776_v50 = vld [vmem:[%s15825_s2 + $0x1a8] sm:$0xff] }
 0x15a   :  { %v9114_v56 = vpop.eup %9113  ;;  %v10788_v52 = vld [vmem:[%s15825_s2 + $0x1a0] sm:$0xff] }
 0x15b   :  { %9119 = vtanh.f32 %v528_v54  ;;  %v529_v57 = vadd.f32 %v521_v55, %v307_v51  ;;  %v553_v58 = vmul.f32 %v9114_v56, %v9112_v53  ;;  %v10781_v51 = vld [vmem:[%s15825_s2 + $0x1b8] sm:$0xff]  ;;  %v10793_v53 = vld [vmem:[%s15825_s2 + $0x1b0] sm:$0xff]  ;;  %v10800_v54 = vld [vmem:[%s15825_s2 + $0x188] sm:$0xff] }
 0x15c   :  { %v10805_v55 = vld [vmem:[%s15825_s2 + $0x198] sm:$0xff]  ;;  %v10812_v56 = vld [vmem:[%s15825_s2 + $0x180] sm:$0xff] }
 0x15d   :  { %v8954_v59 = vmul.f32 -1.442695, %v529_v57  ;;  %578 = vst [vmem:[#allocation2 + $0x10] sm:$0x3] %v553_v58  ;;  %713 = vmatmul.mubr.f32.vlgmr.msra.gmra.mxu0 %v553_v58  ;;  %784 = vmatmul.mubr.f32.vlgmr.msra.gmra.mxu1 %v553_v58  ;;  %v10817_v57 = vld [vmem:[%s15825_s2 + $0x190] sm:$0xff]  ;;  %v10824_v58 = vld [vmem:[%s15825_s2 + $0x168] sm:$0xff] }
 0x15e   :  { %878 = vmatpush1.msra.mxu0 %v9900_v20  ;;  %949 = vmatpush1.msra.mxu1 %v10385_v10  ;;  %v16391_v20 = vld [vmem:[#allocation16_spill] sm:$0xff]  ;;  %v9116_v10 = vpop.eup %9115 }
 0x15f   :  { %9121 = vpow2.f32 %v8954_v59  ;;  %879 = vmatprep.subr.mxu0 %v9912_v22  ;;  %950 = vmatprep.subr.mxu1 %v10392_v11  ;;  %v16392_v22 = vld [vmem:[#allocation17_spill] sm:$0xff]  ;;  %v16394_v11 = vld [vmem:[#allocation19_spill] sm:$0xff]  ;;  %v10829_v59 = vld [vmem:[%s15825_s2 + $0x178] sm:$0xff] }
 0x160   :  { %880 = vmatpush1.msra.mxu0 %v9924_v24  ;;  %951 = vmatpush1.msra.mxu1 %v10400_v12  ;;  %v16393_v24 = vld [vmem:[#allocation18_spill] sm:$0xff]  ;;  %v573_v12 = vmul.f32 0.0, %v9116_v10  ;;  %v10848_v10 = vld [vmem:[%s15825_s2 + $0x148] sm:$0xff] }
 0x161   :  { %881 = vmatprep.subr.mxu0 %v9929_v25  ;;  %952 = vmatprep.subr.mxu1 %v10406_v13  ;;  %v9118_v25 = vpop.eup %9117  ;;  %v16395_v13 = vld [vmem:[#allocation20_spill] sm:$0xff] }
 0x162   :  { %882 = vmatpush1.msra.mxu0 %v16390_v60  ;;  %953 = vmatpush1.msra.mxu1 %v10413_v14  ;;  %v16396_v14 = vld [vmem:[#allocation21_spill] sm:$0xff]  ;;  %v10836_v60 = vld [vmem:[%s15825_s2 + $0x160] sm:$0xff] }
 0x163   :  { %883 = vmatprep.subr.mxu0 %v16391_v20  ;;  %954 = vmatprep.subr.mxu1 %v10420_v29  ;;  %v10841_v20 = vld [vmem:[%s15825_s2 + $0x170] sm:$0xff] }
 0x164   :  { %884 = vmatpush1.msra.mxu0 %v16392_v22  ;;  %955 = vmatpush1.msra.mxu1 %v10427_v27  ;;  %v10854_v22 = vld [vmem:[%s15825_s2 + $0x158] sm:$0xff] }
 0x165   :  { %885 = vmatprep.subr.mxu0 %v16393_v24  ;;  %956 = vmatprep.subr.mxu1 %v10434_v15  ;;  %v16398_v15 = vld [vmem:[#allocation23_spill] sm:$0xff] }
 0x166   :  { %886 = vmatpush1.msra.mxu0 %v16394_v11  ;;  %957 = vmatpush1.msra.mxu1 %v10441_v16  ;;  %v10859_v24 = vld [vmem:[%s15825_s2 + $0x140] sm:$0xff]  ;;  %v10871_v11 = vld [vmem:[%s15825_s2 + $0x128] sm:$0xff] }
 0x167   :  { %887 = vmatprep.subr.mxu0 %v16395_v13  ;;  %958 = vmatprep.subr.mxu1 %v10448_v17  ;;  %v10883_v13 = vld [vmem:[%s15825_s2 + $0x120] sm:$0xff] }
 0x168   :  { %v9120_v29 = vpop.eup %9119  ;;  %888 = vmatpush1.msra.mxu0 %v16396_v14  ;;  %959 = vmatpush1.msra.mxu1 %v10455_v18  ;;  %v10895_v14 = vld [vmem:[%s15825_s2 + $0x108] sm:$0xff] }
 0x169   :  { %v574_v27 = vmul.f32 %v9120_v29, %v9118_v25  ;;  %889 = vmatprep.subr.mxu0 %v16397_v61  ;;  %960 = vmatprep.subr.mxu1 %v10462_v21  ;;  %v16402_v21 = vld [vmem:[#allocation27_spill] sm:$0xff]  ;;  %v10864_v25 = vld [vmem:[%s15825_s2 + $0x150] sm:$0xff] }
 0x16a   :  { %890 = vmatpush1.msra.mxu0 %v16398_v15  ;;  %961 = vmatpush1.msra.mxu1 %v10469_v23  ;;  %v16403_v23 = vld [vmem:[#allocation28_spill] sm:$0xff]  ;;  %v10888_v29 = vld [vmem:[%s15825_s2 + $0x130] sm:$0xff]  ;;  %v10907_v61 = vld [vmem:[%s15825_s2 + $0x100] sm:$0xff] }
 0x16b   :  { %v10682_v16 = vadd.f32 %v574_v27, %v573_v12  ;;  %891 = vmatprep.subr.mxu0 %v16399_v62  ;;  %962 = vmatprep.subr.mxu1 %v10476_v26  ;;  %v16404_v26 = vld [vmem:[#allocation29_spill] sm:$0xff]  ;;  %v10878_v12 = vld [vmem:[%s15825_s2 + $0x138] sm:$0xff]  ;;  %v10919_v62 = vld [vmem:[%s15825_s2 + $0xe8] sm:$0xff] }
 0x16c   :  { %v9122_v17 = vpop.eup %9121  ;;  %892 = vmatpush1.msra.mxu0 %v16400_v63  ;;  %963 = vmatpush1.msra.mxu1 %v10483_v28  ;;  %v16405_v28 = vld [vmem:[#allocation30_spill] sm:$0xff]  ;;  %v10912_v15 = vld [vmem:[%s15825_s2 + $0x110] sm:$0xff]  ;;  %v10931_v63 = vld [vmem:[%s15825_s2 + $0xe0] sm:$0xff] }
 0x16d   :  { %v570_v18 = vadd.f32 1.0, %v9122_v17  ;;  %893 = vmatprep.subr.mxu0 %v16401_v1  ;;  %964 = vmatprep.subr.mxu1 %v10490_v30  ;;  %9123 = vtanh.f32 %v10682_v16  ;;  %v16406_v30 = vld [vmem:[#allocation31_spill] sm:$0xff]  ;;  %v10900_v27 = vld [vmem:[%s15825_s2 + $0x118] sm:$0xff]  ;;  %v10943_v1 = vld [vmem:[%s15825_s2 + $0xc8] sm:$0xff] }
 0x16e   :  { %894 = vmatpush1.msra.mxu0 %v16402_v21  ;;  %965 = vmatpush1.msra.mxu1 %v10497_v32  ;;  %v16409_v32 = vld [vmem:[#allocation43_spill] sm:$0xff]  ;;  %v10924_v17 = vld [vmem:[%s15825_s2 + $0xf8] sm:$0xff] }
 0x16f   :  { %9125 = vrcp.f32 %v570_v18  ;;  %895 = vmatprep.subr.mxu0 %v16403_v23  ;;  %966 = vmatprep.subr.mxu1 %v10504_v34  ;;  %v16412_v34 = vld [vmem:[#allocation34_spill] sm:$0xff]  ;;  %v10936_v18 = vld [vmem:[%s15825_s2 + $0xf0] sm:$0xff]  ;;  %v10955_v23 = vld [vmem:[%s15825_s2 + $0xc0] sm:$0xff] }
 0x170   :  { %896 = vmatpush1.msra.mxu0 %v16404_v26  ;;  %967 = vmatpush1.msra.mxu1 %v10511_v36  ;;  %v16414_v36 = vld [vmem:[#allocation35_spill] sm:$0xff]  ;;  %v10948_v21 = vld [vmem:[%s15825_s2 + $0xd8] sm:$0xff]  ;;  %v10960_v26 = vld [vmem:[%s15825_s2 + $0xd0] sm:$0xff] }
 0x171   :  { %897 = vmatprep.subr.mxu0 %v16405_v28  ;;  %968 = vmatprep.subr.mxu1 %v10518_v38  ;;  %v16416_v38 = vld [vmem:[#allocation36_spill] sm:$0xff] }
 0x172   :  { %898 = vmatpush1.msra.mxu0 %v16406_v30  ;;  %969 = vmatpush1.msra.mxu1 %v16407_v2  ;;  %v10967_v28 = vld [vmem:[%s15825_s2 + $0xa8] sm:$0xff]  ;;  %v10972_v30 = vld [vmem:[%s15825_s2 + $0xb8] sm:$0xff]  ;;  %v10979_v2 = vld [vmem:[%s15825_s2 + $0xa0] sm:$0xff] }
 0x173   :  { %899 = vmatprep.subr.mxu0 %v16408_v3  ;;  %970 = vmatprep.subr.mxu1 %v16409_v32  ;;  %16422 = vst [vmem:[#allocation15_spill] sm:$0xff] %v10979_v2  ;;  %v10984_v3 = vld [vmem:[%s15825_s2 + $0xb0] sm:$0xff]  ;;  %v10991_v32 = vld [vmem:[%s15825_s2 + $0x88] sm:$0xff] }
 0x174   :  { %900 = vmatpush1.msra.mxu0 %v16410_v4  ;;  %971 = vmatpush1.msra.mxu1 %v16411_v5  ;;  %16423 = vst [vmem:[#allocation16_spill] sm:$0xff] %v10984_v3  ;;  %16424 = vst [vmem:[#allocation17_spill] sm:$0xff] %v10991_v32  ;;  %v10996_v4 = vld [vmem:[%s15825_s2 + $0x98] sm:$0xff]  ;;  %v11003_v5 = vld [vmem:[%s15825_s2 + $0x80] sm:$0xff] }
 0x175   :  { %901 = vmatprep.subr.mxu0 %v16412_v34  ;;  %972 = vmatprep.subr.mxu1 %v16413_v6  ;;  %16425 = vst [vmem:[#allocation18_spill] sm:$0xff] %v10996_v4  ;;  %16426 = vst [vmem:[#allocation19_spill] sm:$0xff] %v11003_v5  ;;  %v11008_v34 = vld [vmem:[%s15825_s2 + $0x90] sm:$0xff]  ;;  %v11015_v6 = vld [vmem:[%s15825_s2 + $0x68] sm:$0xff] }
 0x176   :  { %902 = vmatpush1.msra.mxu0 %v16414_v36  ;;  %973 = vmatpush1.msra.mxu1 %v16415_v7  ;;  %16427 = vst [vmem:[#allocation20_spill] sm:$0xff] %v11008_v34  ;;  %16428 = vst [vmem:[#allocation21_spill] sm:$0xff] %v11015_v6  ;;  %v11020_v36 = vld [vmem:[%s15825_s2 + $0x78] sm:$0xff]  ;;  %v11027_v7 = vld [vmem:[%s15825_s2 + $0x60] sm:$0xff] }
 0x177   :  { %903 = vmatprep.subr.mxu0 %v16416_v38  ;;  %974 = vmatprep.subr.mxu1 %v10559_v40  ;;  %16429 = vst [vmem:[#allocation22_spill] sm:$0xff] %v11020_v36  ;;  %16430 = vst [vmem:[#allocation23_spill] sm:$0xff] %v11027_v7  ;;  %v11032_v38 = vld [vmem:[%s15825_s2 + $0x70] sm:$0xff] }
 0x178   :  { %904 = vmatpush1.msra.mxu0 %v16417_v8  ;;  %975 = vmatpush1.msra.mxu1 %v10565_v19  ;;  %v10745_v19 = vld [vmem:[%s15825_s2 + $0x1f0] sm:$0xff]  ;;  %16431 = vst [vmem:[#allocation24_spill] sm:$0xff] %v11032_v38  ;;  %v11039_v8 = vld [vmem:[%s15825_s2 + $0x48] sm:$0xff] }
 0x179   :  { %905 = vmatprep.subr.mxu0 %v16418_v9  ;;  %976 = vmatprep.subr.mxu1 %v10571_v42  ;;  %16432 = vst [vmem:[#allocation25_spill] sm:$0xff] %v11039_v8  ;;  %v11044_v9 = vld [vmem:[%s15825_s2 + $0x58] sm:$0xff] }
 0x17a   :  { %906 = vmatpush1.msra.mxu0 %v16419_v0  ;;  %977 = vmatpush1.msra.mxu1 %v10577_v44  ;;  %v9124_v35 = vpop.eup %9123  ;;  %v10728_v44 = vld [vmem:[%s15825_s2 + $0x1e8] sm:$0xff]  ;;  %16433 = vst [vmem:[#allocation26_spill] sm:$0xff] %v11044_v9  ;;  %v11051_v0 = vld [vmem:[%s15825_s2 + $0x40] sm:$0xff] }
 0x17b   :  { %907 = vmatprep.subr.mxu0 %v16420_v37  ;;  %978 = vmatprep.subr.mxu1 %v10583_v46  ;;  %v10733_v46 = vld [vmem:[%s15825_s2 + $0x1f8] sm:$0xff]  ;;  %16434 = vst [vmem:[#allocation27_spill] sm:$0xff] %v11051_v0  ;;  %v11063_v37 = vld [vmem:[%s15825_s2 + $0x28] sm:$0xff] }
 0x17c   :  { %v9126_v39 = vpop.eup %9125  ;;  %908 = vmatpush1.msra.mxu0 %v16421_v41  ;;  %941 = vmatprep.mubr.f32.mxu0 %v16384_v33  ;;  %16436 = vst [vmem:[#allocation29_spill] sm:$0xff] %v11063_v37  ;;  %v11075_v41 = vld [vmem:[%s15825_s2 + $0x20] sm:$0xff] }
 0x17d   :  { %979 = vmatpush1.msra.mxu1 %v10589_v48  ;;  %1012 = vmatprep.mubr.f32.mxu1 %v16384_v33  ;;  %v577_v40 = vmul.f32 %v9126_v39, %v9124_v35  ;;  %v10740_v48 = vld [vmem:[%s15825_s2 + $0x1e0] sm:$0xff]  ;;  %v11056_v35 = vld [vmem:[%s15825_s2 + $0x50] sm:$0xff]  ;;  %v11068_v39 = vld [vmem:[%s15825_s2 + $0x38] sm:$0xff]  ;;  %16438 = vst [vmem:[#allocation31_spill] sm:$0xff] %v11075_v41 }
 0x17e   :  { %1162 = vmatprep.subr.mxu0 %v10728_v44  ;;  %1233 = vmatprep.subr.mxu1 %v10733_v46  ;;  %16435 = vst [vmem:[#allocation28_spill] sm:$0xff] %v11056_v35  ;;  %16437 = vst [vmem:[#allocation30_spill] sm:$0xff] %v11068_v39 }
 0x17f   :  { %579 = vst [vmem:[#allocation2] sm:$0xc0] %v577_v40  ;;  %v875_v42 = vrot.slane %v577_v40, 6  ;;  %v11080_v40 = vld [vmem:[%s15825_s2 + $0x30] sm:$0xff] }
 0x180   :  { %16439 = vst [vmem:[#allocation42_spill] sm:$0xff] %v11080_v40 }
 0x181   :  { %942 = vmatmul.mubr.f32.vlgmr.msra.gmra.mxu0 %v875_v42  ;;  %1013 = vmatmul.mubr.f32.vlgmr.msra.gmra.mxu1 %v875_v42  ;;  %v11087_v42 = vld [vmem:[%s15825_s2 + $0x8] sm:$0xff] }
 0x182   :  { %1226 = vmatprep.mubr.f32.mxu0 %v16384_v33  ;;  %1297 = vmatprep.mubr.f32.mxu1 %v16384_v33  ;;  %16440 = vst [vmem:[#allocation32_spill] sm:$0xff] %v11087_v42 }
 0x183   :  { %1163 = vmatpush1.msra.mxu0 %v10740_v48  ;;  %1234 = vmatpush1.msra.mxu1 %v10745_v19 }
 0x184   :  { %1164 = vmatprep.subr.mxu0 %v10752_v43  ;;  %1235 = vmatprep.subr.mxu1 %v10757_v45 }
 0x185   :  { %1165 = vmatpush1.msra.mxu0 %v10764_v47  ;;  %1236 = vmatpush1.msra.mxu1 %v10769_v49 }
 0x186   :  { %1166 = vmatprep.subr.mxu0 %v10776_v50  ;;  %1237 = vmatprep.subr.mxu1 %v10781_v51 }
 0x187   :  { %1167 = vmatpush1.msra.mxu0 %v10788_v52  ;;  %1238 = vmatpush1.msra.mxu1 %v10793_v53 }
 0x188   :  { %1168 = vmatprep.subr.mxu0 %v10800_v54  ;;  %1239 = vmatprep.subr.mxu1 %v10805_v55 }
 0x189   :  { %1169 = vmatpush1.msra.mxu0 %v10812_v56  ;;  %1240 = vmatpush1.msra.mxu1 %v10817_v57 }
 0x18a   :  { %1170 = vmatprep.subr.mxu0 %v10824_v58  ;;  %1241 = vmatprep.subr.mxu1 %v10829_v59 }
 0x18b   :  { %1171 = vmatpush1.msra.mxu0 %v10836_v60  ;;  %1242 = vmatpush1.msra.mxu1 %v10841_v20 }
 0x18c   :  { %1172 = vmatprep.subr.mxu0 %v10848_v10  ;;  %1243 = vmatprep.subr.mxu1 %v10854_v22 }
 0x18d   :  { %1173 = vmatpush1.msra.mxu0 %v10859_v24  ;;  %1244 = vmatpush1.msra.mxu1 %v10864_v25 }
 0x18e   :  { %1174 = vmatprep.subr.mxu0 %v10871_v11  ;;  %1245 = vmatprep.subr.mxu1 %v10878_v12 }
 0x18f   :  { %1175 = vmatpush1.msra.mxu0 %v10883_v13  ;;  %1246 = vmatpush1.msra.mxu1 %v10888_v29 }
 0x190   :  { %1176 = vmatprep.subr.mxu0 %v10895_v14  ;;  %1247 = vmatprep.subr.mxu1 %v10900_v27 }
 0x191   :  { %1177 = vmatpush1.msra.mxu0 %v10907_v61  ;;  %1248 = vmatpush1.msra.mxu1 %v10912_v15 }
 0x192   :  { %1178 = vmatprep.subr.mxu0 %v10919_v62  ;;  %1249 = vmatprep.subr.mxu1 %v10924_v17 }
 0x193   :  { %1179 = vmatpush1.msra.mxu0 %v10931_v63  ;;  %1250 = vmatpush1.msra.mxu1 %v10936_v18 }
 0x194   :  { %1180 = vmatprep.subr.mxu0 %v10943_v1  ;;  %1251 = vmatprep.subr.mxu1 %v10948_v21 }
 0x195   :  { %1181 = vmatpush1.msra.mxu0 %v10955_v23  ;;  %1252 = vmatpush1.msra.mxu1 %v10960_v26 }
 0x196   :  { %1182 = vmatprep.subr.mxu0 %v10967_v28  ;;  %1253 = vmatprep.subr.mxu1 %v10972_v30 }
 0x197   :  { %1183 = vmatpush1.msra.mxu0 %v10979_v2  ;;  %1254 = vmatpush1.msra.mxu1 %v10984_v3 }
 0x198   :  { %1184 = vmatprep.subr.mxu0 %v10991_v32  ;;  %1255 = vmatprep.subr.mxu1 %v10996_v4  ;;  %v582_v4 = vld [vmem:[%s15823_s0 + $0x10] sm:$0xc] }
 0x199   :  { %1185 = vmatpush1.msra.mxu0 %v11003_v5  ;;  %1256 = vmatpush1.msra.mxu1 %v11008_v34  ;;  %v583_v34 = vld [vmem:[%s15823_s0 + $0x18] sm:$0xc] }
 0x19a   :  { %1186 = vmatprep.subr.mxu0 %v11015_v6  ;;  %1257 = vmatprep.subr.mxu1 %v11020_v36 }
 0x19b   :  { %1187 = vmatpush1.msra.mxu0 %v11027_v7  ;;  %1258 = vmatpush1.msra.mxu1 %v11032_v38 }
 0x19c   :  { %1188 = vmatprep.subr.mxu0 %v11039_v8  ;;  %1259 = vmatprep.subr.mxu1 %v11044_v9 }
 0x19d   :  { %1189 = vmatpush1.msra.mxu0 %v11051_v0  ;;  %1260 = vmatpush1.msra.mxu1 %v11056_v35  ;;  %v581_v35 = vld [vmem:[%s15823_s0 + $0x8] sm:$0xc] }
 0x19e   :  { %1190 = vmatprep.subr.mxu0 %v11063_v37  ;;  %1261 = vmatprep.subr.mxu1 %v11068_v39  ;;  %v11092_v37 = vld [vmem:[%s15825_s2 + $0x18] sm:$0xff]  ;;  %v11099_v39 = vld [vmem:[%s15825_s2] sm:$0xff] }
 0x19f   :  { %1191 = vmatpush1.msra.mxu0 %v11075_v41  ;;  %16441 = vst [vmem:[#allocation43_spill] sm:$0xff] %v11092_v37  ;;  %1262 = vmatpush1.msra.mxu1 %v11080_v40  ;;  %16442 = vst [vmem:[#allocation33_spill] sm:$0xff] %v11099_v39  ;;  %v11104_v41 = vld [vmem:[%s15825_s2 + $0x10] sm:$0xff]  ;;  %v11117_v40 = vld [vmem:[%s15826_s3 + $0x1f8] sm:$0xff] }
 0x1a0   :  { %1192 = vmatprep.subr.mxu0 %v11087_v42  ;;  %16443 = vst [vmem:[#allocation44_spill] sm:$0xff] %v11104_v41  ;;  %1263 = vmatprep.subr.mxu1 %v11092_v37  ;;  %v11112_v42 = vld [vmem:[%s15826_s3 + $0x1e8] sm:$0xff]  ;;  %16445 = vst [vmem:[#allocation45_spill] sm:$0xff] %v11117_v40 }
 0x1a1   :  { %1193 = vmatpush1.msra.mxu0 %v11099_v39  ;;  %1264 = vmatpush1.msra.mxu1 %v11104_v41  ;;  %16444 = vst [vmem:[#allocation34_spill] sm:$0xff] %v11112_v42  ;;  %v580_v39 = vld [vmem:[%s15823_s0] sm:$0xc] }
 0x1a2   :  { %1391 = vmatprep.subr.mxu0 %v11112_v42  ;;  %1462 = vmatprep.subr.mxu1 %v11117_v40 }
 0x21d   :  { %v714_v37 = vpop.f32.mrf.mxu0  ;;  %v785_v8 = vpop.f32.mrf.mxu1 }
 0x21e   :  { %v794_v41 = vrot.slane %v714_v37, 6  ;;  %v796_v5 = vrot.slane %v785_v8, 6 }
 0x21f   :  { %v716_v0 = vpop.f32.mrf.mxu0  ;;  %v787_v6 = vpop.f32.mrf.mxu1 }
 0x220   :  { %v802_v9 = vadd.f32 %v794_v41, %v580_v39  ;;  %v795_v38 = vrot.slane %v716_v0, 6  ;;  %v797_v40 = vrot.slane %v787_v6, 6  ;;  %v804_v0 = vadd.f32 %v796_v5, %v582_v4  ;;  %v807_v5 = vld [vmem:[%s15824_s1 + $0x28] sm:$0x30] }
 0x222   :  { %v8955_v7 = vmul.f32 -1.442695, %v802_v9  ;;  %v803_v36 = vadd.f32 %v795_v38, %v581_v35  ;;  %v805_v37 = vadd.f32 %v797_v40, %v583_v34  ;;  %v806_v34 = vld [vmem:[%s15824_s1 + $0x20] sm:$0x30]  ;;  %v1055_v40 = vrot.slane %v10647_v31, 6 }
 0x224   :  { %9127 = vpow2.f32 %v8955_v7  ;;  %v8956_v42 = vmul.f32 -1.442695, %v803_v36  ;;  %v8957_v39 = vmul.f32 -1.442695, %v805_v37 }
 0x226   :  { %9129 = vpow2.f32 %v8956_v42 }
 0x227   :  { %9131 = vpow2.f32 %v8957_v39 }
 0x231   :  { %v9128_v41 = vpop.eup %9127 }
 0x232   :  { %v1038_v9 = vadd.f32 1.0, %v9128_v41 }
 0x233   :  { %v9130_v38 = vpop.eup %9129 }
 0x234   :  { %9133 = vrcp.f32 %v1038_v9  ;;  %v1044_v36 = vadd.f32 1.0, %v9130_v38  ;;  %v9132_v6 = vpop.eup %9131 }
 0x235   :  { %9135 = vtanh.f32 %v804_v0  ;;  %v1051_v4 = vadd.f32 1.0, %v9132_v6 }
 0x236   :  { %9137 = vrcp.f32 %v1044_v36 }
 0x237   :  { %9139 = vrcp.f32 %v1051_v4 }
 0x241   :  { %v9134_v7 = vpop.eup %9133  ;;  %v943_v8 = vpop.f32.mrf.mxu0 }
 0x242   :  { %v9136_v35 = vpop.eup %9135  ;;  %v1023_v42 = vrot.slane %v943_v8, 4  ;;  %v1014_v38 = vpop.f32.mrf.mxu1 }
 0x243   :  { %v9138_v37 = vpop.eup %9137  ;;  %v945_v39 = vpop.f32.mrf.mxu0  ;;  %v1058_v41 = vmul.f32 %v9136_v35, %v9134_v7  ;;  %v809_v7 = vld [vmem:[%s15824_s1 + $0x38] sm:$0x30] }
 0x244   :  { %v1057_v0 = vmul.f32 %v9138_v37, %v1055_v40  ;;  %v1031_v9 = vadd.f32 %v1023_v42, %v806_v34  ;;  %v1024_v36 = vrot.slane %v945_v39, 4  ;;  %v1016_v8 = vpop.f32.mrf.mxu1  ;;  %v1025_v34 = vrot.slane %v1014_v38, 4  ;;  %v808_v40 = vld [vmem:[%s15824_s1 + $0x30] sm:$0x30]  ;;  %v9140_v37 = vpop.eup %9139  ;;  %v11152_v38 = vld [vmem:[%s15826_s3 + $0x1e0] sm:$0xff] }
 0x245   :  { %v1026_v6 = vrot.slane %v1016_v8, 4  ;;  %v11167_v8 = vld [vmem:[%s15826_s3 + $0x1d8] sm:$0xff] }
 0x246   :  { %v11140_v32 = vadd.f32 %v1058_v41, %v1057_v0  ;;  %v8958_v3 = vmul.f32 -1.442695, %v1031_v9  ;;  %v1032_v2 = vadd.f32 %v1024_v36, %v807_v5  ;;  %v11157_v36 = vld [vmem:[%s15826_s3 + $0x1f0] sm:$0xff] }
 0x247   :  { %v1034_v35 = vadd.f32 %v1026_v6, %v809_v7  ;;  %v11172_v6 = vld [vmem:[%s15826_s3 + $0x1c0] sm:$0xff]  ;;  %v11177_v7 = vld [vmem:[%s15826_s3 + $0x1d0] sm:$0xff] }
 0x248   :  { %9141 = vpow2.f32 %v8958_v3  ;;  %v8959_v31 = vmul.f32 -1.442695, %v1032_v2  ;;  %v1033_v3 = vadd.f32 %v1025_v34, %v808_v40  ;;  %16446 = vst [vmem:[#allocation35_spill] sm:$0xff] %v11172_v6  ;;  %16447 = vst [vmem:[#allocation46_spill] sm:$0xff] %v11177_v7  ;;  %v11189_v34 = vld [vmem:[%s15826_s3 + $0x1b8] sm:$0xff]  ;;  %v11196_v40 = vld [vmem:[%s15826_s3 + $0x1a0] sm:$0xff] }
 0x249   :  { %9143 = vtanh.f32 %v11140_v32  ;;  %v8960_v42 = vmul.f32 -1.442695, %v1034_v35  ;;  %v11184_v35 = vld [vmem:[%s15826_s3 + $0x1a8] sm:$0xff]  ;;  %16449 = vst [vmem:[#allocation37_spill] sm:$0xff] %v11189_v34  ;;  %16450 = vst [vmem:[#allocation38_spill] sm:$0xff] %v11196_v40 }
 0x24a   :  { %9145 = vpow2.f32 %v8959_v31  ;;  %v11162_v31 = vld [vmem:[%s15826_s3 + $0x1c8] sm:$0xff]  ;;  %16448 = vst [vmem:[#allocation36_spill] sm:$0xff] %v11184_v35 }
 0x24b   :  { %9147 = vpow2.f32 %v8960_v42  ;;  %v11201_v42 = vld [vmem:[%s15826_s3 + $0x1b0] sm:$0xff] }
 0x24c   :  { %16451 = vst [vmem:[#allocation39_spill] sm:$0xff] %v11201_v42 }
 0x255   :  { %v9142_v4 = vpop.eup %9141 }
 0x256   :  { %v9144_v2 = vpop.eup %9143  ;;  %v1065_v5 = vadd.f32 1.0, %v9142_v4  ;;  %v11213_v4 = vld [vmem:[%s15826_s3 + $0x198] sm:$0xff] }
 0x257   :  { %v9146_v39 = vpop.eup %9145  ;;  %v1061_v41 = vmul.f32 %v9144_v2, %v9140_v37  ;;  %v11208_v37 = vld [vmem:[%s15826_s3 + $0x188] sm:$0xff]  ;;  %16453 = vst [vmem:[#allocation41_spill] sm:$0xff] %v11213_v4  ;;  %v11225_v2 = vld [vmem:[%s15826_s3 + $0x190] sm:$0xff] }
 0x258   :  { %9149 = vrcp.f32 %v1065_v5  ;;  %v1071_v0 = vadd.f32 1.0, %v9146_v39  ;;  %16452 = vst [vmem:[#allocation40_spill] sm:$0xff] %v11208_v37  ;;  %16455 = vst [vmem:[#allocation48_spill] sm:$0xff] %v11225_v2  ;;  %v11232_v5 = vld [vmem:[%s15826_s3 + $0x168] sm:$0xff]  ;;  %v11237_v39 = vld [vmem:[%s15826_s3 + $0x178] sm:$0xff] }
 0x259   :  { %9151 = vtanh.f32 %v1033_v3  ;;  %1089 = vst [vmem:[#allocation2 + $0x10] sm:$0xc] %v1061_v41  ;;  %v1160_v9 = vrot.slane %v1061_v41, 2  ;;  %v11220_v3 = vld [vmem:[%s15826_s3 + $0x180] sm:$0xff]  ;;  %16456 = vst [vmem:[#allocation49_spill] sm:$0xff] %v11232_v5 }
 0x25a   :  { %9153 = vrcp.f32 %v1071_v0  ;;  %16454 = vst [vmem:[#allocation47_spill] sm:$0xff] %v11220_v3  ;;  %16457 = vst [vmem:[#allocation50_spill] sm:$0xff] %v11237_v39  ;;  %v11244_v41 = vld [vmem:[%s15826_s3 + $0x160] sm:$0xff]  ;;  %v11249_v0 = vld [vmem:[%s15826_s3 + $0x170] sm:$0xff] }
 0x25b   :  { %1227 = vmatmul.mubr.f32.vlgmr.msra.gmra.mxu0 %v1160_v9  ;;  %1298 = vmatmul.mubr.f32.vlgmr.msra.gmra.mxu1 %v1160_v9  ;;  %16458 = vst [vmem:[#allocation51_spill] sm:$0xff] %v11244_v41  ;;  %16459 = vst [vmem:[#allocation52_spill] sm:$0xff] %v11249_v0  ;;  %v11256_v9 = vld [vmem:[%s15826_s3 + $0x148] sm:$0xff] }
 0x25c   :  { %1392 = vmatpush1.msra.mxu0 %v11152_v38  ;;  %1463 = vmatpush1.msra.mxu1 %v11157_v36  ;;  %16460 = vst [vmem:[#allocation53_spill] sm:$0xff] %v11256_v9 }
 0x25d   :  { %1393 = vmatprep.subr.mxu0 %v11162_v31  ;;  %1464 = vmatprep.subr.mxu1 %v11167_v8 }
 0x25e   :  { %1394 = vmatpush1.msra.mxu0 %v11172_v6  ;;  %1465 = vmatpush1.msra.mxu1 %v11177_v7 }
 0x25f   :  { %1395 = vmatprep.subr.mxu0 %v11184_v35  ;;  %1466 = vmatprep.subr.mxu1 %v11189_v34  ;;  %v1082_v34 = vrot.slane %v10682_v16, 2  ;;  %v11317_v16 = vld [vmem:[%s15826_s3 + $0x100] sm:$0xff] }
 0x260   :  { %1396 = vmatpush1.msra.mxu0 %v11196_v40  ;;  %1467 = vmatpush1.msra.mxu1 %v11201_v42 }
 0x261   :  { %1397 = vmatprep.subr.mxu0 %v11208_v37  ;;  %1468 = vmatprep.subr.mxu1 %v11213_v4  ;;  %v11261_v4 = vld [vmem:[%s15826_s3 + $0x158] sm:$0xff]  ;;  %v9148_v37 = vpop.eup %9147 }
 0x262   :  { %1398 = vmatpush1.msra.mxu0 %v11220_v3  ;;  %1469 = vmatpush1.msra.mxu1 %v11225_v2  ;;  %16461 = vst [vmem:[#allocation54_spill] sm:$0xff] %v11261_v4  ;;  %v11268_v3 = vld [vmem:[%s15826_s3 + $0x140] sm:$0xff]  ;;  %v11273_v2 = vld [vmem:[%s15826_s3 + $0x150] sm:$0xff]  ;;  %v1078_v7 = vadd.f32 1.0, %v9148_v37  ;;  %v11329_v37 = vld [vmem:[%s15826_s3 + $0xe8] sm:$0xff] }
 0x263   :  { %1399 = vmatprep.subr.mxu0 %v11232_v5  ;;  %1470 = vmatprep.subr.mxu1 %v11237_v39  ;;  %16462 = vst [vmem:[#allocation55_spill] sm:$0xff] %v11268_v3  ;;  %16463 = vst [vmem:[#allocation56_spill] sm:$0xff] %v11273_v2  ;;  %v11280_v5 = vld [vmem:[%s15826_s3 + $0x128] sm:$0xff]  ;;  %v11285_v39 = vld [vmem:[%s15826_s3 + $0x138] sm:$0xff] }
 0x264   :  { %1400 = vmatpush1.msra.mxu0 %v11244_v41  ;;  %1471 = vmatpush1.msra.mxu1 %v11249_v0  ;;  %16464 = vst [vmem:[#allocation57_spill] sm:$0xff] %v11285_v39  ;;  %v11292_v41 = vld [vmem:[%s15826_s3 + $0x120] sm:$0xff]  ;;  %v11297_v0 = vld [vmem:[%s15826_s3 + $0x130] sm:$0xff]  ;;  %16467 = vst [vmem:[#allocation60_spill] sm:$0xff] %v11329_v37  ;;  %9155 = vrcp.f32 %v1078_v7 }
 0x265   :  { %v9150_v42 = vpop.eup %9149  ;;  %1401 = vmatprep.subr.mxu0 %v11256_v9  ;;  %1472 = vmatprep.subr.mxu1 %v11261_v4  ;;  %v11305_v4 = vld [vmem:[%s15826_s3 + $0x108] sm:$0xff]  ;;  %v11310_v9 = vld [vmem:[%s15826_s3 + $0x118] sm:$0xff] }
 0x266   :  { %v9152_v40 = vpop.eup %9151  ;;  %1402 = vmatpush1.msra.mxu0 %v11268_v3  ;;  %1473 = vmatpush1.msra.mxu1 %v11273_v2  ;;  %16465 = vst [vmem:[#allocation58_spill] sm:$0xff] %v11310_v9  ;;  %v11322_v2 = vld [vmem:[%s15826_s3 + $0x110] sm:$0xff]  ;;  %v11379_v7 = vld [vmem:[%s15826_s3 + $0xa8] sm:$0xff] }
 0x267   :  { %v9154_v35 = vpop.eup %9153  ;;  %1403 = vmatprep.subr.mxu0 %v11280_v5  ;;  %1474 = vmatprep.subr.mxu1 %v11285_v39  ;;  %16466 = vst [vmem:[#allocation59_spill] sm:$0xff] %v11322_v2  ;;  %v1085_v3 = vmul.f32 %v9152_v40, %v9150_v42  ;;  %v11334_v39 = vld [vmem:[%s15826_s3 + $0xf8] sm:$0xff]  ;;  %v11355_v42 = vld [vmem:[%s15826_s3 + $0xc8] sm:$0xff]  ;;  %16475 = vst [vmem:[#allocation68_spill] sm:$0xff] %v11379_v7 }
 0x268   :  { %v1084_v6 = vmul.f32 %v9154_v35, %v1082_v34  ;;  %1404 = vmatpush1.msra.mxu0 %v11292_v41  ;;  %1475 = vmatpush1.msra.mxu1 %v11297_v0  ;;  %16468 = vst [vmem:[#allocation61_spill] sm:$0xff] %v11334_v39  ;;  %v11341_v35 = vld [vmem:[%s15826_s3 + $0xe0] sm:$0xff]  ;;  %v11346_v34 = vld [vmem:[%s15826_s3 + $0xf0] sm:$0xff]  ;;  %16471 = vst [vmem:[#allocation64_spill] sm:$0xff] %v11355_v42 }
 0x269   :  { %1405 = vmatprep.subr.mxu0 %v11305_v4  ;;  %1476 = vmatprep.subr.mxu1 %v11310_v9  ;;  %16469 = vst [vmem:[#allocation62_spill] sm:$0xff] %v11341_v35  ;;  %16470 = vst [vmem:[#allocation63_spill] sm:$0xff] %v11346_v34  ;;  %v11360_v9 = vld [vmem:[%s15826_s3 + $0xd8] sm:$0xff] }
 0x26a   :  { %v11348_v40 = vadd.f32 %v1085_v3, %v1084_v6  ;;  %1406 = vmatpush1.msra.mxu0 %v11317_v16  ;;  %1477 = vmatpush1.msra.mxu1 %v11322_v2  ;;  %16472 = vst [vmem:[#allocation65_spill] sm:$0xff] %v11360_v9  ;;  %v11367_v6 = vld [vmem:[%s15826_s3 + $0xc0] sm:$0xff]  ;;  %v11372_v3 = vld [vmem:[%s15826_s3 + $0xd0] sm:$0xff] }
 0x26b   :  { %1407 = vmatprep.subr.mxu0 %v11329_v37  ;;  %1478 = vmatprep.subr.mxu1 %v11334_v39  ;;  %16473 = vst [vmem:[#allocation66_spill] sm:$0xff] %v11367_v6  ;;  %16474 = vst [vmem:[#allocation67_spill] sm:$0xff] %v11372_v3  ;;  %v11384_v39 = vld [vmem:[%s15826_s3 + $0xb8] sm:$0xff]  ;;  %v11519_v37 = vld [vmem:[%s15826_s3 + $0x10] sm:$0xff] }
 0x26c   :  { %1408 = vmatpush1.msra.mxu0 %v11341_v35  ;;  %1479 = vmatpush1.msra.mxu1 %v11346_v34  ;;  %16476 = vst [vmem:[#allocation69_spill] sm:$0xff] %v11384_v39  ;;  %9157 = vtanh.f32 %v11348_v40  ;;  %v11392_v34 = vld [vmem:[%s15826_s3 + $0xa0] sm:$0xff]  ;;  %v11397_v35 = vld [vmem:[%s15826_s3 + $0xb0] sm:$0xff] }
 0x26d   :  { %1409 = vmatprep.subr.mxu0 %v11355_v42  ;;  %1480 = vmatprep.subr.mxu1 %v11360_v9  ;;  %16477 = vst [vmem:[#allocation70_spill] sm:$0xff] %v11392_v34  ;;  %16478 = vst [vmem:[#allocation71_spill] sm:$0xff] %v11397_v35  ;;  %v11404_v42 = vld [vmem:[%s15826_s3 + $0x88] sm:$0xff]  ;;  %v11409_v9 = vld [vmem:[%s15826_s3 + $0x98] sm:$0xff] }
 0x26e   :  { %1410 = vmatpush1.msra.mxu0 %v11367_v6  ;;  %1481 = vmatpush1.msra.mxu1 %v11372_v3  ;;  %16479 = vst [vmem:[#allocation72_spill] sm:$0xff] %v11404_v42  ;;  %16480 = vst [vmem:[#allocation73_spill] sm:$0xff] %v11409_v9  ;;  %v11416_v6 = vld [vmem:[%s15826_s3 + $0x80] sm:$0xff]  ;;  %v11421_v3 = vld [vmem:[%s15826_s3 + $0x90] sm:$0xff] }
 0x26f   :  { %1411 = vmatprep.subr.mxu0 %v11379_v7  ;;  %1482 = vmatprep.subr.mxu1 %v11384_v39  ;;  %16481 = vst [vmem:[#allocation74_spill] sm:$0xff] %v11416_v6  ;;  %16482 = vst [vmem:[#allocation75_spill] sm:$0xff] %v11421_v3  ;;  %v11428_v7 = vld [vmem:[%s15826_s3 + $0x68] sm:$0xff]  ;;  %v11433_v39 = vld [vmem:[%s15826_s3 + $0x78] sm:$0xff] }
 0x270   :  { %1412 = vmatpush1.msra.mxu0 %v11392_v34  ;;  %1483 = vmatpush1.msra.mxu1 %v11397_v35  ;;  %16483 = vst [vmem:[#allocation76_spill] sm:$0xff] %v11428_v7  ;;  %16484 = vst [vmem:[#allocation77_spill] sm:$0xff] %v11433_v39  ;;  %v11440_v34 = vld [vmem:[%s15826_s3 + $0x60] sm:$0xff]  ;;  %v11445_v35 = vld [vmem:[%s15826_s3 + $0x70] sm:$0xff] }
 0x271   :  { %1413 = vmatprep.subr.mxu0 %v11404_v42  ;;  %1484 = vmatprep.subr.mxu1 %v11409_v9  ;;  %16485 = vst [vmem:[#allocation78_spill] sm:$0xff] %v11440_v34  ;;  %16486 = vst [vmem:[#allocation79_spill] sm:$0xff] %v11445_v35  ;;  %v11452_v42 = vld [vmem:[%s15826_s3 + $0x48] sm:$0xff]  ;;  %v11457_v9 = vld [vmem:[%s15826_s3 + $0x58] sm:$0xff] }
 0x272   :  { %1414 = vmatpush1.msra.mxu0 %v11416_v6  ;;  %1485 = vmatpush1.msra.mxu1 %v11421_v3  ;;  %16487 = vst [vmem:[#allocation80_spill] sm:$0xff] %v11452_v42  ;;  %16488 = vst [vmem:[#allocation81_spill] sm:$0xff] %v11457_v9  ;;  %v11464_v6 = vld [vmem:[%s15826_s3 + $0x40] sm:$0xff]  ;;  %v11469_v3 = vld [vmem:[%s15826_s3 + $0x50] sm:$0xff] }
 0x273   :  { %1415 = vmatprep.subr.mxu0 %v11428_v7  ;;  %1486 = vmatprep.subr.mxu1 %v11433_v39  ;;  %16489 = vst [vmem:[#allocation82_spill] sm:$0xff] %v11464_v6  ;;  %16490 = vst [vmem:[#allocation83_spill] sm:$0xff] %v11469_v3  ;;  %v11476_v7 = vld [vmem:[%s15826_s3 + $0x28] sm:$0xff]  ;;  %v11481_v39 = vld [vmem:[%s15826_s3 + $0x38] sm:$0xff] }
 0x274   :  { %1416 = vmatpush1.msra.mxu0 %v11440_v34  ;;  %1487 = vmatpush1.msra.mxu1 %v11445_v35  ;;  %16491 = vst [vmem:[#allocation84_spill] sm:$0xff] %v11481_v39  ;;  %v11488_v34 = vld [vmem:[%s15826_s3 + $0x20] sm:$0xff]  ;;  %v11493_v35 = vld [vmem:[%s15826_s3 + $0x30] sm:$0xff] }
 0x275   :  { %1417 = vmatprep.subr.mxu0 %v11452_v42  ;;  %1488 = vmatprep.subr.mxu1 %v11457_v9  ;;  %16492 = vst [vmem:[#allocation85_spill] sm:$0xff] %v11493_v35  ;;  %v11500_v42 = vld [vmem:[%s15826_s3 + $0x8] sm:$0xff]  ;;  %v11505_v9 = vld [vmem:[%s15826_s3 + $0x18] sm:$0xff] }
 0x276   :  { %1418 = vmatpush1.msra.mxu0 %v11464_v6  ;;  %1489 = vmatpush1.msra.mxu1 %v11469_v3  ;;  %v11512_v6 = vld [vmem:[%s15826_s3] sm:$0xff]  ;;  %v9156_v3 = vpop.eup %9155 }
 0x277   :  { %1419 = vmatprep.subr.mxu0 %v11476_v7  ;;  %1490 = vmatprep.subr.mxu1 %v11481_v39 }
 0x278   :  { %1420 = vmatpush1.msra.mxu0 %v11488_v34  ;;  %1491 = vmatpush1.msra.mxu1 %v11493_v35 }
 0x279   :  { %v9158_v2 = vpop.eup %9157  ;;  %1421 = vmatprep.subr.mxu0 %v11500_v42  ;;  %1492 = vmatprep.subr.mxu1 %v11505_v9 }
 0x27a   :  { %1422 = vmatpush1.msra.mxu0 %v11512_v6  ;;  %1455 = vmatprep.mubr.f32.mxu0 %v16384_v33  ;;  %v1088_v39 = vmul.f32 %v9158_v2, %v9156_v3 }
 0x27b   :  { %1493 = vmatpush1.msra.mxu1 %v11519_v37  ;;  %1526 = vmatprep.mubr.f32.mxu1 %v16384_v33 }
 0x27c   :  { %1090 = vst [vmem:[#allocation2] sm:$0x30] %v1088_v39  ;;  %v1389_v35 = vrot.slane %v1088_v39, 4  ;;  %1676 = vmatprep.subr.mxu0 %v10728_v44  ;;  %1747 = vmatprep.subr.mxu1 %v10733_v46  ;;  %v16493_v44 = vld [vmem:[#allocation15_spill] sm:$0xff]  ;;  %v16494_v46 = vld [vmem:[#allocation16_spill] sm:$0xff] }
 0x27e   :  { %1456 = vmatmul.mubr.f32.vlgmr.msra.gmra.mxu0 %v1389_v35  ;;  %1527 = vmatmul.mubr.f32.vlgmr.msra.gmra.mxu1 %v1389_v35 }
 0x27f   :  { %1677 = vmatpush1.msra.mxu0 %v10740_v48  ;;  %1748 = vmatpush1.msra.mxu1 %v10745_v19  ;;  %v16495_v48 = vld [vmem:[#allocation17_spill] sm:$0xff]  ;;  %v16496_v19 = vld [vmem:[#allocation18_spill] sm:$0xff] }
 0x280   :  { %1678 = vmatprep.subr.mxu0 %v10752_v43  ;;  %1749 = vmatprep.subr.mxu1 %v10757_v45  ;;  %v16497_v43 = vld [vmem:[#allocation19_spill] sm:$0xff]  ;;  %v16498_v45 = vld [vmem:[#allocation20_spill] sm:$0xff] }
 0x281   :  { %1679 = vmatpush1.msra.mxu0 %v10764_v47  ;;  %1750 = vmatpush1.msra.mxu1 %v10769_v49  ;;  %v16499_v47 = vld [vmem:[#allocation21_spill] sm:$0xff]  ;;  %v16500_v49 = vld [vmem:[#allocation22_spill] sm:$0xff] }
 0x282   :  { %1680 = vmatprep.subr.mxu0 %v10776_v50  ;;  %1751 = vmatprep.subr.mxu1 %v10781_v51  ;;  %v16501_v50 = vld [vmem:[#allocation23_spill] sm:$0xff]  ;;  %v16502_v51 = vld [vmem:[#allocation24_spill] sm:$0xff] }
 0x283   :  { %1681 = vmatpush1.msra.mxu0 %v10788_v52  ;;  %1752 = vmatpush1.msra.mxu1 %v10793_v53  ;;  %v16503_v52 = vld [vmem:[#allocation25_spill] sm:$0xff]  ;;  %v16504_v53 = vld [vmem:[#allocation26_spill] sm:$0xff] }
 0x284   :  { %1682 = vmatprep.subr.mxu0 %v10800_v54  ;;  %1753 = vmatprep.subr.mxu1 %v10805_v55  ;;  %v16505_v54 = vld [vmem:[#allocation27_spill] sm:$0xff]  ;;  %v16506_v55 = vld [vmem:[#allocation28_spill] sm:$0xff] }
 0x285   :  { %1683 = vmatpush1.msra.mxu0 %v10812_v56  ;;  %1754 = vmatpush1.msra.mxu1 %v10817_v57  ;;  %v16507_v56 = vld [vmem:[#allocation29_spill] sm:$0xff]  ;;  %v16508_v57 = vld [vmem:[#allocation30_spill] sm:$0xff] }
 0x286   :  { %1684 = vmatprep.subr.mxu0 %v10824_v58  ;;  %1755 = vmatprep.subr.mxu1 %v10829_v59  ;;  %v16509_v58 = vld [vmem:[#allocation31_spill] sm:$0xff]  ;;  %v16510_v59 = vld [vmem:[#allocation42_spill] sm:$0xff] }
 0x287   :  { %1685 = vmatpush1.msra.mxu0 %v10836_v60  ;;  %1756 = vmatpush1.msra.mxu1 %v10841_v20  ;;  %v16511_v60 = vld [vmem:[#allocation32_spill] sm:$0xff]  ;;  %v16512_v20 = vld [vmem:[#allocation43_spill] sm:$0xff] }
 0x288   :  { %1686 = vmatprep.subr.mxu0 %v10848_v10  ;;  %1757 = vmatprep.subr.mxu1 %v10854_v22  ;;  %v16513_v10 = vld [vmem:[#allocation33_spill] sm:$0xff]  ;;  %v16514_v22 = vld [vmem:[#allocation44_spill] sm:$0xff] }
 0x289   :  { %1687 = vmatpush1.msra.mxu0 %v10859_v24  ;;  %1758 = vmatpush1.msra.mxu1 %v10864_v25  ;;  %v16515_v24 = vld [vmem:[#allocation34_spill] sm:$0xff]  ;;  %v16516_v25 = vld [vmem:[#allocation45_spill] sm:$0xff] }
 0x28a   :  { %1688 = vmatprep.subr.mxu0 %v10871_v11  ;;  %1759 = vmatprep.subr.mxu1 %v10878_v12  ;;  %v1091_v11 = vld [vmem:[%s15823_s0] sm:$0x30] }
 0x28b   :  { %1689 = vmatpush1.msra.mxu0 %v10883_v13  ;;  %1760 = vmatpush1.msra.mxu1 %v10888_v29 }
 0x28c   :  { %1690 = vmatprep.subr.mxu0 %v10895_v14  ;;  %1761 = vmatprep.subr.mxu1 %v10900_v27  ;;  %v1092_v14 = vld [vmem:[%s15823_s0 + $0x8] sm:$0x30] }
 0x28d   :  { %1691 = vmatpush1.msra.mxu0 %v10907_v61  ;;  %1762 = vmatpush1.msra.mxu1 %v10912_v15 }
 0x28e   :  { %1692 = vmatprep.subr.mxu0 %v10919_v62  ;;  %1763 = vmatprep.subr.mxu1 %v10924_v17 }
 0x28f   :  { %1693 = vmatpush1.msra.mxu0 %v10931_v63  ;;  %1764 = vmatpush1.msra.mxu1 %v10936_v18 }
 0x290   :  { %1694 = vmatprep.subr.mxu0 %v10943_v1  ;;  %1765 = vmatprep.subr.mxu1 %v10948_v21  ;;  %v1094_v21 = vld [vmem:[%s15823_s0 + $0x18] sm:$0x30] }
 0x291   :  { %1695 = vmatpush1.msra.mxu0 %v10955_v23  ;;  %1766 = vmatpush1.msra.mxu1 %v10960_v26 }
 0x292   :  { %1696 = vmatprep.subr.mxu0 %v10967_v28  ;;  %1767 = vmatprep.subr.mxu1 %v10972_v30  ;;  %v1093_v28 = vld [vmem:[%s15823_s0 + $0x10] sm:$0x30] }
 0x293   :  { %1697 = vmatpush1.msra.mxu0 %v16493_v44  ;;  %1768 = vmatpush1.msra.mxu1 %v16494_v46 }
 0x294   :  { %1698 = vmatprep.subr.mxu0 %v16495_v48  ;;  %1769 = vmatprep.subr.mxu1 %v16496_v19  ;;  %v1320_v48 = vld [vmem:[%s15824_s1 + $0x20] sm:$0xc] }
 0x295   :  { %1699 = vmatpush1.msra.mxu0 %v16497_v43  ;;  %1770 = vmatpush1.msra.mxu1 %v16498_v45 }
 0x296   :  { %1700 = vmatprep.subr.mxu0 %v16499_v47  ;;  %1771 = vmatprep.subr.mxu1 %v16500_v49  ;;  %v1569_v49 = vrot.slane %v11140_v32, 6 }
 0x297   :  { %1701 = vmatpush1.msra.mxu0 %v16501_v50  ;;  %1772 = vmatpush1.msra.mxu1 %v16502_v51  ;;  %v1321_v51 = vld [vmem:[%s15824_s1 + $0x28] sm:$0xc] }
 0x298   :  { %1702 = vmatprep.subr.mxu0 %v16503_v52  ;;  %1773 = vmatprep.subr.mxu1 %v16504_v53 }
 0x299   :  { %1703 = vmatpush1.msra.mxu0 %v16505_v54  ;;  %1774 = vmatpush1.msra.mxu1 %v16506_v55 }
 0x29a   :  { %1704 = vmatprep.subr.mxu0 %v16507_v56  ;;  %1775 = vmatprep.subr.mxu1 %v16508_v57 }
 0x29b   :  { %1705 = vmatpush1.msra.mxu0 %v16509_v58  ;;  %1776 = vmatpush1.msra.mxu1 %v16510_v59 }
 0x29c   :  { %1706 = vmatprep.subr.mxu0 %v16511_v60  ;;  %1777 = vmatprep.subr.mxu1 %v16512_v20 }
 0x29d   :  { %1707 = vmatpush1.msra.mxu0 %v16513_v10  ;;  %1740 = vmatprep.mubr.f32.mxu0 %v16384_v33 }
 0x29e   :  { %1778 = vmatpush1.msra.mxu1 %v16514_v22  ;;  %1811 = vmatprep.mubr.f32.mxu1 %v16384_v33 }
 0x29f   :  { %1905 = vmatprep.subr.mxu0 %v16515_v24  ;;  %1976 = vmatprep.subr.mxu1 %v16516_v25  ;;  %v1323_v24 = vld [vmem:[%s15824_s1 + $0x38] sm:$0xc] }
 0x31b   :  { %v1228_v12 = vpop.f32.mrf.mxu0  ;;  %v1299_v29 = vpop.f32.mrf.mxu1 }
 0x31c   :  { %v1308_v13 = vrot.slane %v1228_v12, 4  ;;  %v1310_v26 = vrot.slane %v1299_v29, 4  ;;  %v1322_v12 = vld [vmem:[%s15824_s1 + $0x30] sm:$0xc] }
 0x31d   :  { %v1230_v27 = vpop.f32.mrf.mxu0  ;;  %v1301_v63 = vpop.f32.mrf.mxu1 }
 0x31e   :  { %v1316_v61 = vadd.f32 %v1308_v13, %v1091_v11  ;;  %v1309_v15 = vrot.slane %v1230_v27, 4  ;;  %v1311_v1 = vrot.slane %v1301_v63, 4  ;;  %v1318_v39 = vadd.f32 %v1310_v26, %v1093_v28  ;;  %v16520_v26 = vld [vmem:[#allocation37_spill] sm:$0xff]  ;;  %v16521_v28 = vld [vmem:[#allocation38_spill] sm:$0xff] }
 0x320   :  { %v8961_v62 = vmul.f32 -1.442695, %v1316_v61  ;;  %v1317_v17 = vadd.f32 %v1309_v15, %v1092_v14  ;;  %v1319_v23 = vadd.f32 %v1311_v1, %v1094_v21  ;;  %v16517_v1 = vld [vmem:[#allocation35_spill] sm:$0xff]  ;;  %v16518_v21 = vld [vmem:[#allocation46_spill] sm:$0xff] }
 0x322   :  { %9159 = vpow2.f32 %v8961_v62  ;;  %v8962_v18 = vmul.f32 -1.442695, %v1317_v17  ;;  %v8963_v30 = vmul.f32 -1.442695, %v1319_v23  ;;  %v16519_v23 = vld [vmem:[#allocation36_spill] sm:$0xff] }
 0x324   :  { %9161 = vpow2.f32 %v8962_v18 }
 0x325   :  { %9163 = vpow2.f32 %v8963_v30  ;;  %v16522_v30 = vld [vmem:[#allocation39_spill] sm:$0xff] }
 0x32f   :  { %v9160_v2 = vpop.eup %9159 }
 0x330   :  { %v1552_v35 = vadd.f32 1.0, %v9160_v2  ;;  %v16523_v2 = vld [vmem:[#allocation40_spill] sm:$0xff] }
 0x331   :  { %v9162_v3 = vpop.eup %9161 }
 0x332   :  { %9165 = vrcp.f32 %v1552_v35  ;;  %v1558_v44 = vadd.f32 1.0, %v9162_v3  ;;  %v9164_v46 = vpop.eup %9163  ;;  %v16529_v3 = vld [vmem:[#allocation51_spill] sm:$0xff] }
 0x333   :  { %9167 = vtanh.f32 %v1318_v39  ;;  %v1565_v50 = vadd.f32 1.0, %v9164_v46  ;;  %v16528_v39 = vld [vmem:[#allocation50_spill] sm:$0xff] }
 0x334   :  { %9169 = vrcp.f32 %v1558_v44  ;;  %v16530_v44 = vld [vmem:[#allocation52_spill] sm:$0xff] }
 0x335   :  { %9171 = vrcp.f32 %v1565_v50 }
 0x33e   :  { %v1457_v19 = vpop.f32.mrf.mxu0  ;;  %v1528_v55 = vpop.f32.mrf.mxu1 }
 0x33f   :  { %v9166_v43 = vpop.eup %9165  ;;  %v1537_v45 = vrot.slane %v1457_v19, 6  ;;  %v1539_v11 = vrot.slane %v1528_v55, 6  ;;  %v16532_v19 = vld [vmem:[#allocation54_spill] sm:$0xff] }
 0x340   :  { %v9168_v47 = vpop.eup %9167  ;;  %v1459_v52 = vpop.f32.mrf.mxu0  ;;  %v16536_v55 = vld [vmem:[#allocation58_spill] sm:$0xff] }
 0x341   :  { %v9170_v53 = vpop.eup %9169  ;;  %v1545_v54 = vadd.f32 %v1537_v45, %v1320_v48  ;;  %v1538_v56 = vrot.slane %v1459_v52, 6  ;;  %v1572_v57 = vmul.f32 %v9168_v47, %v9166_v43  ;;  %v1530_v32 = vpop.f32.mrf.mxu1  ;;  %v1547_v27 = vadd.f32 %v1539_v11, %v1322_v12  ;;  %v16531_v48 = vld [vmem:[#allocation53_spill] sm:$0xff]  ;;  %v16533_v47 = vld [vmem:[#allocation55_spill] sm:$0xff]  ;;  %v16552_v11 = vld [vmem:[#allocation74_spill] sm:$0xff] }
 0x342   :  { %v1571_v58 = vmul.f32 %v9170_v53, %v1569_v49  ;;  %v1540_v22 = vrot.slane %v1530_v32, 6  ;;  %v9172_v29 = vpop.eup %9171  ;;  %v1596_v45 = vrot.slane %v11348_v40, 2  ;;  %v16534_v49 = vld [vmem:[#allocation56_spill] sm:$0xff]  ;;  %v16535_v52 = vld [vmem:[#allocation57_spill] sm:$0xff]  ;;  %v16548_v32 = vld [vmem:[#allocation70_spill] sm:$0xff] }
 0x343   :  { %v8964_v59 = vmul.f32 -1.442695, %v1545_v54  ;;  %v1546_v60 = vadd.f32 %v1538_v56, %v1321_v51  ;;  %v16537_v56 = vld [vmem:[#allocation59_spill] sm:$0xff] }
 0x344   :  { %v11614_v20 = vadd.f32 %v1572_v57, %v1571_v58  ;;  %v1548_v25 = vadd.f32 %v1540_v22, %v1323_v24  ;;  %v16539_v57 = vld [vmem:[#allocation61_spill] sm:$0xff]  ;;  %v16540_v58 = vld [vmem:[#allocation62_spill] sm:$0xff]  ;;  %v16549_v22 = vld [vmem:[#allocation71_spill] sm:$0xff] }
 0x345   :  { %9173 = vpow2.f32 %v8964_v59  ;;  %v8965_v10 = vmul.f32 -1.442695, %v1546_v60  ;;  %v16544_v59 = vld [vmem:[#allocation66_spill] sm:$0xff]  ;;  %v16546_v60 = vld [vmem:[#allocation68_spill] sm:$0xff]  ;;  %v16553_v12 = vld [vmem:[#allocation75_spill] sm:$0xff] }
 0x346   :  { %9175 = vtanh.f32 %v11614_v20  ;;  %v8966_v13 = vmul.f32 -1.442695, %v1548_v25  ;;  %v16550_v24 = vld [vmem:[#allocation72_spill] sm:$0xff]  ;;  %v16551_v25 = vld [vmem:[#allocation73_spill] sm:$0xff] }
 0x347   :  { %9177 = vpow2.f32 %v8965_v10  ;;  %v16547_v10 = vld [vmem:[#allocation69_spill] sm:$0xff] }
 0x348   :  { %9179 = vpow2.f32 %v8966_v13  ;;  %v16554_v13 = vld [vmem:[#allocation76_spill] sm:$0xff] }
 0x352   :  { %v9174_v14 = vpop.eup %9173 }
 0x353   :  { %v9176_v61 = vpop.eup %9175  ;;  %v1579_v15 = vadd.f32 1.0, %v9174_v14  ;;  %v16556_v14 = vld [vmem:[#allocation78_spill] sm:$0xff] }
 0x354   :  { %v9178_v62 = vpop.eup %9177  ;;  %v1575_v17 = vmul.f32 %v9176_v61, %v9172_v29  ;;  %v16555_v29 = vld [vmem:[#allocation77_spill] sm:$0xff]  ;;  %v16558_v61 = vld [vmem:[#allocation80_spill] sm:$0xff] }
 0x355   :  { %9181 = vrcp.f32 %v1579_v15  ;;  %v1585_v63 = vadd.f32 1.0, %v9178_v62  ;;  %v9180_v35 = vpop.eup %9179  ;;  %v16559_v15 = vld [vmem:[#allocation81_spill] sm:$0xff]  ;;  %v16560_v62 = vld [vmem:[#allocation82_spill] sm:$0xff] }
 0x356   :  { %9183 = vtanh.f32 %v1547_v27  ;;  %1603 = vst [vmem:[#allocation2 + $0x10] sm:$0x30] %v1575_v17  ;;  %v1674_v18 = vrot.slane %v1575_v17, 4  ;;  %v1592_v51 = vadd.f32 1.0, %v9180_v35  ;;  %v16557_v27 = vld [vmem:[#allocation79_spill] sm:$0xff] }
 0x357   :  { %9185 = vrcp.f32 %v1585_v63  ;;  %v16561_v17 = vld [vmem:[#allocation83_spill] sm:$0xff]  ;;  %v16562_v63 = vld [vmem:[#allocation84_spill] sm:$0xff] }
 0x358   :  { %1741 = vmatmul.mubr.f32.vlgmr.msra.gmra.mxu0 %v1674_v18  ;;  %1812 = vmatmul.mubr.f32.vlgmr.msra.gmra.mxu1 %v1674_v18  ;;  %9187 = vrcp.f32 %v1592_v51  ;;  %v11780_v35 = vld [vmem:[%s15825_s2 + $0x180] sm:$0xff]  ;;  %v11844_v51 = vld [vmem:[%s15825_s2 + $0x138] sm:$0xff] }
 0x359   :  { %1906 = vmatpush1.msra.mxu0 %v11152_v38  ;;  %1977 = vmatpush1.msra.mxu1 %v11157_v36  ;;  %v16524_v38 = vld [vmem:[#allocation41_spill] sm:$0xff]  ;;  %v16525_v36 = vld [vmem:[#allocation47_spill] sm:$0xff] }
 0x35a   :  { %1907 = vmatprep.subr.mxu0 %v11162_v31  ;;  %1978 = vmatprep.subr.mxu1 %v11167_v8  ;;  %v16526_v31 = vld [vmem:[#allocation48_spill] sm:$0xff]  ;;  %v16527_v8 = vld [vmem:[#allocation49_spill] sm:$0xff] }
 0x35b   :  { %1908 = vmatpush1.msra.mxu0 %v16517_v1  ;;  %1979 = vmatpush1.msra.mxu1 %v16518_v21  ;;  %v16563_v1 = vld [vmem:[#allocation85_spill] sm:$0xff] }
 0x35c   :  { %1909 = vmatprep.subr.mxu0 %v16519_v23  ;;  %1980 = vmatprep.subr.mxu1 %v16520_v26  ;;  %v11725_v26 = vld [vmem:[%s15825_s2 + $0x1d8] sm:$0xff] }
 0x35d   :  { %1910 = vmatpush1.msra.mxu0 %v16521_v28  ;;  %1981 = vmatpush1.msra.mxu1 %v16522_v30  ;;  %v11732_v28 = vld [vmem:[%s15825_s2 + $0x1c0] sm:$0xff]  ;;  %v11737_v30 = vld [vmem:[%s15825_s2 + $0x1d0] sm:$0xff] }
 0x35e   :  { %1911 = vmatprep.subr.mxu0 %v16523_v2  ;;  %1982 = vmatprep.subr.mxu1 %v16524_v38  ;;  %v11744_v2 = vld [vmem:[%s15825_s2 + $0x1a8] sm:$0xff]  ;;  %v11749_v38 = vld [vmem:[%s15825_s2 + $0x1b8] sm:$0xff] }
 0x35f   :  { %1912 = vmatpush1.msra.mxu0 %v16525_v36  ;;  %1983 = vmatpush1.msra.mxu1 %v16526_v31  ;;  %v11756_v36 = vld [vmem:[%s15825_s2 + $0x1a0] sm:$0xff]  ;;  %v11761_v31 = vld [vmem:[%s15825_s2 + $0x1b0] sm:$0xff] }
 0x360   :  { %1913 = vmatprep.subr.mxu0 %v16527_v8  ;;  %1984 = vmatprep.subr.mxu1 %v16528_v39  ;;  %v11768_v8 = vld [vmem:[%s15825_s2 + $0x188] sm:$0xff]  ;;  %v11773_v39 = vld [vmem:[%s15825_s2 + $0x198] sm:$0xff] }
 0x361   :  { %1914 = vmatpush1.msra.mxu0 %v16529_v3  ;;  %1985 = vmatpush1.msra.mxu1 %v16530_v44  ;;  %v11785_v3 = vld [vmem:[%s15825_s2 + $0x190] sm:$0xff]  ;;  %v11792_v44 = vld [vmem:[%s15825_s2 + $0x168] sm:$0xff] }
 0x362   :  { %v9182_v46 = vpop.eup %9181  ;;  %1915 = vmatprep.subr.mxu0 %v16531_v48  ;;  %1986 = vmatprep.subr.mxu1 %v16532_v19  ;;  %v11803_v48 = vld [vmem:[%s15825_s2 + $0x160] sm:$0xff]  ;;  %v11808_v19 = vld [vmem:[%s15825_s2 + $0x170] sm:$0xff] }
 0x363   :  { %v9184_v43 = vpop.eup %9183  ;;  %1916 = vmatpush1.msra.mxu0 %v16533_v47  ;;  %1987 = vmatpush1.msra.mxu1 %v16534_v49  ;;  %v11827_v47 = vld [vmem:[%s15825_s2 + $0x140] sm:$0xff]  ;;  %v11832_v49 = vld [vmem:[%s15825_s2 + $0x150] sm:$0xff] }
 0x364   :  { %v9186_v50 = vpop.eup %9185  ;;  %1917 = vmatprep.subr.mxu0 %v11280_v5  ;;  %1988 = vmatprep.subr.mxu1 %v16535_v52  ;;  %v1599_v53 = vmul.f32 %v9184_v43, %v9182_v46  ;;  %v16538_v5 = vld [vmem:[#allocation60_spill] sm:$0xff]  ;;  %v11798_v46 = vld [vmem:[%s15825_s2 + $0x178] sm:$0xff]  ;;  %v11851_v52 = vld [vmem:[%s15825_s2 + $0x120] sm:$0xff] }
 0x365   :  { %v1598_v54 = vmul.f32 %v9186_v50, %v1596_v45  ;;  %1918 = vmatpush1.msra.mxu0 %v11292_v41  ;;  %1989 = vmatpush1.msra.mxu1 %v11297_v0  ;;  %v16541_v41 = vld [vmem:[#allocation63_spill] sm:$0xff]  ;;  %v16543_v0 = vld [vmem:[#allocation65_spill] sm:$0xff]  ;;  %v9188_v18 = vpop.eup %9187  ;;  %v11815_v43 = vld [vmem:[%s15825_s2 + $0x148] sm:$0xff] }
 0x366   :  { %1919 = vmatprep.subr.mxu0 %v11305_v4  ;;  %1990 = vmatprep.subr.mxu1 %v16536_v55  ;;  %v16542_v4 = vld [vmem:[#allocation64_spill] sm:$0xff]  ;;  %v11822_v45 = vld [vmem:[%s15825_s2 + $0x158] sm:$0xff] }
 0x367   :  { %v11652_v40 = vadd.f32 %v1599_v53, %v1598_v54  ;;  %1920 = vmatpush1.msra.mxu0 %v11317_v16  ;;  %1991 = vmatpush1.msra.mxu1 %v16537_v56  ;;  %v16545_v16 = vld [vmem:[#allocation67_spill] sm:$0xff]  ;;  %v11839_v50 = vld [vmem:[%s15825_s2 + $0x128] sm:$0xff]  ;;  %v11856_v53 = vld [vmem:[%s15825_s2 + $0x130] sm:$0xff] }
 0x368   :  { %1921 = vmatprep.subr.mxu0 %v16538_v5  ;;  %1992 = vmatprep.subr.mxu1 %v16539_v57  ;;  %v11863_v54 = vld [vmem:[%s15825_s2 + $0x108] sm:$0xff]  ;;  %v11868_v55 = vld [vmem:[%s15825_s2 + $0x118] sm:$0xff]  ;;  %v11875_v56 = vld [vmem:[%s15825_s2 + $0x100] sm:$0xff] }
 0x369   :  { %1922 = vmatpush1.msra.mxu0 %v16540_v58  ;;  %1993 = vmatpush1.msra.mxu1 %v16541_v41  ;;  %9189 = vtanh.f32 %v11652_v40  ;;  %v11880_v5 = vld [vmem:[%s15825_s2 + $0x110] sm:$0xff]  ;;  %v11887_v57 = vld [vmem:[%s15825_s2 + $0xe8] sm:$0xff]  ;;  %v11892_v58 = vld [vmem:[%s15825_s2 + $0xf8] sm:$0xff] }
 0x36a   :  { %1923 = vmatprep.subr.mxu0 %v16542_v4  ;;  %1994 = vmatprep.subr.mxu1 %v16543_v0  ;;  %v11899_v41 = vld [vmem:[%s15825_s2 + $0xe0] sm:$0xff]  ;;  %v11904_v4 = vld [vmem:[%s15825_s2 + $0xf0] sm:$0xff]  ;;  %v11911_v0 = vld [vmem:[%s15825_s2 + $0xc8] sm:$0xff] }
 0x36b   :  { %1924 = vmatpush1.msra.mxu0 %v16544_v59  ;;  %1995 = vmatpush1.msra.mxu1 %v16545_v16  ;;  %v11916_v59 = vld [vmem:[%s15825_s2 + $0xd8] sm:$0xff]  ;;  %v11923_v16 = vld [vmem:[%s15825_s2 + $0xc0] sm:$0xff] }
 0x36c   :  { %1925 = vmatprep.subr.mxu0 %v16546_v60  ;;  %1996 = vmatprep.subr.mxu1 %v16547_v10  ;;  %v11928_v60 = vld [vmem:[%s15825_s2 + $0xd0] sm:$0xff]  ;;  %v11935_v10 = vld [vmem:[%s15825_s2 + $0xa8] sm:$0xff] }
 0x36d   :  { %1926 = vmatpush1.msra.mxu0 %v16548_v32  ;;  %1997 = vmatpush1.msra.mxu1 %v16549_v22  ;;  %v11940_v32 = vld [vmem:[%s15825_s2 + $0xb8] sm:$0xff]  ;;  %v11947_v22 = vld [vmem:[%s15825_s2 + $0xa0] sm:$0xff] }
 0x36e   :  { %1927 = vmatprep.subr.mxu0 %v16550_v24  ;;  %1998 = vmatprep.subr.mxu1 %v16551_v25  ;;  %v11952_v24 = vld [vmem:[%s15825_s2 + $0xb0] sm:$0xff]  ;;  %v11959_v25 = vld [vmem:[%s15825_s2 + $0x88] sm:$0xff] }
 0x36f   :  { %1928 = vmatpush1.msra.mxu0 %v16552_v11  ;;  %1999 = vmatpush1.msra.mxu1 %v16553_v12  ;;  %16564 = vst [vmem:[#allocation15_spill] sm:$0xff] %v11952_v24  ;;  %16565 = vst [vmem:[#allocation16_spill] sm:$0xff] %v11959_v25  ;;  %v11964_v11 = vld [vmem:[%s15825_s2 + $0x98] sm:$0xff]  ;;  %v11971_v12 = vld [vmem:[%s15825_s2 + $0x80] sm:$0xff] }
 0x370   :  { %1929 = vmatprep.subr.mxu0 %v16554_v13  ;;  %2000 = vmatprep.subr.mxu1 %v16555_v29  ;;  %16566 = vst [vmem:[#allocation17_spill] sm:$0xff] %v11964_v11  ;;  %16567 = vst [vmem:[#allocation18_spill] sm:$0xff] %v11971_v12  ;;  %v11976_v13 = vld [vmem:[%s15825_s2 + $0x90] sm:$0xff]  ;;  %v11983_v29 = vld [vmem:[%s15825_s2 + $0x68] sm:$0xff] }
 0x371   :  { %1930 = vmatpush1.msra.mxu0 %v16556_v14  ;;  %2001 = vmatpush1.msra.mxu1 %v16557_v27  ;;  %16568 = vst [vmem:[#allocation19_spill] sm:$0xff] %v11976_v13  ;;  %16569 = vst [vmem:[#allocation20_spill] sm:$0xff] %v11983_v29  ;;  %v11988_v14 = vld [vmem:[%s15825_s2 + $0x78] sm:$0xff]  ;;  %v11995_v27 = vld [vmem:[%s15825_s2 + $0x60] sm:$0xff] }
 0x372   :  { %1931 = vmatprep.subr.mxu0 %v16558_v61  ;;  %2002 = vmatprep.subr.mxu1 %v16559_v15  ;;  %16570 = vst [vmem:[#allocation21_spill] sm:$0xff] %v11988_v14  ;;  %16571 = vst [vmem:[#allocation22_spill] sm:$0xff] %v11995_v27  ;;  %v12000_v61 = vld [vmem:[%s15825_s2 + $0x70] sm:$0xff]  ;;  %v12007_v15 = vld [vmem:[%s15825_s2 + $0x48] sm:$0xff] }
 0x373   :  { %1932 = vmatpush1.msra.mxu0 %v16560_v62  ;;  %2003 = vmatpush1.msra.mxu1 %v16561_v17  ;;  %16572 = vst [vmem:[#allocation23_spill] sm:$0xff] %v12000_v61  ;;  %16573 = vst [vmem:[#allocation24_spill] sm:$0xff] %v12007_v15  ;;  %v12012_v62 = vld [vmem:[%s15825_s2 + $0x58] sm:$0xff]  ;;  %v12019_v17 = vld [vmem:[%s15825_s2 + $0x40] sm:$0xff] }
 0x374   :  { %1933 = vmatprep.subr.mxu0 %v11476_v7  ;;  %2004 = vmatprep.subr.mxu1 %v16562_v63  ;;  %16574 = vst [vmem:[#allocation25_spill] sm:$0xff] %v12012_v62  ;;  %16575 = vst [vmem:[#allocation26_spill] sm:$0xff] %v12019_v17  ;;  %v12024_v63 = vld [vmem:[%s15825_s2 + $0x50] sm:$0xff] }
 0x375   :  { %1934 = vmatpush1.msra.mxu0 %v11488_v34  ;;  %2005 = vmatpush1.msra.mxu1 %v16563_v1  ;;  %v11701_v34 = vld [vmem:[%s15825_s2 + $0x1f8] sm:$0xff]  ;;  %16576 = vst [vmem:[#allocation27_spill] sm:$0xff] %v12024_v63 }
 0x376   :  { %v9190_v21 = vpop.eup %9189  ;;  %1935 = vmatprep.subr.mxu0 %v11500_v42  ;;  %2006 = vmatprep.subr.mxu1 %v11505_v9  ;;  %v11696_v9 = vld [vmem:[%s15825_s2 + $0x1e8] sm:$0xff]  ;;  %v11713_v42 = vld [vmem:[%s15825_s2 + $0x1f0] sm:$0xff]  ;;  %v12036_v1 = vld [vmem:[%s15825_s2 + $0x38] sm:$0xff] }
 0x377   :  { %1936 = vmatpush1.msra.mxu0 %v11512_v6  ;;  %1969 = vmatprep.mubr.f32.mxu0 %v16384_v33  ;;  %v1602_v23 = vmul.f32 %v9190_v21, %v9188_v18  ;;  %v11720_v6 = vld [vmem:[%s15825_s2 + $0x1c8] sm:$0xff]  ;;  %16578 = vst [vmem:[#allocation29_spill] sm:$0xff] %v12036_v1  ;;  %v12043_v21 = vld [vmem:[%s15825_s2 + $0x20] sm:$0xff] }
 0x378   :  { %2007 = vmatpush1.msra.mxu1 %v11519_v37  ;;  %2040 = vmatprep.mubr.f32.mxu1 %v16384_v33  ;;  %v11708_v37 = vld [vmem:[%s15825_s2 + $0x1e0] sm:$0xff]  ;;  %v12031_v18 = vld [vmem:[%s15825_s2 + $0x28] sm:$0xff]  ;;  %16579 = vst [vmem:[#allocation30_spill] sm:$0xff] %v12043_v21 }
 0x379   :  { %1604 = vst [vmem:[#allocation2] sm:$0xc] %v1602_v23  ;;  %v1903_v7 = vrot.slane %v1602_v23, 2  ;;  %2178 = vmatprep.subr.mxu0 %v11696_v9  ;;  %2249 = vmatprep.subr.mxu1 %v11701_v34  ;;  %16577 = vst [vmem:[#allocation28_spill] sm:$0xff] %v12031_v18  ;;  %v12048_v23 = vld [vmem:[%s15825_s2 + $0x30] sm:$0xff] }
 0x37a   :  { %16580 = vst [vmem:[#allocation31_spill] sm:$0xff] %v12048_v23 }
 0x37b   :  { %1970 = vmatmul.mubr.f32.vlgmr.msra.gmra.mxu0 %v1903_v7  ;;  %2041 = vmatmul.mubr.f32.vlgmr.msra.gmra.mxu1 %v1903_v7  ;;  %v12055_v7 = vld [vmem:[%s15825_s2 + $0x8] sm:$0xff] }
 0x37c   :  { %2242 = vmatprep.mubr.f32.mxu0 %v16384_v33  ;;  %2313 = vmatprep.mubr.f32.mxu1 %v16384_v33  ;;  %16581 = vst [vmem:[#allocation42_spill] sm:$0xff] %v12055_v7 }
 0x37d   :  { %2179 = vmatpush1.msra.mxu0 %v11708_v37  ;;  %2250 = vmatpush1.msra.mxu1 %v11713_v42 }
 0x37e   :  { %2180 = vmatprep.subr.mxu0 %v11720_v6  ;;  %2251 = vmatprep.subr.mxu1 %v11725_v26 }
 0x37f   :  { %2181 = vmatpush1.msra.mxu0 %v11732_v28  ;;  %2252 = vmatpush1.msra.mxu1 %v11737_v30 }
 0x380   :  { %2182 = vmatprep.subr.mxu0 %v11744_v2  ;;  %2253 = vmatprep.subr.mxu1 %v11749_v38 }
 0x381   :  { %2183 = vmatpush1.msra.mxu0 %v11756_v36  ;;  %2254 = vmatpush1.msra.mxu1 %v11761_v31 }
 0x382   :  { %2184 = vmatprep.subr.mxu0 %v11768_v8  ;;  %2255 = vmatprep.subr.mxu1 %v11773_v39 }
 0x383   :  { %2185 = vmatpush1.msra.mxu0 %v11780_v35  ;;  %2256 = vmatpush1.msra.mxu1 %v11785_v3 }
 0x384   :  { %2186 = vmatprep.subr.mxu0 %v11792_v44  ;;  %2257 = vmatprep.subr.mxu1 %v11798_v46 }
 0x385   :  { %2187 = vmatpush1.msra.mxu0 %v11803_v48  ;;  %2258 = vmatpush1.msra.mxu1 %v11808_v19 }
 0x386   :  { %2188 = vmatprep.subr.mxu0 %v11815_v43  ;;  %2259 = vmatprep.subr.mxu1 %v11822_v45 }
 0x387   :  { %2189 = vmatpush1.msra.mxu0 %v11827_v47  ;;  %2260 = vmatpush1.msra.mxu1 %v11832_v49 }
 0x388   :  { %2190 = vmatprep.subr.mxu0 %v11839_v50  ;;  %2261 = vmatprep.subr.mxu1 %v11844_v51 }
 0x389   :  { %2191 = vmatpush1.msra.mxu0 %v11851_v52  ;;  %2262 = vmatpush1.msra.mxu1 %v11856_v53 }
 0x38a   :  { %2192 = vmatprep.subr.mxu0 %v11863_v54  ;;  %2263 = vmatprep.subr.mxu1 %v11868_v55 }
 0x38b   :  { %2193 = vmatpush1.msra.mxu0 %v11875_v56  ;;  %2264 = vmatpush1.msra.mxu1 %v11880_v5 }
 0x38c   :  { %2194 = vmatprep.subr.mxu0 %v11887_v57  ;;  %2265 = vmatprep.subr.mxu1 %v11892_v58 }
 0x38d   :  { %2195 = vmatpush1.msra.mxu0 %v11899_v41  ;;  %2266 = vmatpush1.msra.mxu1 %v11904_v4 }
 0x38e   :  { %2196 = vmatprep.subr.mxu0 %v11911_v0  ;;  %2267 = vmatprep.subr.mxu1 %v11916_v59 }
 0x38f   :  { %2197 = vmatpush1.msra.mxu0 %v11923_v16  ;;  %2268 = vmatpush1.msra.mxu1 %v11928_v60 }
 0x390   :  { %2198 = vmatprep.subr.mxu0 %v11935_v10  ;;  %2269 = vmatprep.subr.mxu1 %v11940_v32 }
 0x391   :  { %2199 = vmatpush1.msra.mxu0 %v11947_v22  ;;  %2270 = vmatpush1.msra.mxu1 %v11952_v24 }
 0x392   :  { %2200 = vmatprep.subr.mxu0 %v11959_v25  ;;  %2271 = vmatprep.subr.mxu1 %v11964_v11  ;;  %v1607_v11 = vld [vmem:[%s15823_s0 + $0x10] sm:$0xc0] }
 0x393   :  { %2201 = vmatpush1.msra.mxu0 %v11971_v12  ;;  %2272 = vmatpush1.msra.mxu1 %v11976_v13  ;;  %v1608_v13 = vld [vmem:[%s15823_s0 + $0x18] sm:$0xc0] }
 0x394   :  { %2202 = vmatprep.subr.mxu0 %v11983_v29  ;;  %2273 = vmatprep.subr.mxu1 %v11988_v14 }
 0x395   :  { %2203 = vmatpush1.msra.mxu0 %v11995_v27  ;;  %2274 = vmatpush1.msra.mxu1 %v12000_v61 }
 0x396   :  { %2204 = vmatprep.subr.mxu0 %v12007_v15  ;;  %2275 = vmatprep.subr.mxu1 %v12012_v62 }
 0x397   :  { %2205 = vmatpush1.msra.mxu0 %v12019_v17  ;;  %2276 = vmatpush1.msra.mxu1 %v12024_v63  ;;  %v1606_v17 = vld [vmem:[%s15823_s0 + $0x8] sm:$0xc0] }
 0x398   :  { %2206 = vmatprep.subr.mxu0 %v12031_v18  ;;  %2277 = vmatprep.subr.mxu1 %v12036_v1  ;;  %v12060_v18 = vld [vmem:[%s15825_s2 + $0x18] sm:$0xff]  ;;  %v12067_v1 = vld [vmem:[%s15825_s2] sm:$0xff] }
 0x399   :  { %2207 = vmatpush1.msra.mxu0 %v12043_v21  ;;  %16582 = vst [vmem:[#allocation32_spill] sm:$0xff] %v12060_v18  ;;  %2278 = vmatpush1.msra.mxu1 %v12048_v23  ;;  %16583 = vst [vmem:[#allocation43_spill] sm:$0xff] %v12067_v1  ;;  %v12072_v21 = vld [vmem:[%s15825_s2 + $0x10] sm:$0xff]  ;;  %v12079_v23 = vld [vmem:[%s15826_s3 + $0x1e8] sm:$0xff] }
 0x39a   :  { %2208 = vmatprep.subr.mxu0 %v12055_v7  ;;  %16584 = vst [vmem:[#allocation33_spill] sm:$0xff] %v12072_v21  ;;  %2279 = vmatprep.subr.mxu1 %v12060_v18  ;;  %16585 = vst [vmem:[#allocation44_spill] sm:$0xff] %v12079_v23  ;;  %v12084_v7 = vld [vmem:[%s15826_s3 + $0x1f8] sm:$0xff] }
 0x39b   :  { %2209 = vmatpush1.msra.mxu0 %v12067_v1  ;;  %16586 = vst [vmem:[#allocation34_spill] sm:$0xff] %v12084_v7  ;;  %2280 = vmatpush1.msra.mxu1 %v12072_v21  ;;  %v1605_v1 = vld [vmem:[%s15823_s0] sm:$0xc0] }
 0x39c   :  { %2392 = vmatprep.subr.mxu0 %v12079_v23  ;;  %2463 = vmatprep.subr.mxu1 %v12084_v7 }
 0x418   :  { %v1742_v18 = vpop.f32.mrf.mxu0  ;;  %v1813_v61 = vpop.f32.mrf.mxu1 }
 0x419   :  { %v1822_v63 = vrot.slane %v1742_v18, 2  ;;  %v1824_v12 = vrot.slane %v1813_v61, 2 }
 0x41a   :  { %v1744_v62 = vpop.f32.mrf.mxu0  ;;  %v1815_v29 = vpop.f32.mrf.mxu1 }
 0x41b   :  { %v1830_v15 = vadd.f32 %v1822_v63, %v1605_v1  ;;  %v1823_v27 = vrot.slane %v1744_v62, 2  ;;  %v1825_v7 = vrot.slane %v1815_v29, 2  ;;  %v1832_v62 = vadd.f32 %v1824_v12, %v1607_v11  ;;  %v1834_v29 = vld [vmem:[%s15824_s1 + $0x20] sm:$0x3] }
 0x41c   :  { %v2071_v12 = vrot.slane %v11614_v20, 6 }
 0x41d   :  { %v8967_v14 = vmul.f32 -1.442695, %v1830_v15  ;;  %v1831_v21 = vadd.f32 %v1823_v27, %v1606_v17  ;;  %v1833_v18 = vadd.f32 %v1825_v7, %v1608_v13  ;;  %v1835_v17 = vld [vmem:[%s15824_s1 + $0x28] sm:$0x3] }
 0x41f   :  { %9191 = vpow2.f32 %v8967_v14  ;;  %v8968_v23 = vmul.f32 -1.442695, %v1831_v21  ;;  %v8969_v63 = vmul.f32 -1.442695, %v1833_v18 }
 0x421   :  { %9193 = vpow2.f32 %v8968_v23 }
 0x422   :  { %9195 = vpow2.f32 %v8969_v63 }
 0x42c   :  { %v9192_v1 = vpop.eup %9191 }
 0x42d   :  { %v2054_v15 = vadd.f32 1.0, %v9192_v1 }
 0x42e   :  { %v9194_v27 = vpop.eup %9193 }
 0x42f   :  { %9197 = vrcp.f32 %v2054_v15  ;;  %v2060_v14 = vadd.f32 1.0, %v9194_v27  ;;  %v9196_v13 = vpop.eup %9195 }
 0x430   :  { %9199 = vtanh.f32 %v1832_v62  ;;  %v2067_v27 = vadd.f32 1.0, %v9196_v13 }
 0x431   :  { %9201 = vrcp.f32 %v2060_v14 }
 0x43b   :  { %v1971_v61 = vpop.f32.mrf.mxu0  ;;  %v2042_v14 = vpop.f32.mrf.mxu1 }
 0x43c   :  { %v9198_v21 = vpop.eup %9197  ;;  %v2047_v23 = vadd.f32 %v1971_v61, %v1834_v29  ;;  %v1837_v29 = vld [vmem:[%s15824_s1 + $0x38] sm:$0x3] }
 0x43d   :  { %v9200_v11 = vpop.eup %9199  ;;  %v1973_v7 = vpop.f32.mrf.mxu0 }
 0x43e   :  { %v9202_v18 = vpop.eup %9201  ;;  %v8970_v63 = vmul.f32 -1.442695, %v2047_v23  ;;  %v2048_v1 = vadd.f32 %v1973_v7, %v1835_v17  ;;  %v2074_v62 = vmul.f32 %v9200_v11, %v9198_v21  ;;  %v2044_v61 = vpop.f32.mrf.mxu1  ;;  %v1836_v17 = vld [vmem:[%s15824_s1 + $0x30] sm:$0x3] }
 0x43f   :  { %v2073_v15 = vmul.f32 %v9202_v18, %v2071_v12  ;;  %v2050_v20 = vadd.f32 %v2044_v61, %v1837_v29  ;;  %v2049_v23 = vadd.f32 %v2042_v14, %v1836_v17  ;;  %v12135_v14 = vld [vmem:[%s15826_s3 + $0x1d8] sm:$0xff]  ;;  %v12140_v29 = vld [vmem:[%s15826_s3 + $0x1c0] sm:$0xff]  ;;  %v12145_v61 = vld [vmem:[%s15826_s3 + $0x1d0] sm:$0xff] }
 0x440   :  { %9203 = vpow2.f32 %v8970_v63  ;;  %v8971_v25 = vmul.f32 -1.442695, %v2048_v1  ;;  %16587 = vst [vmem:[#allocation45_spill] sm:$0xff] %v12135_v14  ;;  %16588 = vst [vmem:[#allocation35_spill] sm:$0xff] %v12140_v29  ;;  %v12157_v17 = vld [vmem:[%s15826_s3 + $0x1b8] sm:$0xff] }
 0x441   :  { %v12108_v24 = vadd.f32 %v2074_v62, %v2073_v15  ;;  %v8972_v13 = vmul.f32 -1.442695, %v2050_v20  ;;  %v12120_v62 = vld [vmem:[%s15826_s3 + $0x1e0] sm:$0xff]  ;;  %v12125_v15 = vld [vmem:[%s15826_s3 + $0x1f0] sm:$0xff]  ;;  %16589 = vst [vmem:[#allocation46_spill] sm:$0xff] %v12145_v61  ;;  %v12152_v20 = vld [vmem:[%s15826_s3 + $0x1a8] sm:$0xff] }
 0x442   :  { %9205 = vpow2.f32 %v8971_v25  ;;  %16590 = vst [vmem:[#allocation36_spill] sm:$0xff] %v12152_v20  ;;  %16591 = vst [vmem:[#allocation37_spill] sm:$0xff] %v12157_v17 }
 0x443   :  { %9207 = vrcp.f32 %v2067_v27  ;;  %v12130_v27 = vld [vmem:[%s15826_s3 + $0x1c8] sm:$0xff] }
 0x444   :  { %9209 = vtanh.f32 %v12108_v24 }
 0x445   :  { %9211 = vpow2.f32 %v8972_v13  ;;  %v12164_v13 = vld [vmem:[%s15826_s3 + $0x1a0] sm:$0xff] }
 0x446   :  { %16592 = vst [vmem:[#allocation38_spill] sm:$0xff] %v12164_v13 }
 0x44d   :  { %v9204_v21 = vpop.eup %9203 }
 0x44e   :  { %v2081_v11 = vadd.f32 1.0, %v9204_v21  ;;  %v12169_v21 = vld [vmem:[%s15826_s3 + $0x1b0] sm:$0xff] }
 0x44f   :  { %v9206_v12 = vpop.eup %9205  ;;  %16593 = vst [vmem:[#allocation39_spill] sm:$0xff] %v12169_v21 }
 0x450   :  { %v9208_v25 = vpop.eup %9207  ;;  %9213 = vrcp.f32 %v2081_v11  ;;  %v2087_v7 = vadd.f32 1.0, %v9206_v12  ;;  %v12181_v11 = vld [vmem:[%s15826_s3 + $0x198] sm:$0xff]  ;;  %v12188_v12 = vld [vmem:[%s15826_s3 + $0x180] sm:$0xff] }
 0x451   :  { %v9210_v18 = vpop.eup %9209  ;;  %9215 = vtanh.f32 %v2049_v23  ;;  %v12176_v23 = vld [vmem:[%s15826_s3 + $0x188] sm:$0xff]  ;;  %16595 = vst [vmem:[#allocation41_spill] sm:$0xff] %v12181_v11  ;;  %16596 = vst [vmem:[#allocation47_spill] sm:$0xff] %v12188_v12 }
 0x452   :  { %9217 = vrcp.f32 %v2087_v7  ;;  %v2077_v63 = vmul.f32 %v9210_v18, %v9208_v25  ;;  %16594 = vst [vmem:[#allocation40_spill] sm:$0xff] %v12176_v23  ;;  %v12193_v25 = vld [vmem:[%s15826_s3 + $0x190] sm:$0xff]  ;;  %v12200_v7 = vld [vmem:[%s15826_s3 + $0x168] sm:$0xff]  ;;  %v12205_v18 = vld [vmem:[%s15826_s3 + $0x178] sm:$0xff] }
 0x453   :  { %16597 = vst [vmem:[#allocation48_spill] sm:$0xff] %v12193_v25  ;;  %16598 = vst [vmem:[#allocation49_spill] sm:$0xff] %v12200_v7 }
 0x454   :  { %2105 = vst [vmem:[#allocation2 + $0x10] sm:$0xc0] %v2077_v63  ;;  %v2176_v1 = vrot.slane %v2077_v63, 6  ;;  %16599 = vst [vmem:[#allocation50_spill] sm:$0xff] %v12205_v18  ;;  %v9212_v63 = vpop.eup %9211 }
 0x456   :  { %2243 = vmatmul.mubr.f32.vlgmr.msra.gmra.mxu0 %v2176_v1  ;;  %2314 = vmatmul.mubr.f32.vlgmr.msra.gmra.mxu1 %v2176_v1  ;;  %v12212_v1 = vld [vmem:[%s15826_s3 + $0x160] sm:$0xff] }
 0x457   :  { %2393 = vmatpush1.msra.mxu0 %v12120_v62  ;;  %2464 = vmatpush1.msra.mxu1 %v12125_v15 }
 0x458   :  { %2394 = vmatprep.subr.mxu0 %v12130_v27  ;;  %2465 = vmatprep.subr.mxu1 %v12135_v14 }
 0x459   :  { %2395 = vmatpush1.msra.mxu0 %v12140_v29  ;;  %2466 = vmatpush1.msra.mxu1 %v12145_v61  ;;  %v2094_v29 = vadd.f32 1.0, %v9212_v63  ;;  %v12261_v63 = vld [vmem:[%s15826_s3 + $0x120] sm:$0xff] }
 0x45a   :  { %2396 = vmatprep.subr.mxu0 %v12152_v20  ;;  %2467 = vmatprep.subr.mxu1 %v12157_v17  ;;  %v2098_v20 = vrot.slane %v11652_v40, 2  ;;  %v12249_v40 = vld [vmem:[%s15826_s3 + $0x128] sm:$0xff]  ;;  %16603 = vst [vmem:[#allocation54_spill] sm:$0xff] %v12261_v63 }
 0x45b   :  { %2397 = vmatpush1.msra.mxu0 %v12164_v13  ;;  %2468 = vmatpush1.msra.mxu1 %v12169_v21  ;;  %v12217_v21 = vld [vmem:[%s15826_s3 + $0x170] sm:$0xff]  ;;  %9219 = vrcp.f32 %v2094_v29  ;;  %v12311_v29 = vld [vmem:[%s15826_s3 + $0xe0] sm:$0xff] }
 0x45c   :  { %2398 = vmatprep.subr.mxu0 %v12176_v23  ;;  %2469 = vmatprep.subr.mxu1 %v12181_v11  ;;  %16600 = vst [vmem:[#allocation51_spill] sm:$0xff] %v12217_v21  ;;  %v12224_v23 = vld [vmem:[%s15826_s3 + $0x148] sm:$0xff]  ;;  %v12229_v11 = vld [vmem:[%s15826_s3 + $0x158] sm:$0xff]  ;;  %16612 = vst [vmem:[#allocation63_spill] sm:$0xff] %v12311_v29 }
 0x45d   :  { %v9214_v13 = vpop.eup %9213  ;;  %2399 = vmatpush1.msra.mxu0 %v12188_v12  ;;  %2470 = vmatpush1.msra.mxu1 %v12193_v25  ;;  %v12237_v25 = vld [vmem:[%s15826_s3 + $0x140] sm:$0xff]  ;;  %v12242_v12 = vld [vmem:[%s15826_s3 + $0x150] sm:$0xff] }
 0x45e   :  { %v9216_v17 = vpop.eup %9215  ;;  %2400 = vmatprep.subr.mxu0 %v12200_v7  ;;  %2471 = vmatprep.subr.mxu1 %v12205_v18  ;;  %16601 = vst [vmem:[#allocation52_spill] sm:$0xff] %v12242_v12  ;;  %v12254_v18 = vld [vmem:[%s15826_s3 + $0x138] sm:$0xff] }
 0x45f   :  { %v9218_v61 = vpop.eup %9217  ;;  %2401 = vmatpush1.msra.mxu0 %v12212_v1  ;;  %2472 = vmatpush1.msra.mxu1 %v12217_v21  ;;  %16602 = vst [vmem:[#allocation53_spill] sm:$0xff] %v12254_v18  ;;  %v2101_v7 = vmul.f32 %v9216_v17, %v9214_v13  ;;  %v12266_v21 = vld [vmem:[%s15826_s3 + $0x130] sm:$0xff]  ;;  %v12287_v13 = vld [vmem:[%s15826_s3 + $0x100] sm:$0xff] }
 0x460   :  { %v2100_v14 = vmul.f32 %v9218_v61, %v2098_v20  ;;  %2402 = vmatprep.subr.mxu0 %v12224_v23  ;;  %2473 = vmatprep.subr.mxu1 %v12229_v11  ;;  %16604 = vst [vmem:[#allocation55_spill] sm:$0xff] %v12266_v21  ;;  %v12273_v61 = vld [vmem:[%s15826_s3 + $0x108] sm:$0xff]  ;;  %v12278_v20 = vld [vmem:[%s15826_s3 + $0x118] sm:$0xff]  ;;  %16608 = vst [vmem:[#allocation59_spill] sm:$0xff] %v12287_v13 }
 0x461   :  { %2403 = vmatpush1.msra.mxu0 %v12237_v25  ;;  %2474 = vmatpush1.msra.mxu1 %v12242_v12  ;;  %16605 = vst [vmem:[#allocation56_spill] sm:$0xff] %v12273_v61  ;;  %16606 = vst [vmem:[#allocation57_spill] sm:$0xff] %v12278_v20  ;;  %v12292_v12 = vld [vmem:[%s15826_s3 + $0x110] sm:$0xff] }
 0x462   :  { %v12280_v17 = vadd.f32 %v2101_v7, %v2100_v14  ;;  %2404 = vmatprep.subr.mxu0 %v12249_v40  ;;  %2475 = vmatprep.subr.mxu1 %v12254_v18  ;;  %16609 = vst [vmem:[#allocation60_spill] sm:$0xff] %v12292_v12  ;;  %v12299_v14 = vld [vmem:[%s15826_s3 + $0xe8] sm:$0xff]  ;;  %v12304_v7 = vld [vmem:[%s15826_s3 + $0xf8] sm:$0xff]  ;;  %v12487_v18 = vld [vmem:[%s15826_s3 + $0x10] sm:$0xff] }
 0x463   :  { %2405 = vmatpush1.msra.mxu0 %v12261_v63  ;;  %2476 = vmatpush1.msra.mxu1 %v12266_v21  ;;  %16610 = vst [vmem:[#allocation61_spill] sm:$0xff] %v12299_v14  ;;  %16611 = vst [vmem:[#allocation62_spill] sm:$0xff] %v12304_v7  ;;  %v12316_v21 = vld [vmem:[%s15826_s3 + $0xf0] sm:$0xff] }
 0x464   :  { %16607 = vst [vmem:[#allocation58_spill] sm:$0xff] %v12280_v17  ;;  %2406 = vmatprep.subr.mxu0 %v12273_v61  ;;  %2477 = vmatprep.subr.mxu1 %v12278_v20  ;;  %16613 = vst [vmem:[#allocation64_spill] sm:$0xff] %v12316_v21  ;;  %9221 = vtanh.f32 %v12280_v17  ;;  %v12324_v20 = vld [vmem:[%s15826_s3 + $0xc8] sm:$0xff]  ;;  %v12329_v61 = vld [vmem:[%s15826_s3 + $0xd8] sm:$0xff] }
 0x465   :  { %2407 = vmatpush1.msra.mxu0 %v12287_v13  ;;  %2478 = vmatpush1.msra.mxu1 %v12292_v12  ;;  %16614 = vst [vmem:[#allocation65_spill] sm:$0xff] %v12324_v20  ;;  %16615 = vst [vmem:[#allocation66_spill] sm:$0xff] %v12329_v61  ;;  %v12336_v13 = vld [vmem:[%s15826_s3 + $0xc0] sm:$0xff]  ;;  %v12341_v12 = vld [vmem:[%s15826_s3 + $0xd0] sm:$0xff] }
 0x466   :  { %2408 = vmatprep.subr.mxu0 %v12299_v14  ;;  %2479 = vmatprep.subr.mxu1 %v12304_v7  ;;  %16616 = vst [vmem:[#allocation67_spill] sm:$0xff] %v12336_v13  ;;  %16617 = vst [vmem:[#allocation68_spill] sm:$0xff] %v12341_v12  ;;  %v12348_v14 = vld [vmem:[%s15826_s3 + $0xa8] sm:$0xff]  ;;  %v12353_v7 = vld [vmem:[%s15826_s3 + $0xb8] sm:$0xff] }
 0x467   :  { %2409 = vmatpush1.msra.mxu0 %v12311_v29  ;;  %2480 = vmatpush1.msra.mxu1 %v12316_v21  ;;  %16618 = vst [vmem:[#allocation69_spill] sm:$0xff] %v12348_v14  ;;  %16619 = vst [vmem:[#allocation70_spill] sm:$0xff] %v12353_v7  ;;  %v12360_v29 = vld [vmem:[%s15826_s3 + $0xa0] sm:$0xff]  ;;  %v12365_v21 = vld [vmem:[%s15826_s3 + $0xb0] sm:$0xff] }
 0x468   :  { %2410 = vmatprep.subr.mxu0 %v12324_v20  ;;  %2481 = vmatprep.subr.mxu1 %v12329_v61  ;;  %16620 = vst [vmem:[#allocation71_spill] sm:$0xff] %v12360_v29  ;;  %16621 = vst [vmem:[#allocation72_spill] sm:$0xff] %v12365_v21  ;;  %v12372_v20 = vld [vmem:[%s15826_s3 + $0x88] sm:$0xff]  ;;  %v12377_v61 = vld [vmem:[%s15826_s3 + $0x98] sm:$0xff]  ;;  %v9220_v63 = vpop.eup %9219 }
 0x469   :  { %2411 = vmatpush1.msra.mxu0 %v12336_v13  ;;  %2482 = vmatpush1.msra.mxu1 %v12341_v12  ;;  %16622 = vst [vmem:[#allocation73_spill] sm:$0xff] %v12372_v20  ;;  %16623 = vst [vmem:[#allocation74_spill] sm:$0xff] %v12377_v61  ;;  %v12384_v13 = vld [vmem:[%s15826_s3 + $0x80] sm:$0xff]  ;;  %v12389_v12 = vld [vmem:[%s15826_s3 + $0x90] sm:$0xff] }
 0x46a   :  { %2412 = vmatprep.subr.mxu0 %v12348_v14  ;;  %2483 = vmatprep.subr.mxu1 %v12353_v7  ;;  %16624 = vst [vmem:[#allocation75_spill] sm:$0xff] %v12384_v13  ;;  %16625 = vst [vmem:[#allocation76_spill] sm:$0xff] %v12389_v12  ;;  %v12396_v14 = vld [vmem:[%s15826_s3 + $0x68] sm:$0xff]  ;;  %v12401_v7 = vld [vmem:[%s15826_s3 + $0x78] sm:$0xff] }
 0x46b   :  { %2413 = vmatpush1.msra.mxu0 %v12360_v29  ;;  %2484 = vmatpush1.msra.mxu1 %v12365_v21  ;;  %16626 = vst [vmem:[#allocation77_spill] sm:$0xff] %v12396_v14  ;;  %16627 = vst [vmem:[#allocation78_spill] sm:$0xff] %v12401_v7  ;;  %v12408_v29 = vld [vmem:[%s15826_s3 + $0x60] sm:$0xff]  ;;  %v12413_v21 = vld [vmem:[%s15826_s3 + $0x70] sm:$0xff] }
 0x46c   :  { %2414 = vmatprep.subr.mxu0 %v12372_v20  ;;  %2485 = vmatprep.subr.mxu1 %v12377_v61  ;;  %16628 = vst [vmem:[#allocation79_spill] sm:$0xff] %v12408_v29  ;;  %16629 = vst [vmem:[#allocation80_spill] sm:$0xff] %v12413_v21  ;;  %v12420_v20 = vld [vmem:[%s15826_s3 + $0x48] sm:$0xff]  ;;  %v12425_v61 = vld [vmem:[%s15826_s3 + $0x58] sm:$0xff] }
 0x46d   :  { %2415 = vmatpush1.msra.mxu0 %v12384_v13  ;;  %2486 = vmatpush1.msra.mxu1 %v12389_v12  ;;  %16630 = vst [vmem:[#allocation81_spill] sm:$0xff] %v12420_v20  ;;  %16631 = vst [vmem:[#allocation82_spill] sm:$0xff] %v12425_v61  ;;  %v12432_v13 = vld [vmem:[%s15826_s3 + $0x40] sm:$0xff]  ;;  %v12437_v12 = vld [vmem:[%s15826_s3 + $0x50] sm:$0xff] }
 0x46e   :  { %2416 = vmatprep.subr.mxu0 %v12396_v14  ;;  %2487 = vmatprep.subr.mxu1 %v12401_v7  ;;  %16632 = vst [vmem:[#allocation83_spill] sm:$0xff] %v12432_v13  ;;  %16633 = vst [vmem:[#allocation84_spill] sm:$0xff] %v12437_v12  ;;  %v12444_v14 = vld [vmem:[%s15826_s3 + $0x28] sm:$0xff]  ;;  %v12449_v7 = vld [vmem:[%s15826_s3 + $0x38] sm:$0xff] }
 0x46f   :  { %2417 = vmatpush1.msra.mxu0 %v12408_v29  ;;  %2488 = vmatpush1.msra.mxu1 %v12413_v21  ;;  %v12456_v29 = vld [vmem:[%s15826_s3 + $0x20] sm:$0xff]  ;;  %v12461_v21 = vld [vmem:[%s15826_s3 + $0x30] sm:$0xff] }
 0x470   :  { %2418 = vmatprep.subr.mxu0 %v12420_v20  ;;  %2489 = vmatprep.subr.mxu1 %v12425_v61  ;;  %v12468_v20 = vld [vmem:[%s15826_s3 + $0x8] sm:$0xff]  ;;  %v12473_v61 = vld [vmem:[%s15826_s3 + $0x18] sm:$0xff] }
 0x471   :  { %v9222_v17 = vpop.eup %9221  ;;  %2419 = vmatpush1.msra.mxu0 %v12432_v13  ;;  %2490 = vmatpush1.msra.mxu1 %v12437_v12  ;;  %v12480_v13 = vld [vmem:[%s15826_s3] sm:$0xff] }
 0x472   :  { %2420 = vmatprep.subr.mxu0 %v12444_v14  ;;  %2491 = vmatprep.subr.mxu1 %v12449_v7  ;;  %v2104_v12 = vmul.f32 %v9222_v17, %v9220_v63 }
 0x473   :  { %2421 = vmatpush1.msra.mxu0 %v12456_v29  ;;  %2492 = vmatpush1.msra.mxu1 %v12461_v21 }
 0x474   :  { %2422 = vmatprep.subr.mxu0 %v12468_v20  ;;  %2493 = vmatprep.subr.mxu1 %v12473_v61  ;;  %2106 = vst [vmem:[#allocation2] sm:$0x3] %v2104_v12 }
 0x475   :  { %2423 = vmatpush1.msra.mxu0 %v12480_v13  ;;  %2456 = vmatprep.mubr.f32.mxu0 %v16384_v33 }
 0x476   :  { %2494 = vmatpush1.msra.mxu1 %v12487_v18  ;;  %2527 = vmatprep.mubr.f32.mxu1 %v16384_v33 }
 0x477   :  { %2457 = vmatmul.mubr.f32.vlgmr.msra.gmra.mxu0 %v2104_v12  ;;  %2528 = vmatmul.mubr.f32.vlgmr.msra.gmra.mxu1 %v2104_v12  ;;  %v2324_v12 = vld [vmem:[%s15824_s1] sm:$0xc0] }
 0x478   :  { %2674 = vmatprep.subr.mxu0 %v11696_v9  ;;  %2745 = vmatprep.subr.mxu1 %v11701_v34  ;;  %v16634_v9 = vld [vmem:[#allocation15_spill] sm:$0xff]  ;;  %v16635_v34 = vld [vmem:[#allocation16_spill] sm:$0xff] }
 0x479   :  { %2675 = vmatpush1.msra.mxu0 %v11708_v37  ;;  %2746 = vmatpush1.msra.mxu1 %v11713_v42  ;;  %v16636_v37 = vld [vmem:[#allocation17_spill] sm:$0xff]  ;;  %v16637_v42 = vld [vmem:[#allocation18_spill] sm:$0xff] }
 0x47a   :  { %2676 = vmatprep.subr.mxu0 %v11720_v6  ;;  %2747 = vmatprep.subr.mxu1 %v11725_v26  ;;  %v16638_v6 = vld [vmem:[#allocation19_spill] sm:$0xff]  ;;  %v16639_v26 = vld [vmem:[#allocation20_spill] sm:$0xff] }
 0x47b   :  { %2677 = vmatpush1.msra.mxu0 %v11732_v28  ;;  %2748 = vmatpush1.msra.mxu1 %v11737_v30  ;;  %v16640_v28 = vld [vmem:[#allocation21_spill] sm:$0xff]  ;;  %v16641_v30 = vld [vmem:[#allocation22_spill] sm:$0xff] }
 0x47c   :  { %2678 = vmatprep.subr.mxu0 %v11744_v2  ;;  %2749 = vmatprep.subr.mxu1 %v11749_v38  ;;  %v16642_v2 = vld [vmem:[#allocation23_spill] sm:$0xff]  ;;  %v16643_v38 = vld [vmem:[#allocation24_spill] sm:$0xff] }
 0x47d   :  { %2679 = vmatpush1.msra.mxu0 %v11756_v36  ;;  %2750 = vmatpush1.msra.mxu1 %v11761_v31  ;;  %v16644_v36 = vld [vmem:[#allocation25_spill] sm:$0xff]  ;;  %v16645_v31 = vld [vmem:[#allocation26_spill] sm:$0xff] }
 0x47e   :  { %2680 = vmatprep.subr.mxu0 %v11768_v8  ;;  %2751 = vmatprep.subr.mxu1 %v11773_v39  ;;  %v16646_v8 = vld [vmem:[#allocation27_spill] sm:$0xff]  ;;  %v16647_v39 = vld [vmem:[#allocation28_spill] sm:$0xff] }
 0x47f   :  { %2681 = vmatpush1.msra.mxu0 %v11780_v35  ;;  %2752 = vmatpush1.msra.mxu1 %v11785_v3  ;;  %v16648_v35 = vld [vmem:[#allocation29_spill] sm:$0xff]  ;;  %v16649_v3 = vld [vmem:[#allocation30_spill] sm:$0xff] }
 0x480   :  { %2682 = vmatprep.subr.mxu0 %v11792_v44  ;;  %2753 = vmatprep.subr.mxu1 %v11798_v46  ;;  %v16650_v44 = vld [vmem:[#allocation31_spill] sm:$0xff]  ;;  %v16651_v46 = vld [vmem:[#allocation42_spill] sm:$0xff] }
 0x481   :  { %2683 = vmatpush1.msra.mxu0 %v11803_v48  ;;  %2754 = vmatpush1.msra.mxu1 %v11808_v19  ;;  %v16652_v48 = vld [vmem:[#allocation32_spill] sm:$0xff]  ;;  %v16653_v19 = vld [vmem:[#allocation43_spill] sm:$0xff] }
 0x482   :  { %2684 = vmatprep.subr.mxu0 %v11815_v43  ;;  %2755 = vmatprep.subr.mxu1 %v11822_v45  ;;  %v16654_v43 = vld [vmem:[#allocation33_spill] sm:$0xff]  ;;  %v16655_v45 = vld [vmem:[#allocation44_spill] sm:$0xff] }
 0x483   :  { %2685 = vmatpush1.msra.mxu0 %v11827_v47  ;;  %2756 = vmatpush1.msra.mxu1 %v11832_v49  ;;  %v16656_v47 = vld [vmem:[#allocation34_spill] sm:$0xff]  ;;  %v2107_v49 = vld [vmem:[%s15823_s0 + $0x20] sm:$0x3] }
 0x484   :  { %2686 = vmatprep.subr.mxu0 %v11839_v50  ;;  %2757 = vmatprep.subr.mxu1 %v11844_v51  ;;  %v2108_v51 = vld [vmem:[%s15823_s0 + $0x28] sm:$0x3] }
 0x485   :  { %2687 = vmatpush1.msra.mxu0 %v11851_v52  ;;  %2758 = vmatpush1.msra.mxu1 %v11856_v53 }
 0x486   :  { %2688 = vmatprep.subr.mxu0 %v11863_v54  ;;  %2759 = vmatprep.subr.mxu1 %v11868_v55 }
 0x487   :  { %2689 = vmatpush1.msra.mxu0 %v11875_v56  ;;  %2760 = vmatpush1.msra.mxu1 %v11880_v5 }
 0x488   :  { %2690 = vmatprep.subr.mxu0 %v11887_v57  ;;  %2761 = vmatprep.subr.mxu1 %v11892_v58  ;;  %v2110_v57 = vld [vmem:[%s15823_s0 + $0x38] sm:$0x3] }
 0x489   :  { %2691 = vmatpush1.msra.mxu0 %v11899_v41  ;;  %2762 = vmatpush1.msra.mxu1 %v11904_v4  ;;  %v2109_v4 = vld [vmem:[%s15823_s0 + $0x30] sm:$0x3] }
 0x48a   :  { %2692 = vmatprep.subr.mxu0 %v11911_v0  ;;  %2763 = vmatprep.subr.mxu1 %v11916_v59 }
 0x48b   :  { %2693 = vmatpush1.msra.mxu0 %v11923_v16  ;;  %2764 = vmatpush1.msra.mxu1 %v11928_v60 }
 0x48c   :  { %2694 = vmatprep.subr.mxu0 %v11935_v10  ;;  %2765 = vmatprep.subr.mxu1 %v11940_v32 }
 0x48d   :  { %2695 = vmatpush1.msra.mxu0 %v11947_v22  ;;  %2766 = vmatpush1.msra.mxu1 %v16634_v9 }
 0x48e   :  { %2696 = vmatprep.subr.mxu0 %v16635_v34  ;;  %2767 = vmatprep.subr.mxu1 %v16636_v37  ;;  %v2570_v37 = vrot.slane %v12108_v24, 6 }
 0x48f   :  { %2697 = vmatpush1.msra.mxu0 %v16637_v42  ;;  %2768 = vmatpush1.msra.mxu1 %v16638_v6  ;;  %v2325_v6 = vld [vmem:[%s15824_s1 + $0x8] sm:$0xc0] }
 0x490   :  { %2698 = vmatprep.subr.mxu0 %v16639_v26  ;;  %2769 = vmatprep.subr.mxu1 %v16640_v28 }
 0x491   :  { %2699 = vmatpush1.msra.mxu0 %v16641_v30  ;;  %2770 = vmatpush1.msra.mxu1 %v16642_v2 }
 0x492   :  { %2700 = vmatprep.subr.mxu0 %v16643_v38  ;;  %2771 = vmatprep.subr.mxu1 %v16644_v36 }
 0x493   :  { %2701 = vmatpush1.msra.mxu0 %v16645_v31  ;;  %2772 = vmatpush1.msra.mxu1 %v16646_v8 }
 0x494   :  { %2702 = vmatprep.subr.mxu0 %v16647_v39  ;;  %2773 = vmatprep.subr.mxu1 %v16648_v35 }
 0x495   :  { %2703 = vmatpush1.msra.mxu0 %v16649_v3  ;;  %2774 = vmatpush1.msra.mxu1 %v16650_v44 }
 0x496   :  { %2704 = vmatprep.subr.mxu0 %v16651_v46  ;;  %2775 = vmatprep.subr.mxu1 %v16652_v48  ;;  %v2327_v46 = vld [vmem:[%s15824_s1 + $0x18] sm:$0xc0] }
 0x497   :  { %2705 = vmatpush1.msra.mxu0 %v16653_v19  ;;  %2738 = vmatprep.mubr.f32.mxu0 %v16384_v33 }
 0x498   :  { %2776 = vmatpush1.msra.mxu1 %v16654_v43  ;;  %2809 = vmatprep.mubr.f32.mxu1 %v16384_v33  ;;  %v2326_v43 = vld [vmem:[%s15824_s1 + $0x10] sm:$0xc0] }
 0x499   :  { %2903 = vmatprep.subr.mxu0 %v16655_v45  ;;  %2974 = vmatprep.subr.mxu1 %v16656_v47 }
 0x516   :  { %v2244_v50 = vpop.f32.mrf.mxu0  ;;  %v2315_v56 = vpop.f32.mrf.mxu1 }
 0x517   :  { %v2320_v52 = vadd.f32 %v2244_v50, %v2107_v49  ;;  %v2322_v16 = vadd.f32 %v2315_v56, %v2109_v4  ;;  %v16657_v56 = vld [vmem:[#allocation45_spill] sm:$0xff]  ;;  %v16662_v4 = vld [vmem:[#allocation38_spill] sm:$0xff] }
 0x518   :  { %v2246_v53 = vpop.f32.mrf.mxu0  ;;  %v2317_v58 = vpop.f32.mrf.mxu1 }
 0x519   :  { %v8973_v54 = vmul.f32 -1.442695, %v2320_v52  ;;  %v2321_v55 = vadd.f32 %v2246_v53, %v2108_v51  ;;  %v2323_v41 = vadd.f32 %v2317_v58, %v2110_v57  ;;  %v16659_v57 = vld [vmem:[#allocation46_spill] sm:$0xff]  ;;  %v16660_v58 = vld [vmem:[#allocation36_spill] sm:$0xff] }
 0x51b   :  { %9223 = vpow2.f32 %v8973_v54  ;;  %v8974_v5 = vmul.f32 -1.442695, %v2321_v55  ;;  %v8975_v0 = vmul.f32 -1.442695, %v2323_v41  ;;  %v16661_v41 = vld [vmem:[#allocation37_spill] sm:$0xff] }
 0x51d   :  { %9225 = vpow2.f32 %v8974_v5  ;;  %v16658_v5 = vld [vmem:[#allocation35_spill] sm:$0xff] }
 0x51e   :  { %9227 = vpow2.f32 %v8975_v0  ;;  %v16663_v0 = vld [vmem:[#allocation39_spill] sm:$0xff] }
 0x528   :  { %v9224_v59 = vpop.eup %9223 }
 0x529   :  { %v2553_v60 = vadd.f32 1.0, %v9224_v59  ;;  %v16664_v59 = vld [vmem:[#allocation40_spill] sm:$0xff] }
 0x52a   :  { %v9226_v10 = vpop.eup %9225 }
 0x52b   :  { %9229 = vrcp.f32 %v2553_v60  ;;  %v2559_v32 = vadd.f32 1.0, %v9226_v10  ;;  %v9228_v22 = vpop.eup %9227  ;;  %v16669_v60 = vld [vmem:[#allocation50_spill] sm:$0xff]  ;;  %v16670_v10 = vld [vmem:[#allocation51_spill] sm:$0xff] }
 0x52c   :  { %9231 = vtanh.f32 %v2322_v16  ;;  %v2566_v42 = vadd.f32 1.0, %v9228_v22  ;;  %v16668_v16 = vld [vmem:[#allocation49_spill] sm:$0xff]  ;;  %v16671_v22 = vld [vmem:[#allocation52_spill] sm:$0xff] }
 0x52d   :  { %9233 = vrcp.f32 %v2559_v32 }
 0x52e   :  { %9235 = vrcp.f32 %v2566_v42 }
 0x537   :  { %v2458_v63 = vpop.f32.mrf.mxu0  ;;  %v2529_v2 = vpop.f32.mrf.mxu1 }
 0x538   :  { %v9230_v17 = vpop.eup %9229  ;;  %v2538_v9 = vrot.slane %v2458_v63, 2  ;;  %v2540_v19 = vrot.slane %v2529_v2, 2  ;;  %v16672_v63 = vld [vmem:[#allocation53_spill] sm:$0xff]  ;;  %v16681_v2 = vld [vmem:[#allocation62_spill] sm:$0xff] }
 0x539   :  { %v9232_v34 = vpop.eup %9231  ;;  %v2460_v26 = vpop.f32.mrf.mxu0 }
 0x53a   :  { %v9234_v28 = vpop.eup %9233  ;;  %v2546_v30 = vadd.f32 %v2538_v9, %v2324_v12  ;;  %v2539_v38 = vrot.slane %v2460_v26, 2  ;;  %v2573_v36 = vmul.f32 %v9232_v34, %v9230_v17  ;;  %v2531_v24 = vpop.f32.mrf.mxu1  ;;  %v2548_v50 = vadd.f32 %v2540_v19, %v2326_v43  ;;  %v16673_v9 = vld [vmem:[#allocation58_spill] sm:$0xff]  ;;  %v16691_v19 = vld [vmem:[#allocation72_spill] sm:$0xff]  ;;  %v16692_v43 = vld [vmem:[#allocation73_spill] sm:$0xff] }
 0x53b   :  { %v2572_v31 = vmul.f32 %v9234_v28, %v2570_v37  ;;  %v2541_v44 = vrot.slane %v2531_v24, 2  ;;  %v9236_v47 = vpop.eup %9235  ;;  %v2597_v34 = vrot.slane %v16673_v9, 2  ;;  %v16675_v37 = vld [vmem:[#allocation55_spill] sm:$0xff]  ;;  %v16687_v24 = vld [vmem:[#allocation68_spill] sm:$0xff]  ;;  %v12790_v9 = vld [vmem:[%s15825_s2 + $0x158] sm:$0xff] }
 0x53c   :  { %v8976_v8 = vmul.f32 -1.442695, %v2546_v30  ;;  %v2547_v39 = vadd.f32 %v2539_v38, %v2325_v6  ;;  %v16677_v6 = vld [vmem:[#allocation57_spill] sm:$0xff]  ;;  %v16678_v28 = vld [vmem:[#allocation59_spill] sm:$0xff] }
 0x53d   :  { %v12582_v35 = vadd.f32 %v2573_v36, %v2572_v31  ;;  %v2549_v48 = vadd.f32 %v2541_v44, %v2327_v46  ;;  %v16680_v30 = vld [vmem:[#allocation61_spill] sm:$0xff]  ;;  %v16682_v36 = vld [vmem:[#allocation63_spill] sm:$0xff]  ;;  %v16683_v31 = vld [vmem:[#allocation64_spill] sm:$0xff] }
 0x53e   :  { %9237 = vpow2.f32 %v8976_v8  ;;  %v8977_v3 = vmul.f32 -1.442695, %v2547_v39  ;;  %v16684_v8 = vld [vmem:[#allocation65_spill] sm:$0xff]  ;;  %v16685_v39 = vld [vmem:[#allocation66_spill] sm:$0xff] }
 0x53f   :  { %9239 = vtanh.f32 %v12582_v35  ;;  %v8978_v45 = vmul.f32 -1.442695, %v2549_v48  ;;  %v16688_v44 = vld [vmem:[#allocation69_spill] sm:$0xff]  ;;  %v16689_v46 = vld [vmem:[#allocation70_spill] sm:$0xff]  ;;  %v16690_v48 = vld [vmem:[#allocation71_spill] sm:$0xff] }
 0x540   :  { %9241 = vpow2.f32 %v8977_v3  ;;  %v16686_v3 = vld [vmem:[#allocation67_spill] sm:$0xff] }
 0x541   :  { %9243 = vpow2.f32 %v8978_v45  ;;  %v16693_v45 = vld [vmem:[#allocation74_spill] sm:$0xff] }
 0x54b   :  { %v9238_v49 = vpop.eup %9237 }
 0x54c   :  { %v9240_v51 = vpop.eup %9239  ;;  %v2580_v52 = vadd.f32 1.0, %v9238_v49  ;;  %v16695_v49 = vld [vmem:[#allocation76_spill] sm:$0xff] }
 0x54d   :  { %v9242_v53 = vpop.eup %9241  ;;  %v2576_v54 = vmul.f32 %v9240_v51, %v9236_v47  ;;  %v16694_v47 = vld [vmem:[#allocation75_spill] sm:$0xff]  ;;  %v16697_v51 = vld [vmem:[#allocation78_spill] sm:$0xff] }
 0x54e   :  { %9245 = vrcp.f32 %v2580_v52  ;;  %v2586_v55 = vadd.f32 1.0, %v9242_v53  ;;  %v9244_v32 = vpop.eup %9243  ;;  %v16698_v52 = vld [vmem:[#allocation79_spill] sm:$0xff]  ;;  %v16699_v53 = vld [vmem:[#allocation80_spill] sm:$0xff] }
 0x54f   :  { %9247 = vtanh.f32 %v2548_v50  ;;  %2604 = vst [vmem:[#allocation2 + $0x8] sm:$0x3] %v2576_v54  ;;  %2739 = vmatmul.mubr.f32.vlgmr.msra.gmra.mxu0 %v2576_v54  ;;  %2810 = vmatmul.mubr.f32.vlgmr.msra.gmra.mxu1 %v2576_v54  ;;  %v2593_v42 = vadd.f32 1.0, %v9244_v32  ;;  %v16696_v50 = vld [vmem:[#allocation77_spill] sm:$0xff]  ;;  %v12760_v32 = vld [vmem:[%s15825_s2 + $0x168] sm:$0xff] }
 0x550   :  { %9249 = vrcp.f32 %v2586_v55  ;;  %2904 = vmatpush1.msra.mxu0 %v12120_v62  ;;  %2975 = vmatpush1.msra.mxu1 %v12125_v15  ;;  %v16665_v62 = vld [vmem:[#allocation41_spill] sm:$0xff]  ;;  %v16666_v15 = vld [vmem:[#allocation47_spill] sm:$0xff]  ;;  %v16701_v55 = vld [vmem:[#allocation82_spill] sm:$0xff] }
 0x551   :  { %2905 = vmatprep.subr.mxu0 %v12130_v27  ;;  %2976 = vmatprep.subr.mxu1 %v16657_v56  ;;  %v16667_v27 = vld [vmem:[#allocation48_spill] sm:$0xff]  ;;  %9251 = vrcp.f32 %v2593_v42  ;;  %v16700_v54 = vld [vmem:[#allocation81_spill] sm:$0xff]  ;;  %v16702_v56 = vld [vmem:[#allocation83_spill] sm:$0xff] }
 0x552   :  { %2906 = vmatpush1.msra.mxu0 %v16658_v5  ;;  %2977 = vmatpush1.msra.mxu1 %v16659_v57  ;;  %v16703_v5 = vld [vmem:[#allocation84_spill] sm:$0xff]  ;;  %v12819_v42 = vld [vmem:[%s15825_s2 + $0x120] sm:$0xff] }
 0x553   :  { %2907 = vmatprep.subr.mxu0 %v16660_v58  ;;  %2978 = vmatprep.subr.mxu1 %v16661_v41  ;;  %v12700_v41 = vld [vmem:[%s15825_s2 + $0x1c0] sm:$0xff] }
 0x554   :  { %2908 = vmatpush1.msra.mxu0 %v16662_v4  ;;  %2979 = vmatpush1.msra.mxu1 %v16663_v0  ;;  %v12705_v4 = vld [vmem:[%s15825_s2 + $0x1d0] sm:$0xff]  ;;  %v12712_v0 = vld [vmem:[%s15825_s2 + $0x1a8] sm:$0xff] }
 0x555   :  { %2909 = vmatprep.subr.mxu0 %v16664_v59  ;;  %2980 = vmatprep.subr.mxu1 %v16665_v62  ;;  %v12717_v59 = vld [vmem:[%s15825_s2 + $0x1b8] sm:$0xff]  ;;  %v12724_v62 = vld [vmem:[%s15825_s2 + $0x1a0] sm:$0xff] }
 0x556   :  { %2910 = vmatpush1.msra.mxu0 %v16666_v15  ;;  %2981 = vmatpush1.msra.mxu1 %v16667_v27  ;;  %v12729_v15 = vld [vmem:[%s15825_s2 + $0x1b0] sm:$0xff]  ;;  %v12736_v27 = vld [vmem:[%s15825_s2 + $0x188] sm:$0xff] }
 0x557   :  { %2911 = vmatprep.subr.mxu0 %v16668_v16  ;;  %2982 = vmatprep.subr.mxu1 %v16669_v60  ;;  %v12741_v16 = vld [vmem:[%s15825_s2 + $0x198] sm:$0xff]  ;;  %v12748_v60 = vld [vmem:[%s15825_s2 + $0x180] sm:$0xff] }
 0x558   :  { %2912 = vmatpush1.msra.mxu0 %v12212_v1  ;;  %2983 = vmatpush1.msra.mxu1 %v16670_v10  ;;  %v16674_v1 = vld [vmem:[#allocation54_spill] sm:$0xff]  ;;  %v12753_v10 = vld [vmem:[%s15825_s2 + $0x190] sm:$0xff] }
 0x559   :  { %2913 = vmatprep.subr.mxu0 %v12224_v23  ;;  %2984 = vmatprep.subr.mxu1 %v12229_v11  ;;  %v16676_v11 = vld [vmem:[#allocation56_spill] sm:$0xff] }
 0x55a   :  { %2914 = vmatpush1.msra.mxu0 %v12237_v25  ;;  %2985 = vmatpush1.msra.mxu1 %v16671_v22  ;;  %v12765_v22 = vld [vmem:[%s15825_s2 + $0x178] sm:$0xff] }
 0x55b   :  { %v9246_v12 = vpop.eup %9245  ;;  %2915 = vmatprep.subr.mxu0 %v12249_v40  ;;  %2986 = vmatprep.subr.mxu1 %v16672_v63  ;;  %v16679_v40 = vld [vmem:[#allocation60_spill] sm:$0xff]  ;;  %v12777_v63 = vld [vmem:[%s15825_s2 + $0x170] sm:$0xff] }
 0x55c   :  { %v9248_v17 = vpop.eup %9247  ;;  %2916 = vmatpush1.msra.mxu0 %v16674_v1  ;;  %2987 = vmatpush1.msra.mxu1 %v16675_v37  ;;  %v12800_v1 = vld [vmem:[%s15825_s2 + $0x150] sm:$0xff]  ;;  %v12807_v37 = vld [vmem:[%s15825_s2 + $0x128] sm:$0xff] }
 0x55d   :  { %v9250_v23 = vpop.eup %9249  ;;  %2917 = vmatprep.subr.mxu0 %v16676_v11  ;;  %2988 = vmatprep.subr.mxu1 %v16677_v6  ;;  %v2600_v25 = vmul.f32 %v9248_v17, %v9246_v12  ;;  %v12772_v12 = vld [vmem:[%s15825_s2 + $0x160] sm:$0xff]  ;;  %v12784_v17 = vld [vmem:[%s15825_s2 + $0x148] sm:$0xff]  ;;  %v12824_v11 = vld [vmem:[%s15825_s2 + $0x130] sm:$0xff] }
 0x55e   :  { %v2599_v26 = vmul.f32 %v9250_v23, %v2597_v34  ;;  %2918 = vmatpush1.msra.mxu0 %v16678_v28  ;;  %2989 = vmatpush1.msra.mxu1 %v16679_v40  ;;  %v9252_v57 = vpop.eup %9251  ;;  %v12795_v34 = vld [vmem:[%s15825_s2 + $0x140] sm:$0xff]  ;;  %v12814_v23 = vld [vmem:[%s15825_s2 + $0x138] sm:$0xff]  ;;  %v12831_v6 = vld [vmem:[%s15825_s2 + $0x108] sm:$0xff] }
 0x55f   :  { %2919 = vmatprep.subr.mxu0 %v16680_v30  ;;  %2990 = vmatprep.subr.mxu1 %v16681_v2  ;;  %v12848_v28 = vld [vmem:[%s15825_s2 + $0x110] sm:$0xff]  ;;  %v12855_v40 = vld [vmem:[%s15825_s2 + $0xe8] sm:$0xff]  ;;  %v12860_v30 = vld [vmem:[%s15825_s2 + $0xf8] sm:$0xff] }
 0x560   :  { %v12624_v38 = vadd.f32 %v2600_v25, %v2599_v26  ;;  %2920 = vmatpush1.msra.mxu0 %v16682_v36  ;;  %2991 = vmatpush1.msra.mxu1 %v16683_v31  ;;  %v12836_v25 = vld [vmem:[%s15825_s2 + $0x118] sm:$0xff]  ;;  %v12843_v26 = vld [vmem:[%s15825_s2 + $0x100] sm:$0xff]  ;;  %v12872_v36 = vld [vmem:[%s15825_s2 + $0xf0] sm:$0xff] }
 0x561   :  { %2921 = vmatprep.subr.mxu0 %v16684_v8  ;;  %2992 = vmatprep.subr.mxu1 %v16685_v39  ;;  %v12867_v2 = vld [vmem:[%s15825_s2 + $0xe0] sm:$0xff]  ;;  %v12879_v31 = vld [vmem:[%s15825_s2 + $0xc8] sm:$0xff]  ;;  %v12884_v8 = vld [vmem:[%s15825_s2 + $0xd8] sm:$0xff] }
 0x562   :  { %2922 = vmatpush1.msra.mxu0 %v16686_v3  ;;  %2993 = vmatpush1.msra.mxu1 %v16687_v24  ;;  %9253 = vtanh.f32 %v12624_v38  ;;  %v12891_v39 = vld [vmem:[%s15825_s2 + $0xc0] sm:$0xff]  ;;  %v12896_v3 = vld [vmem:[%s15825_s2 + $0xd0] sm:$0xff]  ;;  %v12903_v24 = vld [vmem:[%s15825_s2 + $0xa8] sm:$0xff] }
 0x563   :  { %2923 = vmatprep.subr.mxu0 %v16688_v44  ;;  %2994 = vmatprep.subr.mxu1 %v16689_v46  ;;  %v12908_v44 = vld [vmem:[%s15825_s2 + $0xb8] sm:$0xff]  ;;  %v12915_v46 = vld [vmem:[%s15825_s2 + $0xa0] sm:$0xff] }
 0x564   :  { %2924 = vmatpush1.msra.mxu0 %v16690_v48  ;;  %2995 = vmatpush1.msra.mxu1 %v16691_v19  ;;  %v12920_v48 = vld [vmem:[%s15825_s2 + $0xb0] sm:$0xff]  ;;  %v12927_v19 = vld [vmem:[%s15825_s2 + $0x88] sm:$0xff] }
 0x565   :  { %2925 = vmatprep.subr.mxu0 %v16692_v43  ;;  %2996 = vmatprep.subr.mxu1 %v16693_v45  ;;  %16704 = vst [vmem:[#allocation85_spill] sm:$0xff] %v12920_v48  ;;  %16705 = vst [vmem:[#allocation15_spill] sm:$0xff] %v12927_v19  ;;  %v12932_v43 = vld [vmem:[%s15825_s2 + $0x98] sm:$0xff]  ;;  %v12939_v45 = vld [vmem:[%s15825_s2 + $0x80] sm:$0xff] }
 0x566   :  { %2926 = vmatpush1.msra.mxu0 %v16694_v47  ;;  %2997 = vmatpush1.msra.mxu1 %v16695_v49  ;;  %16706 = vst [vmem:[#allocation16_spill] sm:$0xff] %v12932_v43  ;;  %16707 = vst [vmem:[#allocation17_spill] sm:$0xff] %v12939_v45  ;;  %v12944_v47 = vld [vmem:[%s15825_s2 + $0x90] sm:$0xff]  ;;  %v12951_v49 = vld [vmem:[%s15825_s2 + $0x68] sm:$0xff] }
 0x567   :  { %2927 = vmatprep.subr.mxu0 %v16696_v50  ;;  %2998 = vmatprep.subr.mxu1 %v16697_v51  ;;  %16708 = vst [vmem:[#allocation18_spill] sm:$0xff] %v12944_v47  ;;  %16709 = vst [vmem:[#allocation19_spill] sm:$0xff] %v12951_v49  ;;  %v12956_v50 = vld [vmem:[%s15825_s2 + $0x78] sm:$0xff]  ;;  %v12963_v51 = vld [vmem:[%s15825_s2 + $0x60] sm:$0xff] }
 0x568   :  { %2928 = vmatpush1.msra.mxu0 %v16698_v52  ;;  %2999 = vmatpush1.msra.mxu1 %v16699_v53  ;;  %16710 = vst [vmem:[#allocation20_spill] sm:$0xff] %v12956_v50  ;;  %16711 = vst [vmem:[#allocation21_spill] sm:$0xff] %v12963_v51  ;;  %v12968_v52 = vld [vmem:[%s15825_s2 + $0x70] sm:$0xff]  ;;  %v12975_v53 = vld [vmem:[%s15825_s2 + $0x48] sm:$0xff] }
 0x569   :  { %2929 = vmatprep.subr.mxu0 %v16700_v54  ;;  %3000 = vmatprep.subr.mxu1 %v16701_v55  ;;  %16712 = vst [vmem:[#allocation22_spill] sm:$0xff] %v12968_v52  ;;  %16713 = vst [vmem:[#allocation23_spill] sm:$0xff] %v12975_v53  ;;  %v12980_v54 = vld [vmem:[%s15825_s2 + $0x58] sm:$0xff]  ;;  %v12987_v55 = vld [vmem:[%s15825_s2 + $0x40] sm:$0xff] }
 0x56a   :  { %2930 = vmatpush1.msra.mxu0 %v16702_v56  ;;  %3001 = vmatpush1.msra.mxu1 %v16703_v5  ;;  %16714 = vst [vmem:[#allocation24_spill] sm:$0xff] %v12980_v54  ;;  %16715 = vst [vmem:[#allocation25_spill] sm:$0xff] %v12987_v55  ;;  %v12992_v56 = vld [vmem:[%s15825_s2 + $0x50] sm:$0xff]  ;;  %v12999_v5 = vld [vmem:[%s15825_s2 + $0x28] sm:$0xff] }
 0x56b   :  { %2931 = vmatprep.subr.mxu0 %v12444_v14  ;;  %3002 = vmatprep.subr.mxu1 %v12449_v7  ;;  %16716 = vst [vmem:[#allocation26_spill] sm:$0xff] %v12992_v56  ;;  %16717 = vst [vmem:[#allocation27_spill] sm:$0xff] %v12999_v5 }
 0x56c   :  { %2932 = vmatpush1.msra.mxu0 %v12456_v29  ;;  %3003 = vmatpush1.msra.mxu1 %v12461_v21  ;;  %v12664_v21 = vld [vmem:[%s15825_s2 + $0x1e8] sm:$0xff]  ;;  %v12693_v29 = vld [vmem:[%s15825_s2 + $0x1d8] sm:$0xff] }
 0x56d   :  { %2933 = vmatprep.subr.mxu0 %v12468_v20  ;;  %3004 = vmatprep.subr.mxu1 %v12473_v61  ;;  %v12676_v61 = vld [vmem:[%s15825_s2 + $0x1e0] sm:$0xff]  ;;  %v12681_v20 = vld [vmem:[%s15825_s2 + $0x1f0] sm:$0xff] }
 0x56e   :  { %2934 = vmatpush1.msra.mxu0 %v12480_v13  ;;  %2967 = vmatprep.mubr.f32.mxu0 %v16384_v33  ;;  %v12688_v13 = vld [vmem:[%s15825_s2 + $0x1c8] sm:$0xff] }
 0x56f   :  { %v9254_v58 = vpop.eup %9253  ;;  %3005 = vmatpush1.msra.mxu1 %v12487_v18  ;;  %3038 = vmatprep.mubr.f32.mxu1 %v16384_v33  ;;  %v12669_v18 = vld [vmem:[%s15825_s2 + $0x1f8] sm:$0xff] }
 0x570   :  { %v2603_v14 = vmul.f32 %v9254_v58, %v9252_v57  ;;  %3188 = vmatprep.subr.mxu0 %v12664_v21  ;;  %3259 = vmatprep.subr.mxu1 %v12669_v18  ;;  %v13004_v57 = vld [vmem:[%s15825_s2 + $0x38] sm:$0xff]  ;;  %v13011_v58 = vld [vmem:[%s15825_s2 + $0x20] sm:$0xff] }
 0x571   :  { %16718 = vst [vmem:[#allocation28_spill] sm:$0xff] %v13004_v57  ;;  %16719 = vst [vmem:[#allocation29_spill] sm:$0xff] %v13011_v58 }
 0x572   :  { %2605 = vst [vmem:[#allocation2 + $0x18] sm:$0xc0] %v2603_v14  ;;  %v2901_v7 = vrot.slane %v2603_v14, 6  ;;  %v13016_v14 = vld [vmem:[%s15825_s2 + $0x30] sm:$0xff] }
 0x573   :  { %16720 = vst [vmem:[#allocation30_spill] sm:$0xff] %v13016_v14 }
 0x574   :  { %2968 = vmatmul.mubr.f32.vlgmr.msra.gmra.mxu0 %v2901_v7  ;;  %3039 = vmatmul.mubr.f32.vlgmr.msra.gmra.mxu1 %v2901_v7  ;;  %v13023_v7 = vld [vmem:[%s15825_s2 + $0x8] sm:$0xff] }
 0x575   :  { %3252 = vmatprep.mubr.f32.mxu0 %v16384_v33  ;;  %3323 = vmatprep.mubr.f32.mxu1 %v16384_v33  ;;  %16721 = vst [vmem:[#allocation31_spill] sm:$0xff] %v13023_v7 }
 0x576   :  { %3189 = vmatpush1.msra.mxu0 %v12676_v61  ;;  %3260 = vmatpush1.msra.mxu1 %v12681_v20 }
 0x577   :  { %3190 = vmatprep.subr.mxu0 %v12688_v13  ;;  %3261 = vmatprep.subr.mxu1 %v12693_v29 }
 0x578   :  { %3191 = vmatpush1.msra.mxu0 %v12700_v41  ;;  %3262 = vmatpush1.msra.mxu1 %v12705_v4 }
 0x579   :  { %3192 = vmatprep.subr.mxu0 %v12712_v0  ;;  %3263 = vmatprep.subr.mxu1 %v12717_v59 }
 0x57a   :  { %3193 = vmatpush1.msra.mxu0 %v12724_v62  ;;  %3264 = vmatpush1.msra.mxu1 %v12729_v15 }
 0x57b   :  { %3194 = vmatprep.subr.mxu0 %v12736_v27  ;;  %3265 = vmatprep.subr.mxu1 %v12741_v16 }
 0x57c   :  { %3195 = vmatpush1.msra.mxu0 %v12748_v60  ;;  %3266 = vmatpush1.msra.mxu1 %v12753_v10 }
 0x57d   :  { %3196 = vmatprep.subr.mxu0 %v12760_v32  ;;  %3267 = vmatprep.subr.mxu1 %v12765_v22 }
 0x57e   :  { %3197 = vmatpush1.msra.mxu0 %v12772_v12  ;;  %3268 = vmatpush1.msra.mxu1 %v12777_v63 }
 0x57f   :  { %3198 = vmatprep.subr.mxu0 %v12784_v17  ;;  %3269 = vmatprep.subr.mxu1 %v12790_v9 }
 0x580   :  { %3199 = vmatpush1.msra.mxu0 %v12795_v34  ;;  %3270 = vmatpush1.msra.mxu1 %v12800_v1 }
 0x581   :  { %3200 = vmatprep.subr.mxu0 %v12807_v37  ;;  %3271 = vmatprep.subr.mxu1 %v12814_v23 }
 0x582   :  { %3201 = vmatpush1.msra.mxu0 %v12819_v42  ;;  %3272 = vmatpush1.msra.mxu1 %v12824_v11 }
 0x583   :  { %3202 = vmatprep.subr.mxu0 %v12831_v6  ;;  %3273 = vmatprep.subr.mxu1 %v12836_v25 }
 0x584   :  { %3203 = vmatpush1.msra.mxu0 %v12843_v26  ;;  %3274 = vmatpush1.msra.mxu1 %v12848_v28 }
 0x585   :  { %3204 = vmatprep.subr.mxu0 %v12855_v40  ;;  %3275 = vmatprep.subr.mxu1 %v12860_v30 }
 0x586   :  { %3205 = vmatpush1.msra.mxu0 %v12867_v2  ;;  %3276 = vmatpush1.msra.mxu1 %v12872_v36 }
 0x587   :  { %3206 = vmatprep.subr.mxu0 %v12879_v31  ;;  %3277 = vmatprep.subr.mxu1 %v12884_v8 }
 0x588   :  { %3207 = vmatpush1.msra.mxu0 %v12891_v39  ;;  %3278 = vmatpush1.msra.mxu1 %v12896_v3 }
 0x589   :  { %3208 = vmatprep.subr.mxu0 %v12903_v24  ;;  %3279 = vmatprep.subr.mxu1 %v12908_v44 }
 0x58a   :  { %3209 = vmatpush1.msra.mxu0 %v12915_v46  ;;  %3280 = vmatpush1.msra.mxu1 %v12920_v48 }
 0x58b   :  { %3210 = vmatprep.subr.mxu0 %v12927_v19  ;;  %3281 = vmatprep.subr.mxu1 %v12932_v43  ;;  %v2608_v43 = vld [vmem:[%s15823_s0 + $0x30] sm:$0xc] }
 0x58c   :  { %3211 = vmatpush1.msra.mxu0 %v12939_v45  ;;  %3282 = vmatpush1.msra.mxu1 %v12944_v47  ;;  %v2609_v47 = vld [vmem:[%s15823_s0 + $0x38] sm:$0xc] }
 0x58d   :  { %3212 = vmatprep.subr.mxu0 %v12951_v49  ;;  %3283 = vmatprep.subr.mxu1 %v12956_v50 }
 0x58e   :  { %3213 = vmatpush1.msra.mxu0 %v12963_v51  ;;  %3284 = vmatpush1.msra.mxu1 %v12968_v52 }
 0x58f   :  { %3214 = vmatprep.subr.mxu0 %v12975_v53  ;;  %3285 = vmatprep.subr.mxu1 %v12980_v54 }
 0x590   :  { %3215 = vmatpush1.msra.mxu0 %v12987_v55  ;;  %3286 = vmatpush1.msra.mxu1 %v12992_v56  ;;  %v2607_v56 = vld [vmem:[%s15823_s0 + $0x28] sm:$0xc] }
 0x591   :  { %3216 = vmatprep.subr.mxu0 %v12999_v5  ;;  %3287 = vmatprep.subr.mxu1 %v13004_v57  ;;  %v13028_v5 = vld [vmem:[%s15825_s2 + $0x18] sm:$0xff]  ;;  %v13035_v57 = vld [vmem:[%s15825_s2] sm:$0xff] }
 0x592   :  { %3217 = vmatpush1.msra.mxu0 %v13011_v58  ;;  %16722 = vst [vmem:[#allocation42_spill] sm:$0xff] %v13028_v5  ;;  %3288 = vmatpush1.msra.mxu1 %v13016_v14  ;;  %16723 = vst [vmem:[#allocation32_spill] sm:$0xff] %v13035_v57  ;;  %v13040_v58 = vld [vmem:[%s15825_s2 + $0x10] sm:$0xff]  ;;  %v13053_v14 = vld [vmem:[%s15826_s3 + $0x1f8] sm:$0xff] }
 0x593   :  { %3218 = vmatprep.subr.mxu0 %v13023_v7  ;;  %16724 = vst [vmem:[#allocation43_spill] sm:$0xff] %v13040_v58  ;;  %3289 = vmatprep.subr.mxu1 %v13028_v5  ;;  %v13048_v7 = vld [vmem:[%s15826_s3 + $0x1e8] sm:$0xff]  ;;  %16726 = vst [vmem:[#allocation44_spill] sm:$0xff] %v13053_v14 }
 0x594   :  { %3219 = vmatpush1.msra.mxu0 %v13035_v57  ;;  %3290 = vmatpush1.msra.mxu1 %v13040_v58  ;;  %16725 = vst [vmem:[#allocation33_spill] sm:$0xff] %v13048_v7  ;;  %v2606_v57 = vld [vmem:[%s15823_s0 + $0x20] sm:$0xc] }
 0x595   :  { %3417 = vmatprep.subr.mxu0 %v13048_v7  ;;  %3488 = vmatprep.subr.mxu1 %v13053_v14 }
 0x60f   :  { %v2740_v5 = vpop.f32.mrf.mxu0  ;;  %v2811_v53 = vpop.f32.mrf.mxu1 }
 0x610   :  { %v2820_v58 = vrot.slane %v2740_v5, 6  ;;  %v2822_v45 = vrot.slane %v2811_v53, 6  ;;  %v2832_v53 = vld [vmem:[%s15824_s1] sm:$0x30] }
 0x611   :  { %v2742_v55 = vpop.f32.mrf.mxu0  ;;  %v2813_v49 = vpop.f32.mrf.mxu1 }
 0x612   :  { %v2828_v54 = vadd.f32 %v2820_v58, %v2606_v57  ;;  %v2821_v52 = vrot.slane %v2742_v55, 6  ;;  %v2823_v14 = vrot.slane %v2813_v49, 6  ;;  %v2830_v55 = vadd.f32 %v2822_v45, %v2608_v43 }
 0x614   :  { %v8979_v51 = vmul.f32 -1.442695, %v2828_v54  ;;  %v2829_v50 = vadd.f32 %v2821_v52, %v2607_v56  ;;  %v2831_v5 = vadd.f32 %v2823_v14, %v2609_v47  ;;  %v3081_v47 = vrot.slane %v12582_v35, 6 }
 0x616   :  { %9255 = vpow2.f32 %v8979_v51  ;;  %v8980_v7 = vmul.f32 -1.442695, %v2829_v50  ;;  %v8981_v57 = vmul.f32 -1.442695, %v2831_v5 }
 0x618   :  { %9257 = vpow2.f32 %v8980_v7 }
 0x619   :  { %9259 = vpow2.f32 %v8981_v57  ;;  %v2833_v57 = vld [vmem:[%s15824_s1 + $0x8] sm:$0x30] }
 0x623   :  { %v9256_v58 = vpop.eup %9255 }
 0x624   :  { %v3064_v54 = vadd.f32 1.0, %v9256_v58 }
 0x625   :  { %v9258_v52 = vpop.eup %9257 }
 0x626   :  { %9261 = vrcp.f32 %v3064_v54  ;;  %v3070_v50 = vadd.f32 1.0, %v9258_v52  ;;  %v9260_v49 = vpop.eup %9259 }
 0x627   :  { %9263 = vtanh.f32 %v2830_v55  ;;  %v3077_v5 = vadd.f32 1.0, %v9260_v49 }
 0x628   :  { %9265 = vrcp.f32 %v3070_v50 }
 0x629   :  { %9267 = vrcp.f32 %v3077_v5 }
 0x633   :  { %v9262_v51 = vpop.eup %9261 }
 0x634   :  { %v9264_v56 = vpop.eup %9263  ;;  %v2969_v14 = vpop.f32.mrf.mxu0 }
 0x635   :  { %v9266_v7 = vpop.eup %9265  ;;  %v3049_v43 = vrot.slane %v2969_v14, 4  ;;  %v3084_v45 = vmul.f32 %v9264_v56, %v9262_v51  ;;  %v3040_v52 = vpop.f32.mrf.mxu1  ;;  %v2835_v56 = vld [vmem:[%s15824_s1 + $0x18] sm:$0x30] }
 0x636   :  { %v3083_v58 = vmul.f32 %v9266_v7, %v3081_v47  ;;  %v2971_v55 = vpop.f32.mrf.mxu0  ;;  %v2834_v7 = vld [vmem:[%s15824_s1 + $0x10] sm:$0x30]  ;;  %v9268_v5 = vpop.eup %9267 }
 0x637   :  { %v3057_v54 = vadd.f32 %v3049_v43, %v2832_v53  ;;  %v3050_v50 = vrot.slane %v2971_v55, 4  ;;  %v3042_v14 = vpop.f32.mrf.mxu1  ;;  %v3051_v53 = vrot.slane %v3040_v52, 4  ;;  %v13093_v52 = vld [vmem:[%s15826_s3 + $0x1f0] sm:$0xff] }
 0x638   :  { %v13076_v19 = vadd.f32 %v3084_v45, %v3083_v58  ;;  %v3052_v51 = vrot.slane %v3042_v14, 4  ;;  %v13098_v14 = vld [vmem:[%s15826_s3 + $0x1c8] sm:$0xff] }
 0x639   :  { %v8982_v35 = vmul.f32 -1.442695, %v3057_v54  ;;  %v3058_v48 = vadd.f32 %v3050_v50, %v2833_v57  ;;  %v3059_v57 = vadd.f32 %v3051_v53, %v2834_v7  ;;  %v13120_v53 = vld [vmem:[%s15826_s3 + $0x1a8] sm:$0xff]  ;;  %v13125_v7 = vld [vmem:[%s15826_s3 + $0x1b8] sm:$0xff] }
 0x63a   :  { %9269 = vtanh.f32 %v13076_v19  ;;  %v3060_v47 = vadd.f32 %v3052_v51, %v2835_v56  ;;  %v13103_v51 = vld [vmem:[%s15826_s3 + $0x1d8] sm:$0xff]  ;;  %v13108_v56 = vld [vmem:[%s15826_s3 + $0x1c0] sm:$0xff]  ;;  %16730 = vst [vmem:[#allocation46_spill] sm:$0xff] %v13120_v53  ;;  %16731 = vst [vmem:[#allocation36_spill] sm:$0xff] %v13125_v7 }
 0x63b   :  { %9271 = vpow2.f32 %v8982_v35  ;;  %v8983_v49 = vmul.f32 -1.442695, %v3058_v48  ;;  %v13088_v35 = vld [vmem:[%s15826_s3 + $0x1e0] sm:$0xff]  ;;  %16727 = vst [vmem:[#allocation34_spill] sm:$0xff] %v13103_v51  ;;  %16728 = vst [vmem:[#allocation45_spill] sm:$0xff] %v13108_v56 }
 0x63c   :  { %v8984_v43 = vmul.f32 -1.442695, %v3060_v47  ;;  %v13113_v47 = vld [vmem:[%s15826_s3 + $0x1d0] sm:$0xff] }
 0x63d   :  { %9273 = vpow2.f32 %v8983_v49  ;;  %16729 = vst [vmem:[#allocation35_spill] sm:$0xff] %v13113_v47 }
 0x63e   :  { %9275 = vpow2.f32 %v8984_v43  ;;  %v13137_v43 = vld [vmem:[%s15826_s3 + $0x1b0] sm:$0xff] }
 0x63f   :  { %16733 = vst [vmem:[#allocation38_spill] sm:$0xff] %v13137_v43 }
 0x647   :  { %v9270_v45 = vpop.eup %9269 }
 0x648   :  { %v9272_v58 = vpop.eup %9271  ;;  %v3087_v55 = vmul.f32 %v9270_v45, %v9268_v5  ;;  %v13132_v5 = vld [vmem:[%s15826_s3 + $0x1a0] sm:$0xff]  ;;  %v13144_v45 = vld [vmem:[%s15826_s3 + $0x188] sm:$0xff] }
 0x649   :  { %v3091_v48 = vadd.f32 1.0, %v9272_v58  ;;  %16732 = vst [vmem:[#allocation37_spill] sm:$0xff] %v13132_v5  ;;  %16734 = vst [vmem:[#allocation39_spill] sm:$0xff] %v13144_v45  ;;  %v13149_v58 = vld [vmem:[%s15826_s3 + $0x198] sm:$0xff] }
 0x64a   :  { %v9274_v54 = vpop.eup %9273  ;;  %3115 = vst [vmem:[#allocation2 + $0x8] sm:$0xc] %v3087_v55  ;;  %v3186_v50 = vrot.slane %v3087_v55, 2  ;;  %16735 = vst [vmem:[#allocation40_spill] sm:$0xff] %v13149_v58  ;;  %v13161_v55 = vld [vmem:[%s15826_s3 + $0x190] sm:$0xff] }
 0x64b   :  { %9277 = vrcp.f32 %v3091_v48  ;;  %v3097_v49 = vadd.f32 1.0, %v9274_v54  ;;  %16737 = vst [vmem:[#allocation47_spill] sm:$0xff] %v13161_v55  ;;  %v13168_v48 = vld [vmem:[%s15826_s3 + $0x168] sm:$0xff]  ;;  %v13173_v54 = vld [vmem:[%s15826_s3 + $0x178] sm:$0xff] }
 0x64c   :  { %9279 = vtanh.f32 %v3059_v57  ;;  %3253 = vmatmul.mubr.f32.vlgmr.msra.gmra.mxu0 %v3186_v50  ;;  %3324 = vmatmul.mubr.f32.vlgmr.msra.gmra.mxu1 %v3186_v50  ;;  %v13156_v57 = vld [vmem:[%s15826_s3 + $0x180] sm:$0xff]  ;;  %16738 = vst [vmem:[#allocation48_spill] sm:$0xff] %v13168_v48  ;;  %16739 = vst [vmem:[#allocation49_spill] sm:$0xff] %v13173_v54 }
 0x64d   :  { %9281 = vrcp.f32 %v3097_v49  ;;  %3418 = vmatpush1.msra.mxu0 %v13088_v35  ;;  %3489 = vmatpush1.msra.mxu1 %v13093_v52  ;;  %16736 = vst [vmem:[#allocation41_spill] sm:$0xff] %v13156_v57  ;;  %v13180_v50 = vld [vmem:[%s15826_s3 + $0x160] sm:$0xff]  ;;  %v13185_v49 = vld [vmem:[%s15826_s3 + $0x170] sm:$0xff] }
 0x64e   :  { %3419 = vmatprep.subr.mxu0 %v13098_v14  ;;  %3490 = vmatprep.subr.mxu1 %v13103_v51  ;;  %16740 = vst [vmem:[#allocation50_spill] sm:$0xff] %v13180_v50  ;;  %16741 = vst [vmem:[#allocation51_spill] sm:$0xff] %v13185_v49 }
 0x64f   :  { %3420 = vmatpush1.msra.mxu0 %v13108_v56  ;;  %3491 = vmatpush1.msra.mxu1 %v13113_v47 }
 0x650   :  { %3421 = vmatprep.subr.mxu0 %v13120_v53  ;;  %3492 = vmatprep.subr.mxu1 %v13125_v7  ;;  %v3108_v53 = vrot.slane %v12624_v38, 2  ;;  %v13277_v38 = vld [vmem:[%s15826_s3 + $0xe0] sm:$0xff] }
 0x651   :  { %3422 = vmatpush1.msra.mxu0 %v13132_v5  ;;  %3493 = vmatpush1.msra.mxu1 %v13137_v43  ;;  %v9276_v43 = vpop.eup %9275 }
 0x652   :  { %3423 = vmatprep.subr.mxu0 %v13144_v45  ;;  %3494 = vmatprep.subr.mxu1 %v13149_v58  ;;  %v13192_v45 = vld [vmem:[%s15826_s3 + $0x148] sm:$0xff]  ;;  %v13197_v58 = vld [vmem:[%s15826_s3 + $0x158] sm:$0xff]  ;;  %v3104_v56 = vadd.f32 1.0, %v9276_v43 }
 0x653   :  { %3424 = vmatpush1.msra.mxu0 %v13156_v57  ;;  %3495 = vmatpush1.msra.mxu1 %v13161_v55  ;;  %16742 = vst [vmem:[#allocation52_spill] sm:$0xff] %v13192_v45  ;;  %16743 = vst [vmem:[#allocation53_spill] sm:$0xff] %v13197_v58  ;;  %v13204_v57 = vld [vmem:[%s15826_s3 + $0x140] sm:$0xff]  ;;  %v13209_v55 = vld [vmem:[%s15826_s3 + $0x150] sm:$0xff] }
 0x654   :  { %3425 = vmatprep.subr.mxu0 %v13168_v48  ;;  %3496 = vmatprep.subr.mxu1 %v13173_v54  ;;  %16744 = vst [vmem:[#allocation58_spill] sm:$0xff] %v13204_v57  ;;  %16745 = vst [vmem:[#allocation54_spill] sm:$0xff] %v13209_v55  ;;  %v13216_v48 = vld [vmem:[%s15826_s3 + $0x128] sm:$0xff]  ;;  %v13221_v54 = vld [vmem:[%s15826_s3 + $0x138] sm:$0xff]  ;;  %9283 = vrcp.f32 %v3104_v56 }
 0x655   :  { %3426 = vmatpush1.msra.mxu0 %v13180_v50  ;;  %3497 = vmatpush1.msra.mxu1 %v13185_v49  ;;  %16746 = vst [vmem:[#allocation55_spill] sm:$0xff] %v13216_v48  ;;  %16747 = vst [vmem:[#allocation56_spill] sm:$0xff] %v13221_v54  ;;  %v13228_v50 = vld [vmem:[%s15826_s3 + $0x120] sm:$0xff]  ;;  %v13233_v49 = vld [vmem:[%s15826_s3 + $0x130] sm:$0xff] }
 0x656   :  { %3427 = vmatprep.subr.mxu0 %v13192_v45  ;;  %3498 = vmatprep.subr.mxu1 %v13197_v58  ;;  %16748 = vst [vmem:[#allocation57_spill] sm:$0xff] %v13228_v50  ;;  %16749 = vst [vmem:[#allocation59_spill] sm:$0xff] %v13233_v49  ;;  %v13240_v45 = vld [vmem:[%s15826_s3 + $0x108] sm:$0xff]  ;;  %v13245_v58 = vld [vmem:[%s15826_s3 + $0x118] sm:$0xff] }
 0x657   :  { %3428 = vmatpush1.msra.mxu0 %v13204_v57  ;;  %3499 = vmatpush1.msra.mxu1 %v13209_v55  ;;  %16750 = vst [vmem:[#allocation60_spill] sm:$0xff] %v13245_v58  ;;  %v13252_v57 = vld [vmem:[%s15826_s3 + $0x100] sm:$0xff]  ;;  %v13257_v55 = vld [vmem:[%s15826_s3 + $0x110] sm:$0xff]  ;;  %v13289_v43 = vld [vmem:[%s15826_s3 + $0xc8] sm:$0xff] }
 0x658   :  { %v9278_v5 = vpop.eup %9277  ;;  %3429 = vmatprep.subr.mxu0 %v13216_v48  ;;  %3500 = vmatprep.subr.mxu1 %v13221_v54  ;;  %v13265_v54 = vld [vmem:[%s15826_s3 + $0xe8] sm:$0xff]  ;;  %v13270_v48 = vld [vmem:[%s15826_s3 + $0xf8] sm:$0xff] }
 0x659   :  { %v9280_v7 = vpop.eup %9279  ;;  %3430 = vmatpush1.msra.mxu0 %v13228_v50  ;;  %3501 = vmatpush1.msra.mxu1 %v13233_v49  ;;  %16751 = vst [vmem:[#allocation61_spill] sm:$0xff] %v13270_v48  ;;  %v13282_v49 = vld [vmem:[%s15826_s3 + $0xf0] sm:$0xff]  ;;  %v13339_v56 = vld [vmem:[%s15826_s3 + $0x88] sm:$0xff] }
 0x65a   :  { %v9282_v47 = vpop.eup %9281  ;;  %3431 = vmatprep.subr.mxu0 %v13240_v45  ;;  %3502 = vmatprep.subr.mxu1 %v13245_v58  ;;  %v3111_v50 = vmul.f32 %v9280_v7, %v9278_v5  ;;  %v13294_v58 = vld [vmem:[%s15826_s3 + $0xd8] sm:$0xff]  ;;  %v13315_v5 = vld [vmem:[%s15826_s3 + $0xa8] sm:$0xff]  ;;  %16759 = vst [vmem:[#allocation69_spill] sm:$0xff] %v13339_v56 }
 0x65b   :  { %v3110_v51 = vmul.f32 %v9282_v47, %v3108_v53  ;;  %3432 = vmatpush1.msra.mxu0 %v13252_v57  ;;  %3503 = vmatpush1.msra.mxu1 %v13257_v55  ;;  %16752 = vst [vmem:[#allocation62_spill] sm:$0xff] %v13294_v58  ;;  %v13301_v47 = vld [vmem:[%s15826_s3 + $0xc0] sm:$0xff]  ;;  %v13306_v53 = vld [vmem:[%s15826_s3 + $0xd0] sm:$0xff]  ;;  %16755 = vst [vmem:[#allocation65_spill] sm:$0xff] %v13315_v5 }
 0x65c   :  { %3433 = vmatprep.subr.mxu0 %v13265_v54  ;;  %3504 = vmatprep.subr.mxu1 %v13270_v48  ;;  %16753 = vst [vmem:[#allocation63_spill] sm:$0xff] %v13301_v47  ;;  %16754 = vst [vmem:[#allocation64_spill] sm:$0xff] %v13306_v53  ;;  %v13320_v48 = vld [vmem:[%s15826_s3 + $0xb8] sm:$0xff] }
 0x65d   :  { %v13308_v7 = vadd.f32 %v3111_v50, %v3110_v51  ;;  %3434 = vmatpush1.msra.mxu0 %v13277_v38  ;;  %3505 = vmatpush1.msra.mxu1 %v13282_v49  ;;  %16756 = vst [vmem:[#allocation66_spill] sm:$0xff] %v13320_v48  ;;  %v13327_v51 = vld [vmem:[%s15826_s3 + $0xa0] sm:$0xff]  ;;  %v13332_v50 = vld [vmem:[%s15826_s3 + $0xb0] sm:$0xff] }
 0x65e   :  { %3435 = vmatprep.subr.mxu0 %v13289_v43  ;;  %3506 = vmatprep.subr.mxu1 %v13294_v58  ;;  %16757 = vst [vmem:[#allocation67_spill] sm:$0xff] %v13327_v51  ;;  %16758 = vst [vmem:[#allocation68_spill] sm:$0xff] %v13332_v50  ;;  %v13344_v58 = vld [vmem:[%s15826_s3 + $0x98] sm:$0xff] }
 0x65f   :  { %3436 = vmatpush1.msra.mxu0 %v13301_v47  ;;  %3507 = vmatpush1.msra.mxu1 %v13306_v53  ;;  %16760 = vst [vmem:[#allocation70_spill] sm:$0xff] %v13344_v58  ;;  %9285 = vtanh.f32 %v13308_v7  ;;  %v13352_v53 = vld [vmem:[%s15826_s3 + $0x80] sm:$0xff]  ;;  %v13357_v47 = vld [vmem:[%s15826_s3 + $0x90] sm:$0xff] }
 0x660   :  { %3437 = vmatprep.subr.mxu0 %v13315_v5  ;;  %3508 = vmatprep.subr.mxu1 %v13320_v48  ;;  %16761 = vst [vmem:[#allocation71_spill] sm:$0xff] %v13352_v53  ;;  %16762 = vst [vmem:[#allocation72_spill] sm:$0xff] %v13357_v47  ;;  %v13364_v5 = vld [vmem:[%s15826_s3 + $0x68] sm:$0xff]  ;;  %v13369_v48 = vld [vmem:[%s15826_s3 + $0x78] sm:$0xff] }
 0x661   :  { %3438 = vmatpush1.msra.mxu0 %v13327_v51  ;;  %3509 = vmatpush1.msra.mxu1 %v13332_v50  ;;  %16763 = vst [vmem:[#allocation73_spill] sm:$0xff] %v13364_v5  ;;  %16764 = vst [vmem:[#allocation74_spill] sm:$0xff] %v13369_v48  ;;  %v13376_v51 = vld [vmem:[%s15826_s3 + $0x60] sm:$0xff]  ;;  %v13381_v50 = vld [vmem:[%s15826_s3 + $0x70] sm:$0xff] }
 0x662   :  { %3439 = vmatprep.subr.mxu0 %v13339_v56  ;;  %3510 = vmatprep.subr.mxu1 %v13344_v58  ;;  %16765 = vst [vmem:[#allocation75_spill] sm:$0xff] %v13376_v51  ;;  %16766 = vst [vmem:[#allocation76_spill] sm:$0xff] %v13381_v50  ;;  %v13388_v56 = vld [vmem:[%s15826_s3 + $0x48] sm:$0xff]  ;;  %v13393_v58 = vld [vmem:[%s15826_s3 + $0x58] sm:$0xff] }
 0x663   :  { %3440 = vmatpush1.msra.mxu0 %v13352_v53  ;;  %3511 = vmatpush1.msra.mxu1 %v13357_v47  ;;  %16767 = vst [vmem:[#allocation77_spill] sm:$0xff] %v13388_v56  ;;  %16768 = vst [vmem:[#allocation78_spill] sm:$0xff] %v13393_v58  ;;  %v13400_v53 = vld [vmem:[%s15826_s3 + $0x40] sm:$0xff]  ;;  %v13405_v47 = vld [vmem:[%s15826_s3 + $0x50] sm:$0xff] }
 0x664   :  { %3441 = vmatprep.subr.mxu0 %v13364_v5  ;;  %3512 = vmatprep.subr.mxu1 %v13369_v48  ;;  %16769 = vst [vmem:[#allocation79_spill] sm:$0xff] %v13400_v53  ;;  %16770 = vst [vmem:[#allocation80_spill] sm:$0xff] %v13405_v47  ;;  %v13412_v5 = vld [vmem:[%s15826_s3 + $0x28] sm:$0xff]  ;;  %v13417_v48 = vld [vmem:[%s15826_s3 + $0x38] sm:$0xff] }
 0x665   :  { %3442 = vmatpush1.msra.mxu0 %v13376_v51  ;;  %3513 = vmatpush1.msra.mxu1 %v13381_v50  ;;  %16771 = vst [vmem:[#allocation81_spill] sm:$0xff] %v13412_v5  ;;  %16772 = vst [vmem:[#allocation82_spill] sm:$0xff] %v13417_v48  ;;  %v13424_v51 = vld [vmem:[%s15826_s3 + $0x20] sm:$0xff]  ;;  %v13429_v50 = vld [vmem:[%s15826_s3 + $0x30] sm:$0xff] }
 0x666   :  { %3443 = vmatprep.subr.mxu0 %v13388_v56  ;;  %3514 = vmatprep.subr.mxu1 %v13393_v58  ;;  %16773 = vst [vmem:[#allocation83_spill] sm:$0xff] %v13424_v51  ;;  %16774 = vst [vmem:[#allocation84_spill] sm:$0xff] %v13429_v50  ;;  %v13436_v56 = vld [vmem:[%s15826_s3 + $0x8] sm:$0xff]  ;;  %v13441_v58 = vld [vmem:[%s15826_s3 + $0x18] sm:$0xff] }
 0x667   :  { %3444 = vmatpush1.msra.mxu0 %v13400_v53  ;;  %3515 = vmatpush1.msra.mxu1 %v13405_v47  ;;  %v13448_v53 = vld [vmem:[%s15826_s3] sm:$0xff]  ;;  %v13455_v47 = vld [vmem:[%s15826_s3 + $0x10] sm:$0xff] }
 0x668   :  { %3445 = vmatprep.subr.mxu0 %v13412_v5  ;;  %3516 = vmatprep.subr.mxu1 %v13417_v48  ;;  %v9284_v5 = vpop.eup %9283 }
 0x669   :  { %3446 = vmatpush1.msra.mxu0 %v13424_v51  ;;  %3517 = vmatpush1.msra.mxu1 %v13429_v50 }
 0x66a   :  { %3447 = vmatprep.subr.mxu0 %v13436_v56  ;;  %3518 = vmatprep.subr.mxu1 %v13441_v58 }
 0x66b   :  { %3448 = vmatpush1.msra.mxu0 %v13448_v53  ;;  %3481 = vmatprep.mubr.f32.mxu0 %v16384_v33 }
 0x66c   :  { %v9286_v48 = vpop.eup %9285  ;;  %3519 = vmatpush1.msra.mxu1 %v13455_v47  ;;  %3552 = vmatprep.mubr.f32.mxu1 %v16384_v33 }
 0x66d   :  { %v3114_v50 = vmul.f32 %v9286_v48, %v9284_v5  ;;  %3702 = vmatprep.subr.mxu0 %v12664_v21  ;;  %3773 = vmatprep.subr.mxu1 %v12669_v18  ;;  %v16775_v21 = vld [vmem:[#allocation85_spill] sm:$0xff]  ;;  %v16776_v18 = vld [vmem:[#allocation15_spill] sm:$0xff] }
 0x66f   :  { %3116 = vst [vmem:[#allocation2 + $0x18] sm:$0x30] %v3114_v50  ;;  %v3415_v51 = vrot.slane %v3114_v50, 4 }
 0x671   :  { %3482 = vmatmul.mubr.f32.vlgmr.msra.gmra.mxu0 %v3415_v51  ;;  %3553 = vmatmul.mubr.f32.vlgmr.msra.gmra.mxu1 %v3415_v51 }
 0x672   :  { %3703 = vmatpush1.msra.mxu0 %v12676_v61  ;;  %3774 = vmatpush1.msra.mxu1 %v12681_v20  ;;  %v16777_v61 = vld [vmem:[#allocation16_spill] sm:$0xff]  ;;  %v16778_v20 = vld [vmem:[#allocation17_spill] sm:$0xff] }
 0x673   :  { %3704 = vmatprep.subr.mxu0 %v12688_v13  ;;  %3775 = vmatprep.subr.mxu1 %v12693_v29  ;;  %v16779_v13 = vld [vmem:[#allocation18_spill] sm:$0xff]  ;;  %v16780_v29 = vld [vmem:[#allocation19_spill] sm:$0xff] }
 0x674   :  { %3705 = vmatpush1.msra.mxu0 %v12700_v41  ;;  %3776 = vmatpush1.msra.mxu1 %v12705_v4  ;;  %v16781_v41 = vld [vmem:[#allocation20_spill] sm:$0xff]  ;;  %v16782_v4 = vld [vmem:[#allocation21_spill] sm:$0xff] }
 0x675   :  { %3706 = vmatprep.subr.mxu0 %v12712_v0  ;;  %3777 = vmatprep.subr.mxu1 %v12717_v59  ;;  %v16783_v0 = vld [vmem:[#allocation22_spill] sm:$0xff]  ;;  %v16784_v59 = vld [vmem:[#allocation23_spill] sm:$0xff] }
 0x676   :  { %3707 = vmatpush1.msra.mxu0 %v12724_v62  ;;  %3778 = vmatpush1.msra.mxu1 %v12729_v15  ;;  %v16785_v62 = vld [vmem:[#allocation24_spill] sm:$0xff]  ;;  %v16786_v15 = vld [vmem:[#allocation25_spill] sm:$0xff] }
 0x677   :  { %3708 = vmatprep.subr.mxu0 %v12736_v27  ;;  %3779 = vmatprep.subr.mxu1 %v12741_v16  ;;  %v16787_v27 = vld [vmem:[#allocation26_spill] sm:$0xff]  ;;  %v16788_v16 = vld [vmem:[#allocation27_spill] sm:$0xff] }
 0x678   :  { %3709 = vmatpush1.msra.mxu0 %v12748_v60  ;;  %3780 = vmatpush1.msra.mxu1 %v12753_v10  ;;  %v16789_v60 = vld [vmem:[#allocation28_spill] sm:$0xff]  ;;  %v16790_v10 = vld [vmem:[#allocation29_spill] sm:$0xff] }
 0x679   :  { %3710 = vmatprep.subr.mxu0 %v12760_v32  ;;  %3781 = vmatprep.subr.mxu1 %v12765_v22  ;;  %v16791_v32 = vld [vmem:[#allocation30_spill] sm:$0xff]  ;;  %v16792_v22 = vld [vmem:[#allocation31_spill] sm:$0xff] }
 0x67a   :  { %3711 = vmatpush1.msra.mxu0 %v12772_v12  ;;  %3782 = vmatpush1.msra.mxu1 %v12777_v63  ;;  %v16793_v12 = vld [vmem:[#allocation42_spill] sm:$0xff]  ;;  %v16794_v63 = vld [vmem:[#allocation32_spill] sm:$0xff] }
 0x67b   :  { %3712 = vmatprep.subr.mxu0 %v12784_v17  ;;  %3783 = vmatprep.subr.mxu1 %v12790_v9  ;;  %v16795_v17 = vld [vmem:[#allocation43_spill] sm:$0xff]  ;;  %v16796_v9 = vld [vmem:[#allocation33_spill] sm:$0xff] }
 0x67c   :  { %3713 = vmatpush1.msra.mxu0 %v12795_v34  ;;  %3784 = vmatpush1.msra.mxu1 %v12800_v1  ;;  %v16797_v34 = vld [vmem:[#allocation44_spill] sm:$0xff]  ;;  %v3117_v1 = vld [vmem:[%s15823_s0 + $0x20] sm:$0x30] }
 0x67d   :  { %3714 = vmatprep.subr.mxu0 %v12807_v37  ;;  %3785 = vmatprep.subr.mxu1 %v12814_v23 }
 0x67e   :  { %3715 = vmatpush1.msra.mxu0 %v12819_v42  ;;  %3786 = vmatpush1.msra.mxu1 %v12824_v11  ;;  %v3118_v42 = vld [vmem:[%s15823_s0 + $0x28] sm:$0x30] }
 0x67f   :  { %3716 = vmatprep.subr.mxu0 %v12831_v6  ;;  %3787 = vmatprep.subr.mxu1 %v12836_v25 }
 0x680   :  { %3717 = vmatpush1.msra.mxu0 %v12843_v26  ;;  %3788 = vmatpush1.msra.mxu1 %v12848_v28 }
 0x681   :  { %3718 = vmatprep.subr.mxu0 %v12855_v40  ;;  %3789 = vmatprep.subr.mxu1 %v12860_v30 }
 0x682   :  { %3719 = vmatpush1.msra.mxu0 %v12867_v2  ;;  %3790 = vmatpush1.msra.mxu1 %v12872_v36 }
 0x683   :  { %3720 = vmatprep.subr.mxu0 %v12879_v31  ;;  %3791 = vmatprep.subr.mxu1 %v12884_v8  ;;  %v3120_v31 = vld [vmem:[%s15823_s0 + $0x38] sm:$0x30] }
 0x684   :  { %3721 = vmatpush1.msra.mxu0 %v12891_v39  ;;  %3792 = vmatpush1.msra.mxu1 %v12896_v3  ;;  %v3119_v3 = vld [vmem:[%s15823_s0 + $0x30] sm:$0x30] }
 0x685   :  { %3722 = vmatprep.subr.mxu0 %v12903_v24  ;;  %3793 = vmatprep.subr.mxu1 %v12908_v44 }
 0x686   :  { %3723 = vmatpush1.msra.mxu0 %v12915_v46  ;;  %3794 = vmatpush1.msra.mxu1 %v16775_v21 }
 0x687   :  { %3724 = vmatprep.subr.mxu0 %v16776_v18  ;;  %3795 = vmatprep.subr.mxu1 %v16777_v61  ;;  %v3595_v61 = vrot.slane %v13076_v19, 6 }
 0x688   :  { %3725 = vmatpush1.msra.mxu0 %v16778_v20  ;;  %3796 = vmatpush1.msra.mxu1 %v16779_v13  ;;  %v3346_v20 = vld [vmem:[%s15824_s1] sm:$0xc] }
 0x689   :  { %3726 = vmatprep.subr.mxu0 %v16780_v29  ;;  %3797 = vmatprep.subr.mxu1 %v16781_v41 }
 0x68a   :  { %3727 = vmatpush1.msra.mxu0 %v16782_v4  ;;  %3798 = vmatpush1.msra.mxu1 %v16783_v0 }
 0x68b   :  { %3728 = vmatprep.subr.mxu0 %v16784_v59  ;;  %3799 = vmatprep.subr.mxu1 %v16785_v62  ;;  %v3347_v62 = vld [vmem:[%s15824_s1 + $0x8] sm:$0xc] }
 0x68c   :  { %3729 = vmatpush1.msra.mxu0 %v16786_v15  ;;  %3800 = vmatpush1.msra.mxu1 %v16787_v27 }
 0x68d   :  { %3730 = vmatprep.subr.mxu0 %v16788_v16  ;;  %3801 = vmatprep.subr.mxu1 %v16789_v60 }
 0x68e   :  { %3731 = vmatpush1.msra.mxu0 %v16790_v10  ;;  %3802 = vmatpush1.msra.mxu1 %v16791_v32 }
 0x68f   :  { %3732 = vmatprep.subr.mxu0 %v16792_v22  ;;  %3803 = vmatprep.subr.mxu1 %v16793_v12 }
 0x690   :  { %3733 = vmatpush1.msra.mxu0 %v16794_v63  ;;  %3766 = vmatprep.mubr.f32.mxu0 %v16384_v33 }
 0x691   :  { %3804 = vmatpush1.msra.mxu1 %v16795_v17  ;;  %3837 = vmatprep.mubr.f32.mxu1 %v16384_v33  ;;  %v3349_v17 = vld [vmem:[%s15824_s1 + $0x18] sm:$0xc] }
 0x692   :  { %3931 = vmatprep.subr.mxu0 %v16796_v9  ;;  %4002 = vmatprep.subr.mxu1 %v16797_v34 }
 0x70c   :  { %v3254_v37 = vpop.f32.mrf.mxu0  ;;  %v3325_v25 = vpop.f32.mrf.mxu1 }
 0x70d   :  { %v3334_v23 = vrot.slane %v3254_v37, 4  ;;  %v3336_v39 = vrot.slane %v3325_v25, 4 }
 0x70e   :  { %v3256_v11 = vpop.f32.mrf.mxu0  ;;  %v3327_v2 = vpop.f32.mrf.mxu1 }
 0x70f   :  { %v3342_v6 = vadd.f32 %v3334_v23, %v3117_v1  ;;  %v3335_v26 = vrot.slane %v3256_v11, 4  ;;  %v3337_v36 = vrot.slane %v3327_v2, 4  ;;  %v3344_v46 = vadd.f32 %v3336_v39, %v3119_v3  ;;  %v3348_v1 = vld [vmem:[%s15824_s1 + $0x10] sm:$0xc]  ;;  %v16798_v2 = vld [vmem:[#allocation34_spill] sm:$0xff]  ;;  %v16802_v39 = vld [vmem:[#allocation36_spill] sm:$0xff] }
 0x710   :  { %v16803_v3 = vld [vmem:[#allocation37_spill] sm:$0xff] }
 0x711   :  { %v8985_v28 = vmul.f32 -1.442695, %v3342_v6  ;;  %v3343_v40 = vadd.f32 %v3335_v26, %v3118_v42  ;;  %v3345_v8 = vadd.f32 %v3337_v36, %v3120_v31  ;;  %v16799_v36 = vld [vmem:[#allocation45_spill] sm:$0xff]  ;;  %v16800_v31 = vld [vmem:[#allocation35_spill] sm:$0xff] }
 0x713   :  { %9287 = vpow2.f32 %v8985_v28  ;;  %v8986_v30 = vmul.f32 -1.442695, %v3343_v40  ;;  %v8987_v24 = vmul.f32 -1.442695, %v3345_v8  ;;  %v16801_v8 = vld [vmem:[#allocation46_spill] sm:$0xff] }
 0x715   :  { %9289 = vpow2.f32 %v8986_v30 }
 0x716   :  { %9291 = vpow2.f32 %v8987_v24  ;;  %v16804_v24 = vld [vmem:[#allocation38_spill] sm:$0xff] }
 0x720   :  { %v9288_v44 = vpop.eup %9287 }
 0x721   :  { %v3578_v48 = vadd.f32 1.0, %v9288_v44  ;;  %v16805_v44 = vld [vmem:[#allocation39_spill] sm:$0xff] }
 0x722   :  { %v9290_v5 = vpop.eup %9289 }
 0x723   :  { %9293 = vrcp.f32 %v3578_v48  ;;  %v3584_v51 = vadd.f32 1.0, %v9290_v5  ;;  %v9292_v50 = vpop.eup %9291  ;;  %v16810_v48 = vld [vmem:[#allocation49_spill] sm:$0xff]  ;;  %v16811_v5 = vld [vmem:[#allocation50_spill] sm:$0xff] }
 0x724   :  { %9295 = vtanh.f32 %v3344_v46  ;;  %v3591_v41 = vadd.f32 1.0, %v9292_v50  ;;  %v16809_v46 = vld [vmem:[#allocation48_spill] sm:$0xff] }
 0x725   :  { %9297 = vrcp.f32 %v3584_v51  ;;  %v16812_v51 = vld [vmem:[#allocation51_spill] sm:$0xff]  ;;  %v16813_v50 = vld [vmem:[#allocation52_spill] sm:$0xff] }
 0x726   :  { %9299 = vrcp.f32 %v3591_v41  ;;  %v16818_v41 = vld [vmem:[#allocation56_spill] sm:$0xff] }
 0x730   :  { %v9294_v21 = vpop.eup %9293 }
 0x731   :  { %v9296_v18 = vpop.eup %9295  ;;  %v3483_v13 = vpop.f32.mrf.mxu0 }
 0x732   :  { %v9298_v29 = vpop.eup %9297  ;;  %v3563_v4 = vrot.slane %v3483_v13, 6  ;;  %v3598_v0 = vmul.f32 %v9296_v18, %v9294_v21  ;;  %v3554_v16 = vpop.f32.mrf.mxu1  ;;  %v16814_v21 = vld [vmem:[#allocation53_spill] sm:$0xff] }
 0x733   :  { %v3597_v59 = vmul.f32 %v9298_v29, %v3595_v61  ;;  %v3485_v15 = vpop.f32.mrf.mxu0  ;;  %v3565_v34 = vrot.slane %v3554_v16, 6  ;;  %v9300_v37 = vpop.eup %9299  ;;  %v16815_v61 = vld [vmem:[#allocation58_spill] sm:$0xff]  ;;  %v16817_v29 = vld [vmem:[#allocation55_spill] sm:$0xff]  ;;  %v16821_v16 = vld [vmem:[#allocation60_spill] sm:$0xff] }
 0x734   :  { %v3571_v27 = vadd.f32 %v3563_v4, %v3346_v20  ;;  %v3564_v60 = vrot.slane %v3485_v15, 6  ;;  %v3556_v12 = vpop.f32.mrf.mxu1  ;;  %v16816_v20 = vld [vmem:[#allocation54_spill] sm:$0xff] }
 0x735   :  { %v13550_v10 = vadd.f32 %v3598_v0, %v3597_v59  ;;  %v3566_v63 = vrot.slane %v3556_v12, 6  ;;  %v3573_v6 = vadd.f32 %v3565_v34, %v3348_v1  ;;  %v3622_v0 = vrot.slane %v13308_v7, 2  ;;  %v16819_v59 = vld [vmem:[#allocation57_spill] sm:$0xff]  ;;  %v16828_v12 = vld [vmem:[#allocation67_spill] sm:$0xff]  ;;  %v16835_v34 = vld [vmem:[#allocation74_spill] sm:$0xff] }
 0x736   :  { %v8988_v19 = vmul.f32 -1.442695, %v3571_v27  ;;  %v3572_v32 = vadd.f32 %v3564_v60, %v3347_v62  ;;  %v16820_v62 = vld [vmem:[#allocation59_spill] sm:$0xff] }
 0x737   :  { %9301 = vtanh.f32 %v13550_v10  ;;  %v3574_v9 = vadd.f32 %v3566_v63, %v3349_v17  ;;  %v16831_v63 = vld [vmem:[#allocation70_spill] sm:$0xff]  ;;  %v16833_v17 = vld [vmem:[#allocation72_spill] sm:$0xff]  ;;  %v16836_v1 = vld [vmem:[#allocation75_spill] sm:$0xff] }
 0x738   :  { %9303 = vpow2.f32 %v8988_v19  ;;  %v8989_v22 = vmul.f32 -1.442695, %v3572_v32  ;;  %v16822_v32 = vld [vmem:[#allocation61_spill] sm:$0xff] }
 0x739   :  { %v8990_v23 = vmul.f32 -1.442695, %v3574_v9  ;;  %v16834_v9 = vld [vmem:[#allocation73_spill] sm:$0xff] }
 0x73a   :  { %9305 = vpow2.f32 %v8989_v22  ;;  %v16824_v22 = vld [vmem:[#allocation63_spill] sm:$0xff] }
 0x73b   :  { %9307 = vpow2.f32 %v8990_v23  ;;  %v16838_v23 = vld [vmem:[#allocation77_spill] sm:$0xff] }
 0x744   :  { %v9302_v42 = vpop.eup %9301 }
 0x745   :  { %v9304_v11 = vpop.eup %9303  ;;  %v3601_v25 = vmul.f32 %v9302_v42, %v9300_v37  ;;  %v16837_v37 = vld [vmem:[#allocation76_spill] sm:$0xff]  ;;  %v16839_v42 = vld [vmem:[#allocation78_spill] sm:$0xff] }
 0x746   :  { %v3605_v26 = vadd.f32 1.0, %v9304_v11  ;;  %v16840_v11 = vld [vmem:[#allocation79_spill] sm:$0xff] }
 0x747   :  { %v9306_v28 = vpop.eup %9305  ;;  %3629 = vst [vmem:[#allocation2 + $0x8] sm:$0x30] %v3601_v25  ;;  %v3700_v40 = vrot.slane %v3601_v25, 4  ;;  %v16842_v25 = vld [vmem:[#allocation81_spill] sm:$0xff] }
 0x748   :  { %9309 = vrcp.f32 %v3605_v26  ;;  %v3611_v30 = vadd.f32 1.0, %v9306_v28  ;;  %v9308_v18 = vpop.eup %9307  ;;  %v16843_v26 = vld [vmem:[#allocation82_spill] sm:$0xff]  ;;  %v16844_v28 = vld [vmem:[#allocation83_spill] sm:$0xff] }
 0x749   :  { %9311 = vtanh.f32 %v3573_v6  ;;  %3767 = vmatmul.mubr.f32.vlgmr.msra.gmra.mxu0 %v3700_v40  ;;  %3838 = vmatmul.mubr.f32.vlgmr.msra.gmra.mxu1 %v3700_v40  ;;  %v3618_v27 = vadd.f32 1.0, %v9308_v18  ;;  %v16841_v6 = vld [vmem:[#allocation80_spill] sm:$0xff]  ;;  %v4225_v18 = vld [vmem:[#allocation5 + $0x2c0] sm:$0xff] }
 0x74a   :  { %9313 = vrcp.f32 %v3611_v30  ;;  %3932 = vmatpush1.msra.mxu0 %v13088_v35  ;;  %4003 = vmatpush1.msra.mxu1 %v13093_v52  ;;  %v16806_v35 = vld [vmem:[#allocation40_spill] sm:$0xff]  ;;  %v16807_v52 = vld [vmem:[#allocation41_spill] sm:$0xff] }
 0x74b   :  { %3933 = vmatprep.subr.mxu0 %v13098_v14  ;;  %4004 = vmatprep.subr.mxu1 %v16798_v2  ;;  %v16808_v14 = vld [vmem:[#allocation47_spill] sm:$0xff]  ;;  %9315 = vrcp.f32 %v3618_v27  ;;  %v16845_v40 = vld [vmem:[#allocation84_spill] sm:$0xff]  ;;  %v4204_v27 = vld [vmem:[#allocation5 + $0x218] sm:$0xff] }
 0x74c   :  { %3934 = vmatpush1.msra.mxu0 %v16799_v36  ;;  %4005 = vmatpush1.msra.mxu1 %v16800_v31 }
 0x74d   :  { %3935 = vmatprep.subr.mxu0 %v16801_v8  ;;  %4006 = vmatprep.subr.mxu1 %v16802_v39  ;;  %v4258_v8 = vld [vmem:[#allocation5 + $0x3c8] sm:$0xff]  ;;  %v4257_v39 = vld [vmem:[#allocation5 + $0x3c0] sm:$0xff] }
 0x74e   :  { %3936 = vmatpush1.msra.mxu0 %v16803_v3  ;;  %4007 = vmatpush1.msra.mxu1 %v16804_v24  ;;  %v4252_v3 = vld [vmem:[#allocation5 + $0x398] sm:$0xff]  ;;  %v4249_v24 = vld [vmem:[#allocation5 + $0x380] sm:$0xff] }
 0x74f   :  { %3937 = vmatprep.subr.mxu0 %v16805_v44  ;;  %4008 = vmatprep.subr.mxu1 %v16806_v35  ;;  %v4242_v44 = vld [vmem:[#allocation5 + $0x348] sm:$0xff]  ;;  %v4244_v35 = vld [vmem:[#allocation5 + $0x358] sm:$0xff] }
 0x750   :  { %3938 = vmatpush1.msra.mxu0 %v16807_v52  ;;  %4009 = vmatpush1.msra.mxu1 %v16808_v14  ;;  %v4241_v52 = vld [vmem:[#allocation5 + $0x340] sm:$0xff]  ;;  %v4243_v14 = vld [vmem:[#allocation5 + $0x350] sm:$0xff] }
 0x751   :  { %3939 = vmatprep.subr.mxu0 %v16809_v46  ;;  %4010 = vmatprep.subr.mxu1 %v16810_v48  ;;  %v4234_v46 = vld [vmem:[#allocation5 + $0x308] sm:$0xff]  ;;  %v4236_v48 = vld [vmem:[#allocation5 + $0x318] sm:$0xff] }
 0x752   :  { %3940 = vmatpush1.msra.mxu0 %v16811_v5  ;;  %4011 = vmatpush1.msra.mxu1 %v16812_v51  ;;  %v4233_v5 = vld [vmem:[#allocation5 + $0x300] sm:$0xff]  ;;  %v4235_v51 = vld [vmem:[#allocation5 + $0x310] sm:$0xff] }
 0x753   :  { %3941 = vmatprep.subr.mxu0 %v16813_v50  ;;  %4012 = vmatprep.subr.mxu1 %v16814_v21  ;;  %v4226_v50 = vld [vmem:[#allocation5 + $0x2c8] sm:$0xff]  ;;  %v4228_v21 = vld [vmem:[#allocation5 + $0x2d8] sm:$0xff] }
 0x754   :  { %3942 = vmatpush1.msra.mxu0 %v16815_v61  ;;  %4013 = vmatpush1.msra.mxu1 %v16816_v20  ;;  %v4227_v61 = vld [vmem:[#allocation5 + $0x2d0] sm:$0xff]  ;;  %v4218_v20 = vld [vmem:[#allocation5 + $0x288] sm:$0xff] }
 0x755   :  { %v9310_v13 = vpop.eup %9309  ;;  %3943 = vmatprep.subr.mxu0 %v16817_v29  ;;  %4014 = vmatprep.subr.mxu1 %v16818_v41  ;;  %v4217_v29 = vld [vmem:[#allocation5 + $0x280] sm:$0xff]  ;;  %v4219_v41 = vld [vmem:[#allocation5 + $0x290] sm:$0xff] }
 0x756   :  { %v9312_v4 = vpop.eup %9311  ;;  %3944 = vmatpush1.msra.mxu0 %v16819_v59  ;;  %4015 = vmatpush1.msra.mxu1 %v16820_v62  ;;  %v4209_v59 = vld [vmem:[#allocation5 + $0x240] sm:$0xff]  ;;  %v4211_v62 = vld [vmem:[#allocation5 + $0x250] sm:$0xff] }
 0x757   :  { %v9314_v15 = vpop.eup %9313  ;;  %3945 = vmatprep.subr.mxu0 %v13240_v45  ;;  %4016 = vmatprep.subr.mxu1 %v16821_v16  ;;  %v3625_v60 = vmul.f32 %v9312_v4, %v9310_v13  ;;  %v16823_v45 = vld [vmem:[#allocation62_spill] sm:$0xff]  ;;  %v4210_v4 = vld [vmem:[#allocation5 + $0x248] sm:$0xff]  ;;  %v4201_v16 = vld [vmem:[#allocation5 + $0x200] sm:$0xff] }
 0x758   :  { %v3624_v19 = vmul.f32 %v9314_v15, %v3622_v0  ;;  %3946 = vmatpush1.msra.mxu0 %v13252_v57  ;;  %4017 = vmatpush1.msra.mxu1 %v13257_v55  ;;  %v16825_v57 = vld [vmem:[#allocation64_spill] sm:$0xff]  ;;  %v16826_v55 = vld [vmem:[#allocation65_spill] sm:$0xff]  ;;  %v9316_v30 = vpop.eup %9315  ;;  %v4220_v13 = vld [vmem:[#allocation5 + $0x298] sm:$0xff] }
 0x759   :  { %3947 = vmatprep.subr.mxu0 %v13265_v54  ;;  %4018 = vmatprep.subr.mxu1 %v16822_v32  ;;  %v16827_v54 = vld [vmem:[#allocation66_spill] sm:$0xff]  ;;  %v4202_v15 = vld [vmem:[#allocation5 + $0x208] sm:$0xff] }
 0x75a   :  { %v13592_v7 = vadd.f32 %v3625_v60, %v3624_v19  ;;  %3948 = vmatpush1.msra.mxu0 %v13277_v38  ;;  %4019 = vmatpush1.msra.mxu1 %v13282_v49  ;;  %v16829_v38 = vld [vmem:[#allocation68_spill] sm:$0xff]  ;;  %v16830_v49 = vld [vmem:[#allocation69_spill] sm:$0xff]  ;;  %v4212_v0 = vld [vmem:[#allocation5 + $0x258] sm:$0xff] }
 0x75b   :  { %3949 = vmatprep.subr.mxu0 %v13289_v43  ;;  %4020 = vmatprep.subr.mxu1 %v16823_v45  ;;  %v16832_v43 = vld [vmem:[#allocation71_spill] sm:$0xff]  ;;  %v4203_v60 = vld [vmem:[#allocation5 + $0x210] sm:$0xff]  ;;  %v4194_v19 = vld [vmem:[#allocation5 + $0x1c8] sm:$0xff] }
 0x75c   :  { %3950 = vmatpush1.msra.mxu0 %v16824_v22  ;;  %4021 = vmatpush1.msra.mxu1 %v16825_v57  ;;  %9317 = vtanh.f32 %v13592_v7  ;;  %v4196_v32 = vld [vmem:[#allocation5 + $0x1d8] sm:$0xff]  ;;  %v4193_v45 = vld [vmem:[#allocation5 + $0x1c0] sm:$0xff]  ;;  %v4195_v22 = vld [vmem:[#allocation5 + $0x1d0] sm:$0xff] }
 0x75d   :  { %3951 = vmatprep.subr.mxu0 %v16826_v55  ;;  %4022 = vmatprep.subr.mxu1 %v16827_v54  ;;  %v4186_v57 = vld [vmem:[#allocation5 + $0x188] sm:$0xff]  ;;  %v4188_v55 = vld [vmem:[#allocation5 + $0x198] sm:$0xff]  ;;  %v4185_v54 = vld [vmem:[#allocation5 + $0x180] sm:$0xff] }
 0x75e   :  { %3952 = vmatpush1.msra.mxu0 %v16828_v12  ;;  %4023 = vmatpush1.msra.mxu1 %v16829_v38  ;;  %v4187_v12 = vld [vmem:[#allocation5 + $0x190] sm:$0xff]  ;;  %v4178_v38 = vld [vmem:[#allocation5 + $0x148] sm:$0xff] }
 0x75f   :  { %3953 = vmatprep.subr.mxu0 %v16830_v49  ;;  %4024 = vmatprep.subr.mxu1 %v16831_v63  ;;  %v4180_v49 = vld [vmem:[#allocation5 + $0x158] sm:$0xff]  ;;  %v4177_v63 = vld [vmem:[#allocation5 + $0x140] sm:$0xff] }
 0x760   :  { %3954 = vmatpush1.msra.mxu0 %v16832_v43  ;;  %4025 = vmatpush1.msra.mxu1 %v16833_v17  ;;  %v4179_v43 = vld [vmem:[#allocation5 + $0x150] sm:$0xff]  ;;  %v4170_v17 = vld [vmem:[#allocation5 + $0x108] sm:$0xff] }
 0x761   :  { %3955 = vmatprep.subr.mxu0 %v16834_v9  ;;  %4026 = vmatprep.subr.mxu1 %v16835_v34  ;;  %v4172_v9 = vld [vmem:[#allocation5 + $0x118] sm:$0xff]  ;;  %v4169_v34 = vld [vmem:[#allocation5 + $0x100] sm:$0xff] }
 0x762   :  { %3956 = vmatpush1.msra.mxu0 %v16836_v1  ;;  %4027 = vmatpush1.msra.mxu1 %v16837_v37  ;;  %v4171_v1 = vld [vmem:[#allocation5 + $0x110] sm:$0xff]  ;;  %v4162_v37 = vld [vmem:[#allocation5 + $0xc8] sm:$0xff] }
 0x763   :  { %3957 = vmatprep.subr.mxu0 %v16838_v23  ;;  %4028 = vmatprep.subr.mxu1 %v16839_v42  ;;  %v4164_v23 = vld [vmem:[#allocation5 + $0xd8] sm:$0xff]  ;;  %v4161_v42 = vld [vmem:[#allocation5 + $0xc0] sm:$0xff] }
 0x764   :  { %3958 = vmatpush1.msra.mxu0 %v16840_v11  ;;  %4029 = vmatpush1.msra.mxu1 %v16841_v6  ;;  %v4163_v11 = vld [vmem:[#allocation5 + $0xd0] sm:$0xff]  ;;  %v4154_v6 = vld [vmem:[#allocation5 + $0x88] sm:$0xff] }
 0x765   :  { %3959 = vmatprep.subr.mxu0 %v16842_v25  ;;  %4030 = vmatprep.subr.mxu1 %v16843_v26  ;;  %v4156_v25 = vld [vmem:[#allocation5 + $0x98] sm:$0xff]  ;;  %v4153_v26 = vld [vmem:[#allocation5 + $0x80] sm:$0xff] }
 0x766   :  { %3960 = vmatpush1.msra.mxu0 %v16844_v28  ;;  %4031 = vmatpush1.msra.mxu1 %v16845_v40  ;;  %v4155_v28 = vld [vmem:[#allocation5 + $0x90] sm:$0xff]  ;;  %v4146_v40 = vld [vmem:[#allocation5 + $0x48] sm:$0xff] }
 0x767   :  { %3961 = vmatprep.subr.mxu0 %v13436_v56  ;;  %4032 = vmatprep.subr.mxu1 %v13441_v58  ;;  %v4260_v56 = vld [vmem:[#allocation5 + $0x3d8] sm:$0xff]  ;;  %v4259_v58 = vld [vmem:[#allocation5 + $0x3d0] sm:$0xff] }
 0x768   :  { %3962 = vmatpush1.msra.mxu0 %v13448_v53  ;;  %3995 = vmatprep.mubr.f32.mxu0 %v16384_v33  ;;  %v4250_v53 = vld [vmem:[#allocation5 + $0x388] sm:$0xff] }
 0x769   :  { %v9318_v2 = vpop.eup %9317  ;;  %4033 = vmatpush1.msra.mxu1 %v13455_v47  ;;  %4066 = vmatprep.mubr.f32.mxu1 %v16384_v33  ;;  %v4251_v47 = vld [vmem:[#allocation5 + $0x390] sm:$0xff] }
 0x76a   :  { %v3628_v36 = vmul.f32 %v9318_v2, %v9316_v30  ;;  %4435 = vmatprep.subr.mxu0 %v4258_v8  ;;  %4512 = vmatprep.subr.mxu1 %v4260_v56  ;;  %v4148_v30 = vld [vmem:[#allocation5 + $0x58] sm:$0xff]  ;;  %v4145_v2 = vld [vmem:[#allocation5 + $0x40] sm:$0xff] }
 0x76b   :  { %v4140_v8 = vld [vmem:[#allocation5 + $0x18] sm:$0xff]  ;;  %v4137_v56 = vld [vmem:[#allocation5] sm:$0xff] }
 0x76c   :  { %3630 = vst [vmem:[#allocation2 + $0x18] sm:$0xc] %v3628_v36  ;;  %v3929_v31 = vrot.slane %v3628_v36, 2  ;;  %v4147_v36 = vld [vmem:[#allocation5 + $0x50] sm:$0xff] }
 0x76e   :  { %3996 = vmatmul.mubr.f32.vlgmr.msra.gmra.mxu0 %v3929_v31  ;;  %4067 = vmatmul.mubr.f32.vlgmr.msra.gmra.mxu1 %v3929_v31  ;;  %v4138_v31 = vld [vmem:[#allocation5 + $0x8] sm:$0xff] }
 0x76f   :  { %4436 = vmatpush1.msra.mxu0 %v4257_v39  ;;  %4513 = vmatpush1.msra.mxu1 %v4259_v58  ;;  %v4139_v39 = vld [vmem:[#allocation5 + $0x10] sm:$0xff]  ;;  %v4386_v58 = vld [vmem:[#allocation5 + $0x7c8] sm:$0xff] }
 0x770   :  { %4437 = vmatprep.subr.mxu0 %v4250_v53  ;;  %4514 = vmatprep.subr.mxu1 %v4252_v3  ;;  %v4388_v53 = vld [vmem:[#allocation5 + $0x7d8] sm:$0xff]  ;;  %v4385_v3 = vld [vmem:[#allocation5 + $0x7c0] sm:$0xff] }
 0x771   :  { %4438 = vmatpush1.msra.mxu0 %v4249_v24  ;;  %4515 = vmatpush1.msra.mxu1 %v4251_v47  ;;  %v4387_v24 = vld [vmem:[#allocation5 + $0x7d0] sm:$0xff]  ;;  %v4378_v47 = vld [vmem:[#allocation5 + $0x788] sm:$0xff] }
 0x772   :  { %4439 = vmatprep.subr.mxu0 %v4242_v44  ;;  %4516 = vmatprep.subr.mxu1 %v4244_v35  ;;  %v4380_v44 = vld [vmem:[#allocation5 + $0x798] sm:$0xff]  ;;  %v4377_v35 = vld [vmem:[#allocation5 + $0x780] sm:$0xff] }
 0x773   :  { %4440 = vmatpush1.msra.mxu0 %v4241_v52  ;;  %4517 = vmatpush1.msra.mxu1 %v4243_v14  ;;  %v4379_v52 = vld [vmem:[#allocation5 + $0x790] sm:$0xff]  ;;  %v4370_v14 = vld [vmem:[#allocation5 + $0x748] sm:$0xff] }
 0x774   :  { %4441 = vmatprep.subr.mxu0 %v4234_v46  ;;  %4518 = vmatprep.subr.mxu1 %v4236_v48  ;;  %v4372_v46 = vld [vmem:[#allocation5 + $0x758] sm:$0xff]  ;;  %v4369_v48 = vld [vmem:[#allocation5 + $0x740] sm:$0xff] }
 0x775   :  { %4442 = vmatpush1.msra.mxu0 %v4233_v5  ;;  %4519 = vmatpush1.msra.mxu1 %v4235_v51  ;;  %v4371_v5 = vld [vmem:[#allocation5 + $0x750] sm:$0xff]  ;;  %v4362_v51 = vld [vmem:[#allocation5 + $0x708] sm:$0xff] }
 0x776   :  { %4443 = vmatprep.subr.mxu0 %v4226_v50  ;;  %4520 = vmatprep.subr.mxu1 %v4228_v21  ;;  %v4364_v50 = vld [vmem:[#allocation5 + $0x718] sm:$0xff]  ;;  %v4361_v21 = vld [vmem:[#allocation5 + $0x700] sm:$0xff] }
 0x777   :  { %4444 = vmatpush1.msra.mxu0 %v4225_v18  ;;  %4521 = vmatpush1.msra.mxu1 %v4227_v61  ;;  %v4363_v18 = vld [vmem:[#allocation5 + $0x710] sm:$0xff]  ;;  %v4354_v61 = vld [vmem:[#allocation5 + $0x6c8] sm:$0xff] }
 0x778   :  { %4445 = vmatprep.subr.mxu0 %v4218_v20  ;;  %4522 = vmatprep.subr.mxu1 %v4220_v13  ;;  %v4356_v20 = vld [vmem:[#allocation5 + $0x6d8] sm:$0xff]  ;;  %v4353_v13 = vld [vmem:[#allocation5 + $0x6c0] sm:$0xff] }
 0x779   :  { %4446 = vmatpush1.msra.mxu0 %v4217_v29  ;;  %4523 = vmatpush1.msra.mxu1 %v4219_v41  ;;  %v4355_v29 = vld [vmem:[#allocation5 + $0x6d0] sm:$0xff]  ;;  %v4346_v41 = vld [vmem:[#allocation5 + $0x688] sm:$0xff] }
 0x77a   :  { %4447 = vmatprep.subr.mxu0 %v4210_v4  ;;  %4524 = vmatprep.subr.mxu1 %v4212_v0  ;;  %v4348_v4 = vld [vmem:[#allocation5 + $0x698] sm:$0xff]  ;;  %v4345_v0 = vld [vmem:[#allocation5 + $0x680] sm:$0xff] }
 0x77b   :  { %4448 = vmatpush1.msra.mxu0 %v4209_v59  ;;  %4525 = vmatpush1.msra.mxu1 %v4211_v62  ;;  %v4347_v59 = vld [vmem:[#allocation5 + $0x690] sm:$0xff]  ;;  %v4338_v62 = vld [vmem:[#allocation5 + $0x648] sm:$0xff] }
 0x77c   :  { %4449 = vmatprep.subr.mxu0 %v4202_v15  ;;  %4526 = vmatprep.subr.mxu1 %v4204_v27  ;;  %v4340_v15 = vld [vmem:[#allocation5 + $0x658] sm:$0xff]  ;;  %v4337_v27 = vld [vmem:[#allocation5 + $0x640] sm:$0xff] }
 0x77d   :  { %4450 = vmatpush1.msra.mxu0 %v4201_v16  ;;  %4527 = vmatpush1.msra.mxu1 %v4203_v60  ;;  %v4339_v16 = vld [vmem:[#allocation5 + $0x650] sm:$0xff]  ;;  %v4330_v60 = vld [vmem:[#allocation5 + $0x608] sm:$0xff] }
 0x77e   :  { %4451 = vmatprep.subr.mxu0 %v4194_v19  ;;  %4528 = vmatprep.subr.mxu1 %v4196_v32  ;;  %v4332_v19 = vld [vmem:[#allocation5 + $0x618] sm:$0xff]  ;;  %v4329_v32 = vld [vmem:[#allocation5 + $0x600] sm:$0xff] }
 0x77f   :  { %4452 = vmatpush1.msra.mxu0 %v4193_v45  ;;  %4529 = vmatpush1.msra.mxu1 %v4195_v22  ;;  %v4331_v45 = vld [vmem:[#allocation5 + $0x610] sm:$0xff]  ;;  %v4322_v22 = vld [vmem:[#allocation5 + $0x5c8] sm:$0xff] }
 0x780   :  { %4453 = vmatprep.subr.mxu0 %v4186_v57  ;;  %4530 = vmatprep.subr.mxu1 %v4188_v55  ;;  %v4324_v57 = vld [vmem:[#allocation5 + $0x5d8] sm:$0xff]  ;;  %v4321_v55 = vld [vmem:[#allocation5 + $0x5c0] sm:$0xff] }
 0x781   :  { %4454 = vmatpush1.msra.mxu0 %v4185_v54  ;;  %4531 = vmatpush1.msra.mxu1 %v4187_v12  ;;  %v4323_v54 = vld [vmem:[#allocation5 + $0x5d0] sm:$0xff]  ;;  %v4314_v12 = vld [vmem:[#allocation5 + $0x588] sm:$0xff] }
 0x782   :  { %4455 = vmatprep.subr.mxu0 %v4178_v38  ;;  %4532 = vmatprep.subr.mxu1 %v4180_v49  ;;  %v4316_v38 = vld [vmem:[#allocation5 + $0x598] sm:$0xff]  ;;  %v4313_v49 = vld [vmem:[#allocation5 + $0x580] sm:$0xff] }
 0x783   :  { %4456 = vmatpush1.msra.mxu0 %v4177_v63  ;;  %4533 = vmatpush1.msra.mxu1 %v4179_v43  ;;  %v4315_v63 = vld [vmem:[#allocation5 + $0x590] sm:$0xff]  ;;  %v4306_v43 = vld [vmem:[#allocation5 + $0x548] sm:$0xff] }
 0x784   :  { %4457 = vmatprep.subr.mxu0 %v4170_v17  ;;  %4534 = vmatprep.subr.mxu1 %v4172_v9  ;;  %v4308_v17 = vld [vmem:[#allocation5 + $0x558] sm:$0xff]  ;;  %v4305_v9 = vld [vmem:[#allocation5 + $0x540] sm:$0xff] }
 0x785   :  { %4458 = vmatpush1.msra.mxu0 %v4169_v34  ;;  %4535 = vmatpush1.msra.mxu1 %v4171_v1  ;;  %v4307_v34 = vld [vmem:[#allocation5 + $0x550] sm:$0xff]  ;;  %v4298_v1 = vld [vmem:[#allocation5 + $0x508] sm:$0xff] }
 0x786   :  { %4459 = vmatprep.subr.mxu0 %v4162_v37  ;;  %4536 = vmatprep.subr.mxu1 %v4164_v23  ;;  %v4300_v37 = vld [vmem:[#allocation5 + $0x518] sm:$0xff]  ;;  %v4297_v23 = vld [vmem:[#allocation5 + $0x500] sm:$0xff] }
 0x787   :  { %4460 = vmatpush1.msra.mxu0 %v4161_v42  ;;  %4537 = vmatpush1.msra.mxu1 %v4163_v11  ;;  %v4299_v42 = vld [vmem:[#allocation5 + $0x510] sm:$0xff]  ;;  %v4290_v11 = vld [vmem:[#allocation5 + $0x4c8] sm:$0xff] }
 0x788   :  { %4461 = vmatprep.subr.mxu0 %v4154_v6  ;;  %4538 = vmatprep.subr.mxu1 %v4156_v25  ;;  %v4292_v6 = vld [vmem:[#allocation5 + $0x4d8] sm:$0xff]  ;;  %v4289_v25 = vld [vmem:[#allocation5 + $0x4c0] sm:$0xff] }
 0x789   :  { %4462 = vmatpush1.msra.mxu0 %v4153_v26  ;;  %4539 = vmatpush1.msra.mxu1 %v4155_v28  ;;  %v4291_v26 = vld [vmem:[#allocation5 + $0x4d0] sm:$0xff]  ;;  %v4282_v28 = vld [vmem:[#allocation5 + $0x488] sm:$0xff] }
 0x78a   :  { %4463 = vmatprep.subr.mxu0 %v4146_v40  ;;  %4540 = vmatprep.subr.mxu1 %v4148_v30  ;;  %v4284_v40 = vld [vmem:[#allocation5 + $0x498] sm:$0xff]  ;;  %v4281_v30 = vld [vmem:[#allocation5 + $0x480] sm:$0xff] }
 0x78b   :  { %4464 = vmatpush1.msra.mxu0 %v4145_v2  ;;  %4541 = vmatpush1.msra.mxu1 %v4147_v36  ;;  %v4283_v2 = vld [vmem:[#allocation5 + $0x490] sm:$0xff]  ;;  %v4274_v36 = vld [vmem:[#allocation5 + $0x448] sm:$0xff] }
 0x78c   :  { %4465 = vmatprep.subr.mxu0 %v4138_v31  ;;  %4542 = vmatprep.subr.mxu1 %v4140_v8  ;;  %v4276_v31 = vld [vmem:[#allocation5 + $0x458] sm:$0xff]  ;;  %v4273_v8 = vld [vmem:[#allocation5 + $0x440] sm:$0xff] }
 0x78d   :  { %4466 = vmatpush1.msra.mxu0 %v4137_v56  ;;  %4543 = vmatpush1.msra.mxu1 %v4139_v39  ;;  %v4275_v56 = vld [vmem:[#allocation5 + $0x450] sm:$0xff]  ;;  %v4266_v39 = vld [vmem:[#allocation5 + $0x408] sm:$0xff] }
 0x78e   :  { %4467 = vmatprep.subr.mxu0 %v4386_v58  ;;  %4544 = vmatprep.subr.mxu1 %v4388_v53  ;;  %v4268_v58 = vld [vmem:[#allocation5 + $0x418] sm:$0xff]  ;;  %v4265_v53 = vld [vmem:[#allocation5 + $0x400] sm:$0xff] }
 0x78f   :  { %4468 = vmatpush2.msra.mxu0 %v4385_v3  ;;  %4545 = vmatpush2.msra.mxu1 %v4387_v24  ;;  %v4267_v3 = vld [vmem:[#allocation5 + $0x410] sm:$0xff]  ;;  %v4262_v24 = vld [vmem:[#allocation5 + $0x3e8] sm:$0xff] }
 0x790   :  { %4469 = vmatprep.subr.mxu0 %v4378_v47  ;;  %4546 = vmatprep.subr.mxu1 %v4380_v44  ;;  %v4264_v47 = vld [vmem:[#allocation5 + $0x3f8] sm:$0xff]  ;;  %v3631_v44 = vld [vmem:[%s15823_s0 + $0x20] sm:$0xc0] }
 0x791   :  { %4470 = vmatpush2.msra.mxu0 %v4377_v35  ;;  %4547 = vmatpush2.msra.mxu1 %v4379_v52 }
 0x792   :  { %4471 = vmatprep.subr.mxu0 %v4370_v14  ;;  %4548 = vmatprep.subr.mxu1 %v4372_v46  ;;  %v3632_v46 = vld [vmem:[%s15823_s0 + $0x28] sm:$0xc0] }
 0x793   :  { %4472 = vmatpush2.msra.mxu0 %v4369_v48  ;;  %4549 = vmatpush2.msra.mxu1 %v4371_v5 }
 0x794   :  { %4473 = vmatprep.subr.mxu0 %v4362_v51  ;;  %4550 = vmatprep.subr.mxu1 %v4364_v50 }
 0x795   :  { %4474 = vmatpush2.msra.mxu0 %v4361_v21  ;;  %4551 = vmatpush2.msra.mxu1 %v4363_v18 }
 0x796   :  { %4475 = vmatprep.subr.mxu0 %v4354_v61  ;;  %4552 = vmatprep.subr.mxu1 %v4356_v20 }
 0x797   :  { %4476 = vmatpush2.msra.mxu0 %v4353_v13  ;;  %4553 = vmatpush2.msra.mxu1 %v4355_v29  ;;  %v3634_v13 = vld [vmem:[%s15823_s0 + $0x38] sm:$0xc0] }
 0x798   :  { %4477 = vmatprep.subr.mxu0 %v4346_v41  ;;  %4554 = vmatprep.subr.mxu1 %v4348_v4  ;;  %v3633_v4 = vld [vmem:[%s15823_s0 + $0x30] sm:$0xc0] }
 0x799   :  { %4478 = vmatpush2.msra.mxu0 %v4345_v0  ;;  %4555 = vmatpush2.msra.mxu1 %v4347_v59 }
 0x79a   :  { %4479 = vmatprep.subr.mxu0 %v4338_v62  ;;  %4556 = vmatprep.subr.mxu1 %v4340_v15 }
 0x79b   :  { %4480 = vmatpush2.msra.mxu0 %v4337_v27  ;;  %4557 = vmatpush2.msra.mxu1 %v4339_v16 }
 0x79c   :  { %4481 = vmatprep.subr.mxu0 %v4330_v60  ;;  %4558 = vmatprep.subr.mxu1 %v4332_v19  ;;  %v3860_v19 = vld [vmem:[%s15824_s1] sm:$0x3] }
 0x79d   :  { %4482 = vmatpush2.msra.mxu0 %v4329_v32  ;;  %4559 = vmatpush2.msra.mxu1 %v4331_v45 }
 0x79e   :  { %4483 = vmatprep.subr.mxu0 %v4322_v22  ;;  %4560 = vmatprep.subr.mxu1 %v4324_v57  ;;  %v4097_v22 = vrot.slane %v13550_v10, 6  ;;  %v3863_v10 = vld [vmem:[%s15824_s1 + $0x18] sm:$0x3] }
 0x79f   :  { %4484 = vmatpush2.msra.mxu0 %v4321_v55  ;;  %4561 = vmatpush2.msra.mxu1 %v4323_v54  ;;  %v3861_v54 = vld [vmem:[%s15824_s1 + $0x8] sm:$0x3] }
 0x7a0   :  { %4485 = vmatprep.subr.mxu0 %v4314_v12  ;;  %4562 = vmatprep.subr.mxu1 %v4316_v38 }
 0x7a1   :  { %4486 = vmatpush2.msra.mxu0 %v4313_v49  ;;  %4563 = vmatpush2.msra.mxu1 %v4315_v63 }
 0x7a2   :  { %4487 = vmatprep.subr.mxu0 %v4306_v43  ;;  %4564 = vmatprep.subr.mxu1 %v4308_v17 }
 0x7a3   :  { %4488 = vmatpush2.msra.mxu0 %v4305_v9  ;;  %4565 = vmatpush2.msra.mxu1 %v4307_v34 }
 0x7a4   :  { %4489 = vmatprep.subr.mxu0 %v4298_v1  ;;  %4566 = vmatprep.subr.mxu1 %v4300_v37 }
 0x7a5   :  { %4490 = vmatpush2.msra.mxu0 %v4297_v23  ;;  %4567 = vmatpush2.msra.mxu1 %v4299_v42 }
 0x7a6   :  { %4491 = vmatprep.subr.mxu0 %v4290_v11  ;;  %4568 = vmatprep.subr.mxu1 %v4292_v6  ;;  %v3862_v11 = vld [vmem:[%s15824_s1 + $0x10] sm:$0x3] }
 0x7a7   :  { %4492 = vmatpush2.msra.mxu0 %v4289_v25  ;;  %4569 = vmatpush2.msra.mxu1 %v4291_v26 }
 0x7a8   :  { %4493 = vmatprep.subr.mxu0 %v4282_v28  ;;  %4570 = vmatprep.subr.mxu1 %v4284_v40 }
 0x7a9   :  { %4494 = vmatpush2.msra.mxu0 %v4281_v30  ;;  %4571 = vmatpush2.msra.mxu1 %v4283_v2 }
 0x7aa   :  { %4495 = vmatprep.subr.mxu0 %v4274_v36  ;;  %4572 = vmatprep.subr.mxu1 %v4276_v31 }
 0x7ab   :  { %4496 = vmatpush2.msra.mxu0 %v4273_v8  ;;  %4573 = vmatpush2.msra.mxu1 %v4275_v56 }
 0x7ac   :  { %4497 = vmatprep.subr.mxu0 %v4266_v39  ;;  %4574 = vmatprep.subr.mxu1 %v4268_v58  ;;  %v4124_v58 = vrot.slane %v13592_v7, 2  ;;  %v4254_v7 = vld [vmem:[#allocation5 + $0x3a8] sm:$0xff] }
 0x7ad   :  { %4498 = vmatpush2.msra.mxu0 %v4265_v53  ;;  %4575 = vmatpush2.msra.mxu1 %v4267_v3 }
 0x7ae   :  { %4589 = vmatprep.subr.mxu0 %v4262_v24  ;;  %4666 = vmatprep.subr.mxu1 %v4264_v47 }
 0x809   :  { %v3768_v35 = vpop.f32.mrf.mxu0  ;;  %v3839_v14 = vpop.f32.mrf.mxu1 }
 0x80a   :  { %v3848_v52 = vrot.slane %v3768_v35, 2  ;;  %v3850_v41 = vrot.slane %v3839_v14, 2 }
 0x80b   :  { %v3770_v48 = vpop.f32.mrf.mxu0  ;;  %v3841_v18 = vpop.f32.mrf.mxu1 }
 0x80c   :  { %v3856_v5 = vadd.f32 %v3848_v52, %v3631_v44  ;;  %v3849_v51 = vrot.slane %v3770_v48, 2  ;;  %v3851_v20 = vrot.slane %v3841_v18, 2  ;;  %v3858_v62 = vadd.f32 %v3850_v41, %v3633_v4  ;;  %v4261_v48 = vld [vmem:[#allocation5 + $0x3e0] sm:$0xff]  ;;  %v4247_v41 = vld [vmem:[#allocation5 + $0x370] sm:$0xff] }
 0x80d   :  { %v4253_v18 = vld [vmem:[#allocation5 + $0x3a0] sm:$0xff] }
 0x80e   :  { %v8991_v50 = vmul.f32 -1.442695, %v3856_v5  ;;  %v3857_v21 = vadd.f32 %v3849_v51, %v3632_v46  ;;  %v3859_v29 = vadd.f32 %v3851_v20, %v3634_v13  ;;  %v4263_v5 = vld [vmem:[#allocation5 + $0x3f0] sm:$0xff]  ;;  %v4246_v20 = vld [vmem:[#allocation5 + $0x368] sm:$0xff]  ;;  %v4248_v13 = vld [vmem:[#allocation5 + $0x378] sm:$0xff] }
 0x80f   :  { %v13653_v51 = vld [vmem:[#allocation2 + $0x10] sm:$0xff] }
 0x810   :  { %9319 = vpow2.f32 %v8991_v50  ;;  %v8992_v61 = vmul.f32 -1.442695, %v3857_v21  ;;  %v8993_v0 = vmul.f32 -1.442695, %v3859_v29  ;;  %v4256_v50 = vld [vmem:[#allocation5 + $0x3b8] sm:$0xff]  ;;  %v13657_v21 = vld [vmem:[#allocation2] sm:$0xff] }
 0x811   :  { %v4245_v29 = vld [vmem:[#allocation5 + $0x360] sm:$0xff] }
 0x812   :  { %9321 = vpow2.f32 %v8992_v61  ;;  %v4255_v61 = vld [vmem:[#allocation5 + $0x3b0] sm:$0xff] }
 0x813   :  { %9323 = vpow2.f32 %v8993_v0  ;;  %v4238_v0 = vld [vmem:[#allocation5 + $0x328] sm:$0xff] }
 0x81d   :  { %v9320_v59 = vpop.eup %9319 }
 0x81e   :  { %v4080_v15 = vadd.f32 1.0, %v9320_v59  ;;  %v4240_v59 = vld [vmem:[#allocation5 + $0x338] sm:$0xff] }
 0x81f   :  { %v9322_v27 = vpop.eup %9321 }
 0x820   :  { %9325 = vrcp.f32 %v4080_v15  ;;  %v4086_v16 = vadd.f32 1.0, %v9322_v27  ;;  %v9324_v60 = vpop.eup %9323  ;;  %v4239_v15 = vld [vmem:[#allocation5 + $0x330] sm:$0xff]  ;;  %v4230_v27 = vld [vmem:[#allocation5 + $0x2e8] sm:$0xff] }
 0x821   :  { %9327 = vtanh.f32 %v3858_v62  ;;  %v4093_v57 = vadd.f32 1.0, %v9324_v60  ;;  %v4237_v62 = vld [vmem:[#allocation5 + $0x320] sm:$0xff] }
 0x822   :  { %9329 = vrcp.f32 %v4086_v16  ;;  %v4232_v16 = vld [vmem:[#allocation5 + $0x2f8] sm:$0xff]  ;;  %v4229_v60 = vld [vmem:[#allocation5 + $0x2e0] sm:$0xff] }
 0x823   :  { %9331 = vrcp.f32 %v4093_v57  ;;  %v4223_v57 = vld [vmem:[#allocation5 + $0x2b0] sm:$0xff] }
 0x82d   :  { %v9326_v32 = vpop.eup %9325 }
 0x82e   :  { %v9328_v45 = vpop.eup %9327  ;;  %v3997_v55 = vpop.f32.mrf.mxu0 }
 0x82f   :  { %v9330_v12 = vpop.eup %9329  ;;  %v4073_v38 = vadd.f32 %v3997_v55, %v3860_v19  ;;  %v4100_v49 = vmul.f32 %v9328_v45, %v9326_v32  ;;  %v4068_v1 = vpop.f32.mrf.mxu1  ;;  %v4231_v19 = vld [vmem:[#allocation5 + $0x2f0] sm:$0xff]  ;;  %v4222_v32 = vld [vmem:[#allocation5 + $0x2a8] sm:$0xff]  ;;  %v4224_v45 = vld [vmem:[#allocation5 + $0x2b8] sm:$0xff] }
 0x830   :  { %v4099_v63 = vmul.f32 %v9330_v12, %v4097_v22  ;;  %v3999_v43 = vpop.f32.mrf.mxu0  ;;  %v9332_v25 = vpop.eup %9331  ;;  %v4075_v28 = vadd.f32 %v4068_v1, %v3862_v11  ;;  %v4221_v22 = vld [vmem:[#allocation5 + $0x2a0] sm:$0xff]  ;;  %v4214_v55 = vld [vmem:[#allocation5 + $0x268] sm:$0xff]  ;;  %v4191_v11 = vld [vmem:[#allocation5 + $0x1b0] sm:$0xff] }
 0x831   :  { %v8994_v17 = vmul.f32 -1.442695, %v4073_v38  ;;  %v4074_v9 = vadd.f32 %v3999_v43, %v3861_v54  ;;  %v4070_v23 = vpop.f32.mrf.mxu1  ;;  %v4216_v54 = vld [vmem:[#allocation5 + $0x278] sm:$0xff]  ;;  %v4213_v12 = vld [vmem:[#allocation5 + $0x260] sm:$0xff]  ;;  %v4215_v38 = vld [vmem:[#allocation5 + $0x270] sm:$0xff] }
 0x832   :  { %v4101_v34 = vadd.f32 %v4100_v49, %v4099_v63  ;;  %v4076_v42 = vadd.f32 %v4070_v23, %v3863_v10  ;;  %v4206_v49 = vld [vmem:[#allocation5 + $0x228] sm:$0xff]  ;;  %v4208_v63 = vld [vmem:[#allocation5 + $0x238] sm:$0xff]  ;;  %v4205_v43 = vld [vmem:[#allocation5 + $0x220] sm:$0xff] }
 0x833   :  { %9333 = vpow2.f32 %v8994_v17  ;;  %v8995_v37 = vmul.f32 -1.442695, %v4074_v9  ;;  %v4207_v17 = vld [vmem:[#allocation5 + $0x230] sm:$0xff]  ;;  %v4198_v9 = vld [vmem:[#allocation5 + $0x1e8] sm:$0xff]  ;;  %v4197_v1 = vld [vmem:[#allocation5 + $0x1e0] sm:$0xff] }
 0x834   :  { %9335 = vtanh.f32 %v4101_v34  ;;  %v8996_v6 = vmul.f32 -1.442695, %v4076_v42  ;;  %v4200_v34 = vld [vmem:[#allocation5 + $0x1f8] sm:$0xff]  ;;  %v4190_v10 = vld [vmem:[#allocation5 + $0x1a8] sm:$0xff]  ;;  %v4189_v42 = vld [vmem:[#allocation5 + $0x1a0] sm:$0xff] }
 0x835   :  { %9337 = vpow2.f32 %v8995_v37  ;;  %v4199_v37 = vld [vmem:[#allocation5 + $0x1f0] sm:$0xff]  ;;  %v4192_v23 = vld [vmem:[#allocation5 + $0x1b8] sm:$0xff] }
 0x836   :  { %9339 = vpow2.f32 %v8996_v6  ;;  %v4182_v6 = vld [vmem:[#allocation5 + $0x168] sm:$0xff] }
 0x840   :  { %v9334_v26 = vpop.eup %9333 }
 0x841   :  { %v9336_v40 = vpop.eup %9335  ;;  %v4107_v30 = vadd.f32 1.0, %v9334_v26  ;;  %v4181_v26 = vld [vmem:[#allocation5 + $0x160] sm:$0xff] }
 0x842   :  { %v9338_v2 = vpop.eup %9337  ;;  %v4103_v36 = vmul.f32 %v9336_v40, %v9332_v25  ;;  %v4184_v25 = vld [vmem:[#allocation5 + $0x178] sm:$0xff]  ;;  %v4174_v40 = vld [vmem:[#allocation5 + $0x128] sm:$0xff] }
 0x843   :  { %9341 = vrcp.f32 %v4107_v30  ;;  %v4113_v31 = vadd.f32 1.0, %v9338_v2  ;;  %v9340_v8 = vpop.eup %9339  ;;  %v4176_v30 = vld [vmem:[#allocation5 + $0x138] sm:$0xff]  ;;  %v4173_v2 = vld [vmem:[#allocation5 + $0x120] sm:$0xff] }
 0x844   :  { %4131 = vst [vmem:[#allocation2 + $0x8] sm:$0xc0] %v4103_v36  ;;  %9343 = vtanh.f32 %v4075_v28  ;;  %v4120_v3 = vadd.f32 1.0, %v9340_v8  ;;  %v4183_v28 = vld [vmem:[#allocation5 + $0x170] sm:$0xff]  ;;  %v4168_v8 = vld [vmem:[#allocation5 + $0xf8] sm:$0xff] }
 0x845   :  { %9345 = vrcp.f32 %v4113_v31  ;;  %v4175_v36 = vld [vmem:[#allocation5 + $0x130] sm:$0xff]  ;;  %v4166_v31 = vld [vmem:[#allocation5 + $0xe8] sm:$0xff] }
 0x846   :  { %9347 = vrcp.f32 %v4120_v3  ;;  %v4157_v3 = vld [vmem:[#allocation5 + $0xa0] sm:$0xff] }
 0x84b   :  { %v13661_v4 = vld [vmem:[#allocation2 + $0x8] sm:$0xff] }
 0x850   :  { %v9342_v56 = vpop.eup %9341 }
 0x851   :  { %v9344_v39 = vpop.eup %9343 }
 0x852   :  { %v9346_v53 = vpop.eup %9345  ;;  %v4127_v24 = vmul.f32 %v9344_v39, %v9342_v56  ;;  %v4165_v56 = vld [vmem:[#allocation5 + $0xe0] sm:$0xff]  ;;  %v4167_v39 = vld [vmem:[#allocation5 + $0xf0] sm:$0xff] }
 0x853   :  { %v4126_v47 = vmul.f32 %v9346_v53, %v4124_v58  ;;  %v9348_v35 = vpop.eup %9347  ;;  %v4158_v58 = vld [vmem:[#allocation5 + $0xa8] sm:$0xff]  ;;  %v4160_v53 = vld [vmem:[#allocation5 + $0xb8] sm:$0xff] }
 0x855   :  { %v4128_v44 = vadd.f32 %v4127_v24, %v4126_v47  ;;  %v4159_v24 = vld [vmem:[#allocation5 + $0xb0] sm:$0xff]  ;;  %v4150_v47 = vld [vmem:[#allocation5 + $0x68] sm:$0xff] }
 0x857   :  { %9349 = vtanh.f32 %v4128_v44  ;;  %v4152_v44 = vld [vmem:[#allocation5 + $0x78] sm:$0xff] }
 0x864   :  { %v9350_v52 = vpop.eup %9349 }
 0x865   :  { %v4130_v14 = vmul.f32 %v9350_v52, %v9348_v35  ;;  %v4149_v35 = vld [vmem:[#allocation5 + $0x60] sm:$0xff]  ;;  %v4151_v52 = vld [vmem:[#allocation5 + $0x70] sm:$0xff] }
 0x867   :  { %4132 = vst [vmem:[#allocation2 + $0x18] sm:$0x3] %v4130_v14  ;;  %v4142_v14 = vld [vmem:[#allocation5 + $0x28] sm:$0xff] }
 0x86e   :  { %v4134_v46 = vld [vmem:[#allocation2 + $0x18] sm:$0xff] }
 0x86f   :  { %4499 = vmatprep.mubr.f32.mxu0 %v4134_v46  ;;  %4576 = vmatprep.mubr.f32.mxu1 %v4134_v46 }
 0x870   :  { %4500 = vmatmul.mubr.f32.vlgmr.msra.gmra.mxu0 %v13653_v51  ;;  %4577 = vmatmul.mubr.f32.vlgmr.msra.gmra.mxu1 %v13653_v51 }
 0x871   :  { %4590 = vmatpush1.msra.mxu0 %v4261_v48  ;;  %4667 = vmatpush1.msra.mxu1 %v4263_v5  ;;  %v4141_v48 = vld [vmem:[#allocation5 + $0x20] sm:$0xff]  ;;  %v4143_v5 = vld [vmem:[#allocation5 + $0x30] sm:$0xff] }
 0x872   :  { %4505 = vmatprep.mubr.f32.mxu0 %v13657_v21  ;;  %4582 = vmatprep.mubr.f32.mxu1 %v13657_v21 }
 0x873   :  { %4591 = vmatprep.subr.mxu0 %v4254_v7  ;;  %4668 = vmatprep.subr.mxu1 %v4256_v50  ;;  %v4390_v7 = vld [vmem:[#allocation5 + $0x7e8] sm:$0xff]  ;;  %v4392_v50 = vld [vmem:[#allocation5 + $0x7f8] sm:$0xff] }
 0x874   :  { %4592 = vmatpush1.msra.mxu0 %v4253_v18  ;;  %4669 = vmatpush1.msra.mxu1 %v4255_v61  ;;  %v4389_v18 = vld [vmem:[#allocation5 + $0x7e0] sm:$0xff]  ;;  %v4391_v61 = vld [vmem:[#allocation5 + $0x7f0] sm:$0xff] }
 0x875   :  { %4593 = vmatprep.subr.mxu0 %v4246_v20  ;;  %4670 = vmatprep.subr.mxu1 %v4248_v13  ;;  %v4382_v20 = vld [vmem:[#allocation5 + $0x7a8] sm:$0xff]  ;;  %v4384_v13 = vld [vmem:[#allocation5 + $0x7b8] sm:$0xff] }
 0x876   :  { %4506 = vmatmul.mubr.f32.gmra.mxu0 %v13661_v4  ;;  %4583 = vmatmul.mubr.f32.gmra.mxu1 %v13661_v4 }
 0x877   :  { %4594 = vmatpush1.msra.mxu0 %v4245_v29  ;;  %4671 = vmatpush1.msra.mxu1 %v4247_v41  ;;  %v4381_v29 = vld [vmem:[#allocation5 + $0x7a0] sm:$0xff]  ;;  %v4383_v41 = vld [vmem:[#allocation5 + $0x7b0] sm:$0xff] }
 0x878   :  { %4595 = vmatprep.subr.mxu0 %v4238_v0  ;;  %4653 = vmatprep.mubr.f32.mxu0 %v4134_v46  ;;  %v4374_v0 = vld [vmem:[#allocation5 + $0x768] sm:$0xff] }
 0x879   :  { %4672 = vmatprep.subr.mxu1 %v4240_v59  ;;  %4730 = vmatprep.mubr.f32.mxu1 %v4134_v46  ;;  %v4144_v46 = vld [vmem:[#allocation5 + $0x38] sm:$0xff] }
 0x87a   :  { %4596 = vmatpush1.msra.mxu0 %v4237_v62  ;;  %4673 = vmatpush1.msra.mxu1 %v4239_v15  ;;  %v4376_v59 = vld [vmem:[#allocation5 + $0x778] sm:$0xff]  ;;  %v4373_v62 = vld [vmem:[#allocation5 + $0x760] sm:$0xff]  ;;  %v4375_v15 = vld [vmem:[#allocation5 + $0x770] sm:$0xff] }
 0x87b   :  { %4597 = vmatprep.subr.mxu0 %v4230_v27  ;;  %4674 = vmatprep.subr.mxu1 %v4232_v16  ;;  %v4366_v27 = vld [vmem:[#allocation5 + $0x728] sm:$0xff]  ;;  %v4368_v16 = vld [vmem:[#allocation5 + $0x738] sm:$0xff] }
 0x87c   :  { %4598 = vmatpush1.msra.mxu0 %v4229_v60  ;;  %4675 = vmatpush1.msra.mxu1 %v4231_v19  ;;  %v4365_v60 = vld [vmem:[#allocation5 + $0x720] sm:$0xff]  ;;  %v4367_v19 = vld [vmem:[#allocation5 + $0x730] sm:$0xff] }
 0x87d   :  { %4599 = vmatprep.subr.mxu0 %v4222_v32  ;;  %4676 = vmatprep.subr.mxu1 %v4224_v45  ;;  %v4358_v32 = vld [vmem:[#allocation5 + $0x6e8] sm:$0xff]  ;;  %v4360_v45 = vld [vmem:[#allocation5 + $0x6f8] sm:$0xff] }
 0x87e   :  { %4600 = vmatpush1.msra.mxu0 %v4221_v22  ;;  %4677 = vmatpush1.msra.mxu1 %v4223_v57  ;;  %v4357_v22 = vld [vmem:[#allocation5 + $0x6e0] sm:$0xff]  ;;  %v4359_v57 = vld [vmem:[#allocation5 + $0x6f0] sm:$0xff] }
 0x87f   :  { %4601 = vmatprep.subr.mxu0 %v4214_v55  ;;  %4678 = vmatprep.subr.mxu1 %v4216_v54  ;;  %v4350_v55 = vld [vmem:[#allocation5 + $0x6a8] sm:$0xff]  ;;  %v4352_v54 = vld [vmem:[#allocation5 + $0x6b8] sm:$0xff] }
 0x880   :  { %4602 = vmatpush1.msra.mxu0 %v4213_v12  ;;  %4679 = vmatpush1.msra.mxu1 %v4215_v38  ;;  %v4349_v12 = vld [vmem:[#allocation5 + $0x6a0] sm:$0xff]  ;;  %v4351_v38 = vld [vmem:[#allocation5 + $0x6b0] sm:$0xff] }
 0x881   :  { %4603 = vmatprep.subr.mxu0 %v4206_v49  ;;  %4680 = vmatprep.subr.mxu1 %v4208_v63  ;;  %v4342_v49 = vld [vmem:[#allocation5 + $0x668] sm:$0xff]  ;;  %v4344_v63 = vld [vmem:[#allocation5 + $0x678] sm:$0xff] }
 0x882   :  { %4604 = vmatpush1.msra.mxu0 %v4205_v43  ;;  %4681 = vmatpush1.msra.mxu1 %v4207_v17  ;;  %v4341_v43 = vld [vmem:[#allocation5 + $0x660] sm:$0xff]  ;;  %v4343_v17 = vld [vmem:[#allocation5 + $0x670] sm:$0xff] }
 0x883   :  { %4605 = vmatprep.subr.mxu0 %v4198_v9  ;;  %4682 = vmatprep.subr.mxu1 %v4200_v34  ;;  %v4334_v9 = vld [vmem:[#allocation5 + $0x628] sm:$0xff]  ;;  %v4336_v34 = vld [vmem:[#allocation5 + $0x638] sm:$0xff] }
 0x884   :  { %4606 = vmatpush1.msra.mxu0 %v4197_v1  ;;  %4683 = vmatpush1.msra.mxu1 %v4199_v37  ;;  %v4333_v1 = vld [vmem:[#allocation5 + $0x620] sm:$0xff]  ;;  %v4335_v37 = vld [vmem:[#allocation5 + $0x630] sm:$0xff] }
 0x885   :  { %4607 = vmatprep.subr.mxu0 %v4190_v10  ;;  %4684 = vmatprep.subr.mxu1 %v4192_v23  ;;  %v4326_v10 = vld [vmem:[#allocation5 + $0x5e8] sm:$0xff]  ;;  %v4328_v23 = vld [vmem:[#allocation5 + $0x5f8] sm:$0xff] }
 0x886   :  { %4608 = vmatpush1.msra.mxu0 %v4189_v42  ;;  %4685 = vmatpush1.msra.mxu1 %v4191_v11  ;;  %v4325_v42 = vld [vmem:[#allocation5 + $0x5e0] sm:$0xff]  ;;  %v4327_v11 = vld [vmem:[#allocation5 + $0x5f0] sm:$0xff] }
 0x887   :  { %4609 = vmatprep.subr.mxu0 %v4182_v6  ;;  %4686 = vmatprep.subr.mxu1 %v4184_v25  ;;  %v4318_v6 = vld [vmem:[#allocation5 + $0x5a8] sm:$0xff]  ;;  %v4320_v25 = vld [vmem:[#allocation5 + $0x5b8] sm:$0xff] }
 0x888   :  { %4610 = vmatpush1.msra.mxu0 %v4181_v26  ;;  %4687 = vmatpush1.msra.mxu1 %v4183_v28  ;;  %v4317_v26 = vld [vmem:[#allocation5 + $0x5a0] sm:$0xff]  ;;  %v4319_v28 = vld [vmem:[#allocation5 + $0x5b0] sm:$0xff] }
 0x889   :  { %4611 = vmatprep.subr.mxu0 %v4174_v40  ;;  %4688 = vmatprep.subr.mxu1 %v4176_v30  ;;  %v4310_v40 = vld [vmem:[#allocation5 + $0x568] sm:$0xff]  ;;  %v4312_v30 = vld [vmem:[#allocation5 + $0x578] sm:$0xff] }
 0x88a   :  { %4612 = vmatpush1.msra.mxu0 %v4173_v2  ;;  %4689 = vmatpush1.msra.mxu1 %v4175_v36  ;;  %v4309_v2 = vld [vmem:[#allocation5 + $0x560] sm:$0xff]  ;;  %v4311_v36 = vld [vmem:[#allocation5 + $0x570] sm:$0xff] }
 0x88b   :  { %4613 = vmatprep.subr.mxu0 %v4166_v31  ;;  %4690 = vmatprep.subr.mxu1 %v4168_v8  ;;  %v4302_v31 = vld [vmem:[#allocation5 + $0x528] sm:$0xff]  ;;  %v4304_v8 = vld [vmem:[#allocation5 + $0x538] sm:$0xff] }
 0x88c   :  { %4614 = vmatpush1.msra.mxu0 %v4165_v56  ;;  %4691 = vmatpush1.msra.mxu1 %v4167_v39  ;;  %v4301_v56 = vld [vmem:[#allocation5 + $0x520] sm:$0xff]  ;;  %v4303_v39 = vld [vmem:[#allocation5 + $0x530] sm:$0xff] }
 0x88d   :  { %4615 = vmatprep.subr.mxu0 %v4158_v58  ;;  %4692 = vmatprep.subr.mxu1 %v4160_v53  ;;  %v4294_v58 = vld [vmem:[#allocation5 + $0x4e8] sm:$0xff]  ;;  %v4296_v53 = vld [vmem:[#allocation5 + $0x4f8] sm:$0xff] }
 0x88e   :  { %4616 = vmatpush1.msra.mxu0 %v4157_v3  ;;  %4693 = vmatpush1.msra.mxu1 %v4159_v24  ;;  %v4293_v3 = vld [vmem:[#allocation5 + $0x4e0] sm:$0xff]  ;;  %v4295_v24 = vld [vmem:[#allocation5 + $0x4f0] sm:$0xff] }
 0x88f   :  { %4617 = vmatprep.subr.mxu0 %v4150_v47  ;;  %4694 = vmatprep.subr.mxu1 %v4152_v44  ;;  %v4286_v47 = vld [vmem:[#allocation5 + $0x4a8] sm:$0xff]  ;;  %v4288_v44 = vld [vmem:[#allocation5 + $0x4b8] sm:$0xff] }
 0x890   :  { %4618 = vmatpush1.msra.mxu0 %v4149_v35  ;;  %4695 = vmatpush1.msra.mxu1 %v4151_v52  ;;  %v4285_v35 = vld [vmem:[#allocation5 + $0x4a0] sm:$0xff]  ;;  %v4287_v52 = vld [vmem:[#allocation5 + $0x4b0] sm:$0xff] }
 0x891   :  { %4619 = vmatprep.subr.mxu0 %v4142_v14  ;;  %4696 = vmatprep.subr.mxu1 %v4144_v46  ;;  %v4278_v14 = vld [vmem:[#allocation5 + $0x468] sm:$0xff]  ;;  %v4280_v46 = vld [vmem:[#allocation5 + $0x478] sm:$0xff] }
 0x892   :  { %4620 = vmatpush1.msra.mxu0 %v4141_v48  ;;  %4697 = vmatpush1.msra.mxu1 %v4143_v5  ;;  %v4277_v48 = vld [vmem:[#allocation5 + $0x460] sm:$0xff]  ;;  %v4279_v5 = vld [vmem:[#allocation5 + $0x470] sm:$0xff] }
 0x893   :  { %4621 = vmatprep.subr.mxu0 %v4390_v7  ;;  %4698 = vmatprep.subr.mxu1 %v4392_v50  ;;  %v4270_v7 = vld [vmem:[#allocation5 + $0x428] sm:$0xff]  ;;  %v4272_v50 = vld [vmem:[#allocation5 + $0x438] sm:$0xff] }
 0x894   :  { %4622 = vmatpush2.msra.mxu0 %v4389_v18  ;;  %4699 = vmatpush2.msra.mxu1 %v4391_v61  ;;  %v4269_v18 = vld [vmem:[#allocation5 + $0x420] sm:$0xff]  ;;  %v4271_v61 = vld [vmem:[#allocation5 + $0x430] sm:$0xff] }
 0x895   :  { %4623 = vmatprep.subr.mxu0 %v4382_v20  ;;  %4700 = vmatprep.subr.mxu1 %v4384_v13  ;;  %v13665_v20 = vld [vmem:[#allocation7 + $0x1e8] sm:$0xff]  ;;  %v13667_v13 = vld [vmem:[#allocation7 + $0x1f8] sm:$0xff] }
 0x896   :  { %4624 = vmatpush2.msra.mxu0 %v4381_v29  ;;  %4701 = vmatpush2.msra.mxu1 %v4383_v41  ;;  %v13671_v29 = vld [vmem:[#allocation7 + $0x1e0] sm:$0xff]  ;;  %v13673_v41 = vld [vmem:[#allocation7 + $0x1f0] sm:$0xff] }
 0x897   :  { %4625 = vmatprep.subr.mxu0 %v4374_v0  ;;  %4702 = vmatprep.subr.mxu1 %v4376_v59  ;;  %v13677_v0 = vld [vmem:[#allocation7 + $0x1c8] sm:$0xff]  ;;  %v13679_v59 = vld [vmem:[#allocation7 + $0x1d8] sm:$0xff] }
 0x898   :  { %4626 = vmatpush2.msra.mxu0 %v4373_v62  ;;  %4703 = vmatpush2.msra.mxu1 %v4375_v15  ;;  %v13683_v62 = vld [vmem:[#allocation7 + $0x1c0] sm:$0xff]  ;;  %v13685_v15 = vld [vmem:[#allocation7 + $0x1d0] sm:$0xff] }
 0x899   :  { %4627 = vmatprep.subr.mxu0 %v4366_v27  ;;  %4704 = vmatprep.subr.mxu1 %v4368_v16  ;;  %v13693_v27 = vld [vmem:[#allocation7 + $0x1b8] sm:$0xff]  ;;  %v13699_v16 = vld [vmem:[#allocation7 + $0x1b0] sm:$0xff] }
 0x89a   :  { %4628 = vmatpush2.msra.mxu0 %v4365_v60  ;;  %4705 = vmatpush2.msra.mxu1 %v4367_v19  ;;  %v13703_v60 = vld [vmem:[#allocation7 + $0x188] sm:$0xff]  ;;  %v13705_v19 = vld [vmem:[#allocation7 + $0x198] sm:$0xff] }
 0x89b   :  { %4629 = vmatprep.subr.mxu0 %v4358_v32  ;;  %4706 = vmatprep.subr.mxu1 %v4360_v45  ;;  %v13709_v32 = vld [vmem:[#allocation7 + $0x180] sm:$0xff]  ;;  %v13711_v45 = vld [vmem:[#allocation7 + $0x190] sm:$0xff] }
 0x89c   :  { %4630 = vmatpush2.msra.mxu0 %v4357_v22  ;;  %4707 = vmatpush2.msra.mxu1 %v4359_v57  ;;  %v13715_v22 = vld [vmem:[#allocation7 + $0x168] sm:$0xff]  ;;  %v13717_v57 = vld [vmem:[#allocation7 + $0x178] sm:$0xff] }
 0x89d   :  { %4631 = vmatprep.subr.mxu0 %v4350_v55  ;;  %4708 = vmatprep.subr.mxu1 %v4352_v54  ;;  %v13723_v55 = vld [vmem:[#allocation7 + $0x170] sm:$0xff]  ;;  %v13727_v54 = vld [vmem:[#allocation7 + $0x148] sm:$0xff] }
 0x89e   :  { %4632 = vmatpush2.msra.mxu0 %v4349_v12  ;;  %4709 = vmatpush2.msra.mxu1 %v4351_v38  ;;  %v13729_v12 = vld [vmem:[#allocation7 + $0x158] sm:$0xff]  ;;  %v13733_v38 = vld [vmem:[#allocation7 + $0x140] sm:$0xff] }
 0x89f   :  { %4633 = vmatprep.subr.mxu0 %v4342_v49  ;;  %4710 = vmatprep.subr.mxu1 %v4344_v63  ;;  %v13735_v49 = vld [vmem:[#allocation7 + $0x150] sm:$0xff]  ;;  %v13739_v63 = vld [vmem:[#allocation7 + $0x128] sm:$0xff] }
 0x8a0   :  { %4634 = vmatpush2.msra.mxu0 %v4341_v43  ;;  %4711 = vmatpush2.msra.mxu1 %v4343_v17  ;;  %v13741_v43 = vld [vmem:[#allocation7 + $0x138] sm:$0xff]  ;;  %v13745_v17 = vld [vmem:[#allocation7 + $0x120] sm:$0xff] }
 0x8a1   :  { %4635 = vmatprep.subr.mxu0 %v4334_v9  ;;  %4712 = vmatprep.subr.mxu1 %v4336_v34  ;;  %v13747_v9 = vld [vmem:[#allocation7 + $0x130] sm:$0xff]  ;;  %v13751_v34 = vld [vmem:[#allocation7 + $0x108] sm:$0xff] }
 0x8a2   :  { %4636 = vmatpush2.msra.mxu0 %v4333_v1  ;;  %4713 = vmatpush2.msra.mxu1 %v4335_v37  ;;  %v13753_v1 = vld [vmem:[#allocation7 + $0x118] sm:$0xff]  ;;  %v13757_v37 = vld [vmem:[#allocation7 + $0x100] sm:$0xff] }
 0x8a3   :  { %4637 = vmatprep.subr.mxu0 %v4326_v10  ;;  %4714 = vmatprep.subr.mxu1 %v4328_v23  ;;  %v13759_v10 = vld [vmem:[#allocation7 + $0x110] sm:$0xff]  ;;  %v13763_v23 = vld [vmem:[#allocation7 + $0xe8] sm:$0xff] }
 0x8a4   :  { %4638 = vmatpush2.msra.mxu0 %v4325_v42  ;;  %4715 = vmatpush2.msra.mxu1 %v4327_v11  ;;  %v13765_v42 = vld [vmem:[#allocation7 + $0xf8] sm:$0xff]  ;;  %v13769_v11 = vld [vmem:[#allocation7 + $0xe0] sm:$0xff] }
 0x8a5   :  { %4639 = vmatprep.subr.mxu0 %v4318_v6  ;;  %4716 = vmatprep.subr.mxu1 %v4320_v25  ;;  %v13771_v6 = vld [vmem:[#allocation7 + $0xf0] sm:$0xff]  ;;  %v13775_v25 = vld [vmem:[#allocation7 + $0xc8] sm:$0xff] }
 0x8a6   :  { %4640 = vmatpush2.msra.mxu0 %v4317_v26  ;;  %4717 = vmatpush2.msra.mxu1 %v4319_v28  ;;  %v13777_v26 = vld [vmem:[#allocation7 + $0xd8] sm:$0xff]  ;;  %v13781_v28 = vld [vmem:[#allocation7 + $0xc0] sm:$0xff] }
 0x8a7   :  { %4641 = vmatprep.subr.mxu0 %v4310_v40  ;;  %4718 = vmatprep.subr.mxu1 %v4312_v30  ;;  %v13783_v40 = vld [vmem:[#allocation7 + $0xd0] sm:$0xff]  ;;  %v13787_v30 = vld [vmem:[#allocation7 + $0xa8] sm:$0xff] }
 0x8a8   :  { %4642 = vmatpush2.msra.mxu0 %v4309_v2  ;;  %4719 = vmatpush2.msra.mxu1 %v4311_v36  ;;  %v13789_v2 = vld [vmem:[#allocation7 + $0xb8] sm:$0xff]  ;;  %v13793_v36 = vld [vmem:[#allocation7 + $0xa0] sm:$0xff] }
 0x8a9   :  { %4643 = vmatprep.subr.mxu0 %v4302_v31  ;;  %4720 = vmatprep.subr.mxu1 %v4304_v8  ;;  %v13795_v31 = vld [vmem:[#allocation7 + $0xb0] sm:$0xff]  ;;  %v13799_v8 = vld [vmem:[#allocation7 + $0x88] sm:$0xff] }
 0x8aa   :  { %4644 = vmatpush2.msra.mxu0 %v4301_v56  ;;  %4721 = vmatpush2.msra.mxu1 %v4303_v39  ;;  %v13801_v56 = vld [vmem:[#allocation7 + $0x98] sm:$0xff]  ;;  %v13805_v39 = vld [vmem:[#allocation7 + $0x80] sm:$0xff] }
 0x8ab   :  { %4645 = vmatprep.subr.mxu0 %v4294_v58  ;;  %4722 = vmatprep.subr.mxu1 %v4296_v53  ;;  %v13807_v58 = vld [vmem:[#allocation7 + $0x90] sm:$0xff]  ;;  %v13811_v53 = vld [vmem:[#allocation7 + $0x68] sm:$0xff] }
 0x8ac   :  { %4646 = vmatpush2.msra.mxu0 %v4293_v3  ;;  %4723 = vmatpush2.msra.mxu1 %v4295_v24  ;;  %v13813_v3 = vld [vmem:[#allocation7 + $0x78] sm:$0xff]  ;;  %v13817_v24 = vld [vmem:[#allocation7 + $0x60] sm:$0xff] }
 0x8ad   :  { %4647 = vmatprep.subr.mxu0 %v4286_v47  ;;  %4724 = vmatprep.subr.mxu1 %v4288_v44  ;;  %v13819_v47 = vld [vmem:[#allocation7 + $0x70] sm:$0xff]  ;;  %v13823_v44 = vld [vmem:[#allocation7 + $0x48] sm:$0xff] }
 0x8ae   :  { %4648 = vmatpush2.msra.mxu0 %v4285_v35  ;;  %4725 = vmatpush2.msra.mxu1 %v4287_v52  ;;  %16846 = vst [vmem:[#allocation85_spill] sm:$0xff] %v13823_v44  ;;  %v13825_v35 = vld [vmem:[#allocation7 + $0x58] sm:$0xff]  ;;  %v13829_v52 = vld [vmem:[#allocation7 + $0x40] sm:$0xff] }
 0x8af   :  { %4649 = vmatprep.subr.mxu0 %v4278_v14  ;;  %4726 = vmatprep.subr.mxu1 %v4280_v46  ;;  %16847 = vst [vmem:[#allocation15_spill] sm:$0xff] %v13825_v35  ;;  %16848 = vst [vmem:[#allocation16_spill] sm:$0xff] %v13829_v52  ;;  %v13831_v14 = vld [vmem:[#allocation7 + $0x50] sm:$0xff]  ;;  %v13835_v46 = vld [vmem:[#allocation7 + $0x28] sm:$0xff] }
 0x8b0   :  { %4650 = vmatpush2.msra.mxu0 %v4277_v48  ;;  %4727 = vmatpush2.msra.mxu1 %v4279_v5  ;;  %16849 = vst [vmem:[#allocation17_spill] sm:$0xff] %v13831_v14  ;;  %16850 = vst [vmem:[#allocation18_spill] sm:$0xff] %v13835_v46  ;;  %v13837_v48 = vld [vmem:[#allocation7 + $0x38] sm:$0xff]  ;;  %v13841_v5 = vld [vmem:[#allocation7 + $0x20] sm:$0xff] }
 0x8b1   :  { %4651 = vmatprep.subr.mxu0 %v4270_v7  ;;  %4728 = vmatprep.subr.mxu1 %v4272_v50  ;;  %16851 = vst [vmem:[#allocation19_spill] sm:$0xff] %v13837_v48  ;;  %16852 = vst [vmem:[#allocation20_spill] sm:$0xff] %v13841_v5  ;;  %v13843_v7 = vld [vmem:[#allocation7 + $0x30] sm:$0xff]  ;;  %v13847_v50 = vld [vmem:[#allocation7 + $0x8] sm:$0xff] }
 0x8b2   :  { %4652 = vmatpush2.msra.mxu0 %v4269_v18  ;;  %4729 = vmatpush2.msra.mxu1 %v4271_v61  ;;  %16853 = vst [vmem:[#allocation21_spill] sm:$0xff] %v13843_v7  ;;  %16854 = vst [vmem:[#allocation22_spill] sm:$0xff] %v13847_v50  ;;  %v13849_v18 = vld [vmem:[#allocation7 + $0x18] sm:$0xff]  ;;  %v13853_v61 = vld [vmem:[#allocation7] sm:$0xff] }
 0x8b3   :  { %4654 = vmatmul.mubr.f32.vlgmr.msra.gmra.mxu0 %v13653_v51  ;;  %4731 = vmatmul.mubr.f32.vlgmr.msra.gmra.mxu1 %v13653_v51  ;;  %v13691_v51 = vld [vmem:[#allocation7 + $0x1a8] sm:$0xff]  ;;  %16855 = vst [vmem:[#allocation23_spill] sm:$0xff] %v13849_v18  ;;  %16856 = vst [vmem:[#allocation24_spill] sm:$0xff] %v13853_v61 }
 0x8b4   :  { %4827 = vmatprep.subr.mxu0 %v13665_v20  ;;  %4898 = vmatprep.subr.mxu1 %v13667_v13 }
 0x8b5   :  { %4659 = vmatprep.mubr.f32.mxu0 %v13657_v21  ;;  %4736 = vmatprep.mubr.f32.mxu1 %v13657_v21  ;;  %v13697_v21 = vld [vmem:[#allocation7 + $0x1a0] sm:$0xff] }
 0x8b6   :  { %4828 = vmatpush1.msra.mxu0 %v13671_v29  ;;  %4899 = vmatpush1.msra.mxu1 %v13673_v41 }
 0x8b7   :  { %4829 = vmatprep.subr.mxu0 %v13677_v0  ;;  %4900 = vmatprep.subr.mxu1 %v13679_v59 }
 0x8b8   :  { %4830 = vmatpush1.msra.mxu0 %v13683_v62  ;;  %4901 = vmatpush1.msra.mxu1 %v13685_v15 }
 0x8b9   :  { %4660 = vmatmul.mubr.f32.gmra.mxu0 %v13661_v4  ;;  %4737 = vmatmul.mubr.f32.gmra.mxu1 %v13661_v4  ;;  %v13721_v4 = vld [vmem:[#allocation7 + $0x160] sm:$0xff] }
 0x8ba   :  { %4831 = vmatprep.subr.mxu0 %v13691_v51  ;;  %4902 = vmatprep.subr.mxu1 %v13693_v27 }
 0x8bb   :  { %4832 = vmatpush1.msra.mxu0 %v13697_v21  ;;  %4903 = vmatpush1.msra.mxu1 %v13699_v16 }
 0x8bc   :  { %4833 = vmatprep.subr.mxu0 %v13703_v60  ;;  %4904 = vmatprep.subr.mxu1 %v13705_v19 }
 0x8bd   :  { %4834 = vmatpush1.msra.mxu0 %v13709_v32  ;;  %4905 = vmatpush1.msra.mxu1 %v13711_v45 }
 0x8be   :  { %4835 = vmatprep.subr.mxu0 %v13715_v22  ;;  %4906 = vmatprep.subr.mxu1 %v13717_v57 }
 0x8bf   :  { %4836 = vmatpush1.msra.mxu0 %v13721_v4  ;;  %4907 = vmatpush1.msra.mxu1 %v13723_v55 }
 0x8c0   :  { %4837 = vmatprep.subr.mxu0 %v13727_v54  ;;  %4908 = vmatprep.subr.mxu1 %v13729_v12 }
 0x8c1   :  { %4838 = vmatpush1.msra.mxu0 %v13733_v38  ;;  %4909 = vmatpush1.msra.mxu1 %v13735_v49 }
 0x8c2   :  { %4839 = vmatprep.subr.mxu0 %v13739_v63  ;;  %4910 = vmatprep.subr.mxu1 %v13741_v43 }
 0x8c3   :  { %4840 = vmatpush1.msra.mxu0 %v13745_v17  ;;  %4911 = vmatpush1.msra.mxu1 %v13747_v9 }
 0x8c4   :  { %4841 = vmatprep.subr.mxu0 %v13751_v34  ;;  %4912 = vmatprep.subr.mxu1 %v13753_v1 }
 0x8c5   :  { %4842 = vmatpush1.msra.mxu0 %v13757_v37  ;;  %4913 = vmatpush1.msra.mxu1 %v13759_v10 }
 0x8c6   :  { %4843 = vmatprep.subr.mxu0 %v13763_v23  ;;  %4914 = vmatprep.subr.mxu1 %v13765_v42 }
 0x8c7   :  { %4844 = vmatpush1.msra.mxu0 %v13769_v11  ;;  %4915 = vmatpush1.msra.mxu1 %v13771_v6 }
 0x8c8   :  { %4845 = vmatprep.subr.mxu0 %v13775_v25  ;;  %4916 = vmatprep.subr.mxu1 %v13777_v26 }
 0x8c9   :  { %4846 = vmatpush1.msra.mxu0 %v13781_v28  ;;  %4917 = vmatpush1.msra.mxu1 %v13783_v40 }
 0x8ca   :  { %4847 = vmatprep.subr.mxu0 %v13787_v30  ;;  %4918 = vmatprep.subr.mxu1 %v13789_v2 }
 0x8cb   :  { %4848 = vmatpush1.msra.mxu0 %v13793_v36  ;;  %4919 = vmatpush1.msra.mxu1 %v13795_v31 }
 0x8cc   :  { %4849 = vmatprep.subr.mxu0 %v13799_v8  ;;  %4920 = vmatprep.subr.mxu1 %v13801_v56 }
 0x8cd   :  { %4850 = vmatpush1.msra.mxu0 %v13805_v39  ;;  %4921 = vmatpush1.msra.mxu1 %v13807_v58 }
 0x8ce   :  { %4851 = vmatprep.subr.mxu0 %v13811_v53  ;;  %4922 = vmatprep.subr.mxu1 %v13813_v3 }
 0x8cf   :  { %4852 = vmatpush1.msra.mxu0 %v13817_v24  ;;  %4923 = vmatpush1.msra.mxu1 %v13819_v47 }
 0x8d0   :  { %4853 = vmatprep.subr.mxu0 %v13823_v44  ;;  %4924 = vmatprep.subr.mxu1 %v13825_v35  ;;  %v13857_v35 = vld [vmem:[#allocation7 + $0x10] sm:$0xff]  ;;  %v13893_v44 = vld [vmem:[#allocation9 + $0x1a0] sm:$0xff] }
 0x8d1   :  { %4854 = vmatpush1.msra.mxu0 %v13829_v52  ;;  %4925 = vmatpush1.msra.mxu1 %v13831_v14  ;;  %16857 = vst [vmem:[#allocation25_spill] sm:$0xff] %v13857_v35  ;;  %v13863_v14 = vld [vmem:[#allocation9 + $0x1e8] sm:$0xff]  ;;  %v13889_v52 = vld [vmem:[#allocation9 + $0x1b8] sm:$0xff]  ;;  %16868 = vst [vmem:[#allocation44_spill] sm:$0xff] %v13893_v44 }
 0x8d2   :  { %4855 = vmatprep.subr.mxu0 %v13835_v46  ;;  %4926 = vmatprep.subr.mxu1 %v13837_v48  ;;  %16858 = vst [vmem:[#allocation26_spill] sm:$0xff] %v13863_v14  ;;  %v13865_v46 = vld [vmem:[#allocation9 + $0x1f8] sm:$0xff]  ;;  %v13887_v48 = vld [vmem:[#allocation9 + $0x1a8] sm:$0xff]  ;;  %16867 = vst [vmem:[#allocation33_spill] sm:$0xff] %v13889_v52 }
 0x8d3   :  { %4856 = vmatpush1.msra.mxu0 %v13841_v5  ;;  %4927 = vmatpush1.msra.mxu1 %v13843_v7  ;;  %16859 = vst [vmem:[#allocation27_spill] sm:$0xff] %v13865_v46  ;;  %v13869_v5 = vld [vmem:[#allocation9 + $0x1e0] sm:$0xff]  ;;  %v13871_v7 = vld [vmem:[#allocation9 + $0x1f0] sm:$0xff]  ;;  %16866 = vst [vmem:[#allocation43_spill] sm:$0xff] %v13887_v48 }
 0x8d4   :  { %4857 = vmatprep.subr.mxu0 %v13847_v50  ;;  %4928 = vmatprep.subr.mxu1 %v13849_v18  ;;  %16860 = vst [vmem:[#allocation28_spill] sm:$0xff] %v13869_v5  ;;  %16861 = vst [vmem:[#allocation29_spill] sm:$0xff] %v13871_v7  ;;  %v13875_v18 = vld [vmem:[#allocation9 + $0x1c8] sm:$0xff]  ;;  %v13881_v50 = vld [vmem:[#allocation9 + $0x1c0] sm:$0xff] }
 0x8d5   :  { %4858 = vmatpush1.msra.mxu0 %v13853_v61  ;;  %4891 = vmatprep.mubr.f32.mxu0 %v16384_v33  ;;  %16862 = vst [vmem:[#allocation30_spill] sm:$0xff] %v13875_v18  ;;  %v13877_v61 = vld [vmem:[#allocation9 + $0x1d8] sm:$0xff]  ;;  %16864 = vst [vmem:[#allocation42_spill] sm:$0xff] %v13881_v50 }
 0x8d6   :  { %4929 = vmatpush1.msra.mxu1 %v13857_v35  ;;  %4962 = vmatprep.mubr.f32.mxu1 %v16384_v33  ;;  %16863 = vst [vmem:[#allocation31_spill] sm:$0xff] %v13877_v61  ;;  %v13883_v35 = vld [vmem:[#allocation9 + $0x1d0] sm:$0xff] }
 0x8d7   :  { %4892 = vmatmul.mubr.f32.vlgmr.msra.gmra.mxu0 %v16384_v33  ;;  %4963 = vmatmul.mubr.f32.vlgmr.msra.gmra.mxu1 %v16384_v33  ;;  %16865 = vst [vmem:[#allocation32_spill] sm:$0xff] %v13883_v35 }
 0x8d8   :  { %5041 = vmatprep.subr.mxu0 %v13863_v14  ;;  %5112 = vmatprep.subr.mxu1 %v13865_v46  ;;  %v13895_v14 = vld [vmem:[#allocation9 + $0x1b0] sm:$0xff]  ;;  %v13899_v46 = vld [vmem:[#allocation9 + $0x188] sm:$0xff] }
 0x8d9   :  { %5042 = vmatpush1.msra.mxu0 %v13869_v5  ;;  %5113 = vmatpush1.msra.mxu1 %v13871_v7  ;;  %16869 = vst [vmem:[#allocation34_spill] sm:$0xff] %v13895_v14  ;;  %16870 = vst [vmem:[#allocation45_spill] sm:$0xff] %v13899_v46  ;;  %v13901_v5 = vld [vmem:[#allocation9 + $0x198] sm:$0xff]  ;;  %v13905_v7 = vld [vmem:[#allocation9 + $0x180] sm:$0xff] }
 0x8da   :  { %5043 = vmatprep.subr.mxu0 %v13875_v18  ;;  %5114 = vmatprep.subr.mxu1 %v13877_v61  ;;  %16871 = vst [vmem:[#allocation35_spill] sm:$0xff] %v13901_v5  ;;  %16872 = vst [vmem:[#allocation46_spill] sm:$0xff] %v13905_v7  ;;  %v13907_v18 = vld [vmem:[#allocation9 + $0x190] sm:$0xff]  ;;  %v13911_v61 = vld [vmem:[#allocation9 + $0x168] sm:$0xff] }
 0x8db   :  { %5044 = vmatpush1.msra.mxu0 %v13881_v50  ;;  %5115 = vmatpush1.msra.mxu1 %v13883_v35  ;;  %16873 = vst [vmem:[#allocation36_spill] sm:$0xff] %v13907_v18  ;;  %16874 = vst [vmem:[#allocation37_spill] sm:$0xff] %v13911_v61  ;;  %v13913_v50 = vld [vmem:[#allocation9 + $0x178] sm:$0xff]  ;;  %v13917_v35 = vld [vmem:[#allocation9 + $0x160] sm:$0xff] }
 0x8dc   :  { %5045 = vmatprep.subr.mxu0 %v13887_v48  ;;  %5116 = vmatprep.subr.mxu1 %v13889_v52  ;;  %16875 = vst [vmem:[#allocation38_spill] sm:$0xff] %v13913_v50  ;;  %16876 = vst [vmem:[#allocation39_spill] sm:$0xff] %v13917_v35  ;;  %v13919_v48 = vld [vmem:[#allocation9 + $0x170] sm:$0xff]  ;;  %v13923_v52 = vld [vmem:[#allocation9 + $0x148] sm:$0xff] }
 0x8dd   :  { %5046 = vmatpush1.msra.mxu0 %v13893_v44  ;;  %5117 = vmatpush1.msra.mxu1 %v13895_v14  ;;  %16877 = vst [vmem:[#allocation40_spill] sm:$0xff] %v13919_v48  ;;  %16878 = vst [vmem:[#allocation41_spill] sm:$0xff] %v13923_v52  ;;  %v13925_v44 = vld [vmem:[#allocation9 + $0x158] sm:$0xff]  ;;  %v13929_v14 = vld [vmem:[#allocation9 + $0x140] sm:$0xff] }
 0x8de   :  { %5047 = vmatprep.subr.mxu0 %v13899_v46  ;;  %5118 = vmatprep.subr.mxu1 %v13901_v5  ;;  %16879 = vst [vmem:[#allocation47_spill] sm:$0xff] %v13925_v44  ;;  %16880 = vst [vmem:[#allocation48_spill] sm:$0xff] %v13929_v14  ;;  %v13931_v46 = vld [vmem:[#allocation9 + $0x150] sm:$0xff]  ;;  %v13935_v5 = vld [vmem:[#allocation9 + $0x128] sm:$0xff] }
 0x8df   :  { %5048 = vmatpush1.msra.mxu0 %v13905_v7  ;;  %5119 = vmatpush1.msra.mxu1 %v13907_v18  ;;  %16881 = vst [vmem:[#allocation49_spill] sm:$0xff] %v13931_v46  ;;  %16882 = vst [vmem:[#allocation50_spill] sm:$0xff] %v13935_v5  ;;  %v13937_v7 = vld [vmem:[#allocation9 + $0x138] sm:$0xff]  ;;  %v13941_v18 = vld [vmem:[#allocation9 + $0x120] sm:$0xff] }
 0x8e0   :  { %5049 = vmatprep.subr.mxu0 %v13911_v61  ;;  %5120 = vmatprep.subr.mxu1 %v13913_v50  ;;  %16883 = vst [vmem:[#allocation51_spill] sm:$0xff] %v13937_v7  ;;  %16884 = vst [vmem:[#allocation52_spill] sm:$0xff] %v13941_v18  ;;  %v13943_v61 = vld [vmem:[#allocation9 + $0x130] sm:$0xff]  ;;  %v13947_v50 = vld [vmem:[#allocation9 + $0x108] sm:$0xff] }
 0x8e1   :  { %5050 = vmatpush1.msra.mxu0 %v13917_v35  ;;  %5121 = vmatpush1.msra.mxu1 %v13919_v48  ;;  %16885 = vst [vmem:[#allocation53_spill] sm:$0xff] %v13943_v61  ;;  %16886 = vst [vmem:[#allocation58_spill] sm:$0xff] %v13947_v50  ;;  %v13949_v35 = vld [vmem:[#allocation9 + $0x118] sm:$0xff]  ;;  %v13953_v48 = vld [vmem:[#allocation9 + $0x100] sm:$0xff] }
 0x8e2   :  { %5051 = vmatprep.subr.mxu0 %v13923_v52  ;;  %5122 = vmatprep.subr.mxu1 %v13925_v44  ;;  %16887 = vst [vmem:[#allocation54_spill] sm:$0xff] %v13949_v35  ;;  %16888 = vst [vmem:[#allocation55_spill] sm:$0xff] %v13953_v48  ;;  %v13955_v52 = vld [vmem:[#allocation9 + $0x110] sm:$0xff]  ;;  %v13959_v44 = vld [vmem:[#allocation9 + $0xe8] sm:$0xff] }
 0x8e3   :  { %5052 = vmatpush1.msra.mxu0 %v13929_v14  ;;  %5123 = vmatpush1.msra.mxu1 %v13931_v46  ;;  %16889 = vst [vmem:[#allocation56_spill] sm:$0xff] %v13955_v52  ;;  %16890 = vst [vmem:[#allocation57_spill] sm:$0xff] %v13959_v44  ;;  %v13961_v14 = vld [vmem:[#allocation9 + $0xf8] sm:$0xff]  ;;  %v13965_v46 = vld [vmem:[#allocation9 + $0xe0] sm:$0xff] }
 0x8e4   :  { %5053 = vmatprep.subr.mxu0 %v13935_v5  ;;  %5124 = vmatprep.subr.mxu1 %v13937_v7  ;;  %16891 = vst [vmem:[#allocation59_spill] sm:$0xff] %v13961_v14  ;;  %16892 = vst [vmem:[#allocation60_spill] sm:$0xff] %v13965_v46  ;;  %v13967_v5 = vld [vmem:[#allocation9 + $0xf0] sm:$0xff]  ;;  %v13971_v7 = vld [vmem:[#allocation9 + $0xc8] sm:$0xff] }
 0x8e5   :  { %5054 = vmatpush1.msra.mxu0 %v13941_v18  ;;  %5125 = vmatpush1.msra.mxu1 %v13943_v61  ;;  %16893 = vst [vmem:[#allocation61_spill] sm:$0xff] %v13967_v5  ;;  %16894 = vst [vmem:[#allocation62_spill] sm:$0xff] %v13971_v7  ;;  %v13973_v18 = vld [vmem:[#allocation9 + $0xd8] sm:$0xff]  ;;  %v13977_v61 = vld [vmem:[#allocation9 + $0xc0] sm:$0xff] }
 0x8e6   :  { %5055 = vmatprep.subr.mxu0 %v13947_v50  ;;  %5126 = vmatprep.subr.mxu1 %v13949_v35  ;;  %16895 = vst [vmem:[#allocation63_spill] sm:$0xff] %v13973_v18  ;;  %16896 = vst [vmem:[#allocation64_spill] sm:$0xff] %v13977_v61  ;;  %v13979_v50 = vld [vmem:[#allocation9 + $0xd0] sm:$0xff]  ;;  %v13983_v35 = vld [vmem:[#allocation9 + $0xa8] sm:$0xff] }
 0x8e7   :  { %5056 = vmatpush1.msra.mxu0 %v13953_v48  ;;  %5127 = vmatpush1.msra.mxu1 %v13955_v52  ;;  %16897 = vst [vmem:[#allocation65_spill] sm:$0xff] %v13979_v50  ;;  %16898 = vst [vmem:[#allocation66_spill] sm:$0xff] %v13983_v35  ;;  %v13985_v48 = vld [vmem:[#allocation9 + $0xb8] sm:$0xff]  ;;  %v13989_v52 = vld [vmem:[#allocation9 + $0xa0] sm:$0xff] }
 0x8e8   :  { %5057 = vmatprep.subr.mxu0 %v13959_v44  ;;  %5128 = vmatprep.subr.mxu1 %v13961_v14  ;;  %16899 = vst [vmem:[#allocation67_spill] sm:$0xff] %v13985_v48  ;;  %16900 = vst [vmem:[#allocation68_spill] sm:$0xff] %v13989_v52  ;;  %v13991_v44 = vld [vmem:[#allocation9 + $0xb0] sm:$0xff]  ;;  %v13995_v14 = vld [vmem:[#allocation9 + $0x88] sm:$0xff] }
 0x8e9   :  { %5058 = vmatpush1.msra.mxu0 %v13965_v46  ;;  %5129 = vmatpush1.msra.mxu1 %v13967_v5  ;;  %16901 = vst [vmem:[#allocation69_spill] sm:$0xff] %v13991_v44  ;;  %16902 = vst [vmem:[#allocation70_spill] sm:$0xff] %v13995_v14  ;;  %v13997_v46 = vld [vmem:[#allocation9 + $0x98] sm:$0xff]  ;;  %v14001_v5 = vld [vmem:[#allocation9 + $0x80] sm:$0xff] }
 0x8ea   :  { %5059 = vmatprep.subr.mxu0 %v13971_v7  ;;  %5130 = vmatprep.subr.mxu1 %v13973_v18  ;;  %16903 = vst [vmem:[#allocation71_spill] sm:$0xff] %v13997_v46  ;;  %16904 = vst [vmem:[#allocation72_spill] sm:$0xff] %v14001_v5  ;;  %v14003_v7 = vld [vmem:[#allocation9 + $0x90] sm:$0xff]  ;;  %v14007_v18 = vld [vmem:[#allocation9 + $0x68] sm:$0xff] }
 0x8eb   :  { %5060 = vmatpush1.msra.mxu0 %v13977_v61  ;;  %5131 = vmatpush1.msra.mxu1 %v13979_v50  ;;  %16905 = vst [vmem:[#allocation73_spill] sm:$0xff] %v14003_v7  ;;  %16906 = vst [vmem:[#allocation74_spill] sm:$0xff] %v14007_v18  ;;  %v14009_v61 = vld [vmem:[#allocation9 + $0x78] sm:$0xff]  ;;  %v14013_v50 = vld [vmem:[#allocation9 + $0x60] sm:$0xff] }
 0x8ec   :  { %5061 = vmatprep.subr.mxu0 %v13983_v35  ;;  %5132 = vmatprep.subr.mxu1 %v13985_v48  ;;  %16907 = vst [vmem:[#allocation75_spill] sm:$0xff] %v14009_v61  ;;  %16908 = vst [vmem:[#allocation76_spill] sm:$0xff] %v14013_v50  ;;  %v14015_v35 = vld [vmem:[#allocation9 + $0x70] sm:$0xff]  ;;  %v14019_v48 = vld [vmem:[#allocation9 + $0x48] sm:$0xff] }
 0x8ed   :  { %5062 = vmatpush1.msra.mxu0 %v13989_v52  ;;  %5133 = vmatpush1.msra.mxu1 %v13991_v44  ;;  %16909 = vst [vmem:[#allocation77_spill] sm:$0xff] %v14015_v35  ;;  %v14021_v52 = vld [vmem:[#allocation9 + $0x58] sm:$0xff]  ;;  %v14025_v44 = vld [vmem:[#allocation9 + $0x40] sm:$0xff] }
 0x8ee   :  { %5063 = vmatprep.subr.mxu0 %v13995_v14  ;;  %5134 = vmatprep.subr.mxu1 %v13997_v46  ;;  %16910 = vst [vmem:[#allocation78_spill] sm:$0xff] %v14021_v52  ;;  %v14027_v14 = vld [vmem:[#allocation9 + $0x50] sm:$0xff]  ;;  %v14031_v46 = vld [vmem:[#allocation9 + $0x28] sm:$0xff] }
 0x8ef   :  { %5064 = vmatpush1.msra.mxu0 %v14001_v5  ;;  %5135 = vmatpush1.msra.mxu1 %v14003_v7  ;;  %v14033_v5 = vld [vmem:[#allocation9 + $0x38] sm:$0xff]  ;;  %v14037_v7 = vld [vmem:[#allocation9 + $0x20] sm:$0xff] }
 0x8f0   :  { %5065 = vmatprep.subr.mxu0 %v14007_v18  ;;  %5136 = vmatprep.subr.mxu1 %v14009_v61  ;;  %v14039_v18 = vld [vmem:[#allocation9 + $0x30] sm:$0xff]  ;;  %v14043_v61 = vld [vmem:[#allocation9 + $0x8] sm:$0xff] }
 0x8f1   :  { %5066 = vmatpush1.msra.mxu0 %v14013_v50  ;;  %5137 = vmatpush1.msra.mxu1 %v14015_v35  ;;  %v14045_v50 = vld [vmem:[#allocation9 + $0x18] sm:$0xff]  ;;  %v14049_v35 = vld [vmem:[#allocation9] sm:$0xff] }
 0x8f2   :  { %5067 = vmatprep.subr.mxu0 %v14019_v48  ;;  %5138 = vmatprep.subr.mxu1 %v14021_v52  ;;  %v14053_v52 = vld [vmem:[#allocation9 + $0x10] sm:$0xff] }
 0x8f3   :  { %5068 = vmatpush1.msra.mxu0 %v14025_v44  ;;  %5139 = vmatpush1.msra.mxu1 %v14027_v14 }
 0x8f4   :  { %5069 = vmatprep.subr.mxu0 %v14031_v46  ;;  %5140 = vmatprep.subr.mxu1 %v14033_v5 }
 0x8f5   :  { %5070 = vmatpush1.msra.mxu0 %v14037_v7  ;;  %5141 = vmatpush1.msra.mxu1 %v14039_v18 }
 0x8f6   :  { %5071 = vmatprep.subr.mxu0 %v14043_v61  ;;  %5142 = vmatprep.subr.mxu1 %v14045_v50 }
 0x8f7   :  { %5072 = vmatpush1.msra.mxu0 %v14049_v35  ;;  %5105 = vmatprep.mubr.f32.mxu0 %v16384_v33 }
 0x8f8   :  { %5143 = vmatpush1.msra.mxu1 %v14053_v52  ;;  %5176 = vmatprep.mubr.f32.mxu1 %v16384_v33 }
 0x8f9   :  { %5106 = vmatmul.mubr.f32.vlgmr.msra.gmra.mxu0 %v16384_v33  ;;  %5177 = vmatmul.mubr.f32.vlgmr.msra.gmra.mxu1 %v16384_v33 }
 0x8fa   :  { %5317 = vmatprep.subr.mxu0 %v13665_v20  ;;  %5388 = vmatprep.subr.mxu1 %v13667_v13  ;;  %v16911_v20 = vld [vmem:[#allocation85_spill] sm:$0xff]  ;;  %v16912_v13 = vld [vmem:[#allocation15_spill] sm:$0xff] }
 0x8fb   :  { %5318 = vmatpush1.msra.mxu0 %v13671_v29  ;;  %5389 = vmatpush1.msra.mxu1 %v13673_v41  ;;  %v16913_v29 = vld [vmem:[#allocation16_spill] sm:$0xff]  ;;  %v16914_v41 = vld [vmem:[#allocation17_spill] sm:$0xff] }
 0x8fc   :  { %5319 = vmatprep.subr.mxu0 %v13677_v0  ;;  %5390 = vmatprep.subr.mxu1 %v13679_v59  ;;  %v16915_v0 = vld [vmem:[#allocation18_spill] sm:$0xff]  ;;  %v16916_v59 = vld [vmem:[#allocation19_spill] sm:$0xff] }
 0x8fd   :  { %5320 = vmatpush1.msra.mxu0 %v13683_v62  ;;  %5391 = vmatpush1.msra.mxu1 %v13685_v15  ;;  %v16917_v62 = vld [vmem:[#allocation20_spill] sm:$0xff]  ;;  %v16918_v15 = vld [vmem:[#allocation21_spill] sm:$0xff] }
 0x8fe   :  { %5321 = vmatprep.subr.mxu0 %v13691_v51  ;;  %5392 = vmatprep.subr.mxu1 %v13693_v27  ;;  %v16919_v51 = vld [vmem:[#allocation22_spill] sm:$0xff]  ;;  %v16920_v27 = vld [vmem:[#allocation23_spill] sm:$0xff] }
 0x8ff   :  { %5322 = vmatpush1.msra.mxu0 %v13697_v21  ;;  %5393 = vmatpush1.msra.mxu1 %v13699_v16  ;;  %v16921_v21 = vld [vmem:[#allocation24_spill] sm:$0xff]  ;;  %v16922_v16 = vld [vmem:[#allocation25_spill] sm:$0xff] }
 0x900   :  { %5323 = vmatprep.subr.mxu0 %v13703_v60  ;;  %5394 = vmatprep.subr.mxu1 %v13705_v19  ;;  %v16923_v60 = vld [vmem:[#allocation26_spill] sm:$0xff]  ;;  %v16924_v19 = vld [vmem:[#allocation27_spill] sm:$0xff] }
 0x901   :  { %5324 = vmatpush1.msra.mxu0 %v13709_v32  ;;  %5395 = vmatpush1.msra.mxu1 %v13711_v45  ;;  %v4395_v32 = vlaneseq }
 0x902   :  { %5325 = vmatprep.subr.mxu0 %v13715_v22  ;;  %5396 = vmatprep.subr.mxu1 %v13717_v57 }
 0x903   :  { %5326 = vmatpush1.msra.mxu0 %v13721_v4  ;;  %5397 = vmatpush1.msra.mxu1 %v13723_v55  ;;  %v4396_v45 = vshrl.u32 %v4395_v32, 7  ;;  %v4393_v4 = vld [vmem:[%s15828_s5] sm:$0xff] }
 0x904   :  { %5327 = vmatprep.subr.mxu0 %v13727_v54  ;;  %5398 = vmatprep.subr.mxu1 %v13729_v12 }
 0x905   :  { %5328 = vmatpush1.msra.mxu0 %v13733_v38  ;;  %5399 = vmatpush1.msra.mxu1 %v13735_v49  ;;  %v4397_v22 = vsub.s32 0, %v4396_v45  ;;  %v4405_v57 = vsub.s32 2, %v4396_v45  ;;  %v4401_v55 = vsub.s32 1, %v4396_v45  ;;  %v4409_v54 = vsub.s32 3, %v4396_v45 }
 0x906   :  { %5329 = vmatprep.subr.mxu0 %v13739_v63  ;;  %5400 = vmatprep.subr.mxu1 %v13741_v43 }
 0x907   :  { %5330 = vmatpush1.msra.mxu0 %v13745_v17  ;;  %5401 = vmatpush1.msra.mxu1 %v13747_v9  ;;  %v4398_v12 = vrot.slane %v4393_v4, %v4397_v22  ;;  %v4406_v38 = vrot.slane %v4393_v4, %v4405_v57  ;;  %v4402_v49 = vrot.slane %v4393_v4, %v4401_v55 }
 0x908   :  { %5331 = vmatprep.subr.mxu0 %v13751_v34  ;;  %5402 = vmatprep.subr.mxu1 %v13753_v1  ;;  %v4410_v63 = vrot.slane %v4393_v4, %v4409_v54 }
 0x909   :  { %5332 = vmatpush1.msra.mxu0 %v13757_v37  ;;  %5403 = vmatpush1.msra.mxu1 %v13759_v10 }
 0x90a   :  { %5333 = vmatprep.subr.mxu0 %v13763_v23  ;;  %5404 = vmatprep.subr.mxu1 %v13765_v42 }
 0x90b   :  { %5334 = vmatpush1.msra.mxu0 %v13769_v11  ;;  %5405 = vmatpush1.msra.mxu1 %v13771_v6 }
 0x90c   :  { %5335 = vmatprep.subr.mxu0 %v13775_v25  ;;  %5406 = vmatprep.subr.mxu1 %v13777_v26 }
 0x90d   :  { %5336 = vmatpush1.msra.mxu0 %v13781_v28  ;;  %5407 = vmatpush1.msra.mxu1 %v13783_v40 }
 0x90e   :  { %5337 = vmatprep.subr.mxu0 %v13787_v30  ;;  %5408 = vmatprep.subr.mxu1 %v13789_v2  ;;  %v4413_v2 = vsub.s32 4, %v4396_v45 }
 0x90f   :  { %5338 = vmatpush1.msra.mxu0 %v13793_v36  ;;  %5409 = vmatpush1.msra.mxu1 %v13795_v31  ;;  %v4421_v36 = vsub.s32 6, %v4396_v45  ;;  %v4417_v31 = vsub.s32 5, %v4396_v45 }
 0x910   :  { %5339 = vmatprep.subr.mxu0 %v13799_v8  ;;  %5410 = vmatprep.subr.mxu1 %v13801_v56  ;;  %v4425_v8 = vsub.s32 7, %v4396_v45  ;;  %v4414_v56 = vrot.slane %v4393_v4, %v4413_v2 }
 0x911   :  { %5340 = vmatpush1.msra.mxu0 %v13805_v39  ;;  %5411 = vmatpush1.msra.mxu1 %v13807_v58  ;;  %v4422_v39 = vrot.slane %v4393_v4, %v4421_v36  ;;  %v4418_v58 = vrot.slane %v4393_v4, %v4417_v31 }
 0x912   :  { %5341 = vmatprep.subr.mxu0 %v13811_v53  ;;  %5412 = vmatprep.subr.mxu1 %v13813_v3  ;;  %v4426_v53 = vrot.slane %v4393_v4, %v4425_v8 }
 0x913   :  { %5342 = vmatpush1.msra.mxu0 %v13817_v24  ;;  %5413 = vmatpush1.msra.mxu1 %v13819_v47 }
 0x914   :  { %5343 = vmatprep.subr.mxu0 %v16911_v20  ;;  %5414 = vmatprep.subr.mxu1 %v16912_v13 }
 0x915   :  { %5344 = vmatpush1.msra.mxu0 %v16913_v29  ;;  %5415 = vmatpush1.msra.mxu1 %v16914_v41 }
 0x916   :  { %5345 = vmatprep.subr.mxu0 %v16915_v0  ;;  %5416 = vmatprep.subr.mxu1 %v16916_v59 }
 0x917   :  { %5346 = vmatpush1.msra.mxu0 %v16917_v62  ;;  %5417 = vmatpush1.msra.mxu1 %v16918_v15 }
 0x918   :  { %5347 = vmatprep.subr.mxu0 %v16919_v51  ;;  %5418 = vmatprep.subr.mxu1 %v16920_v27 }
 0x919   :  { %5348 = vmatpush1.msra.mxu0 %v16921_v21  ;;  %5381 = vmatprep.mubr.f32.mxu0 %v16384_v33 }
 0x91a   :  { %5419 = vmatpush1.msra.mxu1 %v16922_v16  ;;  %5452 = vmatprep.mubr.f32.mxu1 %v16384_v33 }
 0x91b   :  { %5546 = vmatprep.subr.mxu0 %v16923_v60  ;;  %5617 = vmatprep.subr.mxu1 %v16924_v19 }
 0x930   :  { %v4501_v43 = vpop.f32.mrf.mxu0  ;;  %v4578_v17 = vpop.f32.mrf.mxu1 }
 0x931   :  { %v4502_v9 = vadd.f32 %v4501_v43, %v4398_v12  ;;  %v4579_v34 = vadd.f32 %v4578_v17, %v4406_v38 }
 0x932   :  { %v4503_v1 = vpop.f32.mrf.mxu0  ;;  %v4580_v37 = vpop.f32.mrf.mxu1 }
 0x933   :  { %4743 = vst [vmem:[#allocation3] sm:$0xff] %v4502_v9  ;;  %4745 = vst [vmem:[#allocation3 + $0x78] sm:$0xff] %v4579_v34  ;;  %v4504_v10 = vadd.f32 %v4503_v1, %v4402_v49  ;;  %v4581_v23 = vadd.f32 %v4580_v37, %v4410_v63 }
 0x935   :  { %4744 = vst [vmem:[#allocation3 + $0x38] sm:$0xff] %v4504_v10  ;;  %4746 = vst [vmem:[#allocation3 + $0x58] sm:$0xff] %v4581_v23 }
 0x936   :  { %v4507_v42 = vpop.f32.mrf.mxu0  ;;  %v4584_v11 = vpop.f32.mrf.mxu1 }
 0x937   :  { %v4508_v6 = vadd.f32 %v4507_v42, %v4398_v12  ;;  %v4585_v25 = vadd.f32 %v4584_v11, %v4406_v38 }
 0x938   :  { %v4509_v26 = vpop.f32.mrf.mxu0  ;;  %v4586_v28 = vpop.f32.mrf.mxu1 }
 0x939   :  { %4751 = vst [vmem:[#allocation3 + $0x40] sm:$0xff] %v4508_v6  ;;  %4753 = vst [vmem:[#allocation3 + $0x68] sm:$0xff] %v4585_v25  ;;  %v4510_v40 = vadd.f32 %v4509_v26, %v4402_v49  ;;  %v4587_v30 = vadd.f32 %v4586_v28, %v4410_v63 }
 0x93a   :  { %v4759_v19 = vld [vmem:[#allocation3] sm:$0x3]  ;;  %v4761_v17 = vld [vmem:[#allocation3 + $0x78] sm:$0x3] }
 0x93b   :  { %4752 = vst [vmem:[#allocation3 + $0x30] sm:$0xff] %v4510_v40  ;;  %4754 = vst [vmem:[#allocation3 + $0x28] sm:$0xff] %v4587_v30 }
 0x93c   :  { %v4760_v22 = vld [vmem:[#allocation3 + $0x38] sm:$0x3] }
 0x93d   :  { %v4762_v49 = vld [vmem:[#allocation3 + $0x58] sm:$0x3] }
 0x973   :  { %v4655_v3 = vpop.f32.mrf.mxu0  ;;  %v4732_v24 = vpop.f32.mrf.mxu1 }
 0x974   :  { %v4656_v47 = vadd.f32 %v4655_v3, %v4414_v56  ;;  %v4733_v20 = vadd.f32 %v4732_v24, %v4422_v39 }
 0x975   :  { %v4657_v13 = vpop.f32.mrf.mxu0  ;;  %v4734_v29 = vpop.f32.mrf.mxu1 }
 0x976   :  { %4747 = vst [vmem:[#allocation3 + $0x20] sm:$0xff] %v4656_v47  ;;  %4749 = vst [vmem:[#allocation3 + $0x70] sm:$0xff] %v4733_v20  ;;  %v4658_v41 = vadd.f32 %v4657_v13, %v4418_v58  ;;  %v4735_v0 = vadd.f32 %v4734_v29, %v4426_v53 }
 0x978   :  { %4748 = vst [vmem:[#allocation3 + $0x8] sm:$0xff] %v4658_v41  ;;  %4750 = vst [vmem:[#allocation3 + $0x10] sm:$0xff] %v4735_v0 }
 0x979   :  { %v4661_v59 = vpop.f32.mrf.mxu0  ;;  %v4738_v62 = vpop.f32.mrf.mxu1 }
 0x97a   :  { %v4662_v15 = vadd.f32 %v4661_v59, %v4414_v56  ;;  %v4739_v51 = vadd.f32 %v4738_v62, %v4422_v39 }
 0x97b   :  { %v4663_v27 = vpop.f32.mrf.mxu0  ;;  %v4740_v21 = vpop.f32.mrf.mxu1 }
 0x97c   :  { %4755 = vst [vmem:[#allocation3 + $0x60] sm:$0xff] %v4662_v15  ;;  %4757 = vst [vmem:[#allocation3 + $0x18] sm:$0xff] %v4739_v51  ;;  %v4664_v16 = vadd.f32 %v4663_v27, %v4418_v58  ;;  %v4741_v60 = vadd.f32 %v4740_v21, %v4426_v53 }
 0x97e   :  { %4756 = vst [vmem:[#allocation3 + $0x48] sm:$0xff] %v4664_v16  ;;  %4758 = vst [vmem:[#allocation3 + $0x50] sm:$0xff] %v4741_v60 }
 0x983   :  { %v4973_v40 = vld [vmem:[#allocation3 + $0x60] sm:$0xc0]  ;;  %v4975_v0 = vld [vmem:[#allocation3 + $0x18] sm:$0xc0] }
 0x985   :  { %v4974_v39 = vld [vmem:[#allocation3 + $0x48] sm:$0xc0]  ;;  %v4976_v13 = vld [vmem:[#allocation3 + $0x50] sm:$0xc0] }
 0x997   :  { %v4893_v32 = vpop.f32.mrf.mxu0  ;;  %v4964_v54 = vpop.f32.mrf.mxu1 }
 0x998   :  { %v4969_v45 = vadd.f32 %v4893_v32, %v4759_v19  ;;  %v4971_v34 = vadd.f32 %v4964_v54, %v4761_v17  ;;  %v16925_v32 = vld [vmem:[#allocation28_spill] sm:$0xff]  ;;  %v16931_v54 = vld [vmem:[#allocation43_spill] sm:$0xff]  ;;  %v16937_v17 = vld [vmem:[#allocation46_spill] sm:$0xff] }
 0x999   :  { %v4895_v57 = vpop.f32.mrf.mxu0  ;;  %v4966_v38 = vpop.f32.mrf.mxu1 }
 0x99a   :  { %v8997_v4 = vmul.f32 -1.442695, %v4969_v45  ;;  %v4970_v55 = vadd.f32 %v4895_v57, %v4760_v22  ;;  %v4972_v63 = vadd.f32 %v4966_v38, %v4762_v49  ;;  %v16926_v45 = vld [vmem:[#allocation29_spill] sm:$0xff]  ;;  %v16927_v22 = vld [vmem:[#allocation30_spill] sm:$0xff]  ;;  %v16928_v57 = vld [vmem:[#allocation31_spill] sm:$0xff] }
 0x99b   :  { %v16933_v38 = vld [vmem:[#allocation44_spill] sm:$0xff]  ;;  %v16934_v49 = vld [vmem:[#allocation34_spill] sm:$0xff] }
 0x99c   :  { %9351 = vpow2.f32 %v8997_v4  ;;  %v8998_v12 = vmul.f32 -1.442695, %v4970_v55  ;;  %v8999_v43 = vmul.f32 -1.442695, %v4972_v63  ;;  %v16929_v4 = vld [vmem:[#allocation42_spill] sm:$0xff]  ;;  %v16930_v55 = vld [vmem:[#allocation32_spill] sm:$0xff] }
 0x99d   :  { %v16935_v63 = vld [vmem:[#allocation45_spill] sm:$0xff] }
 0x99e   :  { %9353 = vpow2.f32 %v8998_v12  ;;  %v16932_v12 = vld [vmem:[#allocation33_spill] sm:$0xff] }
 0x99f   :  { %9355 = vpow2.f32 %v8999_v43  ;;  %v16936_v43 = vld [vmem:[#allocation35_spill] sm:$0xff] }
 0x9a9   :  { %v9352_v9 = vpop.eup %9351 }
 0x9aa   :  { %v5202_v1 = vadd.f32 1.0, %v9352_v9  ;;  %v16938_v9 = vld [vmem:[#allocation36_spill] sm:$0xff] }
 0x9ab   :  { %v9354_v37 = vpop.eup %9353 }
 0x9ac   :  { %9357 = vrcp.f32 %v5202_v1  ;;  %v5208_v10 = vadd.f32 1.0, %v9354_v37  ;;  %v9356_v23 = vpop.eup %9355  ;;  %v16940_v1 = vld [vmem:[#allocation38_spill] sm:$0xff]  ;;  %v16941_v37 = vld [vmem:[#allocation39_spill] sm:$0xff] }
 0x9ad   :  { %9359 = vtanh.f32 %v4971_v34  ;;  %v5215_v28 = vadd.f32 1.0, %v9356_v23  ;;  %v16939_v34 = vld [vmem:[#allocation37_spill] sm:$0xff] }
 0x9ae   :  { %9361 = vrcp.f32 %v5208_v10  ;;  %v16942_v10 = vld [vmem:[#allocation40_spill] sm:$0xff]  ;;  %v16943_v23 = vld [vmem:[#allocation41_spill] sm:$0xff] }
 0x9af   :  { %9363 = vrcp.f32 %v5215_v28  ;;  %v16948_v28 = vld [vmem:[#allocation51_spill] sm:$0xff] }
 0x9b9   :  { %v9358_v42 = vpop.eup %9357  ;;  %v5107_v11 = vpop.f32.mrf.mxu0 }
 0x9ba   :  { %v9360_v6 = vpop.eup %9359  ;;  %v5187_v25 = vrot.slane %v5107_v11, 2  ;;  %v5178_v8 = vpop.f32.mrf.mxu1  ;;  %v16945_v11 = vld [vmem:[#allocation48_spill] sm:$0xff] }
 0x9bb   :  { %v9362_v26 = vpop.eup %9361  ;;  %v5109_v30 = vpop.f32.mrf.mxu0  ;;  %v5219_v36 = vmul.f32 %v9360_v6, %v9358_v42  ;;  %v5189_v41 = vrot.slane %v5178_v8, 2  ;;  %v16944_v42 = vld [vmem:[#allocation47_spill] sm:$0xff]  ;;  %v16946_v6 = vld [vmem:[#allocation49_spill] sm:$0xff]  ;;  %v16952_v8 = vld [vmem:[#allocation54_spill] sm:$0xff] }
 0x9bc   :  { %v5218_v2 = vmul.f32 0.0, %v9362_v26  ;;  %v5195_v31 = vadd.f32 %v5187_v25, %v4973_v40  ;;  %v5188_v56 = vrot.slane %v5109_v30, 2  ;;  %v5180_v47 = vpop.f32.mrf.mxu1  ;;  %v9364_v62 = vpop.eup %9363  ;;  %v16947_v26 = vld [vmem:[#allocation50_spill] sm:$0xff]  ;;  %v16949_v30 = vld [vmem:[#allocation52_spill] sm:$0xff] }
 0x9bd   :  { %v5190_v20 = vrot.slane %v5180_v47, 2  ;;  %v5197_v15 = vadd.f32 %v5189_v41, %v4975_v0  ;;  %v16958_v41 = vld [vmem:[#allocation61_spill] sm:$0xff] }
 0x9be   :  { %v14134_v58 = vadd.f32 %v5219_v36, %v5218_v2  ;;  %v9000_v53 = vmul.f32 -1.442695, %v5195_v31  ;;  %v5196_v3 = vadd.f32 %v5188_v56, %v4974_v39  ;;  %v16950_v2 = vld [vmem:[#allocation53_spill] sm:$0xff]  ;;  %v16951_v31 = vld [vmem:[#allocation58_spill] sm:$0xff] }
 0x9bf   :  { %v5198_v29 = vadd.f32 %v5190_v20, %v4976_v13  ;;  %v16955_v20 = vld [vmem:[#allocation57_spill] sm:$0xff]  ;;  %v16956_v13 = vld [vmem:[#allocation59_spill] sm:$0xff] }
 0x9c0   :  { %9365 = vtanh.f32 %v14134_v58  ;;  %v9001_v24 = vmul.f32 -1.442695, %v5196_v3  ;;  %v16954_v3 = vld [vmem:[#allocation56_spill] sm:$0xff] }
 0x9c1   :  { %9367 = vpow2.f32 %v9000_v53  ;;  %v9002_v59 = vmul.f32 -1.442695, %v5198_v29  ;;  %v16953_v53 = vld [vmem:[#allocation55_spill] sm:$0xff]  ;;  %v16957_v29 = vld [vmem:[#allocation60_spill] sm:$0xff] }
 0x9c2   :  { %9369 = vpow2.f32 %v9001_v24 }
 0x9c3   :  { %9371 = vpow2.f32 %v9002_v59  ;;  %v16959_v59 = vld [vmem:[#allocation62_spill] sm:$0xff] }
 0x9c4   :  { %9373 = vtanh.f32 %v5197_v15  ;;  %v16961_v15 = vld [vmem:[#allocation64_spill] sm:$0xff] }
 0x9cd   :  { %v9366_v51 = vpop.eup %9365 }
 0x9ce   :  { %v9368_v27 = vpop.eup %9367  ;;  %v5222_v21 = vmul.f32 %v9366_v51, %v9364_v62  ;;  %v16960_v62 = vld [vmem:[#allocation63_spill] sm:$0xff]  ;;  %v16962_v51 = vld [vmem:[#allocation65_spill] sm:$0xff] }
 0x9cf   :  { %v9370_v16 = vpop.eup %9369  ;;  %v5226_v60 = vadd.f32 1.0, %v9368_v27  ;;  %v16963_v27 = vld [vmem:[#allocation66_spill] sm:$0xff] }
 0x9d0   :  { %v5232_v19 = vadd.f32 1.0, %v9370_v16  ;;  %5247 = vst [vmem:[#allocation4 + $0x18] sm:$0x3] %v5222_v21  ;;  %5382 = vmatmul.mubr.f32.vlgmr.msra.gmra.mxu0 %v5222_v21  ;;  %5453 = vmatmul.mubr.f32.vlgmr.msra.gmra.mxu1 %v5222_v21  ;;  %v9372_v25 = vpop.eup %9371  ;;  %v16964_v21 = vld [vmem:[#allocation67_spill] sm:$0xff]  ;;  %v16965_v16 = vld [vmem:[#allocation68_spill] sm:$0xff] }
 0x9d1   :  { %9375 = vrcp.f32 %v5226_v60  ;;  %5547 = vmatpush1.msra.mxu0 %v16925_v32  ;;  %5618 = vmatpush1.msra.mxu1 %v16926_v45  ;;  %v9374_v40 = vpop.eup %9373  ;;  %v5239_v39 = vadd.f32 1.0, %v9372_v25  ;;  %v16966_v60 = vld [vmem:[#allocation69_spill] sm:$0xff]  ;;  %v16968_v32 = vld [vmem:[#allocation71_spill] sm:$0xff]  ;;  %v16969_v45 = vld [vmem:[#allocation72_spill] sm:$0xff] }
 0x9d2   :  { %9377 = vrcp.f32 %v5232_v19  ;;  %5548 = vmatprep.subr.mxu0 %v16927_v22  ;;  %5619 = vmatprep.subr.mxu1 %v16928_v57  ;;  %v16967_v19 = vld [vmem:[#allocation70_spill] sm:$0xff]  ;;  %v16970_v22 = vld [vmem:[#allocation73_spill] sm:$0xff] }
 0x9d3   :  { %5549 = vmatpush1.msra.mxu0 %v16929_v4  ;;  %5620 = vmatpush1.msra.mxu1 %v16930_v55  ;;  %9379 = vrcp.f32 %v5239_v39  ;;  %v16971_v57 = vld [vmem:[#allocation74_spill] sm:$0xff]  ;;  %v16972_v4 = vld [vmem:[#allocation75_spill] sm:$0xff]  ;;  %v16973_v55 = vld [vmem:[#allocation76_spill] sm:$0xff] }
 0x9d4   :  { %5550 = vmatprep.subr.mxu0 %v16931_v54  ;;  %5621 = vmatprep.subr.mxu1 %v16932_v12  ;;  %v16974_v54 = vld [vmem:[#allocation77_spill] sm:$0xff]  ;;  %v16975_v12 = vld [vmem:[#allocation78_spill] sm:$0xff] }
 0x9d5   :  { %5551 = vmatpush1.msra.mxu0 %v16933_v38  ;;  %5622 = vmatpush1.msra.mxu1 %v16934_v49  ;;  %v14226_v38 = vld [vmem:[#allocation7 + $0x1d0] sm:$0xff]  ;;  %v14230_v49 = vld [vmem:[#allocation7 + $0x1a8] sm:$0xff]  ;;  %v14268_v25 = vld [vmem:[#allocation7 + $0x158] sm:$0xff] }
 0x9d6   :  { %5552 = vmatprep.subr.mxu0 %v16935_v63  ;;  %5623 = vmatprep.subr.mxu1 %v16936_v43  ;;  %v14232_v63 = vld [vmem:[#allocation7 + $0x1b8] sm:$0xff]  ;;  %v14236_v43 = vld [vmem:[#allocation7 + $0x1a0] sm:$0xff]  ;;  %v14298_v39 = vld [vmem:[#allocation7 + $0x110] sm:$0xff] }
 0x9d7   :  { %5553 = vmatpush1.msra.mxu0 %v16937_v17  ;;  %5624 = vmatpush1.msra.mxu1 %v16938_v9  ;;  %v14238_v17 = vld [vmem:[#allocation7 + $0x1b0] sm:$0xff]  ;;  %v14242_v9 = vld [vmem:[#allocation7 + $0x188] sm:$0xff] }
 0x9d8   :  { %5554 = vmatprep.subr.mxu0 %v16939_v34  ;;  %5625 = vmatprep.subr.mxu1 %v16940_v1  ;;  %v14244_v34 = vld [vmem:[#allocation7 + $0x198] sm:$0xff]  ;;  %v14248_v1 = vld [vmem:[#allocation7 + $0x180] sm:$0xff] }
 0x9d9   :  { %5555 = vmatpush1.msra.mxu0 %v16941_v37  ;;  %5626 = vmatpush1.msra.mxu1 %v16942_v10  ;;  %v14250_v37 = vld [vmem:[#allocation7 + $0x190] sm:$0xff]  ;;  %v14254_v10 = vld [vmem:[#allocation7 + $0x168] sm:$0xff] }
 0x9da   :  { %5556 = vmatprep.subr.mxu0 %v16943_v23  ;;  %5627 = vmatprep.subr.mxu1 %v16944_v42  ;;  %v14256_v23 = vld [vmem:[#allocation7 + $0x178] sm:$0xff]  ;;  %v14260_v42 = vld [vmem:[#allocation7 + $0x160] sm:$0xff] }
 0x9db   :  { %5557 = vmatpush1.msra.mxu0 %v16945_v11  ;;  %5628 = vmatpush1.msra.mxu1 %v16946_v6  ;;  %v14262_v11 = vld [vmem:[#allocation7 + $0x170] sm:$0xff]  ;;  %v14266_v6 = vld [vmem:[#allocation7 + $0x148] sm:$0xff] }
 0x9dc   :  { %5558 = vmatprep.subr.mxu0 %v16947_v26  ;;  %5629 = vmatprep.subr.mxu1 %v16948_v28  ;;  %v14272_v26 = vld [vmem:[#allocation7 + $0x140] sm:$0xff]  ;;  %v14274_v28 = vld [vmem:[#allocation7 + $0x150] sm:$0xff] }
 0x9dd   :  { %5559 = vmatpush1.msra.mxu0 %v16949_v30  ;;  %5630 = vmatpush1.msra.mxu1 %v16950_v2  ;;  %v14280_v30 = vld [vmem:[#allocation7 + $0x138] sm:$0xff]  ;;  %v14284_v2 = vld [vmem:[#allocation7 + $0x120] sm:$0xff] }
 0x9de   :  { %v9376_v36 = vpop.eup %9375  ;;  %5560 = vmatprep.subr.mxu0 %v16951_v31  ;;  %5631 = vmatprep.subr.mxu1 %v16952_v8  ;;  %v14290_v31 = vld [vmem:[#allocation7 + $0x108] sm:$0xff]  ;;  %v14292_v8 = vld [vmem:[#allocation7 + $0x118] sm:$0xff] }
 0x9df   :  { %v9378_v56 = vpop.eup %9377  ;;  %5561 = vmatpush1.msra.mxu0 %v16953_v53  ;;  %5632 = vmatpush1.msra.mxu1 %v16954_v3  ;;  %v5243_v47 = vmul.f32 %v9376_v36, %v9374_v40  ;;  %v14278_v40 = vld [vmem:[#allocation7 + $0x128] sm:$0xff]  ;;  %v14286_v36 = vld [vmem:[#allocation7 + $0x130] sm:$0xff]  ;;  %v14304_v3 = vld [vmem:[#allocation7 + $0xf8] sm:$0xff] }
 0x9e0   :  { %v5242_v24 = vmul.f32 0.0, %v9378_v56  ;;  %5562 = vmatprep.subr.mxu0 %v16955_v20  ;;  %5633 = vmatprep.subr.mxu1 %v16956_v13  ;;  %v14296_v56 = vld [vmem:[#allocation7 + $0x100] sm:$0xff]  ;;  %v14302_v53 = vld [vmem:[#allocation7 + $0xe8] sm:$0xff]  ;;  %v14316_v13 = vld [vmem:[#allocation7 + $0xd8] sm:$0xff] }
 0x9e1   :  { %5563 = vmatpush1.msra.mxu0 %v16957_v29  ;;  %5634 = vmatpush1.msra.mxu1 %v16958_v41  ;;  %v14314_v20 = vld [vmem:[#allocation7 + $0xc8] sm:$0xff]  ;;  %v14320_v29 = vld [vmem:[#allocation7 + $0xc0] sm:$0xff]  ;;  %v14322_v41 = vld [vmem:[#allocation7 + $0xd0] sm:$0xff] }
 0x9e2   :  { %v14171_v0 = vadd.f32 %v5243_v47, %v5242_v24  ;;  %5564 = vmatprep.subr.mxu0 %v16959_v59  ;;  %5635 = vmatprep.subr.mxu1 %v16960_v62  ;;  %v14308_v24 = vld [vmem:[#allocation7 + $0xe0] sm:$0xff]  ;;  %v14310_v47 = vld [vmem:[#allocation7 + $0xf0] sm:$0xff]  ;;  %v14326_v59 = vld [vmem:[#allocation7 + $0xa8] sm:$0xff] }
 0x9e3   :  { %5565 = vmatpush1.msra.mxu0 %v16961_v15  ;;  %5636 = vmatpush1.msra.mxu1 %v16962_v51  ;;  %16976 = vst [vmem:[#allocation79_spill] sm:$0xff] %v14326_v59  ;;  %v14328_v62 = vld [vmem:[#allocation7 + $0xb8] sm:$0xff]  ;;  %v14332_v15 = vld [vmem:[#allocation7 + $0xa0] sm:$0xff]  ;;  %v14334_v51 = vld [vmem:[#allocation7 + $0xb0] sm:$0xff] }
 0x9e4   :  { %9381 = vtanh.f32 %v14171_v0  ;;  %5566 = vmatprep.subr.mxu0 %v16963_v27  ;;  %5637 = vmatprep.subr.mxu1 %v16964_v21  ;;  %16977 = vst [vmem:[#allocation80_spill] sm:$0xff] %v14328_v62  ;;  %16978 = vst [vmem:[#allocation81_spill] sm:$0xff] %v14332_v15  ;;  %v14338_v27 = vld [vmem:[#allocation7 + $0x88] sm:$0xff]  ;;  %v14340_v21 = vld [vmem:[#allocation7 + $0x98] sm:$0xff] }
 0x9e5   :  { %5567 = vmatpush1.msra.mxu0 %v16965_v16  ;;  %5638 = vmatpush1.msra.mxu1 %v16966_v60  ;;  %16979 = vst [vmem:[#allocation82_spill] sm:$0xff] %v14334_v51  ;;  %16980 = vst [vmem:[#allocation83_spill] sm:$0xff] %v14338_v27  ;;  %v14344_v16 = vld [vmem:[#allocation7 + $0x80] sm:$0xff]  ;;  %v14346_v60 = vld [vmem:[#allocation7 + $0x90] sm:$0xff] }
 0x9e6   :  { %5568 = vmatprep.subr.mxu0 %v16967_v19  ;;  %5639 = vmatprep.subr.mxu1 %v16968_v32  ;;  %16981 = vst [vmem:[#allocation84_spill] sm:$0xff] %v14340_v21  ;;  %16982 = vst [vmem:[#allocation85_spill] sm:$0xff] %v14344_v16  ;;  %v14350_v19 = vld [vmem:[#allocation7 + $0x68] sm:$0xff]  ;;  %v14352_v32 = vld [vmem:[#allocation7 + $0x78] sm:$0xff] }
 0x9e7   :  { %5569 = vmatpush1.msra.mxu0 %v16969_v45  ;;  %5640 = vmatpush1.msra.mxu1 %v16970_v22  ;;  %16983 = vst [vmem:[#allocation15_spill] sm:$0xff] %v14346_v60  ;;  %16984 = vst [vmem:[#allocation16_spill] sm:$0xff] %v14350_v19  ;;  %v14356_v45 = vld [vmem:[#allocation7 + $0x60] sm:$0xff]  ;;  %v14358_v22 = vld [vmem:[#allocation7 + $0x70] sm:$0xff] }
 0x9e8   :  { %5570 = vmatprep.subr.mxu0 %v16971_v57  ;;  %5641 = vmatprep.subr.mxu1 %v16972_v4  ;;  %16985 = vst [vmem:[#allocation17_spill] sm:$0xff] %v14352_v32  ;;  %16986 = vst [vmem:[#allocation18_spill] sm:$0xff] %v14356_v45  ;;  %v14362_v57 = vld [vmem:[#allocation7 + $0x48] sm:$0xff]  ;;  %v14364_v4 = vld [vmem:[#allocation7 + $0x58] sm:$0xff] }
 0x9e9   :  { %5571 = vmatpush1.msra.mxu0 %v16973_v55  ;;  %5642 = vmatpush1.msra.mxu1 %v16974_v54  ;;  %16987 = vst [vmem:[#allocation19_spill] sm:$0xff] %v14358_v22  ;;  %16988 = vst [vmem:[#allocation20_spill] sm:$0xff] %v14362_v57  ;;  %v14368_v55 = vld [vmem:[#allocation7 + $0x40] sm:$0xff]  ;;  %v14370_v54 = vld [vmem:[#allocation7 + $0x50] sm:$0xff] }
 0x9ea   :  { %5572 = vmatprep.subr.mxu0 %v14019_v48  ;;  %5643 = vmatprep.subr.mxu1 %v16975_v12  ;;  %v9380_v48 = vpop.eup %9379  ;;  %16989 = vst [vmem:[#allocation21_spill] sm:$0xff] %v14364_v4  ;;  %16990 = vst [vmem:[#allocation22_spill] sm:$0xff] %v14368_v55  ;;  %v14374_v12 = vld [vmem:[#allocation7 + $0x28] sm:$0xff] }
 0x9eb   :  { %5573 = vmatpush1.msra.mxu0 %v14025_v44  ;;  %5644 = vmatpush1.msra.mxu1 %v14027_v14  ;;  %16991 = vst [vmem:[#allocation23_spill] sm:$0xff] %v14370_v54  ;;  %16992 = vst [vmem:[#allocation24_spill] sm:$0xff] %v14374_v12 }
 0x9ec   :  { %5574 = vmatprep.subr.mxu0 %v14031_v46  ;;  %5645 = vmatprep.subr.mxu1 %v14033_v5  ;;  %v14206_v5 = vld [vmem:[#allocation7 + $0x1e8] sm:$0xff] }
 0x9ed   :  { %5575 = vmatpush1.msra.mxu0 %v14037_v7  ;;  %5646 = vmatpush1.msra.mxu1 %v14039_v18  ;;  %v14214_v7 = vld [vmem:[#allocation7 + $0x1f0] sm:$0xff]  ;;  %v14220_v18 = vld [vmem:[#allocation7 + $0x1d8] sm:$0xff] }
 0x9ee   :  { %5576 = vmatprep.subr.mxu0 %v14043_v61  ;;  %5647 = vmatprep.subr.mxu1 %v14045_v50  ;;  %v14218_v50 = vld [vmem:[#allocation7 + $0x1c8] sm:$0xff]  ;;  %v14224_v61 = vld [vmem:[#allocation7 + $0x1c0] sm:$0xff] }
 0x9ef   :  { %5577 = vmatpush1.msra.mxu0 %v14049_v35  ;;  %5610 = vmatprep.mubr.f32.mxu0 %v16384_v33  ;;  %v14208_v35 = vld [vmem:[#allocation7 + $0x1f8] sm:$0xff] }
 0x9f0   :  { %5648 = vmatpush1.msra.mxu1 %v14053_v52  ;;  %5681 = vmatprep.mubr.f32.mxu1 %v16384_v33  ;;  %v14212_v52 = vld [vmem:[#allocation7 + $0x1e0] sm:$0xff] }
 0x9f1   :  { %v9382_v44 = vpop.eup %9381  ;;  %5831 = vmatprep.subr.mxu0 %v14206_v5  ;;  %5902 = vmatprep.subr.mxu1 %v14208_v35 }
 0x9f2   :  { %v5246_v14 = vmul.f32 %v9382_v44, %v9380_v48  ;;  %v14376_v48 = vld [vmem:[#allocation7 + $0x38] sm:$0xff]  ;;  %v14380_v44 = vld [vmem:[#allocation7 + $0x20] sm:$0xff] }
 0x9f3   :  { %16993 = vst [vmem:[#allocation25_spill] sm:$0xff] %v14376_v48  ;;  %16994 = vst [vmem:[#allocation26_spill] sm:$0xff] %v14380_v44 }
 0x9f4   :  { %5248 = vst [vmem:[#allocation4] sm:$0xc0] %v5246_v14  ;;  %v5544_v46 = vrot.slane %v5246_v14, 6  ;;  %v14382_v14 = vld [vmem:[#allocation7 + $0x30] sm:$0xff] }
 0x9f5   :  { %16995 = vst [vmem:[#allocation27_spill] sm:$0xff] %v14382_v14 }
 0x9f6   :  { %5611 = vmatmul.mubr.f32.vlgmr.msra.gmra.mxu0 %v5544_v46  ;;  %5682 = vmatmul.mubr.f32.vlgmr.msra.gmra.mxu1 %v5544_v46  ;;  %v14386_v46 = vld [vmem:[#allocation7 + $0x8] sm:$0xff] }
 0x9f7   :  { %5895 = vmatprep.mubr.f32.mxu0 %v16384_v33  ;;  %5966 = vmatprep.mubr.f32.mxu1 %v16384_v33  ;;  %16996 = vst [vmem:[#allocation28_spill] sm:$0xff] %v14386_v46 }
 0x9f8   :  { %5832 = vmatpush1.msra.mxu0 %v14212_v52  ;;  %5903 = vmatpush1.msra.mxu1 %v14214_v7 }
 0x9f9   :  { %5833 = vmatprep.subr.mxu0 %v14218_v50  ;;  %5904 = vmatprep.subr.mxu1 %v14220_v18 }
 0x9fa   :  { %5834 = vmatpush1.msra.mxu0 %v14224_v61  ;;  %5905 = vmatpush1.msra.mxu1 %v14226_v38 }
 0x9fb   :  { %5835 = vmatprep.subr.mxu0 %v14230_v49  ;;  %5906 = vmatprep.subr.mxu1 %v14232_v63 }
 0x9fc   :  { %5836 = vmatpush1.msra.mxu0 %v14236_v43  ;;  %5907 = vmatpush1.msra.mxu1 %v14238_v17 }
 0x9fd   :  { %5837 = vmatprep.subr.mxu0 %v14242_v9  ;;  %5908 = vmatprep.subr.mxu1 %v14244_v34 }
 0x9fe   :  { %5838 = vmatpush1.msra.mxu0 %v14248_v1  ;;  %5909 = vmatpush1.msra.mxu1 %v14250_v37 }
 0x9ff   :  { %5839 = vmatprep.subr.mxu0 %v14254_v10  ;;  %5910 = vmatprep.subr.mxu1 %v14256_v23 }
 0xa00   :  { %5840 = vmatpush1.msra.mxu0 %v14260_v42  ;;  %5911 = vmatpush1.msra.mxu1 %v14262_v11 }
 0xa01   :  { %5841 = vmatprep.subr.mxu0 %v14266_v6  ;;  %5912 = vmatprep.subr.mxu1 %v14268_v25 }
 0xa02   :  { %5842 = vmatpush1.msra.mxu0 %v14272_v26  ;;  %5913 = vmatpush1.msra.mxu1 %v14274_v28 }
 0xa03   :  { %5843 = vmatprep.subr.mxu0 %v14278_v40  ;;  %5914 = vmatprep.subr.mxu1 %v14280_v30 }
 0xa04   :  { %5844 = vmatpush1.msra.mxu0 %v14284_v2  ;;  %5915 = vmatpush1.msra.mxu1 %v14286_v36 }
 0xa05   :  { %5845 = vmatprep.subr.mxu0 %v14290_v31  ;;  %5916 = vmatprep.subr.mxu1 %v14292_v8 }
 0xa06   :  { %5846 = vmatpush1.msra.mxu0 %v14296_v56  ;;  %5917 = vmatpush1.msra.mxu1 %v14298_v39 }
 0xa07   :  { %5847 = vmatprep.subr.mxu0 %v14302_v53  ;;  %5918 = vmatprep.subr.mxu1 %v14304_v3 }
 0xa08   :  { %5848 = vmatpush1.msra.mxu0 %v14308_v24  ;;  %5919 = vmatpush1.msra.mxu1 %v14310_v47 }
 0xa09   :  { %5849 = vmatprep.subr.mxu0 %v14314_v20  ;;  %5920 = vmatprep.subr.mxu1 %v14316_v13 }
 0xa0a   :  { %5850 = vmatpush1.msra.mxu0 %v14320_v29  ;;  %5921 = vmatpush1.msra.mxu1 %v14322_v41 }
 0xa0b   :  { %5851 = vmatprep.subr.mxu0 %v14326_v59  ;;  %5922 = vmatprep.subr.mxu1 %v14328_v62 }
 0xa0c   :  { %5852 = vmatpush1.msra.mxu0 %v14332_v15  ;;  %5923 = vmatpush1.msra.mxu1 %v14334_v51 }
 0xa0d   :  { %5853 = vmatprep.subr.mxu0 %v14338_v27  ;;  %5924 = vmatprep.subr.mxu1 %v14340_v21  ;;  %v5252_v21 = vld [vmem:[#allocation3 + $0x58] sm:$0xc] }
 0xa0e   :  { %5854 = vmatpush1.msra.mxu0 %v14344_v16  ;;  %5925 = vmatpush1.msra.mxu1 %v14346_v60 }
 0xa0f   :  { %5855 = vmatprep.subr.mxu0 %v14350_v19  ;;  %5926 = vmatprep.subr.mxu1 %v14352_v32  ;;  %v5250_v32 = vld [vmem:[#allocation3 + $0x38] sm:$0xc] }
 0xa10   :  { %5856 = vmatpush1.msra.mxu0 %v14356_v45  ;;  %5927 = vmatpush1.msra.mxu1 %v14358_v22 }
 0xa11   :  { %5857 = vmatprep.subr.mxu0 %v14362_v57  ;;  %5928 = vmatprep.subr.mxu1 %v14364_v4  ;;  %v5249_v4 = vld [vmem:[#allocation3] sm:$0xc] }
 0xa12   :  { %5858 = vmatpush1.msra.mxu0 %v14368_v55  ;;  %5929 = vmatpush1.msra.mxu1 %v14370_v54  ;;  %v14388_v55 = vld [vmem:[#allocation7 + $0x18] sm:$0xff]  ;;  %v14392_v54 = vld [vmem:[#allocation7] sm:$0xff] }
 0xa13   :  { %5859 = vmatprep.subr.mxu0 %v14374_v12  ;;  %5930 = vmatprep.subr.mxu1 %v14376_v48  ;;  %16997 = vst [vmem:[#allocation29_spill] sm:$0xff] %v14388_v55  ;;  %16998 = vst [vmem:[#allocation30_spill] sm:$0xff] %v14392_v54  ;;  %v14394_v12 = vld [vmem:[#allocation7 + $0x10] sm:$0xff]  ;;  %v14398_v48 = vld [vmem:[#allocation9 + $0x1e8] sm:$0xff] }
 0xa14   :  { %5860 = vmatpush1.msra.mxu0 %v14380_v44  ;;  %5931 = vmatpush1.msra.mxu1 %v14382_v14  ;;  %16999 = vst [vmem:[#allocation31_spill] sm:$0xff] %v14394_v12  ;;  %17000 = vst [vmem:[#allocation42_spill] sm:$0xff] %v14398_v48  ;;  %v14400_v44 = vld [vmem:[#allocation9 + $0x1f8] sm:$0xff] }
 0xa15   :  { %5861 = vmatprep.subr.mxu0 %v14386_v46  ;;  %5932 = vmatprep.subr.mxu1 %v14388_v55  ;;  %17001 = vst [vmem:[#allocation32_spill] sm:$0xff] %v14400_v44 }
 0xa16   :  { %5862 = vmatpush1.msra.mxu0 %v14392_v54  ;;  %5933 = vmatpush1.msra.mxu1 %v14394_v12 }
 0xa17   :  { %6060 = vmatprep.subr.mxu0 %v14398_v48  ;;  %6131 = vmatprep.subr.mxu1 %v14400_v44  ;;  %v5251_v44 = vld [vmem:[#allocation3 + $0x78] sm:$0xc] }
 0xa90   :  { %v5383_v14 = vpop.f32.mrf.mxu0  ;;  %v5454_v22 = vpop.f32.mrf.mxu1 }
 0xa91   :  { %v5463_v46 = vrot.slane %v5383_v14, 6  ;;  %v5465_v48 = vrot.slane %v5454_v22, 6 }
 0xa92   :  { %v5385_v55 = vpop.f32.mrf.mxu0  ;;  %v5456_v60 = vpop.f32.mrf.mxu1 }
 0xa93   :  { %v5471_v57 = vadd.f32 %v5463_v46, %v5249_v4  ;;  %v5464_v45 = vrot.slane %v5385_v55, 6  ;;  %v5466_v16 = vrot.slane %v5456_v60, 6  ;;  %v5473_v14 = vadd.f32 %v5465_v48, %v5251_v44  ;;  %v5476_v48 = vld [vmem:[#allocation3 + $0x48] sm:$0x30] }
 0xa95   :  { %v9003_v19 = vmul.f32 -1.442695, %v5471_v57  ;;  %v5472_v54 = vadd.f32 %v5464_v45, %v5250_v32  ;;  %v5474_v27 = vadd.f32 %v5466_v16, %v5252_v21  ;;  %v5724_v57 = vrot.slane %v14134_v58, 6 }
 0xa97   :  { %9383 = vpow2.f32 %v9003_v19  ;;  %v9004_v12 = vmul.f32 -1.442695, %v5472_v54  ;;  %v9005_v51 = vmul.f32 -1.442695, %v5474_v27  ;;  %v5475_v54 = vld [vmem:[#allocation3 + $0x60] sm:$0x30] }
 0xa99   :  { %9385 = vpow2.f32 %v9004_v12 }
 0xa9a   :  { %9387 = vpow2.f32 %v9005_v51 }
 0xaa4   :  { %v9384_v15 = vpop.eup %9383 }
 0xaa5   :  { %v5707_v62 = vadd.f32 1.0, %v9384_v15 }
 0xaa6   :  { %v9386_v59 = vpop.eup %9385 }
 0xaa7   :  { %9389 = vrcp.f32 %v5707_v62  ;;  %v5713_v4 = vadd.f32 1.0, %v9386_v59  ;;  %v9388_v32 = vpop.eup %9387 }
 0xaa8   :  { %9391 = vtanh.f32 %v5473_v14  ;;  %v5720_v27 = vadd.f32 1.0, %v9388_v32  ;;  %v5478_v32 = vld [vmem:[#allocation3 + $0x50] sm:$0x30] }
 0xaa9   :  { %9393 = vrcp.f32 %v5713_v4 }
 0xaaa   :  { %9395 = vrcp.f32 %v5720_v27 }
 0xab4   :  { %v9390_v19 = vpop.eup %9389 }
 0xab5   :  { %v9392_v45 = vpop.eup %9391 }
 0xab6   :  { %v9394_v60 = vpop.eup %9393  ;;  %v5612_v55 = vpop.f32.mrf.mxu0  ;;  %v5727_v21 = vmul.f32 %v9392_v45, %v9390_v19 }
 0xab7   :  { %v5726_v16 = vmul.f32 %v9394_v60, %v5724_v57  ;;  %v5692_v22 = vrot.slane %v5612_v55, 4  ;;  %v5683_v62 = vpop.f32.mrf.mxu1  ;;  %v9396_v57 = vpop.eup %9395 }
 0xab8   :  { %v5614_v12 = vpop.f32.mrf.mxu0  ;;  %v5694_v45 = vrot.slane %v5683_v62, 4  ;;  %v14414_v62 = vld [vmem:[#allocation9 + $0x1d8] sm:$0xff] }
 0xab9   :  { %v14405_v15 = vadd.f32 %v5727_v21, %v5726_v16  ;;  %v5700_v51 = vadd.f32 %v5692_v22, %v5475_v54  ;;  %v5693_v59 = vrot.slane %v5614_v12, 4  ;;  %v5685_v14 = vpop.f32.mrf.mxu1  ;;  %v5477_v21 = vld [vmem:[#allocation3 + $0x18] sm:$0x30] }
 0xaba   :  { %v5695_v4 = vrot.slane %v5685_v14, 4  ;;  %v5702_v22 = vadd.f32 %v5694_v45, %v5477_v21  ;;  %v14418_v14 = vld [vmem:[#allocation9 + $0x1d0] sm:$0xff] }
 0xabb   :  { %v9006_v44 = vmul.f32 -1.442695, %v5700_v51  ;;  %v5701_v46 = vadd.f32 %v5693_v59, %v5476_v48  ;;  %9397 = vtanh.f32 %v14405_v15  ;;  %v14408_v59 = vld [vmem:[#allocation9 + $0x1e0] sm:$0xff]  ;;  %v14410_v48 = vld [vmem:[#allocation9 + $0x1f0] sm:$0xff]  ;;  %17003 = vst [vmem:[#allocation33_spill] sm:$0xff] %v14418_v14 }
 0xabc   :  { %v5703_v19 = vadd.f32 %v5695_v4, %v5478_v32  ;;  %v14422_v4 = vld [vmem:[#allocation9 + $0x1a8] sm:$0xff]  ;;  %v14424_v32 = vld [vmem:[#allocation9 + $0x1b8] sm:$0xff]  ;;  %v14430_v45 = vld [vmem:[#allocation9 + $0x1b0] sm:$0xff] }
 0xabd   :  { %9399 = vpow2.f32 %v9006_v44  ;;  %v9007_v58 = vmul.f32 -1.442695, %v5701_v46  ;;  %v14412_v46 = vld [vmem:[#allocation9 + $0x1c8] sm:$0xff]  ;;  %17004 = vst [vmem:[#allocation44_spill] sm:$0xff] %v14422_v4  ;;  %17005 = vst [vmem:[#allocation34_spill] sm:$0xff] %v14424_v32  ;;  %v14442_v21 = vld [vmem:[#allocation9 + $0x190] sm:$0xff] }
 0xabe   :  { %v9008_v60 = vmul.f32 -1.442695, %v5703_v19  ;;  %v14428_v19 = vld [vmem:[#allocation9 + $0x1a0] sm:$0xff]  ;;  %17007 = vst [vmem:[#allocation35_spill] sm:$0xff] %v14430_v45  ;;  %17011 = vst [vmem:[#allocation38_spill] sm:$0xff] %v14442_v21 }
 0xabf   :  { %9401 = vpow2.f32 %v9007_v58  ;;  %v14416_v58 = vld [vmem:[#allocation9 + $0x1c0] sm:$0xff]  ;;  %17006 = vst [vmem:[#allocation45_spill] sm:$0xff] %v14428_v19 }
 0xac0   :  { %9403 = vpow2.f32 %v9008_v60  ;;  %17002 = vst [vmem:[#allocation43_spill] sm:$0xff] %v14416_v58  ;;  %v14436_v60 = vld [vmem:[#allocation9 + $0x198] sm:$0xff] }
 0xac1   :  { %17009 = vst [vmem:[#allocation36_spill] sm:$0xff] %v14436_v60 }
 0xac8   :  { %v9398_v55 = vpop.eup %9397 }
 0xac9   :  { %v5730_v54 = vmul.f32 %v9398_v55, %v9396_v57  ;;  %v14434_v57 = vld [vmem:[#allocation9 + $0x188] sm:$0xff]  ;;  %v14440_v55 = vld [vmem:[#allocation9 + $0x180] sm:$0xff] }
 0xaca   :  { %v9400_v16 = vpop.eup %9399  ;;  %17008 = vst [vmem:[#allocation46_spill] sm:$0xff] %v14434_v57  ;;  %17010 = vst [vmem:[#allocation37_spill] sm:$0xff] %v14440_v55 }
 0xacb   :  { %v5734_v27 = vadd.f32 1.0, %v9400_v16  ;;  %5758 = vst [vmem:[#allocation4 + $0x18] sm:$0xc] %v5730_v54  ;;  %v5829_v51 = vrot.slane %v5730_v54, 2  ;;  %v14446_v16 = vld [vmem:[#allocation9 + $0x168] sm:$0xff]  ;;  %v14452_v54 = vld [vmem:[#allocation9 + $0x160] sm:$0xff] }
 0xacc   :  { %v9402_v12 = vpop.eup %9401  ;;  %17012 = vst [vmem:[#allocation39_spill] sm:$0xff] %v14446_v16  ;;  %17014 = vst [vmem:[#allocation41_spill] sm:$0xff] %v14452_v54 }
 0xacd   :  { %9405 = vrcp.f32 %v5734_v27  ;;  %v5740_v44 = vadd.f32 1.0, %v9402_v12  ;;  %5896 = vmatmul.mubr.f32.vlgmr.msra.gmra.mxu0 %v5829_v51  ;;  %5967 = vmatmul.mubr.f32.vlgmr.msra.gmra.mxu1 %v5829_v51  ;;  %v14454_v27 = vld [vmem:[#allocation9 + $0x170] sm:$0xff]  ;;  %v14458_v12 = vld [vmem:[#allocation9 + $0x148] sm:$0xff]  ;;  %v14460_v51 = vld [vmem:[#allocation9 + $0x158] sm:$0xff] }
 0xace   :  { %9407 = vtanh.f32 %v5702_v22  ;;  %6061 = vmatpush1.msra.mxu0 %v14408_v59  ;;  %6132 = vmatpush1.msra.mxu1 %v14410_v48  ;;  %v14448_v22 = vld [vmem:[#allocation9 + $0x178] sm:$0xff]  ;;  %17015 = vst [vmem:[#allocation47_spill] sm:$0xff] %v14454_v27  ;;  %17016 = vst [vmem:[#allocation48_spill] sm:$0xff] %v14458_v12 }
 0xacf   :  { %9409 = vrcp.f32 %v5740_v44  ;;  %6062 = vmatprep.subr.mxu0 %v14412_v46  ;;  %6133 = vmatprep.subr.mxu1 %v14414_v62  ;;  %17013 = vst [vmem:[#allocation40_spill] sm:$0xff] %v14448_v22  ;;  %17017 = vst [vmem:[#allocation49_spill] sm:$0xff] %v14460_v51  ;;  %v14464_v44 = vld [vmem:[#allocation9 + $0x140] sm:$0xff] }
 0xad0   :  { %6063 = vmatpush1.msra.mxu0 %v14416_v58  ;;  %6134 = vmatpush1.msra.mxu1 %v14418_v14  ;;  %17018 = vst [vmem:[#allocation50_spill] sm:$0xff] %v14464_v44 }
 0xad1   :  { %6064 = vmatprep.subr.mxu0 %v14422_v4  ;;  %6135 = vmatprep.subr.mxu1 %v14424_v32  ;;  %v5751_v32 = vrot.slane %v14171_v0, 2 }
 0xad2   :  { %6065 = vmatpush1.msra.mxu0 %v14428_v19  ;;  %6136 = vmatpush1.msra.mxu1 %v14430_v45 }
 0xad3   :  { %6066 = vmatprep.subr.mxu0 %v14434_v57  ;;  %6137 = vmatprep.subr.mxu1 %v14436_v60  ;;  %v14466_v57 = vld [vmem:[#allocation9 + $0x150] sm:$0xff]  ;;  %v14470_v60 = vld [vmem:[#allocation9 + $0x128] sm:$0xff] }
 0xad4   :  { %6067 = vmatpush1.msra.mxu0 %v14440_v55  ;;  %6138 = vmatpush1.msra.mxu1 %v14442_v21  ;;  %17019 = vst [vmem:[#allocation51_spill] sm:$0xff] %v14466_v57  ;;  %17020 = vst [vmem:[#allocation52_spill] sm:$0xff] %v14470_v60  ;;  %v14472_v55 = vld [vmem:[#allocation9 + $0x138] sm:$0xff]  ;;  %v14476_v21 = vld [vmem:[#allocation9 + $0x120] sm:$0xff] }
 0xad5   :  { %6068 = vmatprep.subr.mxu0 %v14446_v16  ;;  %6139 = vmatprep.subr.mxu1 %v14448_v22  ;;  %17021 = vst [vmem:[#allocation53_spill] sm:$0xff] %v14472_v55  ;;  %17022 = vst [vmem:[#allocation58_spill] sm:$0xff] %v14476_v21  ;;  %v14478_v16 = vld [vmem:[#allocation9 + $0x130] sm:$0xff]  ;;  %v9404_v22 = vpop.eup %9403 }
 0xad6   :  { %6069 = vmatpush1.msra.mxu0 %v14452_v54  ;;  %6140 = vmatpush1.msra.mxu1 %v14454_v27  ;;  %17023 = vst [vmem:[#allocation54_spill] sm:$0xff] %v14478_v16  ;;  %v14482_v54 = vld [vmem:[#allocation9 + $0x108] sm:$0xff]  ;;  %v14484_v27 = vld [vmem:[#allocation9 + $0x118] sm:$0xff]  ;;  %v5747_v14 = vadd.f32 1.0, %v9404_v22  ;;  %v14513_v22 = vld [vmem:[#allocation9 + $0xc0] sm:$0xff] }
 0xad7   :  { %6070 = vmatprep.subr.mxu0 %v14458_v12  ;;  %6141 = vmatprep.subr.mxu1 %v14460_v51  ;;  %17024 = vst [vmem:[#allocation55_spill] sm:$0xff] %v14482_v54  ;;  %17025 = vst [vmem:[#allocation56_spill] sm:$0xff] %v14484_v27  ;;  %v14488_v12 = vld [vmem:[#allocation9 + $0x100] sm:$0xff]  ;;  %v14490_v51 = vld [vmem:[#allocation9 + $0x110] sm:$0xff] }
 0xad8   :  { %6071 = vmatpush1.msra.mxu0 %v14464_v44  ;;  %6142 = vmatpush1.msra.mxu1 %v14466_v57  ;;  %v14495_v57 = vld [vmem:[#allocation9 + $0xe8] sm:$0xff]  ;;  %v14497_v44 = vld [vmem:[#allocation9 + $0xf8] sm:$0xff]  ;;  %17028 = vst [vmem:[#allocation60_spill] sm:$0xff] %v14513_v22  ;;  %9411 = vrcp.f32 %v5747_v14  ;;  %v14540_v14 = vld [vmem:[#allocation9 + $0x80] sm:$0xff] }
 0xad9   :  { %6072 = vmatprep.subr.mxu0 %v14470_v60  ;;  %6143 = vmatprep.subr.mxu1 %v14472_v55  ;;  %v14501_v55 = vld [vmem:[#allocation9 + $0xe0] sm:$0xff]  ;;  %v14503_v60 = vld [vmem:[#allocation9 + $0xf0] sm:$0xff]  ;;  %17036 = vst [vmem:[#allocation68_spill] sm:$0xff] %v14540_v14 }
 0xada   :  { %v9406_v45 = vpop.eup %9405  ;;  %6073 = vmatpush1.msra.mxu0 %v14476_v21  ;;  %6144 = vmatpush1.msra.mxu1 %v14478_v16  ;;  %v14507_v16 = vld [vmem:[#allocation9 + $0xc8] sm:$0xff]  ;;  %v14509_v21 = vld [vmem:[#allocation9 + $0xd8] sm:$0xff] }
 0xadb   :  { %v9408_v19 = vpop.eup %9407  ;;  %6074 = vmatprep.subr.mxu0 %v14482_v54  ;;  %6145 = vmatprep.subr.mxu1 %v14484_v27  ;;  %17026 = vst [vmem:[#allocation57_spill] sm:$0xff] %v14507_v16  ;;  %17027 = vst [vmem:[#allocation59_spill] sm:$0xff] %v14509_v21  ;;  %v14515_v27 = vld [vmem:[#allocation9 + $0xd0] sm:$0xff] }
 0xadc   :  { %v9410_v4 = vpop.eup %9409  ;;  %v5754_v58 = vmul.f32 %v9408_v19, %v9406_v45  ;;  %6075 = vmatpush1.msra.mxu0 %v14488_v12  ;;  %6146 = vmatpush1.msra.mxu1 %v14490_v51  ;;  %17029 = vst [vmem:[#allocation61_spill] sm:$0xff] %v14515_v27  ;;  %v14527_v19 = vld [vmem:[#allocation9 + $0xa0] sm:$0xff]  ;;  %v14529_v45 = vld [vmem:[#allocation9 + $0xb0] sm:$0xff] }
 0xadd   :  { %v5753_v0 = vmul.f32 %v9410_v4, %v5751_v32  ;;  %6076 = vmatprep.subr.mxu0 %v14495_v57  ;;  %6147 = vmatprep.subr.mxu1 %v14497_v44  ;;  %v14521_v4 = vld [vmem:[#allocation9 + $0xa8] sm:$0xff]  ;;  %v14523_v32 = vld [vmem:[#allocation9 + $0xb8] sm:$0xff]  ;;  %17032 = vst [vmem:[#allocation64_spill] sm:$0xff] %v14527_v19  ;;  %17033 = vst [vmem:[#allocation65_spill] sm:$0xff] %v14529_v45 }
 0xade   :  { %6077 = vmatpush1.msra.mxu0 %v14501_v55  ;;  %6148 = vmatpush1.msra.mxu1 %v14503_v60  ;;  %17030 = vst [vmem:[#allocation62_spill] sm:$0xff] %v14521_v4  ;;  %17031 = vst [vmem:[#allocation63_spill] sm:$0xff] %v14523_v32 }
 0xadf   :  { %v14517_v54 = vadd.f32 %v5754_v58, %v5753_v0  ;;  %6078 = vmatprep.subr.mxu0 %v14507_v16  ;;  %6149 = vmatprep.subr.mxu1 %v14509_v21  ;;  %v14533_v58 = vld [vmem:[#allocation9 + $0x88] sm:$0xff]  ;;  %v14535_v0 = vld [vmem:[#allocation9 + $0x98] sm:$0xff]  ;;  %v14542_v21 = vld [vmem:[#allocation9 + $0x90] sm:$0xff] }
 0xae0   :  { %6079 = vmatpush1.msra.mxu0 %v14513_v22  ;;  %6150 = vmatpush1.msra.mxu1 %v14515_v27  ;;  %17034 = vst [vmem:[#allocation66_spill] sm:$0xff] %v14533_v58  ;;  %17035 = vst [vmem:[#allocation67_spill] sm:$0xff] %v14535_v0  ;;  %v14546_v22 = vld [vmem:[#allocation9 + $0x68] sm:$0xff]  ;;  %v14548_v27 = vld [vmem:[#allocation9 + $0x78] sm:$0xff] }
 0xae1   :  { %9413 = vtanh.f32 %v14517_v54  ;;  %6080 = vmatprep.subr.mxu0 %v14521_v4  ;;  %6151 = vmatprep.subr.mxu1 %v14523_v32  ;;  %17037 = vst [vmem:[#allocation69_spill] sm:$0xff] %v14542_v21  ;;  %17038 = vst [vmem:[#allocation70_spill] sm:$0xff] %v14546_v22  ;;  %v14552_v16 = vld [vmem:[#allocation9 + $0x60] sm:$0xff]  ;;  %v14554_v4 = vld [vmem:[#allocation9 + $0x70] sm:$0xff] }
 0xae2   :  { %6081 = vmatpush1.msra.mxu0 %v14527_v19  ;;  %6152 = vmatpush1.msra.mxu1 %v14529_v45  ;;  %17039 = vst [vmem:[#allocation71_spill] sm:$0xff] %v14548_v27  ;;  %17040 = vst [vmem:[#allocation72_spill] sm:$0xff] %v14552_v16  ;;  %v14558_v32 = vld [vmem:[#allocation9 + $0x48] sm:$0xff]  ;;  %v14560_v19 = vld [vmem:[#allocation9 + $0x58] sm:$0xff] }
 0xae3   :  { %6082 = vmatprep.subr.mxu0 %v14533_v58  ;;  %6153 = vmatprep.subr.mxu1 %v14535_v0  ;;  %17041 = vst [vmem:[#allocation73_spill] sm:$0xff] %v14554_v4  ;;  %17042 = vst [vmem:[#allocation74_spill] sm:$0xff] %v14560_v19  ;;  %v14564_v45 = vld [vmem:[#allocation9 + $0x40] sm:$0xff]  ;;  %v14566_v58 = vld [vmem:[#allocation9 + $0x50] sm:$0xff] }
 0xae4   :  { %6083 = vmatpush1.msra.mxu0 %v14540_v14  ;;  %6154 = vmatpush1.msra.mxu1 %v14542_v21  ;;  %17043 = vst [vmem:[#allocation75_spill] sm:$0xff] %v14566_v58  ;;  %v14570_v0 = vld [vmem:[#allocation9 + $0x28] sm:$0xff]  ;;  %v14572_v14 = vld [vmem:[#allocation9 + $0x38] sm:$0xff]  ;;  %v14576_v21 = vld [vmem:[#allocation9 + $0x20] sm:$0xff] }
 0xae5   :  { %6084 = vmatprep.subr.mxu0 %v14546_v22  ;;  %6155 = vmatprep.subr.mxu1 %v14548_v27  ;;  %17044 = vst [vmem:[#allocation76_spill] sm:$0xff] %v14570_v0  ;;  %17045 = vst [vmem:[#allocation77_spill] sm:$0xff] %v14572_v14  ;;  %v14578_v22 = vld [vmem:[#allocation9 + $0x30] sm:$0xff]  ;;  %v14582_v27 = vld [vmem:[#allocation9 + $0x8] sm:$0xff] }
 0xae6   :  { %6085 = vmatpush1.msra.mxu0 %v14552_v16  ;;  %6156 = vmatpush1.msra.mxu1 %v14554_v4  ;;  %17046 = vst [vmem:[#allocation78_spill] sm:$0xff] %v14578_v22  ;;  %v14584_v16 = vld [vmem:[#allocation9 + $0x18] sm:$0xff]  ;;  %v14588_v4 = vld [vmem:[#allocation9] sm:$0xff] }
 0xae7   :  { %6086 = vmatprep.subr.mxu0 %v14558_v32  ;;  %6157 = vmatprep.subr.mxu1 %v14560_v19  ;;  %v14592_v19 = vld [vmem:[#allocation9 + $0x10] sm:$0xff] }
 0xae8   :  { %6087 = vmatpush1.msra.mxu0 %v14564_v45  ;;  %6158 = vmatpush1.msra.mxu1 %v14566_v58  ;;  %v9412_v58 = vpop.eup %9411 }
 0xae9   :  { %6088 = vmatprep.subr.mxu0 %v14570_v0  ;;  %6159 = vmatprep.subr.mxu1 %v14572_v14 }
 0xaea   :  { %6089 = vmatpush1.msra.mxu0 %v14576_v21  ;;  %6160 = vmatpush1.msra.mxu1 %v14578_v22 }
 0xaeb   :  { %6090 = vmatprep.subr.mxu0 %v14582_v27  ;;  %6161 = vmatprep.subr.mxu1 %v14584_v16 }
 0xaec   :  { %6091 = vmatpush1.msra.mxu0 %v14588_v4  ;;  %6124 = vmatprep.mubr.f32.mxu0 %v16384_v33 }
 0xaed   :  { %6162 = vmatpush1.msra.mxu1 %v14592_v19  ;;  %6195 = vmatprep.mubr.f32.mxu1 %v16384_v33 }
 0xaee   :  { %v9414_v0 = vpop.eup %9413  ;;  %6345 = vmatprep.subr.mxu0 %v14206_v5  ;;  %6416 = vmatprep.subr.mxu1 %v14208_v35  ;;  %v17047_v5 = vld [vmem:[#allocation79_spill] sm:$0xff]  ;;  %v17048_v35 = vld [vmem:[#allocation80_spill] sm:$0xff] }
 0xaef   :  { %v5757_v14 = vmul.f32 %v9414_v0, %v9412_v58 }
 0xaf1   :  { %5759 = vst [vmem:[#allocation4] sm:$0x30] %v5757_v14  ;;  %v6058_v22 = vrot.slane %v5757_v14, 4  ;;  %v5762_v14 = vld [vmem:[#allocation3 + $0x78] sm:$0x30] }
 0xaf3   :  { %6125 = vmatmul.mubr.f32.vlgmr.msra.gmra.mxu0 %v6058_v22  ;;  %6196 = vmatmul.mubr.f32.vlgmr.msra.gmra.mxu1 %v6058_v22 }
 0xaf4   :  { %6346 = vmatpush1.msra.mxu0 %v14212_v52  ;;  %6417 = vmatpush1.msra.mxu1 %v14214_v7  ;;  %v17049_v52 = vld [vmem:[#allocation81_spill] sm:$0xff]  ;;  %v17050_v7 = vld [vmem:[#allocation82_spill] sm:$0xff] }
 0xaf5   :  { %6347 = vmatprep.subr.mxu0 %v14218_v50  ;;  %6418 = vmatprep.subr.mxu1 %v14220_v18  ;;  %v17051_v50 = vld [vmem:[#allocation83_spill] sm:$0xff]  ;;  %v17052_v18 = vld [vmem:[#allocation84_spill] sm:$0xff] }
 0xaf6   :  { %6348 = vmatpush1.msra.mxu0 %v14224_v61  ;;  %6419 = vmatpush1.msra.mxu1 %v14226_v38  ;;  %v17053_v61 = vld [vmem:[#allocation85_spill] sm:$0xff]  ;;  %v17054_v38 = vld [vmem:[#allocation15_spill] sm:$0xff] }
 0xaf7   :  { %6349 = vmatprep.subr.mxu0 %v14230_v49  ;;  %6420 = vmatprep.subr.mxu1 %v14232_v63  ;;  %v17055_v49 = vld [vmem:[#allocation16_spill] sm:$0xff]  ;;  %v17056_v63 = vld [vmem:[#allocation17_spill] sm:$0xff] }
 0xaf8   :  { %6350 = vmatpush1.msra.mxu0 %v14236_v43  ;;  %6421 = vmatpush1.msra.mxu1 %v14238_v17  ;;  %v17057_v43 = vld [vmem:[#allocation18_spill] sm:$0xff]  ;;  %v17058_v17 = vld [vmem:[#allocation19_spill] sm:$0xff] }
 0xaf9   :  { %6351 = vmatprep.subr.mxu0 %v14242_v9  ;;  %6422 = vmatprep.subr.mxu1 %v14244_v34  ;;  %v17059_v9 = vld [vmem:[#allocation20_spill] sm:$0xff]  ;;  %v17060_v34 = vld [vmem:[#allocation21_spill] sm:$0xff] }
 0xafa   :  { %6352 = vmatpush1.msra.mxu0 %v14248_v1  ;;  %6423 = vmatpush1.msra.mxu1 %v14250_v37  ;;  %v17061_v1 = vld [vmem:[#allocation22_spill] sm:$0xff]  ;;  %v17062_v37 = vld [vmem:[#allocation23_spill] sm:$0xff] }
 0xafb   :  { %6353 = vmatprep.subr.mxu0 %v14254_v10  ;;  %6424 = vmatprep.subr.mxu1 %v14256_v23  ;;  %v17063_v10 = vld [vmem:[#allocation24_spill] sm:$0xff]  ;;  %v17064_v23 = vld [vmem:[#allocation25_spill] sm:$0xff] }
 0xafc   :  { %6354 = vmatpush1.msra.mxu0 %v14260_v42  ;;  %6425 = vmatpush1.msra.mxu1 %v14262_v11  ;;  %v17065_v42 = vld [vmem:[#allocation26_spill] sm:$0xff]  ;;  %v17066_v11 = vld [vmem:[#allocation27_spill] sm:$0xff] }
 0xafd   :  { %6355 = vmatprep.subr.mxu0 %v14266_v6  ;;  %6426 = vmatprep.subr.mxu1 %v14268_v25  ;;  %v17067_v6 = vld [vmem:[#allocation28_spill] sm:$0xff]  ;;  %v17068_v25 = vld [vmem:[#allocation29_spill] sm:$0xff] }
 0xafe   :  { %6356 = vmatpush1.msra.mxu0 %v14272_v26  ;;  %6427 = vmatpush1.msra.mxu1 %v14274_v28  ;;  %v17069_v26 = vld [vmem:[#allocation30_spill] sm:$0xff]  ;;  %v17070_v28 = vld [vmem:[#allocation31_spill] sm:$0xff] }
 0xaff   :  { %6357 = vmatprep.subr.mxu0 %v14278_v40  ;;  %6428 = vmatprep.subr.mxu1 %v14280_v30  ;;  %v17071_v40 = vld [vmem:[#allocation42_spill] sm:$0xff]  ;;  %v17072_v30 = vld [vmem:[#allocation32_spill] sm:$0xff] }
 0xb00   :  { %6358 = vmatpush1.msra.mxu0 %v14284_v2  ;;  %6429 = vmatpush1.msra.mxu1 %v14286_v36 }
 0xb01   :  { %6359 = vmatprep.subr.mxu0 %v14290_v31  ;;  %6430 = vmatprep.subr.mxu1 %v14292_v8  ;;  %v5760_v31 = vld [vmem:[#allocation3] sm:$0x30] }
 0xb02   :  { %6360 = vmatpush1.msra.mxu0 %v14296_v56  ;;  %6431 = vmatpush1.msra.mxu1 %v14298_v39 }
 0xb03   :  { %6361 = vmatprep.subr.mxu0 %v14302_v53  ;;  %6432 = vmatprep.subr.mxu1 %v14304_v3  ;;  %v5761_v3 = vld [vmem:[#allocation3 + $0x38] sm:$0x30] }
 0xb04   :  { %6362 = vmatpush1.msra.mxu0 %v14308_v24  ;;  %6433 = vmatpush1.msra.mxu1 %v14310_v47 }
 0xb05   :  { %6363 = vmatprep.subr.mxu0 %v14314_v20  ;;  %6434 = vmatprep.subr.mxu1 %v14316_v13 }
 0xb06   :  { %6364 = vmatpush1.msra.mxu0 %v14320_v29  ;;  %6435 = vmatpush1.msra.mxu1 %v14322_v41  ;;  %v5763_v41 = vld [vmem:[#allocation3 + $0x58] sm:$0x30] }
 0xb07   :  { %6365 = vmatprep.subr.mxu0 %v17047_v5  ;;  %6436 = vmatprep.subr.mxu1 %v17048_v35 }
 0xb08   :  { %6366 = vmatpush1.msra.mxu0 %v17049_v52  ;;  %6437 = vmatpush1.msra.mxu1 %v17050_v7 }
 0xb09   :  { %6367 = vmatprep.subr.mxu0 %v17051_v50  ;;  %6438 = vmatprep.subr.mxu1 %v17052_v18 }
 0xb0a   :  { %6368 = vmatpush1.msra.mxu0 %v17053_v61  ;;  %6439 = vmatpush1.msra.mxu1 %v17054_v38 }
 0xb0b   :  { %6369 = vmatprep.subr.mxu0 %v17055_v49  ;;  %6440 = vmatprep.subr.mxu1 %v17056_v63  ;;  %v6238_v49 = vrot.slane %v14405_v15, 6 }
 0xb0c   :  { %6370 = vmatpush1.msra.mxu0 %v17057_v43  ;;  %6441 = vmatpush1.msra.mxu1 %v17058_v17 }
 0xb0d   :  { %6371 = vmatprep.subr.mxu0 %v17059_v9  ;;  %6442 = vmatprep.subr.mxu1 %v17060_v34 }
 0xb0e   :  { %6372 = vmatpush1.msra.mxu0 %v17061_v1  ;;  %6443 = vmatpush1.msra.mxu1 %v17062_v37  ;;  %v5989_v37 = vld [vmem:[#allocation3 + $0x60] sm:$0xc] }
 0xb0f   :  { %6373 = vmatprep.subr.mxu0 %v17063_v10  ;;  %6444 = vmatprep.subr.mxu1 %v17064_v23 }
 0xb10   :  { %6374 = vmatpush1.msra.mxu0 %v17065_v42  ;;  %6445 = vmatpush1.msra.mxu1 %v17066_v11 }
 0xb11   :  { %6375 = vmatprep.subr.mxu0 %v17067_v6  ;;  %6446 = vmatprep.subr.mxu1 %v17068_v25  ;;  %v5990_v25 = vld [vmem:[#allocation3 + $0x48] sm:$0xc] }
 0xb12   :  { %6376 = vmatpush1.msra.mxu0 %v17069_v26  ;;  %6409 = vmatprep.mubr.f32.mxu0 %v16384_v33 }
 0xb13   :  { %6447 = vmatpush1.msra.mxu1 %v17070_v28  ;;  %6480 = vmatprep.mubr.f32.mxu1 %v16384_v33 }
 0xb14   :  { %6574 = vmatprep.subr.mxu0 %v17071_v40  ;;  %6645 = vmatprep.subr.mxu1 %v17072_v30 }
 0xb8d   :  { %v5897_v2 = vpop.f32.mrf.mxu0  ;;  %v5968_v39 = vpop.f32.mrf.mxu1 }
 0xb8e   :  { %v5977_v36 = vrot.slane %v5897_v2, 4  ;;  %v5979_v58 = vrot.slane %v5968_v39, 4  ;;  %v5992_v2 = vld [vmem:[#allocation3 + $0x50] sm:$0xc] }
 0xb8f   :  { %v5899_v8 = vpop.f32.mrf.mxu0  ;;  %v5970_v13 = vpop.f32.mrf.mxu1 }
 0xb90   :  { %v5985_v56 = vadd.f32 %v5977_v36, %v5760_v31  ;;  %v5978_v53 = vrot.slane %v5899_v8, 4  ;;  %v5980_v29 = vrot.slane %v5970_v13, 4  ;;  %v5987_v35 = vadd.f32 %v5979_v58, %v5762_v14  ;;  %v17074_v58 = vld [vmem:[#allocation33_spill] sm:$0xff]  ;;  %v17076_v14 = vld [vmem:[#allocation34_spill] sm:$0xff] }
 0xb92   :  { %v9009_v24 = vmul.f32 -1.442695, %v5985_v56  ;;  %v5986_v47 = vadd.f32 %v5978_v53, %v5761_v3  ;;  %v5988_v22 = vadd.f32 %v5980_v29, %v5763_v41  ;;  %v5991_v53 = vld [vmem:[#allocation3 + $0x18] sm:$0xc] }
 0xb94   :  { %9415 = vpow2.f32 %v9009_v24  ;;  %v9010_v20 = vmul.f32 -1.442695, %v5986_v47  ;;  %v9011_v0 = vmul.f32 -1.442695, %v5988_v22  ;;  %v17073_v22 = vld [vmem:[#allocation43_spill] sm:$0xff] }
 0xb96   :  { %9417 = vpow2.f32 %v9010_v20 }
 0xb97   :  { %9419 = vpow2.f32 %v9011_v0  ;;  %v17075_v0 = vld [vmem:[#allocation44_spill] sm:$0xff] }
 0xba1   :  { %v9416_v5 = vpop.eup %9415 }
 0xba2   :  { %v6221_v52 = vadd.f32 1.0, %v9416_v5  ;;  %v17077_v5 = vld [vmem:[#allocation45_spill] sm:$0xff] }
 0xba3   :  { %v9418_v7 = vpop.eup %9417 }
 0xba4   :  { %9421 = vrcp.f32 %v6221_v52  ;;  %v6227_v50 = vadd.f32 1.0, %v9418_v7  ;;  %v9420_v18 = vpop.eup %9419  ;;  %v17079_v52 = vld [vmem:[#allocation46_spill] sm:$0xff]  ;;  %v17084_v7 = vld [vmem:[#allocation40_spill] sm:$0xff] }
 0xba5   :  { %9423 = vtanh.f32 %v5987_v35  ;;  %v6234_v17 = vadd.f32 1.0, %v9420_v18  ;;  %v17078_v35 = vld [vmem:[#allocation35_spill] sm:$0xff] }
 0xba6   :  { %9425 = vrcp.f32 %v6227_v50  ;;  %v17085_v50 = vld [vmem:[#allocation41_spill] sm:$0xff]  ;;  %v17086_v18 = vld [vmem:[#allocation47_spill] sm:$0xff] }
 0xba7   :  { %9427 = vrcp.f32 %v6234_v17 }
 0xbb1   :  { %v9422_v61 = vpop.eup %9421 }
 0xbb2   :  { %v9424_v38 = vpop.eup %9423 }
 0xbb3   :  { %v6126_v63 = vpop.f32.mrf.mxu0  ;;  %v9426_v43 = vpop.eup %9425  ;;  %v6241_v34 = vmul.f32 %v9424_v38, %v9422_v61  ;;  %v17087_v61 = vld [vmem:[#allocation48_spill] sm:$0xff]  ;;  %v17088_v38 = vld [vmem:[#allocation49_spill] sm:$0xff] }
 0xbb4   :  { %v6206_v9 = vrot.slane %v6126_v63, 6  ;;  %v6240_v1 = vmul.f32 %v9426_v43, %v6238_v49  ;;  %v6197_v42 = vpop.f32.mrf.mxu1  ;;  %v9428_v8 = vpop.eup %9427  ;;  %v17089_v63 = vld [vmem:[#allocation50_spill] sm:$0xff]  ;;  %v17090_v43 = vld [vmem:[#allocation51_spill] sm:$0xff] }
 0xbb5   :  { %v6128_v10 = vpop.f32.mrf.mxu0  ;;  %v6208_v31 = vrot.slane %v6197_v42, 6 }
 0xbb6   :  { %v6214_v23 = vadd.f32 %v6206_v9, %v5989_v37  ;;  %v6207_v11 = vrot.slane %v6128_v10, 6  ;;  %v14669_v6 = vadd.f32 %v6241_v34, %v6240_v1  ;;  %v6199_v40 = vpop.f32.mrf.mxu1  ;;  %v17091_v9 = vld [vmem:[#allocation52_spill] sm:$0xff]  ;;  %v17092_v34 = vld [vmem:[#allocation53_spill] sm:$0xff]  ;;  %v6265_v37 = vrot.slane %v14517_v54, 2  ;;  %v17093_v10 = vld [vmem:[#allocation58_spill] sm:$0xff] }
 0xbb7   :  { %v6209_v30 = vrot.slane %v6199_v40, 6  ;;  %v6216_v24 = vadd.f32 %v6208_v31, %v5991_v53  ;;  %v17097_v40 = vld [vmem:[#allocation57_spill] sm:$0xff]  ;;  %v17107_v31 = vld [vmem:[#allocation68_spill] sm:$0xff] }
 0xbb8   :  { %v9012_v26 = vmul.f32 -1.442695, %v6214_v23  ;;  %v6215_v28 = vadd.f32 %v6207_v11, %v5990_v25  ;;  %9429 = vtanh.f32 %v14669_v6  ;;  %v17094_v23 = vld [vmem:[#allocation54_spill] sm:$0xff]  ;;  %v17095_v25 = vld [vmem:[#allocation55_spill] sm:$0xff]  ;;  %v17111_v53 = vld [vmem:[#allocation72_spill] sm:$0xff] }
 0xbb9   :  { %v6217_v36 = vadd.f32 %v6209_v30, %v5992_v2  ;;  %v17098_v30 = vld [vmem:[#allocation59_spill] sm:$0xff]  ;;  %v17099_v2 = vld [vmem:[#allocation60_spill] sm:$0xff] }
 0xbba   :  { %9431 = vpow2.f32 %v9012_v26  ;;  %v9013_v15 = vmul.f32 -1.442695, %v6215_v28  ;;  %v17096_v26 = vld [vmem:[#allocation56_spill] sm:$0xff] }
 0xbbb   :  { %v9014_v56 = vmul.f32 -1.442695, %v6217_v36  ;;  %v17106_v36 = vld [vmem:[#allocation67_spill] sm:$0xff] }
 0xbbc   :  { %9433 = vpow2.f32 %v9013_v15 }
 0xbbd   :  { %9435 = vpow2.f32 %v9014_v56  ;;  %v17109_v56 = vld [vmem:[#allocation70_spill] sm:$0xff] }
 0xbc5   :  { %v9430_v39 = vpop.eup %9429 }
 0xbc6   :  { %v6244_v47 = vmul.f32 %v9430_v39, %v9428_v8  ;;  %v17108_v8 = vld [vmem:[#allocation69_spill] sm:$0xff]  ;;  %v17110_v39 = vld [vmem:[#allocation71_spill] sm:$0xff] }
 0xbc7   :  { %v9432_v3 = vpop.eup %9431 }
 0xbc8   :  { %v6248_v20 = vadd.f32 1.0, %v9432_v3  ;;  %6272 = vst [vmem:[#allocation4 + $0x18] sm:$0x30] %v6244_v47  ;;  %v6343_v29 = vrot.slane %v6244_v47, 4  ;;  %v17112_v3 = vld [vmem:[#allocation73_spill] sm:$0xff]  ;;  %v17114_v47 = vld [vmem:[#allocation75_spill] sm:$0xff] }
 0xbc9   :  { %v9434_v13 = vpop.eup %9433 }
 0xbca   :  { %9437 = vrcp.f32 %v6248_v20  ;;  %v6254_v41 = vadd.f32 1.0, %v9434_v13  ;;  %6410 = vmatmul.mubr.f32.vlgmr.msra.gmra.mxu0 %v6343_v29  ;;  %6481 = vmatmul.mubr.f32.vlgmr.msra.gmra.mxu1 %v6343_v29  ;;  %v9436_v49 = vpop.eup %9435  ;;  %v17115_v20 = vld [vmem:[#allocation76_spill] sm:$0xff]  ;;  %v17116_v13 = vld [vmem:[#allocation77_spill] sm:$0xff]  ;;  %v17117_v29 = vld [vmem:[#allocation78_spill] sm:$0xff] }
 0xbcb   :  { %9439 = vtanh.f32 %v6216_v24  ;;  %6575 = vmatpush1.msra.mxu0 %v14408_v59  ;;  %6646 = vmatpush1.msra.mxu1 %v14410_v48  ;;  %v17080_v59 = vld [vmem:[#allocation36_spill] sm:$0xff]  ;;  %v17081_v48 = vld [vmem:[#allocation37_spill] sm:$0xff]  ;;  %v6261_v11 = vadd.f32 1.0, %v9436_v49  ;;  %v17113_v24 = vld [vmem:[#allocation74_spill] sm:$0xff] }
 0xbcc   :  { %9441 = vrcp.f32 %v6254_v41  ;;  %6576 = vmatprep.subr.mxu0 %v14412_v46  ;;  %6647 = vmatprep.subr.mxu1 %v14414_v62  ;;  %v17082_v46 = vld [vmem:[#allocation38_spill] sm:$0xff]  ;;  %v17083_v62 = vld [vmem:[#allocation39_spill] sm:$0xff]  ;;  %v14802_v49 = vld [vmem:[#allocation7 + $0x148] sm:$0xff] }
 0xbcd   :  { %6577 = vmatpush1.msra.mxu0 %v17073_v22  ;;  %6648 = vmatpush1.msra.mxu1 %v17074_v58  ;;  %9443 = vrcp.f32 %v6261_v11  ;;  %v14756_v58 = vld [vmem:[#allocation7 + $0x1d8] sm:$0xff]  ;;  %v14834_v11 = vld [vmem:[#allocation7 + $0x110] sm:$0xff] }
 0xbce   :  { %6578 = vmatprep.subr.mxu0 %v17075_v0  ;;  %6649 = vmatprep.subr.mxu1 %v17076_v14  ;;  %v14760_v0 = vld [vmem:[#allocation7 + $0x1c0] sm:$0xff]  ;;  %v14762_v14 = vld [vmem:[#allocation7 + $0x1d0] sm:$0xff] }
 0xbcf   :  { %6579 = vmatpush1.msra.mxu0 %v17077_v5  ;;  %6650 = vmatpush1.msra.mxu1 %v17078_v35  ;;  %v14766_v5 = vld [vmem:[#allocation7 + $0x1a8] sm:$0xff]  ;;  %v14768_v35 = vld [vmem:[#allocation7 + $0x1b8] sm:$0xff] }
 0xbd0   :  { %6580 = vmatprep.subr.mxu0 %v17079_v52  ;;  %6651 = vmatprep.subr.mxu1 %v17080_v59  ;;  %v14772_v52 = vld [vmem:[#allocation7 + $0x1a0] sm:$0xff]  ;;  %v14774_v59 = vld [vmem:[#allocation7 + $0x1b0] sm:$0xff] }
 0xbd1   :  { %6581 = vmatpush1.msra.mxu0 %v17081_v48  ;;  %6652 = vmatpush1.msra.mxu1 %v17082_v46  ;;  %v14778_v48 = vld [vmem:[#allocation7 + $0x188] sm:$0xff]  ;;  %v14780_v46 = vld [vmem:[#allocation7 + $0x198] sm:$0xff] }
 0xbd2   :  { %6582 = vmatprep.subr.mxu0 %v17083_v62  ;;  %6653 = vmatprep.subr.mxu1 %v17084_v7  ;;  %v14784_v62 = vld [vmem:[#allocation7 + $0x180] sm:$0xff]  ;;  %v14786_v7 = vld [vmem:[#allocation7 + $0x190] sm:$0xff] }
 0xbd3   :  { %6583 = vmatpush1.msra.mxu0 %v17085_v50  ;;  %6654 = vmatpush1.msra.mxu1 %v17086_v18  ;;  %v14790_v50 = vld [vmem:[#allocation7 + $0x168] sm:$0xff]  ;;  %v14792_v18 = vld [vmem:[#allocation7 + $0x178] sm:$0xff] }
 0xbd4   :  { %6584 = vmatprep.subr.mxu0 %v17087_v61  ;;  %6655 = vmatprep.subr.mxu1 %v17088_v38  ;;  %v14796_v61 = vld [vmem:[#allocation7 + $0x160] sm:$0xff]  ;;  %v14798_v38 = vld [vmem:[#allocation7 + $0x170] sm:$0xff] }
 0xbd5   :  { %6585 = vmatpush1.msra.mxu0 %v17089_v63  ;;  %6656 = vmatpush1.msra.mxu1 %v17090_v43  ;;  %v14804_v63 = vld [vmem:[#allocation7 + $0x158] sm:$0xff]  ;;  %v14808_v43 = vld [vmem:[#allocation7 + $0x140] sm:$0xff] }
 0xbd6   :  { %6586 = vmatprep.subr.mxu0 %v17091_v9  ;;  %6657 = vmatprep.subr.mxu1 %v17092_v34  ;;  %v14814_v9 = vld [vmem:[#allocation7 + $0x128] sm:$0xff]  ;;  %v14816_v34 = vld [vmem:[#allocation7 + $0x138] sm:$0xff] }
 0xbd7   :  { %v9438_v17 = vpop.eup %9437  ;;  %6587 = vmatpush1.msra.mxu0 %v17093_v10  ;;  %6658 = vmatpush1.msra.mxu1 %v17094_v23  ;;  %v14826_v10 = vld [vmem:[#allocation7 + $0x108] sm:$0xff]  ;;  %v14828_v23 = vld [vmem:[#allocation7 + $0x118] sm:$0xff] }
 0xbd8   :  { %v9440_v1 = vpop.eup %9439  ;;  %6588 = vmatprep.subr.mxu0 %v17095_v25  ;;  %6659 = vmatprep.subr.mxu1 %v17096_v26  ;;  %v14838_v25 = vld [vmem:[#allocation7 + $0xe8] sm:$0xff]  ;;  %v14840_v26 = vld [vmem:[#allocation7 + $0xf8] sm:$0xff] }
 0xbd9   :  { %v9442_v42 = vpop.eup %9441  ;;  %v6268_v28 = vmul.f32 %v9440_v1, %v9438_v17  ;;  %6589 = vmatpush1.msra.mxu0 %v14488_v12  ;;  %6660 = vmatpush1.msra.mxu1 %v14490_v51  ;;  %v17100_v12 = vld [vmem:[#allocation61_spill] sm:$0xff]  ;;  %v17102_v51 = vld [vmem:[#allocation63_spill] sm:$0xff] }
 0xbda   :  { %v6267_v15 = vmul.f32 %v9442_v42, %v6265_v37  ;;  %6590 = vmatprep.subr.mxu0 %v14495_v57  ;;  %6661 = vmatprep.subr.mxu1 %v14497_v44  ;;  %v17101_v57 = vld [vmem:[#allocation62_spill] sm:$0xff]  ;;  %v17103_v44 = vld [vmem:[#allocation64_spill] sm:$0xff]  ;;  %v9444_v41 = vpop.eup %9443  ;;  %v14810_v17 = vld [vmem:[#allocation7 + $0x150] sm:$0xff] }
 0xbdb   :  { %6591 = vmatpush1.msra.mxu0 %v14501_v55  ;;  %6662 = vmatpush1.msra.mxu1 %v14503_v60  ;;  %v17104_v55 = vld [vmem:[#allocation65_spill] sm:$0xff]  ;;  %v17105_v60 = vld [vmem:[#allocation66_spill] sm:$0xff]  ;;  %v14820_v1 = vld [vmem:[#allocation7 + $0x120] sm:$0xff] }
 0xbdc   :  { %v14705_v54 = vadd.f32 %v6268_v28, %v6267_v15  ;;  %6592 = vmatprep.subr.mxu0 %v17097_v40  ;;  %6663 = vmatprep.subr.mxu1 %v17098_v30  ;;  %v14822_v37 = vld [vmem:[#allocation7 + $0x130] sm:$0xff]  ;;  %v14832_v42 = vld [vmem:[#allocation7 + $0x100] sm:$0xff]  ;;  %v14850_v40 = vld [vmem:[#allocation7 + $0xc8] sm:$0xff] }
 0xbdd   :  { %6593 = vmatpush1.msra.mxu0 %v17099_v2  ;;  %6664 = vmatpush1.msra.mxu1 %v17100_v12  ;;  %v14844_v28 = vld [vmem:[#allocation7 + $0xe0] sm:$0xff]  ;;  %v14846_v15 = vld [vmem:[#allocation7 + $0xf0] sm:$0xff]  ;;  %v14852_v30 = vld [vmem:[#allocation7 + $0xd8] sm:$0xff] }
 0xbde   :  { %9445 = vtanh.f32 %v14705_v54  ;;  %6594 = vmatprep.subr.mxu0 %v17101_v57  ;;  %6665 = vmatprep.subr.mxu1 %v17102_v51  ;;  %v14856_v2 = vld [vmem:[#allocation7 + $0xc0] sm:$0xff]  ;;  %v14858_v12 = vld [vmem:[#allocation7 + $0xd0] sm:$0xff]  ;;  %v14862_v57 = vld [vmem:[#allocation7 + $0xa8] sm:$0xff] }
 0xbdf   :  { %6595 = vmatpush1.msra.mxu0 %v17103_v44  ;;  %6666 = vmatpush1.msra.mxu1 %v17104_v55  ;;  %17118 = vst [vmem:[#allocation79_spill] sm:$0xff] %v14862_v57  ;;  %v14864_v51 = vld [vmem:[#allocation7 + $0xb8] sm:$0xff]  ;;  %v14868_v44 = vld [vmem:[#allocation7 + $0xa0] sm:$0xff]  ;;  %v14870_v55 = vld [vmem:[#allocation7 + $0xb0] sm:$0xff] }
 0xbe0   :  { %6596 = vmatprep.subr.mxu0 %v17105_v60  ;;  %6667 = vmatprep.subr.mxu1 %v17106_v36  ;;  %17119 = vst [vmem:[#allocation80_spill] sm:$0xff] %v14864_v51  ;;  %17120 = vst [vmem:[#allocation81_spill] sm:$0xff] %v14868_v44  ;;  %v14874_v60 = vld [vmem:[#allocation7 + $0x88] sm:$0xff]  ;;  %v14876_v36 = vld [vmem:[#allocation7 + $0x98] sm:$0xff] }
 0xbe1   :  { %6597 = vmatpush1.msra.mxu0 %v17107_v31  ;;  %6668 = vmatpush1.msra.mxu1 %v17108_v8  ;;  %17121 = vst [vmem:[#allocation82_spill] sm:$0xff] %v14870_v55  ;;  %17122 = vst [vmem:[#allocation83_spill] sm:$0xff] %v14874_v60  ;;  %v14880_v31 = vld [vmem:[#allocation7 + $0x80] sm:$0xff]  ;;  %v14882_v8 = vld [vmem:[#allocation7 + $0x90] sm:$0xff] }
 0xbe2   :  { %6598 = vmatprep.subr.mxu0 %v17109_v56  ;;  %6669 = vmatprep.subr.mxu1 %v17110_v39  ;;  %17123 = vst [vmem:[#allocation84_spill] sm:$0xff] %v14876_v36  ;;  %17124 = vst [vmem:[#allocation85_spill] sm:$0xff] %v14880_v31  ;;  %v14886_v56 = vld [vmem:[#allocation7 + $0x68] sm:$0xff]  ;;  %v14888_v39 = vld [vmem:[#allocation7 + $0x78] sm:$0xff] }
 0xbe3   :  { %6599 = vmatpush1.msra.mxu0 %v17111_v53  ;;  %6670 = vmatpush1.msra.mxu1 %v17112_v3  ;;  %17125 = vst [vmem:[#allocation15_spill] sm:$0xff] %v14882_v8  ;;  %17126 = vst [vmem:[#allocation16_spill] sm:$0xff] %v14886_v56  ;;  %v14892_v53 = vld [vmem:[#allocation7 + $0x60] sm:$0xff]  ;;  %v14894_v3 = vld [vmem:[#allocation7 + $0x70] sm:$0xff] }
 0xbe4   :  { %6600 = vmatprep.subr.mxu0 %v14558_v32  ;;  %6671 = vmatprep.subr.mxu1 %v17113_v24  ;;  %17127 = vst [vmem:[#allocation17_spill] sm:$0xff] %v14888_v39  ;;  %17128 = vst [vmem:[#allocation18_spill] sm:$0xff] %v14892_v53  ;;  %v14898_v24 = vld [vmem:[#allocation7 + $0x48] sm:$0xff] }
 0xbe5   :  { %6601 = vmatpush1.msra.mxu0 %v14564_v45  ;;  %6672 = vmatpush1.msra.mxu1 %v17114_v47  ;;  %17129 = vst [vmem:[#allocation19_spill] sm:$0xff] %v14894_v3  ;;  %17130 = vst [vmem:[#allocation20_spill] sm:$0xff] %v14898_v24  ;;  %v14900_v47 = vld [vmem:[#allocation7 + $0x58] sm:$0xff] }
 0xbe6   :  { %6602 = vmatprep.subr.mxu0 %v17115_v20  ;;  %6673 = vmatprep.subr.mxu1 %v17116_v13  ;;  %17131 = vst [vmem:[#allocation21_spill] sm:$0xff] %v14900_v47  ;;  %v14904_v20 = vld [vmem:[#allocation7 + $0x40] sm:$0xff]  ;;  %v14906_v13 = vld [vmem:[#allocation7 + $0x50] sm:$0xff] }
 0xbe7   :  { %6603 = vmatpush1.msra.mxu0 %v14576_v21  ;;  %6674 = vmatpush1.msra.mxu1 %v17117_v29  ;;  %v14742_v21 = vld [vmem:[#allocation7 + $0x1e8] sm:$0xff]  ;;  %17132 = vst [vmem:[#allocation22_spill] sm:$0xff] %v14904_v20  ;;  %17133 = vst [vmem:[#allocation23_spill] sm:$0xff] %v14906_v13 }
 0xbe8   :  { %6604 = vmatprep.subr.mxu0 %v14582_v27  ;;  %6675 = vmatprep.subr.mxu1 %v14584_v16  ;;  %v14744_v16 = vld [vmem:[#allocation7 + $0x1f8] sm:$0xff]  ;;  %v14748_v27 = vld [vmem:[#allocation7 + $0x1e0] sm:$0xff]  ;;  %v14910_v29 = vld [vmem:[#allocation7 + $0x28] sm:$0xff] }
 0xbe9   :  { %6605 = vmatpush1.msra.mxu0 %v14588_v4  ;;  %6638 = vmatprep.mubr.f32.mxu0 %v16384_v33  ;;  %v14750_v4 = vld [vmem:[#allocation7 + $0x1f0] sm:$0xff]  ;;  %17134 = vst [vmem:[#allocation24_spill] sm:$0xff] %v14910_v29 }
 0xbea   :  { %6676 = vmatpush1.msra.mxu1 %v14592_v19  ;;  %6709 = vmatprep.mubr.f32.mxu1 %v16384_v33  ;;  %v14754_v19 = vld [vmem:[#allocation7 + $0x1c8] sm:$0xff] }
 0xbeb   :  { %v9446_v32 = vpop.eup %9445  ;;  %6847 = vmatprep.subr.mxu0 %v14742_v21  ;;  %6918 = vmatprep.subr.mxu1 %v14744_v16 }
 0xbec   :  { %v6271_v45 = vmul.f32 %v9446_v32, %v9444_v41  ;;  %v14912_v41 = vld [vmem:[#allocation7 + $0x38] sm:$0xff]  ;;  %v14916_v32 = vld [vmem:[#allocation7 + $0x20] sm:$0xff] }
 0xbed   :  { %17135 = vst [vmem:[#allocation25_spill] sm:$0xff] %v14912_v41  ;;  %17136 = vst [vmem:[#allocation26_spill] sm:$0xff] %v14916_v32 }
 0xbee   :  { %6273 = vst [vmem:[#allocation4] sm:$0xc] %v6271_v45  ;;  %v6572_v22 = vrot.slane %v6271_v45, 2  ;;  %v14918_v45 = vld [vmem:[#allocation7 + $0x30] sm:$0xff] }
 0xbef   :  { %17137 = vst [vmem:[#allocation27_spill] sm:$0xff] %v14918_v45 }
 0xbf0   :  { %6639 = vmatmul.mubr.f32.vlgmr.msra.gmra.mxu0 %v6572_v22  ;;  %6710 = vmatmul.mubr.f32.vlgmr.msra.gmra.mxu1 %v6572_v22  ;;  %v14922_v22 = vld [vmem:[#allocation7 + $0x8] sm:$0xff] }
 0xbf1   :  { %6911 = vmatprep.mubr.f32.mxu0 %v16384_v33  ;;  %6982 = vmatprep.mubr.f32.mxu1 %v16384_v33  ;;  %17138 = vst [vmem:[#allocation28_spill] sm:$0xff] %v14922_v22 }
 0xbf2   :  { %6848 = vmatpush1.msra.mxu0 %v14748_v27  ;;  %6919 = vmatpush1.msra.mxu1 %v14750_v4 }
 0xbf3   :  { %6849 = vmatprep.subr.mxu0 %v14754_v19  ;;  %6920 = vmatprep.subr.mxu1 %v14756_v58 }
 0xbf4   :  { %6850 = vmatpush1.msra.mxu0 %v14760_v0  ;;  %6921 = vmatpush1.msra.mxu1 %v14762_v14 }
 0xbf5   :  { %6851 = vmatprep.subr.mxu0 %v14766_v5  ;;  %6922 = vmatprep.subr.mxu1 %v14768_v35 }
 0xbf6   :  { %6852 = vmatpush1.msra.mxu0 %v14772_v52  ;;  %6923 = vmatpush1.msra.mxu1 %v14774_v59 }
 0xbf7   :  { %6853 = vmatprep.subr.mxu0 %v14778_v48  ;;  %6924 = vmatprep.subr.mxu1 %v14780_v46 }
 0xbf8   :  { %6854 = vmatpush1.msra.mxu0 %v14784_v62  ;;  %6925 = vmatpush1.msra.mxu1 %v14786_v7 }
 0xbf9   :  { %6855 = vmatprep.subr.mxu0 %v14790_v50  ;;  %6926 = vmatprep.subr.mxu1 %v14792_v18 }
 0xbfa   :  { %6856 = vmatpush1.msra.mxu0 %v14796_v61  ;;  %6927 = vmatpush1.msra.mxu1 %v14798_v38 }
 0xbfb   :  { %6857 = vmatprep.subr.mxu0 %v14802_v49  ;;  %6928 = vmatprep.subr.mxu1 %v14804_v63 }
 0xbfc   :  { %6858 = vmatpush1.msra.mxu0 %v14808_v43  ;;  %6929 = vmatpush1.msra.mxu1 %v14810_v17 }
 0xbfd   :  { %6859 = vmatprep.subr.mxu0 %v14814_v9  ;;  %6930 = vmatprep.subr.mxu1 %v14816_v34 }
 0xbfe   :  { %6860 = vmatpush1.msra.mxu0 %v14820_v1  ;;  %6931 = vmatpush1.msra.mxu1 %v14822_v37 }
 0xbff   :  { %6861 = vmatprep.subr.mxu0 %v14826_v10  ;;  %6932 = vmatprep.subr.mxu1 %v14828_v23 }
 0xc00   :  { %6862 = vmatpush1.msra.mxu0 %v14832_v42  ;;  %6933 = vmatpush1.msra.mxu1 %v14834_v11 }
 0xc01   :  { %6863 = vmatprep.subr.mxu0 %v14838_v25  ;;  %6934 = vmatprep.subr.mxu1 %v14840_v26 }
 0xc02   :  { %6864 = vmatpush1.msra.mxu0 %v14844_v28  ;;  %6935 = vmatpush1.msra.mxu1 %v14846_v15 }
 0xc03   :  { %6865 = vmatprep.subr.mxu0 %v14850_v40  ;;  %6936 = vmatprep.subr.mxu1 %v14852_v30 }
 0xc04   :  { %6866 = vmatpush1.msra.mxu0 %v14856_v2  ;;  %6937 = vmatpush1.msra.mxu1 %v14858_v12 }
 0xc05   :  { %6867 = vmatprep.subr.mxu0 %v14862_v57  ;;  %6938 = vmatprep.subr.mxu1 %v14864_v51 }
 0xc06   :  { %6868 = vmatpush1.msra.mxu0 %v14868_v44  ;;  %6939 = vmatpush1.msra.mxu1 %v14870_v55 }
 0xc07   :  { %6869 = vmatprep.subr.mxu0 %v14874_v60  ;;  %6940 = vmatprep.subr.mxu1 %v14876_v36  ;;  %v6277_v36 = vld [vmem:[#allocation3 + $0x58] sm:$0xc0] }
 0xc08   :  { %6870 = vmatpush1.msra.mxu0 %v14880_v31  ;;  %6941 = vmatpush1.msra.mxu1 %v14882_v8 }
 0xc09   :  { %6871 = vmatprep.subr.mxu0 %v14886_v56  ;;  %6942 = vmatprep.subr.mxu1 %v14888_v39  ;;  %v6275_v39 = vld [vmem:[#allocation3 + $0x38] sm:$0xc0] }
 0xc0a   :  { %6872 = vmatpush1.msra.mxu0 %v14892_v53  ;;  %6943 = vmatpush1.msra.mxu1 %v14894_v3 }
 0xc0b   :  { %6873 = vmatprep.subr.mxu0 %v14898_v24  ;;  %6944 = vmatprep.subr.mxu1 %v14900_v47  ;;  %v6274_v47 = vld [vmem:[#allocation3] sm:$0xc0] }
 0xc0c   :  { %6874 = vmatpush1.msra.mxu0 %v14904_v20  ;;  %6945 = vmatpush1.msra.mxu1 %v14906_v13  ;;  %v14924_v20 = vld [vmem:[#allocation7 + $0x18] sm:$0xff]  ;;  %v14928_v13 = vld [vmem:[#allocation7] sm:$0xff] }
 0xc0d   :  { %6875 = vmatprep.subr.mxu0 %v14910_v29  ;;  %6946 = vmatprep.subr.mxu1 %v14912_v41  ;;  %17139 = vst [vmem:[#allocation29_spill] sm:$0xff] %v14924_v20  ;;  %17140 = vst [vmem:[#allocation30_spill] sm:$0xff] %v14928_v13  ;;  %v14930_v29 = vld [vmem:[#allocation7 + $0x10] sm:$0xff]  ;;  %v14934_v41 = vld [vmem:[#allocation9 + $0x1e8] sm:$0xff] }
 0xc0e   :  { %6876 = vmatpush1.msra.mxu0 %v14916_v32  ;;  %6947 = vmatpush1.msra.mxu1 %v14918_v45  ;;  %17141 = vst [vmem:[#allocation31_spill] sm:$0xff] %v14930_v29  ;;  %17142 = vst [vmem:[#allocation42_spill] sm:$0xff] %v14934_v41  ;;  %v14936_v32 = vld [vmem:[#allocation9 + $0x1f8] sm:$0xff] }
 0xc0f   :  { %6877 = vmatprep.subr.mxu0 %v14922_v22  ;;  %6948 = vmatprep.subr.mxu1 %v14924_v20  ;;  %17143 = vst [vmem:[#allocation32_spill] sm:$0xff] %v14936_v32 }
 0xc10   :  { %6878 = vmatpush1.msra.mxu0 %v14928_v13  ;;  %6949 = vmatpush1.msra.mxu1 %v14930_v29 }
 0xc11   :  { %7061 = vmatprep.subr.mxu0 %v14934_v41  ;;  %7132 = vmatprep.subr.mxu1 %v14936_v32  ;;  %v6276_v32 = vld [vmem:[#allocation3 + $0x78] sm:$0xc0] }
 0xc8a   :  { %v6411_v45 = vpop.f32.mrf.mxu0  ;;  %v6482_v20 = vpop.f32.mrf.mxu1 }
 0xc8b   :  { %v6491_v22 = vrot.slane %v6411_v45, 2  ;;  %v6493_v41 = vrot.slane %v6482_v20, 2 }
 0xc8c   :  { %v6413_v24 = vpop.f32.mrf.mxu0  ;;  %v6484_v8 = vpop.f32.mrf.mxu1 }
 0xc8d   :  { %v6499_v3 = vadd.f32 %v6491_v22, %v6274_v47  ;;  %v6492_v53 = vrot.slane %v6413_v24, 2  ;;  %v6494_v31 = vrot.slane %v6484_v8, 2  ;;  %v6501_v45 = vadd.f32 %v6493_v41, %v6276_v32  ;;  %v6503_v47 = vld [vmem:[#allocation3 + $0x60] sm:$0x3]  ;;  %v6506_v22 = vld [vmem:[#allocation3 + $0x50] sm:$0x3] }
 0xc8f   :  { %v9015_v56 = vmul.f32 -1.442695, %v6499_v3  ;;  %v6500_v13 = vadd.f32 %v6492_v53, %v6275_v39  ;;  %v6502_v60 = vadd.f32 %v6494_v31, %v6277_v36  ;;  %v6740_v3 = vrot.slane %v14669_v6, 6 }
 0xc91   :  { %9447 = vpow2.f32 %v9015_v56  ;;  %v9016_v29 = vmul.f32 -1.442695, %v6500_v13  ;;  %v9017_v55 = vmul.f32 -1.442695, %v6502_v60 }
 0xc93   :  { %9449 = vpow2.f32 %v9016_v29  ;;  %v6504_v29 = vld [vmem:[#allocation3 + $0x48] sm:$0x3] }
 0xc94   :  { %9451 = vpow2.f32 %v9017_v55 }
 0xc9e   :  { %v9448_v44 = vpop.eup %9447 }
 0xc9f   :  { %v6723_v51 = vadd.f32 1.0, %v9448_v44 }
 0xca0   :  { %v9450_v57 = vpop.eup %9449 }
 0xca1   :  { %9453 = vrcp.f32 %v6723_v51  ;;  %v6729_v24 = vadd.f32 1.0, %v9450_v57  ;;  %v9452_v39 = vpop.eup %9451 }
 0xca2   :  { %9455 = vtanh.f32 %v6501_v45  ;;  %v6736_v8 = vadd.f32 1.0, %v9452_v39 }
 0xca3   :  { %9457 = vrcp.f32 %v6729_v24 }
 0xca4   :  { %9459 = vrcp.f32 %v6736_v8 }
 0xcae   :  { %v9454_v53 = vpop.eup %9453 }
 0xcaf   :  { %v9456_v56 = vpop.eup %9455 }
 0xcb0   :  { %v6640_v36 = vpop.f32.mrf.mxu0  ;;  %v9458_v31 = vpop.eup %9457  ;;  %v6743_v20 = vmul.f32 %v9456_v56, %v9454_v53  ;;  %v6505_v53 = vld [vmem:[#allocation3 + $0x18] sm:$0x3] }
 0xcb1   :  { %v6716_v60 = vadd.f32 %v6640_v36, %v6503_v47  ;;  %v6742_v13 = vmul.f32 %v9458_v31, %v6740_v3  ;;  %v6711_v57 = vpop.f32.mrf.mxu1  ;;  %v9460_v39 = vpop.eup %9459 }
 0xcb2   :  { %v6642_v44 = vpop.f32.mrf.mxu0  ;;  %v6718_v3 = vadd.f32 %v6711_v57, %v6505_v53  ;;  %v14954_v57 = vld [vmem:[#allocation9 + $0x1d0] sm:$0xff]  ;;  %v14976_v53 = vld [vmem:[#allocation9 + $0x180] sm:$0xff] }
 0xcb3   :  { %v9018_v55 = vmul.f32 -1.442695, %v6716_v60  ;;  %v6717_v41 = vadd.f32 %v6642_v44, %v6504_v29  ;;  %v14941_v51 = vadd.f32 %v6743_v20, %v6742_v13  ;;  %v6713_v6 = vpop.f32.mrf.mxu1  ;;  %v14944_v13 = vld [vmem:[#allocation9 + $0x1e0] sm:$0xff]  ;;  %v14946_v29 = vld [vmem:[#allocation9 + $0x1f0] sm:$0xff]  ;;  %v14948_v44 = vld [vmem:[#allocation9 + $0x1c8] sm:$0xff]  ;;  %17145 = vst [vmem:[#allocation33_spill] sm:$0xff] %v14954_v57 }
 0xcb4   :  { %v6719_v45 = vadd.f32 %v6713_v6, %v6506_v22  ;;  %v14960_v6 = vld [vmem:[#allocation9 + $0x1b8] sm:$0xff]  ;;  %v14964_v22 = vld [vmem:[#allocation9 + $0x1a0] sm:$0xff]  ;;  %17152 = vst [vmem:[#allocation37_spill] sm:$0xff] %v14976_v53 }
 0xcb5   :  { %9461 = vpow2.f32 %v9018_v55  ;;  %v9019_v32 = vmul.f32 -1.442695, %v6717_v41  ;;  %v14950_v55 = vld [vmem:[#allocation9 + $0x1d8] sm:$0xff]  ;;  %v14952_v41 = vld [vmem:[#allocation9 + $0x1c0] sm:$0xff]  ;;  %17147 = vst [vmem:[#allocation34_spill] sm:$0xff] %v14960_v6  ;;  %17148 = vst [vmem:[#allocation45_spill] sm:$0xff] %v14964_v22 }
 0xcb6   :  { %9463 = vtanh.f32 %v14941_v51  ;;  %v9020_v24 = vmul.f32 -1.442695, %v6719_v45  ;;  %17144 = vst [vmem:[#allocation43_spill] sm:$0xff] %v14952_v41  ;;  %v14966_v45 = vld [vmem:[#allocation9 + $0x1b0] sm:$0xff] }
 0xcb7   :  { %9465 = vpow2.f32 %v9019_v32  ;;  %v14958_v32 = vld [vmem:[#allocation9 + $0x1a8] sm:$0xff]  ;;  %17149 = vst [vmem:[#allocation35_spill] sm:$0xff] %v14966_v45 }
 0xcb8   :  { %9467 = vpow2.f32 %v9020_v24  ;;  %17146 = vst [vmem:[#allocation44_spill] sm:$0xff] %v14958_v32  ;;  %v14970_v24 = vld [vmem:[#allocation9 + $0x188] sm:$0xff] }
 0xcb9   :  { %17150 = vst [vmem:[#allocation46_spill] sm:$0xff] %v14970_v24 }
 0xcc2   :  { %v9462_v56 = vpop.eup %9461 }
 0xcc3   :  { %v9464_v47 = vpop.eup %9463  ;;  %v6750_v36 = vadd.f32 1.0, %v9462_v56  ;;  %v14978_v56 = vld [vmem:[#allocation9 + $0x190] sm:$0xff] }
 0xcc4   :  { %v9466_v31 = vpop.eup %9465  ;;  %v6746_v60 = vmul.f32 %v9464_v47, %v9460_v39  ;;  %v14972_v39 = vld [vmem:[#allocation9 + $0x198] sm:$0xff]  ;;  %17153 = vst [vmem:[#allocation38_spill] sm:$0xff] %v14978_v56 }
 0xcc5   :  { %9469 = vrcp.f32 %v6750_v36  ;;  %v6756_v8 = vadd.f32 1.0, %v9466_v31  ;;  %17151 = vst [vmem:[#allocation36_spill] sm:$0xff] %v14972_v39  ;;  %v14984_v47 = vld [vmem:[#allocation9 + $0x178] sm:$0xff]  ;;  %v14988_v36 = vld [vmem:[#allocation9 + $0x160] sm:$0xff]  ;;  %v14990_v31 = vld [vmem:[#allocation9 + $0x170] sm:$0xff] }
 0xcc6   :  { %9471 = vtanh.f32 %v6718_v3  ;;  %6774 = vst [vmem:[#allocation4 + $0x18] sm:$0xc0] %v6746_v60  ;;  %v6845_v20 = vrot.slane %v6746_v60, 6  ;;  %v14982_v3 = vld [vmem:[#allocation9 + $0x168] sm:$0xff]  ;;  %17155 = vst [vmem:[#allocation40_spill] sm:$0xff] %v14984_v47 }
 0xcc7   :  { %9473 = vrcp.f32 %v6756_v8  ;;  %17154 = vst [vmem:[#allocation39_spill] sm:$0xff] %v14982_v3  ;;  %17156 = vst [vmem:[#allocation41_spill] sm:$0xff] %v14988_v36  ;;  %v14994_v60 = vld [vmem:[#allocation9 + $0x148] sm:$0xff]  ;;  %v14996_v8 = vld [vmem:[#allocation9 + $0x158] sm:$0xff] }
 0xcc8   :  { %6912 = vmatmul.mubr.f32.vlgmr.msra.gmra.mxu0 %v6845_v20  ;;  %6983 = vmatmul.mubr.f32.vlgmr.msra.gmra.mxu1 %v6845_v20  ;;  %17157 = vst [vmem:[#allocation47_spill] sm:$0xff] %v14990_v31  ;;  %17158 = vst [vmem:[#allocation48_spill] sm:$0xff] %v14994_v60  ;;  %v15000_v20 = vld [vmem:[#allocation9 + $0x140] sm:$0xff] }
 0xcc9   :  { %7062 = vmatpush1.msra.mxu0 %v14944_v13  ;;  %7133 = vmatpush1.msra.mxu1 %v14946_v29  ;;  %17159 = vst [vmem:[#allocation49_spill] sm:$0xff] %v14996_v8  ;;  %17160 = vst [vmem:[#allocation50_spill] sm:$0xff] %v15000_v20 }
 0xcca   :  { %7063 = vmatprep.subr.mxu0 %v14948_v44  ;;  %7134 = vmatprep.subr.mxu1 %v14950_v55 }
 0xccb   :  { %7064 = vmatpush1.msra.mxu0 %v14952_v41  ;;  %7135 = vmatpush1.msra.mxu1 %v14954_v57 }
 0xccc   :  { %7065 = vmatprep.subr.mxu0 %v14958_v32  ;;  %7136 = vmatprep.subr.mxu1 %v14960_v6  ;;  %v6767_v6 = vrot.slane %v14705_v54, 2 }
 0xccd   :  { %7066 = vmatpush1.msra.mxu0 %v14964_v22  ;;  %7137 = vmatpush1.msra.mxu1 %v14966_v45 }
 0xcce   :  { %7067 = vmatprep.subr.mxu0 %v14970_v24  ;;  %7138 = vmatprep.subr.mxu1 %v14972_v39  ;;  %v15002_v24 = vld [vmem:[#allocation9 + $0x150] sm:$0xff]  ;;  %v9468_v39 = vpop.eup %9467 }
 0xccf   :  { %7068 = vmatpush1.msra.mxu0 %v14976_v53  ;;  %7139 = vmatpush1.msra.mxu1 %v14978_v56  ;;  %17161 = vst [vmem:[#allocation51_spill] sm:$0xff] %v15002_v24  ;;  %v15006_v53 = vld [vmem:[#allocation9 + $0x128] sm:$0xff]  ;;  %v15008_v56 = vld [vmem:[#allocation9 + $0x138] sm:$0xff]  ;;  %v6763_v57 = vadd.f32 1.0, %v9468_v39  ;;  %v15037_v39 = vld [vmem:[#allocation9 + $0xe0] sm:$0xff] }
 0xcd0   :  { %7069 = vmatprep.subr.mxu0 %v14982_v3  ;;  %7140 = vmatprep.subr.mxu1 %v14984_v47  ;;  %17162 = vst [vmem:[#allocation52_spill] sm:$0xff] %v15006_v53  ;;  %17163 = vst [vmem:[#allocation53_spill] sm:$0xff] %v15008_v56  ;;  %v15012_v3 = vld [vmem:[#allocation9 + $0x120] sm:$0xff]  ;;  %v15014_v47 = vld [vmem:[#allocation9 + $0x130] sm:$0xff] }
 0xcd1   :  { %7070 = vmatpush1.msra.mxu0 %v14988_v36  ;;  %7141 = vmatpush1.msra.mxu1 %v14990_v31  ;;  %v15019_v31 = vld [vmem:[#allocation9 + $0x108] sm:$0xff]  ;;  %v15021_v36 = vld [vmem:[#allocation9 + $0x118] sm:$0xff]  ;;  %17166 = vst [vmem:[#allocation55_spill] sm:$0xff] %v15037_v39  ;;  %9475 = vrcp.f32 %v6763_v57  ;;  %v15064_v57 = vld [vmem:[#allocation9 + $0xa0] sm:$0xff] }
 0xcd2   :  { %v9470_v45 = vpop.eup %9469  ;;  %7071 = vmatprep.subr.mxu0 %v14994_v60  ;;  %7142 = vmatprep.subr.mxu1 %v14996_v8  ;;  %v15025_v8 = vld [vmem:[#allocation9 + $0x100] sm:$0xff]  ;;  %v15027_v60 = vld [vmem:[#allocation9 + $0x110] sm:$0xff]  ;;  %17174 = vst [vmem:[#allocation64_spill] sm:$0xff] %v15064_v57 }
 0xcd3   :  { %v9472_v22 = vpop.eup %9471  ;;  %7072 = vmatpush1.msra.mxu0 %v15000_v20  ;;  %7143 = vmatpush1.msra.mxu1 %v15002_v24  ;;  %v15031_v24 = vld [vmem:[#allocation9 + $0xe8] sm:$0xff]  ;;  %v15033_v20 = vld [vmem:[#allocation9 + $0xf8] sm:$0xff] }
 0xcd4   :  { %v9474_v32 = vpop.eup %9473  ;;  %7073 = vmatprep.subr.mxu0 %v15006_v53  ;;  %7144 = vmatprep.subr.mxu1 %v15008_v56  ;;  %v6770_v41 = vmul.f32 %v9472_v22, %v9470_v45  ;;  %17164 = vst [vmem:[#allocation58_spill] sm:$0xff] %v15031_v24  ;;  %17165 = vst [vmem:[#allocation54_spill] sm:$0xff] %v15033_v20  ;;  %v15039_v56 = vld [vmem:[#allocation9 + $0xf0] sm:$0xff]  ;;  %v15051_v22 = vld [vmem:[#allocation9 + $0xc0] sm:$0xff] }
 0xcd5   :  { %v6769_v54 = vmul.f32 %v9474_v32, %v6767_v6  ;;  %7074 = vmatpush1.msra.mxu0 %v15012_v3  ;;  %7145 = vmatpush1.msra.mxu1 %v15014_v47  ;;  %17167 = vst [vmem:[#allocation56_spill] sm:$0xff] %v15039_v56  ;;  %v15045_v32 = vld [vmem:[#allocation9 + $0xc8] sm:$0xff]  ;;  %v15047_v6 = vld [vmem:[#allocation9 + $0xd8] sm:$0xff]  ;;  %17170 = vst [vmem:[#allocation60_spill] sm:$0xff] %v15051_v22 }
 0xcd6   :  { %7075 = vmatprep.subr.mxu0 %v15019_v31  ;;  %7146 = vmatprep.subr.mxu1 %v15021_v36  ;;  %17168 = vst [vmem:[#allocation57_spill] sm:$0xff] %v15045_v32  ;;  %17169 = vst [vmem:[#allocation59_spill] sm:$0xff] %v15047_v6  ;;  %v15053_v45 = vld [vmem:[#allocation9 + $0xd0] sm:$0xff] }
 0xcd7   :  { %v15041_v53 = vadd.f32 %v6770_v41, %v6769_v54  ;;  %7076 = vmatpush1.msra.mxu0 %v15025_v8  ;;  %7147 = vmatpush1.msra.mxu1 %v15027_v60  ;;  %17171 = vst [vmem:[#allocation61_spill] sm:$0xff] %v15053_v45  ;;  %v15057_v41 = vld [vmem:[#allocation9 + $0xa8] sm:$0xff]  ;;  %v15059_v54 = vld [vmem:[#allocation9 + $0xb8] sm:$0xff] }
 0xcd8   :  { %7077 = vmatprep.subr.mxu0 %v15031_v24  ;;  %7148 = vmatprep.subr.mxu1 %v15033_v20  ;;  %17172 = vst [vmem:[#allocation62_spill] sm:$0xff] %v15057_v41  ;;  %17173 = vst [vmem:[#allocation63_spill] sm:$0xff] %v15059_v54  ;;  %v15066_v20 = vld [vmem:[#allocation9 + $0xb0] sm:$0xff]  ;;  %v15076_v24 = vld [vmem:[#allocation9 + $0x80] sm:$0xff] }
 0xcd9   :  { %7078 = vmatpush1.msra.mxu0 %v15037_v39  ;;  %7149 = vmatpush1.msra.mxu1 %v15039_v56  ;;  %9477 = vtanh.f32 %v15041_v53  ;;  %17175 = vst [vmem:[#allocation65_spill] sm:$0xff] %v15066_v20  ;;  %v15070_v39 = vld [vmem:[#allocation9 + $0x88] sm:$0xff]  ;;  %v15072_v56 = vld [vmem:[#allocation9 + $0x98] sm:$0xff]  ;;  %17178 = vst [vmem:[#allocation68_spill] sm:$0xff] %v15076_v24 }
 0xcda   :  { %7079 = vmatprep.subr.mxu0 %v15045_v32  ;;  %7150 = vmatprep.subr.mxu1 %v15047_v6  ;;  %17176 = vst [vmem:[#allocation66_spill] sm:$0xff] %v15070_v39  ;;  %17177 = vst [vmem:[#allocation67_spill] sm:$0xff] %v15072_v56  ;;  %v15078_v32 = vld [vmem:[#allocation9 + $0x90] sm:$0xff]  ;;  %v15082_v6 = vld [vmem:[#allocation9 + $0x68] sm:$0xff] }
 0xcdb   :  { %7080 = vmatpush1.msra.mxu0 %v15051_v22  ;;  %7151 = vmatpush1.msra.mxu1 %v15053_v45  ;;  %17179 = vst [vmem:[#allocation69_spill] sm:$0xff] %v15078_v32  ;;  %17180 = vst [vmem:[#allocation70_spill] sm:$0xff] %v15082_v6  ;;  %v15084_v22 = vld [vmem:[#allocation9 + $0x78] sm:$0xff]  ;;  %v15088_v45 = vld [vmem:[#allocation9 + $0x60] sm:$0xff] }
 0xcdc   :  { %7081 = vmatprep.subr.mxu0 %v15057_v41  ;;  %7152 = vmatprep.subr.mxu1 %v15059_v54  ;;  %17181 = vst [vmem:[#allocation71_spill] sm:$0xff] %v15084_v22  ;;  %17182 = vst [vmem:[#allocation72_spill] sm:$0xff] %v15088_v45  ;;  %v15090_v41 = vld [vmem:[#allocation9 + $0x70] sm:$0xff]  ;;  %v15094_v54 = vld [vmem:[#allocation9 + $0x48] sm:$0xff] }
 0xcdd   :  { %7082 = vmatpush1.msra.mxu0 %v15064_v57  ;;  %7153 = vmatpush1.msra.mxu1 %v15066_v20  ;;  %17183 = vst [vmem:[#allocation73_spill] sm:$0xff] %v15090_v41  ;;  %17184 = vst [vmem:[#allocation74_spill] sm:$0xff] %v15094_v54  ;;  %v15096_v57 = vld [vmem:[#allocation9 + $0x58] sm:$0xff]  ;;  %v15100_v20 = vld [vmem:[#allocation9 + $0x40] sm:$0xff] }
 0xcde   :  { %7083 = vmatprep.subr.mxu0 %v15070_v39  ;;  %7154 = vmatprep.subr.mxu1 %v15072_v56  ;;  %17185 = vst [vmem:[#allocation75_spill] sm:$0xff] %v15096_v57  ;;  %17186 = vst [vmem:[#allocation76_spill] sm:$0xff] %v15100_v20  ;;  %v15102_v39 = vld [vmem:[#allocation9 + $0x50] sm:$0xff]  ;;  %v15106_v56 = vld [vmem:[#allocation9 + $0x28] sm:$0xff] }
 0xcdf   :  { %7084 = vmatpush1.msra.mxu0 %v15076_v24  ;;  %7155 = vmatpush1.msra.mxu1 %v15078_v32  ;;  %17187 = vst [vmem:[#allocation77_spill] sm:$0xff] %v15106_v56  ;;  %v15108_v24 = vld [vmem:[#allocation9 + $0x38] sm:$0xff]  ;;  %v15112_v32 = vld [vmem:[#allocation9 + $0x20] sm:$0xff] }
 0xce0   :  { %7085 = vmatprep.subr.mxu0 %v15082_v6  ;;  %7156 = vmatprep.subr.mxu1 %v15084_v22  ;;  %v15114_v6 = vld [vmem:[#allocation9 + $0x30] sm:$0xff]  ;;  %v15118_v22 = vld [vmem:[#allocation9 + $0x8] sm:$0xff] }
 0xce1   :  { %7086 = vmatpush1.msra.mxu0 %v15088_v45  ;;  %7157 = vmatpush1.msra.mxu1 %v15090_v41  ;;  %v15120_v45 = vld [vmem:[#allocation9 + $0x18] sm:$0xff]  ;;  %v15124_v41 = vld [vmem:[#allocation9] sm:$0xff] }
 0xce2   :  { %7087 = vmatprep.subr.mxu0 %v15094_v54  ;;  %7158 = vmatprep.subr.mxu1 %v15096_v57  ;;  %v9476_v54 = vpop.eup %9475  ;;  %v15128_v57 = vld [vmem:[#allocation9 + $0x10] sm:$0xff] }
 0xce3   :  { %7088 = vmatpush1.msra.mxu0 %v15100_v20  ;;  %7159 = vmatpush1.msra.mxu1 %v15102_v39 }
 0xce4   :  { %7089 = vmatprep.subr.mxu0 %v15106_v56  ;;  %7160 = vmatprep.subr.mxu1 %v15108_v24 }
 0xce5   :  { %7090 = vmatpush1.msra.mxu0 %v15112_v32  ;;  %7161 = vmatpush1.msra.mxu1 %v15114_v6 }
 0xce6   :  { %v9478_v20 = vpop.eup %9477  ;;  %7091 = vmatprep.subr.mxu0 %v15118_v22  ;;  %7162 = vmatprep.subr.mxu1 %v15120_v45 }
 0xce7   :  { %7092 = vmatpush1.msra.mxu0 %v15124_v41  ;;  %7125 = vmatprep.mubr.f32.mxu0 %v16384_v33  ;;  %v6773_v56 = vmul.f32 %v9478_v20, %v9476_v54 }
 0xce8   :  { %7163 = vmatpush1.msra.mxu1 %v15128_v57  ;;  %7196 = vmatprep.mubr.f32.mxu1 %v16384_v33 }
 0xce9   :  { %6775 = vst [vmem:[#allocation4] sm:$0x3] %v6773_v56  ;;  %7126 = vmatmul.mubr.f32.vlgmr.msra.gmra.mxu0 %v6773_v56  ;;  %7197 = vmatmul.mubr.f32.vlgmr.msra.gmra.mxu1 %v6773_v56 }
 0xcea   :  { %7343 = vmatprep.subr.mxu0 %v14742_v21  ;;  %7414 = vmatprep.subr.mxu1 %v14744_v16  ;;  %v17188_v21 = vld [vmem:[#allocation79_spill] sm:$0xff]  ;;  %v17189_v16 = vld [vmem:[#allocation80_spill] sm:$0xff] }
 0xceb   :  { %7344 = vmatpush1.msra.mxu0 %v14748_v27  ;;  %7415 = vmatpush1.msra.mxu1 %v14750_v4  ;;  %v17190_v27 = vld [vmem:[#allocation81_spill] sm:$0xff]  ;;  %v17191_v4 = vld [vmem:[#allocation82_spill] sm:$0xff] }
 0xcec   :  { %7345 = vmatprep.subr.mxu0 %v14754_v19  ;;  %7416 = vmatprep.subr.mxu1 %v14756_v58  ;;  %v17192_v19 = vld [vmem:[#allocation83_spill] sm:$0xff]  ;;  %v17193_v58 = vld [vmem:[#allocation84_spill] sm:$0xff] }
 0xced   :  { %7346 = vmatpush1.msra.mxu0 %v14760_v0  ;;  %7417 = vmatpush1.msra.mxu1 %v14762_v14  ;;  %v17194_v0 = vld [vmem:[#allocation85_spill] sm:$0xff]  ;;  %v17195_v14 = vld [vmem:[#allocation15_spill] sm:$0xff] }
 0xcee   :  { %7347 = vmatprep.subr.mxu0 %v14766_v5  ;;  %7418 = vmatprep.subr.mxu1 %v14768_v35  ;;  %v17196_v5 = vld [vmem:[#allocation16_spill] sm:$0xff]  ;;  %v17197_v35 = vld [vmem:[#allocation17_spill] sm:$0xff] }
 0xcef   :  { %7348 = vmatpush1.msra.mxu0 %v14772_v52  ;;  %7419 = vmatpush1.msra.mxu1 %v14774_v59  ;;  %v17198_v52 = vld [vmem:[#allocation18_spill] sm:$0xff]  ;;  %v17199_v59 = vld [vmem:[#allocation19_spill] sm:$0xff] }
 0xcf0   :  { %7349 = vmatprep.subr.mxu0 %v14778_v48  ;;  %7420 = vmatprep.subr.mxu1 %v14780_v46  ;;  %v17200_v48 = vld [vmem:[#allocation20_spill] sm:$0xff]  ;;  %v17201_v46 = vld [vmem:[#allocation21_spill] sm:$0xff] }
 0xcf1   :  { %7350 = vmatpush1.msra.mxu0 %v14784_v62  ;;  %7421 = vmatpush1.msra.mxu1 %v14786_v7  ;;  %v17202_v62 = vld [vmem:[#allocation22_spill] sm:$0xff]  ;;  %v17203_v7 = vld [vmem:[#allocation23_spill] sm:$0xff] }
 0xcf2   :  { %7351 = vmatprep.subr.mxu0 %v14790_v50  ;;  %7422 = vmatprep.subr.mxu1 %v14792_v18  ;;  %v17204_v50 = vld [vmem:[#allocation24_spill] sm:$0xff]  ;;  %v17205_v18 = vld [vmem:[#allocation25_spill] sm:$0xff] }
 0xcf3   :  { %7352 = vmatpush1.msra.mxu0 %v14796_v61  ;;  %7423 = vmatpush1.msra.mxu1 %v14798_v38  ;;  %v17206_v61 = vld [vmem:[#allocation26_spill] sm:$0xff]  ;;  %v17207_v38 = vld [vmem:[#allocation27_spill] sm:$0xff] }
 0xcf4   :  { %7353 = vmatprep.subr.mxu0 %v14802_v49  ;;  %7424 = vmatprep.subr.mxu1 %v14804_v63  ;;  %v17208_v49 = vld [vmem:[#allocation28_spill] sm:$0xff]  ;;  %v17209_v63 = vld [vmem:[#allocation29_spill] sm:$0xff] }
 0xcf5   :  { %7354 = vmatpush1.msra.mxu0 %v14808_v43  ;;  %7425 = vmatpush1.msra.mxu1 %v14810_v17  ;;  %v17210_v43 = vld [vmem:[#allocation30_spill] sm:$0xff]  ;;  %v17211_v17 = vld [vmem:[#allocation31_spill] sm:$0xff] }
 0xcf6   :  { %7355 = vmatprep.subr.mxu0 %v14814_v9  ;;  %7426 = vmatprep.subr.mxu1 %v14816_v34  ;;  %v17212_v9 = vld [vmem:[#allocation42_spill] sm:$0xff]  ;;  %v17213_v34 = vld [vmem:[#allocation32_spill] sm:$0xff] }
 0xcf7   :  { %7356 = vmatpush1.msra.mxu0 %v14820_v1  ;;  %7427 = vmatpush1.msra.mxu1 %v14822_v37  ;;  %v6776_v1 = vld [vmem:[#allocation3 + $0x40] sm:$0x3] }
 0xcf8   :  { %7357 = vmatprep.subr.mxu0 %v14826_v10  ;;  %7428 = vmatprep.subr.mxu1 %v14828_v23  ;;  %v6777_v23 = vld [vmem:[#allocation3 + $0x30] sm:$0x3] }
 0xcf9   :  { %7358 = vmatpush1.msra.mxu0 %v14832_v42  ;;  %7429 = vmatpush1.msra.mxu1 %v14834_v11 }
 0xcfa   :  { %7359 = vmatprep.subr.mxu0 %v14838_v25  ;;  %7430 = vmatprep.subr.mxu1 %v14840_v26 }
 0xcfb   :  { %7360 = vmatpush1.msra.mxu0 %v14844_v28  ;;  %7431 = vmatpush1.msra.mxu1 %v14846_v15 }
 0xcfc   :  { %7361 = vmatprep.subr.mxu0 %v14850_v40  ;;  %7432 = vmatprep.subr.mxu1 %v14852_v30  ;;  %v6779_v40 = vld [vmem:[#allocation3 + $0x28] sm:$0x3] }
 0xcfd   :  { %7362 = vmatpush1.msra.mxu0 %v14856_v2  ;;  %7433 = vmatpush1.msra.mxu1 %v14858_v12  ;;  %v6778_v12 = vld [vmem:[#allocation3 + $0x68] sm:$0x3] }
 0xcfe   :  { %7363 = vmatprep.subr.mxu0 %v17188_v21  ;;  %7434 = vmatprep.subr.mxu1 %v17189_v16 }
 0xcff   :  { %7364 = vmatpush1.msra.mxu0 %v17190_v27  ;;  %7435 = vmatpush1.msra.mxu1 %v17191_v4 }
 0xd00   :  { %7365 = vmatprep.subr.mxu0 %v17192_v19  ;;  %7436 = vmatprep.subr.mxu1 %v17193_v58 }
 0xd01   :  { %7366 = vmatpush1.msra.mxu0 %v17194_v0  ;;  %7437 = vmatpush1.msra.mxu1 %v17195_v14  ;;  %v7239_v14 = vrot.slane %v14941_v51, 6 }
 0xd02   :  { %7367 = vmatprep.subr.mxu0 %v17196_v5  ;;  %7438 = vmatprep.subr.mxu1 %v17197_v35  ;;  %v6993_v35 = vld [vmem:[#allocation3 + $0x20] sm:$0xc0] }
 0xd03   :  { %7368 = vmatpush1.msra.mxu0 %v17198_v52  ;;  %7439 = vmatpush1.msra.mxu1 %v17199_v59 }
 0xd04   :  { %7369 = vmatprep.subr.mxu0 %v17200_v48  ;;  %7440 = vmatprep.subr.mxu1 %v17201_v46 }
 0xd05   :  { %7370 = vmatpush1.msra.mxu0 %v17202_v62  ;;  %7441 = vmatpush1.msra.mxu1 %v17203_v7 }
 0xd06   :  { %7371 = vmatprep.subr.mxu0 %v17204_v50  ;;  %7442 = vmatprep.subr.mxu1 %v17205_v18  ;;  %v6994_v18 = vld [vmem:[#allocation3 + $0x8] sm:$0xc0] }
 0xd07   :  { %7372 = vmatpush1.msra.mxu0 %v17206_v61  ;;  %7443 = vmatpush1.msra.mxu1 %v17207_v38 }
 0xd08   :  { %7373 = vmatprep.subr.mxu0 %v17208_v49  ;;  %7444 = vmatprep.subr.mxu1 %v17209_v63 }
 0xd09   :  { %7374 = vmatpush1.msra.mxu0 %v17210_v43  ;;  %7407 = vmatprep.mubr.f32.mxu0 %v16384_v33 }
 0xd0a   :  { %7445 = vmatpush1.msra.mxu1 %v17211_v17  ;;  %7478 = vmatprep.mubr.f32.mxu1 %v16384_v33  ;;  %v6996_v17 = vld [vmem:[#allocation3 + $0x10] sm:$0xc0] }
 0xd0b   :  { %7572 = vmatprep.subr.mxu0 %v17212_v9  ;;  %7643 = vmatprep.subr.mxu1 %v17213_v34 }
 0xd88   :  { %v6913_v37 = vpop.f32.mrf.mxu0  ;;  %v6984_v26 = vpop.f32.mrf.mxu1 }
 0xd89   :  { %v6989_v10 = vadd.f32 %v6913_v37, %v6776_v1  ;;  %v6991_v20 = vadd.f32 %v6984_v26, %v6778_v12  ;;  %v17217_v12 = vld [vmem:[#allocation34_spill] sm:$0xff] }
 0xd8a   :  { %v6915_v42 = vpop.f32.mrf.mxu0  ;;  %v6986_v15 = vpop.f32.mrf.mxu1 }
 0xd8b   :  { %v9021_v11 = vmul.f32 -1.442695, %v6989_v10  ;;  %v6990_v25 = vadd.f32 %v6915_v42, %v6777_v23  ;;  %v6992_v30 = vadd.f32 %v6986_v15, %v6779_v40  ;;  %v6995_v10 = vld [vmem:[#allocation3 + $0x70] sm:$0xc0]  ;;  %v17214_v40 = vld [vmem:[#allocation43_spill] sm:$0xff] }
 0xd8d   :  { %9479 = vpow2.f32 %v9021_v11  ;;  %v9022_v28 = vmul.f32 -1.442695, %v6990_v25  ;;  %v9023_v2 = vmul.f32 -1.442695, %v6992_v30  ;;  %v17215_v30 = vld [vmem:[#allocation33_spill] sm:$0xff] }
 0xd8f   :  { %9481 = vpow2.f32 %v9022_v28 }
 0xd90   :  { %9483 = vpow2.f32 %v9023_v2  ;;  %v17216_v2 = vld [vmem:[#allocation44_spill] sm:$0xff] }
 0xd9a   :  { %v9480_v56 = vpop.eup %9479 }
 0xd9b   :  { %v7222_v54 = vadd.f32 1.0, %v9480_v56  ;;  %v17218_v56 = vld [vmem:[#allocation45_spill] sm:$0xff] }
 0xd9c   :  { %v9482_v21 = vpop.eup %9481 }
 0xd9d   :  { %9485 = vrcp.f32 %v7222_v54  ;;  %v7228_v16 = vadd.f32 1.0, %v9482_v21  ;;  %v9484_v27 = vpop.eup %9483  ;;  %v17220_v54 = vld [vmem:[#allocation46_spill] sm:$0xff]  ;;  %v17225_v21 = vld [vmem:[#allocation40_spill] sm:$0xff] }
 0xd9e   :  { %9487 = vtanh.f32 %v6991_v20  ;;  %v7235_v5 = vadd.f32 1.0, %v9484_v27  ;;  %v17219_v20 = vld [vmem:[#allocation35_spill] sm:$0xff] }
 0xd9f   :  { %9489 = vrcp.f32 %v7228_v16  ;;  %v17226_v16 = vld [vmem:[#allocation41_spill] sm:$0xff]  ;;  %v17227_v27 = vld [vmem:[#allocation47_spill] sm:$0xff] }
 0xda0   :  { %9491 = vrcp.f32 %v7235_v5 }
 0xda9   :  { %v7127_v4 = vpop.f32.mrf.mxu0  ;;  %v7198_v46 = vpop.f32.mrf.mxu1 }
 0xdaa   :  { %v9486_v19 = vpop.eup %9485  ;;  %v7207_v58 = vrot.slane %v7127_v4, 2  ;;  %v7209_v34 = vrot.slane %v7198_v46, 2  ;;  %v17228_v4 = vld [vmem:[#allocation48_spill] sm:$0xff] }
 0xdab   :  { %v9488_v0 = vpop.eup %9487  ;;  %v7129_v52 = vpop.f32.mrf.mxu0 }
 0xdac   :  { %v9490_v59 = vpop.eup %9489  ;;  %v7215_v48 = vadd.f32 %v7207_v58, %v6993_v35  ;;  %v7208_v62 = vrot.slane %v7129_v52, 2  ;;  %v7242_v7 = vmul.f32 %v9488_v0, %v9486_v19  ;;  %v7200_v43 = vpop.f32.mrf.mxu1  ;;  %v7217_v42 = vadd.f32 %v7209_v34, %v6995_v10  ;;  %v17229_v19 = vld [vmem:[#allocation49_spill] sm:$0xff]  ;;  %v17230_v0 = vld [vmem:[#allocation50_spill] sm:$0xff]  ;;  %v17232_v35 = vld [vmem:[#allocation52_spill] sm:$0xff] }
 0xdad   :  { %v7241_v50 = vmul.f32 %v9490_v59, %v7239_v14  ;;  %v7210_v51 = vrot.slane %v7200_v43, 2  ;;  %v9492_v37 = vpop.eup %9491  ;;  %v17231_v14 = vld [vmem:[#allocation51_spill] sm:$0xff]  ;;  %v17233_v52 = vld [vmem:[#allocation53_spill] sm:$0xff]  ;;  %v17244_v43 = vld [vmem:[#allocation64_spill] sm:$0xff] }
 0xdae   :  { %v9024_v61 = vmul.f32 -1.442695, %v7215_v48  ;;  %v7216_v38 = vadd.f32 %v7208_v62, %v6994_v18  ;;  %v7266_v48 = vrot.slane %v15041_v53, 2  ;;  %v17234_v18 = vld [vmem:[#allocation58_spill] sm:$0xff]  ;;  %v17248_v34 = vld [vmem:[#allocation68_spill] sm:$0xff]  ;;  %v17251_v10 = vld [vmem:[#allocation71_spill] sm:$0xff] }
 0xdaf   :  { %v15205_v49 = vadd.f32 %v7242_v7, %v7241_v50  ;;  %v7218_v9 = vadd.f32 %v7210_v51, %v6996_v17  ;;  %v17245_v51 = vld [vmem:[#allocation65_spill] sm:$0xff]  ;;  %v17246_v17 = vld [vmem:[#allocation66_spill] sm:$0xff] }
 0xdb0   :  { %9493 = vpow2.f32 %v9024_v61  ;;  %v9025_v63 = vmul.f32 -1.442695, %v7216_v38  ;;  %v17235_v61 = vld [vmem:[#allocation54_spill] sm:$0xff]  ;;  %v17240_v38 = vld [vmem:[#allocation60_spill] sm:$0xff] }
 0xdb1   :  { %9495 = vtanh.f32 %v15205_v49  ;;  %v9026_v1 = vmul.f32 -1.442695, %v7218_v9  ;;  %v17247_v9 = vld [vmem:[#allocation67_spill] sm:$0xff] }
 0xdb2   :  { %9497 = vpow2.f32 %v9025_v63  ;;  %v17243_v63 = vld [vmem:[#allocation63_spill] sm:$0xff] }
 0xdb3   :  { %9499 = vpow2.f32 %v9026_v1  ;;  %v17249_v1 = vld [vmem:[#allocation69_spill] sm:$0xff] }
 0xdbd   :  { %v9494_v23 = vpop.eup %9493 }
 0xdbe   :  { %v9496_v11 = vpop.eup %9495  ;;  %v7249_v25 = vadd.f32 1.0, %v9494_v23  ;;  %v17252_v23 = vld [vmem:[#allocation72_spill] sm:$0xff] }
 0xdbf   :  { %v9498_v26 = vpop.eup %9497  ;;  %v7245_v28 = vmul.f32 %v9496_v11, %v9492_v37  ;;  %v17250_v37 = vld [vmem:[#allocation70_spill] sm:$0xff] }
 0xdc0   :  { %9501 = vrcp.f32 %v7249_v25  ;;  %v7255_v15 = vadd.f32 1.0, %v9498_v26  ;;  %v9500_v58 = vpop.eup %9499  ;;  %v17254_v11 = vld [vmem:[#allocation74_spill] sm:$0xff]  ;;  %v17255_v25 = vld [vmem:[#allocation75_spill] sm:$0xff]  ;;  %v17256_v26 = vld [vmem:[#allocation76_spill] sm:$0xff] }
 0xdc1   :  { %9503 = vtanh.f32 %v7217_v42  ;;  %7273 = vst [vmem:[#allocation4 + $0x10] sm:$0x3] %v7245_v28  ;;  %7408 = vmatmul.mubr.f32.vlgmr.msra.gmra.mxu0 %v7245_v28  ;;  %7479 = vmatmul.mubr.f32.vlgmr.msra.gmra.mxu1 %v7245_v28  ;;  %v7262_v62 = vadd.f32 1.0, %v9500_v58  ;;  %v17253_v42 = vld [vmem:[#allocation73_spill] sm:$0xff]  ;;  %v15340_v58 = vld [vmem:[#allocation7 + $0x158] sm:$0xff] }
 0xdc2   :  { %9505 = vrcp.f32 %v7255_v15  ;;  %7573 = vmatpush1.msra.mxu0 %v14944_v13  ;;  %7644 = vmatpush1.msra.mxu1 %v14946_v29  ;;  %v17221_v13 = vld [vmem:[#allocation36_spill] sm:$0xff]  ;;  %v17222_v29 = vld [vmem:[#allocation37_spill] sm:$0xff] }
 0xdc3   :  { %7574 = vmatprep.subr.mxu0 %v14948_v44  ;;  %7645 = vmatprep.subr.mxu1 %v14950_v55  ;;  %v17223_v44 = vld [vmem:[#allocation38_spill] sm:$0xff]  ;;  %v17224_v55 = vld [vmem:[#allocation39_spill] sm:$0xff]  ;;  %9507 = vrcp.f32 %v7262_v62  ;;  %v17257_v28 = vld [vmem:[#allocation77_spill] sm:$0xff] }
 0xdc4   :  { %7575 = vmatpush1.msra.mxu0 %v17214_v40  ;;  %7646 = vmatpush1.msra.mxu1 %v17215_v30  ;;  %v15296_v30 = vld [vmem:[#allocation7 + $0x1c0] sm:$0xff] }
 0xdc5   :  { %7576 = vmatprep.subr.mxu0 %v17216_v2  ;;  %7647 = vmatprep.subr.mxu1 %v17217_v12  ;;  %v15298_v2 = vld [vmem:[#allocation7 + $0x1d0] sm:$0xff]  ;;  %v15302_v12 = vld [vmem:[#allocation7 + $0x1a8] sm:$0xff]  ;;  %v15368_v62 = vld [vmem:[#allocation7 + $0x100] sm:$0xff] }
 0xdc6   :  { %7577 = vmatpush1.msra.mxu0 %v17218_v56  ;;  %7648 = vmatpush1.msra.mxu1 %v17219_v20  ;;  %v15304_v56 = vld [vmem:[#allocation7 + $0x1b8] sm:$0xff]  ;;  %v15308_v20 = vld [vmem:[#allocation7 + $0x1a0] sm:$0xff] }
 0xdc7   :  { %7578 = vmatprep.subr.mxu0 %v17220_v54  ;;  %7649 = vmatprep.subr.mxu1 %v17221_v13  ;;  %v15310_v54 = vld [vmem:[#allocation7 + $0x1b0] sm:$0xff]  ;;  %v15314_v13 = vld [vmem:[#allocation7 + $0x188] sm:$0xff] }
 0xdc8   :  { %7579 = vmatpush1.msra.mxu0 %v17222_v29  ;;  %7650 = vmatpush1.msra.mxu1 %v17223_v44  ;;  %v15316_v29 = vld [vmem:[#allocation7 + $0x198] sm:$0xff]  ;;  %v15320_v44 = vld [vmem:[#allocation7 + $0x180] sm:$0xff] }
 0xdc9   :  { %7580 = vmatprep.subr.mxu0 %v17224_v55  ;;  %7651 = vmatprep.subr.mxu1 %v17225_v21  ;;  %v15322_v55 = vld [vmem:[#allocation7 + $0x190] sm:$0xff]  ;;  %v15326_v21 = vld [vmem:[#allocation7 + $0x168] sm:$0xff] }
 0xdca   :  { %7581 = vmatpush1.msra.mxu0 %v17226_v16  ;;  %7652 = vmatpush1.msra.mxu1 %v17227_v27  ;;  %v15328_v16 = vld [vmem:[#allocation7 + $0x178] sm:$0xff]  ;;  %v15332_v27 = vld [vmem:[#allocation7 + $0x160] sm:$0xff] }
 0xdcb   :  { %7582 = vmatprep.subr.mxu0 %v17228_v4  ;;  %7653 = vmatprep.subr.mxu1 %v17229_v19  ;;  %v15334_v4 = vld [vmem:[#allocation7 + $0x170] sm:$0xff]  ;;  %v15338_v19 = vld [vmem:[#allocation7 + $0x148] sm:$0xff] }
 0xdcc   :  { %7583 = vmatpush1.msra.mxu0 %v17230_v0  ;;  %7654 = vmatpush1.msra.mxu1 %v17231_v14  ;;  %v15344_v0 = vld [vmem:[#allocation7 + $0x140] sm:$0xff]  ;;  %v15346_v14 = vld [vmem:[#allocation7 + $0x150] sm:$0xff] }
 0xdcd   :  { %v9502_v5 = vpop.eup %9501  ;;  %7584 = vmatprep.subr.mxu0 %v17232_v35  ;;  %7655 = vmatprep.subr.mxu1 %v17233_v52  ;;  %v15352_v35 = vld [vmem:[#allocation7 + $0x138] sm:$0xff]  ;;  %v15356_v52 = vld [vmem:[#allocation7 + $0x120] sm:$0xff] }
 0xdce   :  { %v9504_v59 = vpop.eup %9503  ;;  %7585 = vmatpush1.msra.mxu0 %v15012_v3  ;;  %7656 = vmatpush1.msra.mxu1 %v15014_v47  ;;  %v17236_v3 = vld [vmem:[#allocation55_spill] sm:$0xff]  ;;  %v17237_v47 = vld [vmem:[#allocation56_spill] sm:$0xff] }
 0xdcf   :  { %v9506_v46 = vpop.eup %9505  ;;  %7586 = vmatprep.subr.mxu0 %v15019_v31  ;;  %7657 = vmatprep.subr.mxu1 %v15021_v36  ;;  %v7269_v7 = vmul.f32 %v9504_v59, %v9502_v5  ;;  %v17238_v31 = vld [vmem:[#allocation57_spill] sm:$0xff]  ;;  %v17239_v36 = vld [vmem:[#allocation59_spill] sm:$0xff]  ;;  %v15350_v5 = vld [vmem:[#allocation7 + $0x128] sm:$0xff] }
 0xdd0   :  { %v7268_v50 = vmul.f32 %v9506_v46, %v7266_v48  ;;  %7587 = vmatpush1.msra.mxu0 %v15025_v8  ;;  %7658 = vmatpush1.msra.mxu1 %v15027_v60  ;;  %v17241_v8 = vld [vmem:[#allocation61_spill] sm:$0xff]  ;;  %v17242_v60 = vld [vmem:[#allocation62_spill] sm:$0xff]  ;;  %v9508_v15 = vpop.eup %9507  ;;  %v15362_v48 = vld [vmem:[#allocation7 + $0x108] sm:$0xff] }
 0xdd1   :  { %7588 = vmatprep.subr.mxu0 %v17234_v18  ;;  %7659 = vmatprep.subr.mxu1 %v17235_v61  ;;  %v15358_v59 = vld [vmem:[#allocation7 + $0x130] sm:$0xff]  ;;  %v15364_v46 = vld [vmem:[#allocation7 + $0x118] sm:$0xff]  ;;  %v15380_v61 = vld [vmem:[#allocation7 + $0xe0] sm:$0xff] }
 0xdd2   :  { %v15241_v53 = vadd.f32 %v7269_v7, %v7268_v50  ;;  %7589 = vmatpush1.msra.mxu0 %v17236_v3  ;;  %7660 = vmatpush1.msra.mxu1 %v17237_v47  ;;  %v15370_v7 = vld [vmem:[#allocation7 + $0x110] sm:$0xff]  ;;  %v15374_v50 = vld [vmem:[#allocation7 + $0xe8] sm:$0xff]  ;;  %v15376_v18 = vld [vmem:[#allocation7 + $0xf8] sm:$0xff] }
 0xdd3   :  { %7590 = vmatprep.subr.mxu0 %v17238_v31  ;;  %7661 = vmatprep.subr.mxu1 %v17239_v36  ;;  %v15382_v3 = vld [vmem:[#allocation7 + $0xf0] sm:$0xff]  ;;  %v15386_v47 = vld [vmem:[#allocation7 + $0xc8] sm:$0xff]  ;;  %v15388_v31 = vld [vmem:[#allocation7 + $0xd8] sm:$0xff] }
 0xdd4   :  { %7591 = vmatpush1.msra.mxu0 %v17240_v38  ;;  %7662 = vmatpush1.msra.mxu1 %v17241_v8  ;;  %9509 = vtanh.f32 %v15241_v53  ;;  %v15392_v36 = vld [vmem:[#allocation7 + $0xc0] sm:$0xff]  ;;  %v15394_v38 = vld [vmem:[#allocation7 + $0xd0] sm:$0xff]  ;;  %v15398_v8 = vld [vmem:[#allocation7 + $0xa8] sm:$0xff] }
 0xdd5   :  { %7592 = vmatprep.subr.mxu0 %v17242_v60  ;;  %7663 = vmatprep.subr.mxu1 %v17243_v63  ;;  %17258 = vst [vmem:[#allocation78_spill] sm:$0xff] %v15398_v8  ;;  %v15400_v60 = vld [vmem:[#allocation7 + $0xb8] sm:$0xff]  ;;  %v15404_v63 = vld [vmem:[#allocation7 + $0xa0] sm:$0xff] }
 0xdd6   :  { %7593 = vmatpush1.msra.mxu0 %v17244_v43  ;;  %7664 = vmatpush1.msra.mxu1 %v17245_v51  ;;  %17259 = vst [vmem:[#allocation79_spill] sm:$0xff] %v15400_v60  ;;  %17260 = vst [vmem:[#allocation80_spill] sm:$0xff] %v15404_v63  ;;  %v15406_v43 = vld [vmem:[#allocation7 + $0xb0] sm:$0xff]  ;;  %v15410_v51 = vld [vmem:[#allocation7 + $0x88] sm:$0xff] }
 0xdd7   :  { %7594 = vmatprep.subr.mxu0 %v17246_v17  ;;  %7665 = vmatprep.subr.mxu1 %v17247_v9  ;;  %17261 = vst [vmem:[#allocation81_spill] sm:$0xff] %v15406_v43  ;;  %17262 = vst [vmem:[#allocation82_spill] sm:$0xff] %v15410_v51  ;;  %v15412_v17 = vld [vmem:[#allocation7 + $0x98] sm:$0xff]  ;;  %v15416_v9 = vld [vmem:[#allocation7 + $0x80] sm:$0xff] }
 0xdd8   :  { %7595 = vmatpush1.msra.mxu0 %v17248_v34  ;;  %7666 = vmatpush1.msra.mxu1 %v17249_v1  ;;  %17263 = vst [vmem:[#allocation83_spill] sm:$0xff] %v15412_v17  ;;  %17264 = vst [vmem:[#allocation84_spill] sm:$0xff] %v15416_v9  ;;  %v15418_v34 = vld [vmem:[#allocation7 + $0x90] sm:$0xff]  ;;  %v15422_v1 = vld [vmem:[#allocation7 + $0x68] sm:$0xff] }
 0xdd9   :  { %7596 = vmatprep.subr.mxu0 %v17250_v37  ;;  %7667 = vmatprep.subr.mxu1 %v17251_v10  ;;  %17265 = vst [vmem:[#allocation85_spill] sm:$0xff] %v15418_v34  ;;  %17266 = vst [vmem:[#allocation15_spill] sm:$0xff] %v15422_v1  ;;  %v15424_v37 = vld [vmem:[#allocation7 + $0x78] sm:$0xff]  ;;  %v15428_v10 = vld [vmem:[#allocation7 + $0x60] sm:$0xff] }
 0xdda   :  { %7597 = vmatpush1.msra.mxu0 %v17252_v23  ;;  %7668 = vmatpush1.msra.mxu1 %v17253_v42  ;;  %17267 = vst [vmem:[#allocation16_spill] sm:$0xff] %v15424_v37  ;;  %17268 = vst [vmem:[#allocation17_spill] sm:$0xff] %v15428_v10  ;;  %v15430_v23 = vld [vmem:[#allocation7 + $0x70] sm:$0xff]  ;;  %v15434_v42 = vld [vmem:[#allocation7 + $0x48] sm:$0xff] }
 0xddb   :  { %7598 = vmatprep.subr.mxu0 %v17254_v11  ;;  %7669 = vmatprep.subr.mxu1 %v17255_v25  ;;  %17269 = vst [vmem:[#allocation18_spill] sm:$0xff] %v15430_v23  ;;  %17270 = vst [vmem:[#allocation19_spill] sm:$0xff] %v15434_v42  ;;  %v15436_v11 = vld [vmem:[#allocation7 + $0x58] sm:$0xff]  ;;  %v15440_v25 = vld [vmem:[#allocation7 + $0x40] sm:$0xff] }
 0xddc   :  { %7599 = vmatpush1.msra.mxu0 %v17256_v26  ;;  %7670 = vmatpush1.msra.mxu1 %v15102_v39  ;;  %17271 = vst [vmem:[#allocation20_spill] sm:$0xff] %v15436_v11  ;;  %17272 = vst [vmem:[#allocation21_spill] sm:$0xff] %v15440_v25  ;;  %v15442_v26 = vld [vmem:[#allocation7 + $0x50] sm:$0xff] }
 0xddd   :  { %7600 = vmatprep.subr.mxu0 %v17257_v28  ;;  %7671 = vmatprep.subr.mxu1 %v15108_v24  ;;  %17273 = vst [vmem:[#allocation22_spill] sm:$0xff] %v15442_v26  ;;  %v15446_v28 = vld [vmem:[#allocation7 + $0x28] sm:$0xff] }
 0xdde   :  { %7601 = vmatpush1.msra.mxu0 %v15112_v32  ;;  %7672 = vmatpush1.msra.mxu1 %v15114_v6  ;;  %v15278_v32 = vld [vmem:[#allocation7 + $0x1e8] sm:$0xff]  ;;  %v15280_v6 = vld [vmem:[#allocation7 + $0x1f8] sm:$0xff]  ;;  %17274 = vst [vmem:[#allocation23_spill] sm:$0xff] %v15446_v28 }
 0xddf   :  { %7602 = vmatprep.subr.mxu0 %v15118_v22  ;;  %7673 = vmatprep.subr.mxu1 %v15120_v45  ;;  %v15284_v22 = vld [vmem:[#allocation7 + $0x1e0] sm:$0xff]  ;;  %v15286_v45 = vld [vmem:[#allocation7 + $0x1f0] sm:$0xff] }
 0xde0   :  { %7603 = vmatpush1.msra.mxu0 %v15124_v41  ;;  %7636 = vmatprep.mubr.f32.mxu0 %v16384_v33  ;;  %v15290_v41 = vld [vmem:[#allocation7 + $0x1c8] sm:$0xff] }
 0xde1   :  { %v9510_v40 = vpop.eup %9509  ;;  %7674 = vmatpush1.msra.mxu1 %v15128_v57  ;;  %7707 = vmatprep.mubr.f32.mxu1 %v16384_v33  ;;  %v15292_v57 = vld [vmem:[#allocation7 + $0x1d8] sm:$0xff] }
 0xde2   :  { %v7272_v39 = vmul.f32 %v9510_v40, %v9508_v15  ;;  %7857 = vmatprep.subr.mxu0 %v15278_v32  ;;  %7928 = vmatprep.subr.mxu1 %v15280_v6  ;;  %v15448_v15 = vld [vmem:[#allocation7 + $0x38] sm:$0xff]  ;;  %v15452_v40 = vld [vmem:[#allocation7 + $0x20] sm:$0xff] }
 0xde3   :  { %17275 = vst [vmem:[#allocation24_spill] sm:$0xff] %v15448_v15  ;;  %17276 = vst [vmem:[#allocation25_spill] sm:$0xff] %v15452_v40 }
 0xde4   :  { %7274 = vst [vmem:[#allocation4 + $0x8] sm:$0xc0] %v7272_v39  ;;  %v7570_v24 = vrot.slane %v7272_v39, 6  ;;  %v15454_v39 = vld [vmem:[#allocation7 + $0x30] sm:$0xff] }
 0xde5   :  { %17277 = vst [vmem:[#allocation26_spill] sm:$0xff] %v15454_v39 }
 0xde6   :  { %7637 = vmatmul.mubr.f32.vlgmr.msra.gmra.mxu0 %v7570_v24  ;;  %7708 = vmatmul.mubr.f32.vlgmr.msra.gmra.mxu1 %v7570_v24  ;;  %v15458_v24 = vld [vmem:[#allocation7 + $0x8] sm:$0xff] }
 0xde7   :  { %7921 = vmatprep.mubr.f32.mxu0 %v16384_v33  ;;  %7992 = vmatprep.mubr.f32.mxu1 %v16384_v33  ;;  %17278 = vst [vmem:[#allocation27_spill] sm:$0xff] %v15458_v24 }
 0xde8   :  { %7858 = vmatpush1.msra.mxu0 %v15284_v22  ;;  %7929 = vmatpush1.msra.mxu1 %v15286_v45 }
 0xde9   :  { %7859 = vmatprep.subr.mxu0 %v15290_v41  ;;  %7930 = vmatprep.subr.mxu1 %v15292_v57 }
 0xdea   :  { %7860 = vmatpush1.msra.mxu0 %v15296_v30  ;;  %7931 = vmatpush1.msra.mxu1 %v15298_v2 }
 0xdeb   :  { %7861 = vmatprep.subr.mxu0 %v15302_v12  ;;  %7932 = vmatprep.subr.mxu1 %v15304_v56 }
 0xdec   :  { %7862 = vmatpush1.msra.mxu0 %v15308_v20  ;;  %7933 = vmatpush1.msra.mxu1 %v15310_v54 }
 0xded   :  { %7863 = vmatprep.subr.mxu0 %v15314_v13  ;;  %7934 = vmatprep.subr.mxu1 %v15316_v29 }
 0xdee   :  { %7864 = vmatpush1.msra.mxu0 %v15320_v44  ;;  %7935 = vmatpush1.msra.mxu1 %v15322_v55 }
 0xdef   :  { %7865 = vmatprep.subr.mxu0 %v15326_v21  ;;  %7936 = vmatprep.subr.mxu1 %v15328_v16 }
 0xdf0   :  { %7866 = vmatpush1.msra.mxu0 %v15332_v27  ;;  %7937 = vmatpush1.msra.mxu1 %v15334_v4 }
 0xdf1   :  { %7867 = vmatprep.subr.mxu0 %v15338_v19  ;;  %7938 = vmatprep.subr.mxu1 %v15340_v58 }
 0xdf2   :  { %7868 = vmatpush1.msra.mxu0 %v15344_v0  ;;  %7939 = vmatpush1.msra.mxu1 %v15346_v14 }
 0xdf3   :  { %7869 = vmatprep.subr.mxu0 %v15350_v5  ;;  %7940 = vmatprep.subr.mxu1 %v15352_v35 }
 0xdf4   :  { %7870 = vmatpush1.msra.mxu0 %v15356_v52  ;;  %7941 = vmatpush1.msra.mxu1 %v15358_v59 }
 0xdf5   :  { %7871 = vmatprep.subr.mxu0 %v15362_v48  ;;  %7942 = vmatprep.subr.mxu1 %v15364_v46 }
 0xdf6   :  { %7872 = vmatpush1.msra.mxu0 %v15368_v62  ;;  %7943 = vmatpush1.msra.mxu1 %v15370_v7 }
 0xdf7   :  { %7873 = vmatprep.subr.mxu0 %v15374_v50  ;;  %7944 = vmatprep.subr.mxu1 %v15376_v18 }
 0xdf8   :  { %7874 = vmatpush1.msra.mxu0 %v15380_v61  ;;  %7945 = vmatpush1.msra.mxu1 %v15382_v3 }
 0xdf9   :  { %7875 = vmatprep.subr.mxu0 %v15386_v47  ;;  %7946 = vmatprep.subr.mxu1 %v15388_v31 }
 0xdfa   :  { %7876 = vmatpush1.msra.mxu0 %v15392_v36  ;;  %7947 = vmatpush1.msra.mxu1 %v15394_v38 }
 0xdfb   :  { %7877 = vmatprep.subr.mxu0 %v15398_v8  ;;  %7948 = vmatprep.subr.mxu1 %v15400_v60 }
 0xdfc   :  { %7878 = vmatpush1.msra.mxu0 %v15404_v63  ;;  %7949 = vmatpush1.msra.mxu1 %v15406_v43 }
 0xdfd   :  { %7879 = vmatprep.subr.mxu0 %v15410_v51  ;;  %7950 = vmatprep.subr.mxu1 %v15412_v17  ;;  %v7278_v17 = vld [vmem:[#allocation3 + $0x28] sm:$0xc] }
 0xdfe   :  { %7880 = vmatpush1.msra.mxu0 %v15416_v9  ;;  %7951 = vmatpush1.msra.mxu1 %v15418_v34 }
 0xdff   :  { %7881 = vmatprep.subr.mxu0 %v15422_v1  ;;  %7952 = vmatprep.subr.mxu1 %v15424_v37  ;;  %v7276_v37 = vld [vmem:[#allocation3 + $0x30] sm:$0xc] }
 0xe00   :  { %7882 = vmatpush1.msra.mxu0 %v15428_v10  ;;  %7953 = vmatpush1.msra.mxu1 %v15430_v23 }
 0xe01   :  { %7883 = vmatprep.subr.mxu0 %v15434_v42  ;;  %7954 = vmatprep.subr.mxu1 %v15436_v11  ;;  %v7275_v11 = vld [vmem:[#allocation3 + $0x40] sm:$0xc] }
 0xe02   :  { %7884 = vmatpush1.msra.mxu0 %v15440_v25  ;;  %7955 = vmatpush1.msra.mxu1 %v15442_v26  ;;  %v15460_v25 = vld [vmem:[#allocation7 + $0x18] sm:$0xff]  ;;  %v15464_v26 = vld [vmem:[#allocation7] sm:$0xff] }
 0xe03   :  { %7885 = vmatprep.subr.mxu0 %v15446_v28  ;;  %7956 = vmatprep.subr.mxu1 %v15448_v15  ;;  %17279 = vst [vmem:[#allocation28_spill] sm:$0xff] %v15460_v25  ;;  %17280 = vst [vmem:[#allocation29_spill] sm:$0xff] %v15464_v26  ;;  %v15466_v28 = vld [vmem:[#allocation7 + $0x10] sm:$0xff]  ;;  %v15470_v15 = vld [vmem:[#allocation9 + $0x1e8] sm:$0xff] }
 0xe04   :  { %7886 = vmatpush1.msra.mxu0 %v15452_v40  ;;  %7957 = vmatpush1.msra.mxu1 %v15454_v39  ;;  %17281 = vst [vmem:[#allocation30_spill] sm:$0xff] %v15466_v28  ;;  %17282 = vst [vmem:[#allocation31_spill] sm:$0xff] %v15470_v15  ;;  %v15472_v40 = vld [vmem:[#allocation9 + $0x1f8] sm:$0xff] }
 0xe05   :  { %7887 = vmatprep.subr.mxu0 %v15458_v24  ;;  %7958 = vmatprep.subr.mxu1 %v15460_v25  ;;  %17283 = vst [vmem:[#allocation42_spill] sm:$0xff] %v15472_v40 }
 0xe06   :  { %7888 = vmatpush1.msra.mxu0 %v15464_v26  ;;  %7959 = vmatpush1.msra.mxu1 %v15466_v28 }
 0xe07   :  { %8086 = vmatprep.subr.mxu0 %v15470_v15  ;;  %8157 = vmatprep.subr.mxu1 %v15472_v40  ;;  %v7277_v40 = vld [vmem:[#allocation3 + $0x68] sm:$0xc] }
 0xe81   :  { %v7409_v39 = vpop.f32.mrf.mxu0  ;;  %v7480_v23 = vpop.f32.mrf.mxu1 }
 0xe82   :  { %v7489_v24 = vrot.slane %v7409_v39, 6  ;;  %v7491_v15 = vrot.slane %v7480_v23, 6 }
 0xe83   :  { %v7411_v25 = vpop.f32.mrf.mxu0  ;;  %v7482_v34 = vpop.f32.mrf.mxu1 }
 0xe84   :  { %v7497_v42 = vadd.f32 %v7489_v24, %v7275_v11  ;;  %v7490_v10 = vrot.slane %v7411_v25, 6  ;;  %v7492_v9 = vrot.slane %v7482_v34, 6  ;;  %v7499_v39 = vadd.f32 %v7491_v15, %v7277_v40 }
 0xe86   :  { %v9027_v1 = vmul.f32 -1.442695, %v7497_v42  ;;  %v7498_v26 = vadd.f32 %v7490_v10, %v7276_v37  ;;  %v7500_v51 = vadd.f32 %v7492_v9, %v7278_v17  ;;  %v7750_v42 = vrot.slane %v15205_v49, 6 }
 0xe88   :  { %9511 = vpow2.f32 %v9027_v1  ;;  %v9028_v28 = vmul.f32 -1.442695, %v7498_v26  ;;  %v9029_v43 = vmul.f32 -1.442695, %v7500_v51  ;;  %v7501_v26 = vld [vmem:[#allocation3 + $0x20] sm:$0x30] }
 0xe8a   :  { %9513 = vpow2.f32 %v9028_v28 }
 0xe8b   :  { %9515 = vpow2.f32 %v9029_v43 }
 0xe95   :  { %v9512_v63 = vpop.eup %9511 }
 0xe96   :  { %v7733_v60 = vadd.f32 1.0, %v9512_v63 }
 0xe97   :  { %v9514_v8 = vpop.eup %9513 }
 0xe98   :  { %9517 = vrcp.f32 %v7733_v60  ;;  %v7739_v11 = vadd.f32 1.0, %v9514_v8  ;;  %v9516_v37 = vpop.eup %9515  ;;  %v7502_v8 = vld [vmem:[#allocation3 + $0x8] sm:$0x30] }
 0xe99   :  { %9519 = vtanh.f32 %v7499_v39  ;;  %v7746_v17 = vadd.f32 1.0, %v9516_v37  ;;  %v7504_v37 = vld [vmem:[#allocation3 + $0x10] sm:$0x30] }
 0xe9a   :  { %9521 = vrcp.f32 %v7739_v11 }
 0xe9b   :  { %9523 = vrcp.f32 %v7746_v17 }
 0xea5   :  { %v9518_v1 = vpop.eup %9517 }
 0xea6   :  { %v9520_v10 = vpop.eup %9519  ;;  %v7638_v34 = vpop.f32.mrf.mxu0 }
 0xea7   :  { %v9522_v25 = vpop.eup %9521  ;;  %v7718_v9 = vrot.slane %v7638_v34, 4  ;;  %v7753_v51 = vmul.f32 %v9520_v10, %v9518_v1  ;;  %v7709_v15 = vpop.f32.mrf.mxu1 }
 0xea8   :  { %v7752_v23 = vmul.f32 %v9522_v25, %v7750_v42  ;;  %v7640_v28 = vpop.f32.mrf.mxu0  ;;  %v7720_v10 = vrot.slane %v7709_v15, 4  ;;  %v9524_v42 = vpop.eup %9523  ;;  %v15486_v15 = vld [vmem:[#allocation9 + $0x1d8] sm:$0xff] }
 0xea9   :  { %v7726_v63 = vadd.f32 %v7718_v9, %v7501_v26  ;;  %v7719_v43 = vrot.slane %v7640_v28, 4  ;;  %v7711_v39 = vpop.f32.mrf.mxu1  ;;  %v7503_v9 = vld [vmem:[#allocation3 + $0x70] sm:$0x30] }
 0xeaa   :  { %v15477_v60 = vadd.f32 %v7753_v51, %v7752_v23  ;;  %v7721_v11 = vrot.slane %v7711_v39, 4  ;;  %v7728_v23 = vadd.f32 %v7720_v10, %v7503_v9  ;;  %v15490_v39 = vld [vmem:[#allocation9 + $0x1d0] sm:$0xff] }
 0xeab   :  { %v9030_v40 = vmul.f32 -1.442695, %v7726_v63  ;;  %v7727_v24 = vadd.f32 %v7719_v43, %v7502_v8  ;;  %v15480_v43 = vld [vmem:[#allocation9 + $0x1e0] sm:$0xff]  ;;  %v15482_v8 = vld [vmem:[#allocation9 + $0x1f0] sm:$0xff]  ;;  %17285 = vst [vmem:[#allocation43_spill] sm:$0xff] %v15490_v39 }
 0xeac   :  { %9525 = vtanh.f32 %v15477_v60  ;;  %v7729_v1 = vadd.f32 %v7721_v11, %v7504_v37  ;;  %v15494_v11 = vld [vmem:[#allocation9 + $0x1a8] sm:$0xff]  ;;  %v15496_v37 = vld [vmem:[#allocation9 + $0x1b8] sm:$0xff]  ;;  %v15502_v10 = vld [vmem:[#allocation9 + $0x1b0] sm:$0xff] }
 0xead   :  { %9527 = vpow2.f32 %v9030_v40  ;;  %v9031_v49 = vmul.f32 -1.442695, %v7727_v24  ;;  %v15484_v24 = vld [vmem:[#allocation9 + $0x1c8] sm:$0xff]  ;;  %17286 = vst [vmem:[#allocation33_spill] sm:$0xff] %v15494_v11  ;;  %17287 = vst [vmem:[#allocation44_spill] sm:$0xff] %v15496_v37  ;;  %v15514_v9 = vld [vmem:[#allocation9 + $0x190] sm:$0xff] }
 0xeae   :  { %v9032_v34 = vmul.f32 -1.442695, %v7729_v1  ;;  %v15500_v1 = vld [vmem:[#allocation9 + $0x1a0] sm:$0xff]  ;;  %17289 = vst [vmem:[#allocation45_spill] sm:$0xff] %v15502_v10  ;;  %17293 = vst [vmem:[#allocation37_spill] sm:$0xff] %v15514_v9 }
 0xeaf   :  { %9529 = vpow2.f32 %v9031_v49  ;;  %v15488_v49 = vld [vmem:[#allocation9 + $0x1c0] sm:$0xff]  ;;  %17288 = vst [vmem:[#allocation34_spill] sm:$0xff] %v15500_v1 }
 0xeb0   :  { %9531 = vpow2.f32 %v9032_v34  ;;  %17284 = vst [vmem:[#allocation32_spill] sm:$0xff] %v15488_v49  ;;  %v15508_v34 = vld [vmem:[#allocation9 + $0x198] sm:$0xff] }
 0xeb1   :  { %17291 = vst [vmem:[#allocation46_spill] sm:$0xff] %v15508_v34 }
 0xeb9   :  { %v9526_v25 = vpop.eup %9525 }
 0xeba   :  { %v9528_v51 = vpop.eup %9527  ;;  %v7756_v26 = vmul.f32 %v9526_v25, %v9524_v42  ;;  %v15506_v42 = vld [vmem:[#allocation9 + $0x188] sm:$0xff]  ;;  %v15512_v25 = vld [vmem:[#allocation9 + $0x180] sm:$0xff] }
 0xebb   :  { %v7760_v17 = vadd.f32 1.0, %v9528_v51  ;;  %17290 = vst [vmem:[#allocation35_spill] sm:$0xff] %v15506_v42  ;;  %17292 = vst [vmem:[#allocation36_spill] sm:$0xff] %v15512_v25  ;;  %v15518_v51 = vld [vmem:[#allocation9 + $0x168] sm:$0xff] }
 0xebc   :  { %v9530_v28 = vpop.eup %9529  ;;  %7784 = vst [vmem:[#allocation4 + $0x10] sm:$0xc] %v7756_v26  ;;  %v7855_v63 = vrot.slane %v7756_v26, 2  ;;  %17294 = vst [vmem:[#allocation38_spill] sm:$0xff] %v15518_v51  ;;  %v15524_v26 = vld [vmem:[#allocation9 + $0x160] sm:$0xff] }
 0xebd   :  { %9533 = vrcp.f32 %v7760_v17  ;;  %v7766_v40 = vadd.f32 1.0, %v9530_v28  ;;  %17296 = vst [vmem:[#allocation40_spill] sm:$0xff] %v15524_v26  ;;  %v15526_v17 = vld [vmem:[#allocation9 + $0x170] sm:$0xff]  ;;  %v15530_v28 = vld [vmem:[#allocation9 + $0x148] sm:$0xff] }
 0xebe   :  { %9535 = vtanh.f32 %v7728_v23  ;;  %7922 = vmatmul.mubr.f32.vlgmr.msra.gmra.mxu0 %v7855_v63  ;;  %7993 = vmatmul.mubr.f32.vlgmr.msra.gmra.mxu1 %v7855_v63  ;;  %v15520_v23 = vld [vmem:[#allocation9 + $0x178] sm:$0xff]  ;;  %17297 = vst [vmem:[#allocation41_spill] sm:$0xff] %v15526_v17  ;;  %17298 = vst [vmem:[#allocation47_spill] sm:$0xff] %v15530_v28 }
 0xebf   :  { %9537 = vrcp.f32 %v7766_v40  ;;  %8087 = vmatpush1.msra.mxu0 %v15480_v43  ;;  %8158 = vmatpush1.msra.mxu1 %v15482_v8  ;;  %17295 = vst [vmem:[#allocation39_spill] sm:$0xff] %v15520_v23  ;;  %v15532_v63 = vld [vmem:[#allocation9 + $0x158] sm:$0xff]  ;;  %v15536_v40 = vld [vmem:[#allocation9 + $0x140] sm:$0xff] }
 0xec0   :  { %8088 = vmatprep.subr.mxu0 %v15484_v24  ;;  %8159 = vmatprep.subr.mxu1 %v15486_v15  ;;  %17299 = vst [vmem:[#allocation48_spill] sm:$0xff] %v15532_v63  ;;  %17300 = vst [vmem:[#allocation49_spill] sm:$0xff] %v15536_v40 }
 0xec1   :  { %8089 = vmatpush1.msra.mxu0 %v15488_v49  ;;  %8160 = vmatpush1.msra.mxu1 %v15490_v39 }
 0xec2   :  { %8090 = vmatprep.subr.mxu0 %v15494_v11  ;;  %8161 = vmatprep.subr.mxu1 %v15496_v37  ;;  %v7777_v37 = vrot.slane %v15241_v53, 2 }
 0xec3   :  { %8091 = vmatpush1.msra.mxu0 %v15500_v1  ;;  %8162 = vmatpush1.msra.mxu1 %v15502_v10 }
 0xec4   :  { %8092 = vmatprep.subr.mxu0 %v15506_v42  ;;  %8163 = vmatprep.subr.mxu1 %v15508_v34  ;;  %v15538_v42 = vld [vmem:[#allocation9 + $0x150] sm:$0xff]  ;;  %v15542_v34 = vld [vmem:[#allocation9 + $0x128] sm:$0xff] }
 0xec5   :  { %8093 = vmatpush1.msra.mxu0 %v15512_v25  ;;  %8164 = vmatpush1.msra.mxu1 %v15514_v9  ;;  %17301 = vst [vmem:[#allocation50_spill] sm:$0xff] %v15538_v42  ;;  %17302 = vst [vmem:[#allocation51_spill] sm:$0xff] %v15542_v34  ;;  %v15544_v25 = vld [vmem:[#allocation9 + $0x138] sm:$0xff]  ;;  %v15548_v9 = vld [vmem:[#allocation9 + $0x120] sm:$0xff] }
 0xec6   :  { %8094 = vmatprep.subr.mxu0 %v15518_v51  ;;  %8165 = vmatprep.subr.mxu1 %v15520_v23  ;;  %17303 = vst [vmem:[#allocation52_spill] sm:$0xff] %v15544_v25  ;;  %17304 = vst [vmem:[#allocation53_spill] sm:$0xff] %v15548_v9  ;;  %v15550_v51 = vld [vmem:[#allocation9 + $0x130] sm:$0xff]  ;;  %v9532_v23 = vpop.eup %9531 }
 0xec7   :  { %8095 = vmatpush1.msra.mxu0 %v15524_v26  ;;  %8166 = vmatpush1.msra.mxu1 %v15526_v17  ;;  %17305 = vst [vmem:[#allocation58_spill] sm:$0xff] %v15550_v51  ;;  %v15554_v26 = vld [vmem:[#allocation9 + $0x108] sm:$0xff]  ;;  %v15556_v17 = vld [vmem:[#allocation9 + $0x118] sm:$0xff]  ;;  %v7773_v39 = vadd.f32 1.0, %v9532_v23  ;;  %v15585_v23 = vld [vmem:[#allocation9 + $0xc0] sm:$0xff] }
 0xec8   :  { %8096 = vmatprep.subr.mxu0 %v15530_v28  ;;  %8167 = vmatprep.subr.mxu1 %v15532_v63  ;;  %17306 = vst [vmem:[#allocation54_spill] sm:$0xff] %v15554_v26  ;;  %17307 = vst [vmem:[#allocation55_spill] sm:$0xff] %v15556_v17  ;;  %v15560_v28 = vld [vmem:[#allocation9 + $0x100] sm:$0xff]  ;;  %v15562_v63 = vld [vmem:[#allocation9 + $0x110] sm:$0xff] }
 0xec9   :  { %8097 = vmatpush1.msra.mxu0 %v15536_v40  ;;  %8168 = vmatpush1.msra.mxu1 %v15538_v42  ;;  %v15567_v42 = vld [vmem:[#allocation9 + $0xe8] sm:$0xff]  ;;  %v15569_v40 = vld [vmem:[#allocation9 + $0xf8] sm:$0xff]  ;;  %17310 = vst [vmem:[#allocation59_spill] sm:$0xff] %v15585_v23  ;;  %9539 = vrcp.f32 %v7773_v39  ;;  %v15612_v39 = vld [vmem:[#allocation9 + $0x80] sm:$0xff] }
 0xeca   :  { %v9534_v10 = vpop.eup %9533  ;;  %8098 = vmatprep.subr.mxu0 %v15542_v34  ;;  %8169 = vmatprep.subr.mxu1 %v15544_v25  ;;  %v15573_v25 = vld [vmem:[#allocation9 + $0xe0] sm:$0xff]  ;;  %v15575_v34 = vld [vmem:[#allocation9 + $0xf0] sm:$0xff]  ;;  %17318 = vst [vmem:[#allocation67_spill] sm:$0xff] %v15612_v39 }
 0xecb   :  { %v9536_v1 = vpop.eup %9535  ;;  %8099 = vmatpush1.msra.mxu0 %v15548_v9  ;;  %8170 = vmatpush1.msra.mxu1 %v15550_v51  ;;  %v15579_v51 = vld [vmem:[#allocation9 + $0xc8] sm:$0xff]  ;;  %v15581_v9 = vld [vmem:[#allocation9 + $0xd8] sm:$0xff] }
 0xecc   :  { %v9538_v11 = vpop.eup %9537  ;;  %8100 = vmatprep.subr.mxu0 %v15554_v26  ;;  %8171 = vmatprep.subr.mxu1 %v15556_v17  ;;  %v7780_v49 = vmul.f32 %v9536_v1, %v9534_v10  ;;  %17308 = vst [vmem:[#allocation56_spill] sm:$0xff] %v15579_v51  ;;  %17309 = vst [vmem:[#allocation57_spill] sm:$0xff] %v15581_v9  ;;  %v15587_v17 = vld [vmem:[#allocation9 + $0xd0] sm:$0xff]  ;;  %v15599_v1 = vld [vmem:[#allocation9 + $0xa0] sm:$0xff] }
 0xecd   :  { %v7779_v53 = vmul.f32 %v9538_v11, %v7777_v37  ;;  %8101 = vmatpush1.msra.mxu0 %v15560_v28  ;;  %8172 = vmatpush1.msra.mxu1 %v15562_v63  ;;  %17311 = vst [vmem:[#allocation60_spill] sm:$0xff] %v15587_v17  ;;  %v15593_v11 = vld [vmem:[#allocation9 + $0xa8] sm:$0xff]  ;;  %v15595_v37 = vld [vmem:[#allocation9 + $0xb8] sm:$0xff]  ;;  %17314 = vst [vmem:[#allocation63_spill] sm:$0xff] %v15599_v1 }
 0xece   :  { %8102 = vmatprep.subr.mxu0 %v15567_v42  ;;  %8173 = vmatprep.subr.mxu1 %v15569_v40  ;;  %17312 = vst [vmem:[#allocation61_spill] sm:$0xff] %v15593_v11  ;;  %17313 = vst [vmem:[#allocation62_spill] sm:$0xff] %v15595_v37  ;;  %v15601_v10 = vld [vmem:[#allocation9 + $0xb0] sm:$0xff] }
 0xecf   :  { %v15589_v26 = vadd.f32 %v7780_v49, %v7779_v53  ;;  %8103 = vmatpush1.msra.mxu0 %v15573_v25  ;;  %8174 = vmatpush1.msra.mxu1 %v15575_v34  ;;  %17315 = vst [vmem:[#allocation64_spill] sm:$0xff] %v15601_v10  ;;  %v15605_v49 = vld [vmem:[#allocation9 + $0x88] sm:$0xff]  ;;  %v15607_v53 = vld [vmem:[#allocation9 + $0x98] sm:$0xff] }
 0xed0   :  { %8104 = vmatprep.subr.mxu0 %v15579_v51  ;;  %8175 = vmatprep.subr.mxu1 %v15581_v9  ;;  %17316 = vst [vmem:[#allocation65_spill] sm:$0xff] %v15605_v49  ;;  %17317 = vst [vmem:[#allocation66_spill] sm:$0xff] %v15607_v53  ;;  %v15614_v9 = vld [vmem:[#allocation9 + $0x90] sm:$0xff]  ;;  %v15624_v51 = vld [vmem:[#allocation9 + $0x60] sm:$0xff] }
 0xed1   :  { %8105 = vmatpush1.msra.mxu0 %v15585_v23  ;;  %8176 = vmatpush1.msra.mxu1 %v15587_v17  ;;  %9541 = vtanh.f32 %v15589_v26  ;;  %17319 = vst [vmem:[#allocation68_spill] sm:$0xff] %v15614_v9  ;;  %v15618_v23 = vld [vmem:[#allocation9 + $0x68] sm:$0xff]  ;;  %v15620_v17 = vld [vmem:[#allocation9 + $0x78] sm:$0xff]  ;;  %17322 = vst [vmem:[#allocation71_spill] sm:$0xff] %v15624_v51 }
 0xed2   :  { %8106 = vmatprep.subr.mxu0 %v15593_v11  ;;  %8177 = vmatprep.subr.mxu1 %v15595_v37  ;;  %17320 = vst [vmem:[#allocation69_spill] sm:$0xff] %v15618_v23  ;;  %17321 = vst [vmem:[#allocation70_spill] sm:$0xff] %v15620_v17  ;;  %v15626_v11 = vld [vmem:[#allocation9 + $0x70] sm:$0xff]  ;;  %v15630_v37 = vld [vmem:[#allocation9 + $0x48] sm:$0xff] }
 0xed3   :  { %8107 = vmatpush1.msra.mxu0 %v15599_v1  ;;  %8178 = vmatpush1.msra.mxu1 %v15601_v10  ;;  %17323 = vst [vmem:[#allocation72_spill] sm:$0xff] %v15626_v11  ;;  %v15632_v1 = vld [vmem:[#allocation9 + $0x58] sm:$0xff]  ;;  %v15636_v10 = vld [vmem:[#allocation9 + $0x40] sm:$0xff] }
 0xed4   :  { %8108 = vmatprep.subr.mxu0 %v15605_v49  ;;  %8179 = vmatprep.subr.mxu1 %v15607_v53  ;;  %17324 = vst [vmem:[#allocation73_spill] sm:$0xff] %v15632_v1  ;;  %v15638_v49 = vld [vmem:[#allocation9 + $0x50] sm:$0xff]  ;;  %v15642_v53 = vld [vmem:[#allocation9 + $0x28] sm:$0xff] }
 0xed5   :  { %8109 = vmatpush1.msra.mxu0 %v15612_v39  ;;  %8180 = vmatpush1.msra.mxu1 %v15614_v9  ;;  %17325 = vst [vmem:[#allocation74_spill] sm:$0xff] %v15638_v49  ;;  %17326 = vst [vmem:[#allocation75_spill] sm:$0xff] %v15642_v53  ;;  %v15644_v39 = vld [vmem:[#allocation9 + $0x38] sm:$0xff]  ;;  %v15648_v9 = vld [vmem:[#allocation9 + $0x20] sm:$0xff] }
 0xed6   :  { %8110 = vmatprep.subr.mxu0 %v15618_v23  ;;  %8181 = vmatprep.subr.mxu1 %v15620_v17  ;;  %17327 = vst [vmem:[#allocation76_spill] sm:$0xff] %v15644_v39  ;;  %v15650_v23 = vld [vmem:[#allocation9 + $0x30] sm:$0xff]  ;;  %v15654_v17 = vld [vmem:[#allocation9 + $0x8] sm:$0xff] }
 0xed7   :  { %8111 = vmatpush1.msra.mxu0 %v15624_v51  ;;  %8182 = vmatpush1.msra.mxu1 %v15626_v11  ;;  %17328 = vst [vmem:[#allocation77_spill] sm:$0xff] %v15650_v23  ;;  %v15656_v51 = vld [vmem:[#allocation9 + $0x18] sm:$0xff]  ;;  %v15660_v11 = vld [vmem:[#allocation9] sm:$0xff] }
 0xed8   :  { %8112 = vmatprep.subr.mxu0 %v15630_v37  ;;  %8183 = vmatprep.subr.mxu1 %v15632_v1  ;;  %v15664_v1 = vld [vmem:[#allocation9 + $0x10] sm:$0xff] }
 0xed9   :  { %8113 = vmatpush1.msra.mxu0 %v15636_v10  ;;  %8184 = vmatpush1.msra.mxu1 %v15638_v49  ;;  %v9540_v49 = vpop.eup %9539 }
 0xeda   :  { %8114 = vmatprep.subr.mxu0 %v15642_v53  ;;  %8185 = vmatprep.subr.mxu1 %v15644_v39 }
 0xedb   :  { %8115 = vmatpush1.msra.mxu0 %v15648_v9  ;;  %8186 = vmatpush1.msra.mxu1 %v15650_v23 }
 0xedc   :  { %8116 = vmatprep.subr.mxu0 %v15654_v17  ;;  %8187 = vmatprep.subr.mxu1 %v15656_v51 }
 0xedd   :  { %8117 = vmatpush1.msra.mxu0 %v15660_v11  ;;  %8150 = vmatprep.mubr.f32.mxu0 %v16384_v33 }
 0xede   :  { %v9542_v53 = vpop.eup %9541  ;;  %8188 = vmatpush1.msra.mxu1 %v15664_v1  ;;  %8221 = vmatprep.mubr.f32.mxu1 %v16384_v33 }
 0xedf   :  { %v7783_v39 = vmul.f32 %v9542_v53, %v9540_v49  ;;  %8371 = vmatprep.subr.mxu0 %v15278_v32  ;;  %8442 = vmatprep.subr.mxu1 %v15280_v6  ;;  %v17329_v32 = vld [vmem:[#allocation78_spill] sm:$0xff]  ;;  %v17330_v6 = vld [vmem:[#allocation79_spill] sm:$0xff] }
 0xee1   :  { %7785 = vst [vmem:[#allocation4 + $0x8] sm:$0x30] %v7783_v39  ;;  %v8084_v23 = vrot.slane %v7783_v39, 4  ;;  %v7788_v39 = vld [vmem:[#allocation3 + $0x68] sm:$0x30] }
 0xee3   :  { %8151 = vmatmul.mubr.f32.vlgmr.msra.gmra.mxu0 %v8084_v23  ;;  %8222 = vmatmul.mubr.f32.vlgmr.msra.gmra.mxu1 %v8084_v23 }
 0xee4   :  { %8372 = vmatpush1.msra.mxu0 %v15284_v22  ;;  %8443 = vmatpush1.msra.mxu1 %v15286_v45  ;;  %v17331_v22 = vld [vmem:[#allocation80_spill] sm:$0xff]  ;;  %v17332_v45 = vld [vmem:[#allocation81_spill] sm:$0xff] }
 0xee5   :  { %8373 = vmatprep.subr.mxu0 %v15290_v41  ;;  %8444 = vmatprep.subr.mxu1 %v15292_v57  ;;  %v17333_v41 = vld [vmem:[#allocation82_spill] sm:$0xff]  ;;  %v17334_v57 = vld [vmem:[#allocation83_spill] sm:$0xff] }
 0xee6   :  { %8374 = vmatpush1.msra.mxu0 %v15296_v30  ;;  %8445 = vmatpush1.msra.mxu1 %v15298_v2  ;;  %v17335_v30 = vld [vmem:[#allocation84_spill] sm:$0xff]  ;;  %v17336_v2 = vld [vmem:[#allocation85_spill] sm:$0xff] }
 0xee7   :  { %8375 = vmatprep.subr.mxu0 %v15302_v12  ;;  %8446 = vmatprep.subr.mxu1 %v15304_v56  ;;  %v17337_v12 = vld [vmem:[#allocation15_spill] sm:$0xff]  ;;  %v17338_v56 = vld [vmem:[#allocation16_spill] sm:$0xff] }
 0xee8   :  { %8376 = vmatpush1.msra.mxu0 %v15308_v20  ;;  %8447 = vmatpush1.msra.mxu1 %v15310_v54  ;;  %v17339_v20 = vld [vmem:[#allocation17_spill] sm:$0xff]  ;;  %v17340_v54 = vld [vmem:[#allocation18_spill] sm:$0xff] }
 0xee9   :  { %8377 = vmatprep.subr.mxu0 %v15314_v13  ;;  %8448 = vmatprep.subr.mxu1 %v15316_v29  ;;  %v17341_v13 = vld [vmem:[#allocation19_spill] sm:$0xff]  ;;  %v17342_v29 = vld [vmem:[#allocation20_spill] sm:$0xff] }
 0xeea   :  { %8378 = vmatpush1.msra.mxu0 %v15320_v44  ;;  %8449 = vmatpush1.msra.mxu1 %v15322_v55  ;;  %v17343_v44 = vld [vmem:[#allocation21_spill] sm:$0xff]  ;;  %v17344_v55 = vld [vmem:[#allocation22_spill] sm:$0xff] }
 0xeeb   :  { %8379 = vmatprep.subr.mxu0 %v15326_v21  ;;  %8450 = vmatprep.subr.mxu1 %v15328_v16  ;;  %v17345_v21 = vld [vmem:[#allocation23_spill] sm:$0xff]  ;;  %v17346_v16 = vld [vmem:[#allocation24_spill] sm:$0xff] }
 0xeec   :  { %8380 = vmatpush1.msra.mxu0 %v15332_v27  ;;  %8451 = vmatpush1.msra.mxu1 %v15334_v4  ;;  %v17347_v27 = vld [vmem:[#allocation25_spill] sm:$0xff]  ;;  %v17348_v4 = vld [vmem:[#allocation26_spill] sm:$0xff] }
 0xeed   :  { %8381 = vmatprep.subr.mxu0 %v15338_v19  ;;  %8452 = vmatprep.subr.mxu1 %v15340_v58  ;;  %v17349_v19 = vld [vmem:[#allocation27_spill] sm:$0xff]  ;;  %v17350_v58 = vld [vmem:[#allocation28_spill] sm:$0xff] }
 0xeee   :  { %8382 = vmatpush1.msra.mxu0 %v15344_v0  ;;  %8453 = vmatpush1.msra.mxu1 %v15346_v14  ;;  %v17351_v0 = vld [vmem:[#allocation29_spill] sm:$0xff]  ;;  %v17352_v14 = vld [vmem:[#allocation30_spill] sm:$0xff] }
 0xeef   :  { %8383 = vmatprep.subr.mxu0 %v15350_v5  ;;  %8454 = vmatprep.subr.mxu1 %v15352_v35  ;;  %v17353_v5 = vld [vmem:[#allocation31_spill] sm:$0xff]  ;;  %v17354_v35 = vld [vmem:[#allocation42_spill] sm:$0xff] }
 0xef0   :  { %8384 = vmatpush1.msra.mxu0 %v15356_v52  ;;  %8455 = vmatpush1.msra.mxu1 %v15358_v59 }
 0xef1   :  { %8385 = vmatprep.subr.mxu0 %v15362_v48  ;;  %8456 = vmatprep.subr.mxu1 %v15364_v46  ;;  %v7786_v48 = vld [vmem:[#allocation3 + $0x40] sm:$0x30] }
 0xef2   :  { %8386 = vmatpush1.msra.mxu0 %v15368_v62  ;;  %8457 = vmatpush1.msra.mxu1 %v15370_v7 }
 0xef3   :  { %8387 = vmatprep.subr.mxu0 %v15374_v50  ;;  %8458 = vmatprep.subr.mxu1 %v15376_v18  ;;  %v7787_v18 = vld [vmem:[#allocation3 + $0x30] sm:$0x30] }
 0xef4   :  { %8388 = vmatpush1.msra.mxu0 %v15380_v61  ;;  %8459 = vmatpush1.msra.mxu1 %v15382_v3 }
 0xef5   :  { %8389 = vmatprep.subr.mxu0 %v15386_v47  ;;  %8460 = vmatprep.subr.mxu1 %v15388_v31 }
 0xef6   :  { %8390 = vmatpush1.msra.mxu0 %v15392_v36  ;;  %8461 = vmatpush1.msra.mxu1 %v15394_v38  ;;  %v7789_v38 = vld [vmem:[#allocation3 + $0x28] sm:$0x30] }
 0xef7   :  { %8391 = vmatprep.subr.mxu0 %v17329_v32  ;;  %8462 = vmatprep.subr.mxu1 %v17330_v6 }
 0xef8   :  { %8392 = vmatpush1.msra.mxu0 %v17331_v22  ;;  %8463 = vmatpush1.msra.mxu1 %v17332_v45 }
 0xef9   :  { %8393 = vmatprep.subr.mxu0 %v17333_v41  ;;  %8464 = vmatprep.subr.mxu1 %v17334_v57 }
 0xefa   :  { %8394 = vmatpush1.msra.mxu0 %v17335_v30  ;;  %8465 = vmatpush1.msra.mxu1 %v17336_v2 }
 0xefb   :  { %8395 = vmatprep.subr.mxu0 %v17337_v12  ;;  %8466 = vmatprep.subr.mxu1 %v17338_v56  ;;  %v8264_v12 = vrot.slane %v15477_v60, 6 }
 0xefc   :  { %8396 = vmatpush1.msra.mxu0 %v17339_v20  ;;  %8467 = vmatpush1.msra.mxu1 %v17340_v54 }
 0xefd   :  { %8397 = vmatprep.subr.mxu0 %v17341_v13  ;;  %8468 = vmatprep.subr.mxu1 %v17342_v29 }
 0xefe   :  { %8398 = vmatpush1.msra.mxu0 %v17343_v44  ;;  %8469 = vmatpush1.msra.mxu1 %v17344_v55  ;;  %v8015_v55 = vld [vmem:[#allocation3 + $0x20] sm:$0xc] }
 0xeff   :  { %8399 = vmatprep.subr.mxu0 %v17345_v21  ;;  %8470 = vmatprep.subr.mxu1 %v17346_v16 }
 0xf00   :  { %8400 = vmatpush1.msra.mxu0 %v17347_v27  ;;  %8471 = vmatpush1.msra.mxu1 %v17348_v4 }
 0xf01   :  { %8401 = vmatprep.subr.mxu0 %v17349_v19  ;;  %8472 = vmatprep.subr.mxu1 %v17350_v58  ;;  %v8016_v58 = vld [vmem:[#allocation3 + $0x8] sm:$0xc] }
 0xf02   :  { %8402 = vmatpush1.msra.mxu0 %v17351_v0  ;;  %8435 = vmatprep.mubr.f32.mxu0 %v16384_v33 }
 0xf03   :  { %8473 = vmatpush1.msra.mxu1 %v17352_v14  ;;  %8506 = vmatprep.mubr.f32.mxu1 %v16384_v33 }
 0xf04   :  { %8600 = vmatprep.subr.mxu0 %v17353_v5  ;;  %8671 = vmatprep.subr.mxu1 %v17354_v35 }
 0xf7e   :  { %v7923_v52 = vpop.f32.mrf.mxu0  ;;  %v7994_v7 = vpop.f32.mrf.mxu1 }
 0xf7f   :  { %v8003_v59 = vrot.slane %v7923_v52, 4  ;;  %v8005_v49 = vrot.slane %v7994_v7, 4  ;;  %v8018_v52 = vld [vmem:[#allocation3 + $0x10] sm:$0xc] }
 0xf80   :  { %v7925_v46 = vpop.f32.mrf.mxu0  ;;  %v7996_v31 = vpop.f32.mrf.mxu1 }
 0xf81   :  { %v8011_v62 = vadd.f32 %v8003_v59, %v7786_v48  ;;  %v8004_v50 = vrot.slane %v7925_v46, 4  ;;  %v8006_v36 = vrot.slane %v7996_v31, 4  ;;  %v8013_v6 = vadd.f32 %v8005_v49, %v7788_v39  ;;  %v17356_v49 = vld [vmem:[#allocation43_spill] sm:$0xff]  ;;  %v17358_v39 = vld [vmem:[#allocation44_spill] sm:$0xff] }
 0xf83   :  { %v9033_v61 = vmul.f32 -1.442695, %v8011_v62  ;;  %v8012_v3 = vadd.f32 %v8004_v50, %v7787_v18  ;;  %v8014_v23 = vadd.f32 %v8006_v36, %v7789_v38  ;;  %v8017_v50 = vld [vmem:[#allocation3 + $0x70] sm:$0xc] }
 0xf85   :  { %9543 = vpow2.f32 %v9033_v61  ;;  %v9034_v47 = vmul.f32 -1.442695, %v8012_v3  ;;  %v9035_v53 = vmul.f32 -1.442695, %v8014_v23  ;;  %v17355_v23 = vld [vmem:[#allocation32_spill] sm:$0xff] }
 0xf87   :  { %9545 = vpow2.f32 %v9034_v47 }
 0xf88   :  { %9547 = vpow2.f32 %v9035_v53  ;;  %v17357_v53 = vld [vmem:[#allocation33_spill] sm:$0xff] }
 0xf92   :  { %v9544_v32 = vpop.eup %9543 }
 0xf93   :  { %v8247_v22 = vadd.f32 1.0, %v9544_v32  ;;  %v17359_v32 = vld [vmem:[#allocation34_spill] sm:$0xff] }
 0xf94   :  { %v9546_v45 = vpop.eup %9545 }
 0xf95   :  { %9549 = vrcp.f32 %v8247_v22  ;;  %v8253_v41 = vadd.f32 1.0, %v9546_v45  ;;  %v9548_v57 = vpop.eup %9547  ;;  %v17361_v22 = vld [vmem:[#allocation35_spill] sm:$0xff] }
 0xf96   :  { %9551 = vtanh.f32 %v8013_v6  ;;  %v8260_v54 = vadd.f32 1.0, %v9548_v57  ;;  %v17360_v6 = vld [vmem:[#allocation45_spill] sm:$0xff]  ;;  %v17366_v45 = vld [vmem:[#allocation39_spill] sm:$0xff] }
 0xf97   :  { %9553 = vrcp.f32 %v8253_v41  ;;  %v17367_v41 = vld [vmem:[#allocation40_spill] sm:$0xff]  ;;  %v17368_v57 = vld [vmem:[#allocation41_spill] sm:$0xff] }
 0xf98   :  { %9555 = vrcp.f32 %v8260_v54 }
 0xfa2   :  { %v9550_v30 = vpop.eup %9549 }
 0xfa3   :  { %v9552_v2 = vpop.eup %9551  ;;  %v8152_v56 = vpop.f32.mrf.mxu0 }
 0xfa4   :  { %v9554_v20 = vpop.eup %9553  ;;  %v8232_v13 = vrot.slane %v8152_v56, 6  ;;  %v8267_v29 = vmul.f32 %v9552_v2, %v9550_v30  ;;  %v8223_v27 = vpop.f32.mrf.mxu1  ;;  %v17369_v30 = vld [vmem:[#allocation47_spill] sm:$0xff]  ;;  %v17370_v2 = vld [vmem:[#allocation48_spill] sm:$0xff]  ;;  %v17371_v56 = vld [vmem:[#allocation49_spill] sm:$0xff] }
 0xfa5   :  { %v8266_v44 = vmul.f32 %v9554_v20, %v8264_v12  ;;  %v8154_v21 = vpop.f32.mrf.mxu0  ;;  %v8234_v48 = vrot.slane %v8223_v27, 6  ;;  %v9556_v46 = vpop.eup %9555  ;;  %v17372_v20 = vld [vmem:[#allocation50_spill] sm:$0xff] }
 0xfa6   :  { %v8240_v16 = vadd.f32 %v8232_v13, %v8015_v55  ;;  %v8233_v4 = vrot.slane %v8154_v21, 6  ;;  %v8225_v5 = vpop.f32.mrf.mxu1  ;;  %v17373_v13 = vld [vmem:[#allocation51_spill] sm:$0xff]  ;;  %v8291_v55 = vrot.slane %v15589_v26, 2  ;;  %v17375_v21 = vld [vmem:[#allocation53_spill] sm:$0xff] }
 0xfa7   :  { %v15741_v19 = vadd.f32 %v8267_v29, %v8266_v44  ;;  %v8235_v35 = vrot.slane %v8225_v5, 6  ;;  %v8242_v61 = vadd.f32 %v8234_v48, %v8017_v50  ;;  %v17374_v29 = vld [vmem:[#allocation52_spill] sm:$0xff]  ;;  %v17389_v48 = vld [vmem:[#allocation67_spill] sm:$0xff] }
 0xfa8   :  { %v9036_v0 = vmul.f32 -1.442695, %v8240_v16  ;;  %v8241_v14 = vadd.f32 %v8233_v4, %v8016_v58  ;;  %v17376_v16 = vld [vmem:[#allocation58_spill] sm:$0xff]  ;;  %v17379_v5 = vld [vmem:[#allocation56_spill] sm:$0xff]  ;;  %v17393_v50 = vld [vmem:[#allocation71_spill] sm:$0xff] }
 0xfa9   :  { %9557 = vtanh.f32 %v15741_v19  ;;  %v8243_v59 = vadd.f32 %v8235_v35, %v8018_v52  ;;  %v17377_v58 = vld [vmem:[#allocation54_spill] sm:$0xff]  ;;  %v17380_v35 = vld [vmem:[#allocation57_spill] sm:$0xff]  ;;  %v17381_v52 = vld [vmem:[#allocation59_spill] sm:$0xff] }
 0xfaa   :  { %9559 = vpow2.f32 %v9036_v0  ;;  %v9037_v60 = vmul.f32 -1.442695, %v8241_v14  ;;  %v17378_v0 = vld [vmem:[#allocation55_spill] sm:$0xff] }
 0xfab   :  { %v9038_v62 = vmul.f32 -1.442695, %v8243_v59  ;;  %v17388_v59 = vld [vmem:[#allocation66_spill] sm:$0xff] }
 0xfac   :  { %9561 = vpow2.f32 %v9037_v60 }
 0xfad   :  { %9563 = vpow2.f32 %v9038_v62  ;;  %v17391_v62 = vld [vmem:[#allocation69_spill] sm:$0xff] }
 0xfb6   :  { %v9558_v7 = vpop.eup %9557 }
 0xfb7   :  { %v9560_v18 = vpop.eup %9559  ;;  %v8270_v3 = vmul.f32 %v9558_v7, %v9556_v46  ;;  %v17390_v46 = vld [vmem:[#allocation68_spill] sm:$0xff]  ;;  %v17392_v7 = vld [vmem:[#allocation70_spill] sm:$0xff] }
 0xfb8   :  { %v8274_v47 = vadd.f32 1.0, %v9560_v18  ;;  %v17394_v18 = vld [vmem:[#allocation72_spill] sm:$0xff] }
 0xfb9   :  { %v9562_v31 = vpop.eup %9561  ;;  %8298 = vst [vmem:[#allocation4 + $0x10] sm:$0x30] %v8270_v3  ;;  %v8369_v36 = vrot.slane %v8270_v3, 4  ;;  %v17396_v3 = vld [vmem:[#allocation74_spill] sm:$0xff] }
 0xfba   :  { %9565 = vrcp.f32 %v8274_v47  ;;  %v8280_v38 = vadd.f32 1.0, %v9562_v31  ;;  %v9564_v12 = vpop.eup %9563  ;;  %v17397_v47 = vld [vmem:[#allocation75_spill] sm:$0xff]  ;;  %v17398_v31 = vld [vmem:[#allocation76_spill] sm:$0xff] }
 0xfbb   :  { %9567 = vtanh.f32 %v8242_v61  ;;  %8436 = vmatmul.mubr.f32.vlgmr.msra.gmra.mxu0 %v8369_v36  ;;  %8507 = vmatmul.mubr.f32.vlgmr.msra.gmra.mxu1 %v8369_v36  ;;  %v8287_v4 = vadd.f32 1.0, %v9564_v12  ;;  %v17395_v61 = vld [vmem:[#allocation73_spill] sm:$0xff]  ;;  %v8811_v12 = vld [vmem:[#allocation10 + $0x28] sm:$0xff] }
 0xfbc   :  { %9569 = vrcp.f32 %v8280_v38  ;;  %8601 = vmatpush1.msra.mxu0 %v15480_v43  ;;  %8672 = vmatpush1.msra.mxu1 %v15482_v8  ;;  %v17362_v43 = vld [vmem:[#allocation46_spill] sm:$0xff]  ;;  %v17363_v8 = vld [vmem:[#allocation36_spill] sm:$0xff]  ;;  %v17399_v36 = vld [vmem:[#allocation77_spill] sm:$0xff] }
 0xfbd   :  { %8602 = vmatprep.subr.mxu0 %v15484_v24  ;;  %8673 = vmatprep.subr.mxu1 %v15486_v15  ;;  %v17364_v24 = vld [vmem:[#allocation37_spill] sm:$0xff]  ;;  %v17365_v15 = vld [vmem:[#allocation38_spill] sm:$0xff]  ;;  %9571 = vrcp.f32 %v8287_v4 }
 0xfbe   :  { %8603 = vmatpush1.msra.mxu0 %v17355_v23  ;;  %8674 = vmatpush1.msra.mxu1 %v17356_v49  ;;  %v8820_v49 = vld [vmem:[#allocation10 + $0x70] sm:$0xff] }
 0xfbf   :  { %8604 = vmatprep.subr.mxu0 %v17357_v53  ;;  %8675 = vmatprep.subr.mxu1 %v17358_v39  ;;  %v8819_v53 = vld [vmem:[#allocation10 + $0x68] sm:$0xff]  ;;  %v8833_v39 = vld [vmem:[#allocation10 + $0xd8] sm:$0xff] }
 0xfc0   :  { %8605 = vmatpush1.msra.mxu0 %v17359_v32  ;;  %8676 = vmatpush1.msra.mxu1 %v17360_v6  ;;  %v8817_v32 = vld [vmem:[#allocation10 + $0x58] sm:$0xff]  ;;  %v8832_v6 = vld [vmem:[#allocation10 + $0xd0] sm:$0xff] }
 0xfc1   :  { %8606 = vmatprep.subr.mxu0 %v17361_v22  ;;  %8677 = vmatprep.subr.mxu1 %v17362_v43  ;;  %v8816_v22 = vld [vmem:[#allocation10 + $0x50] sm:$0xff]  ;;  %v8831_v43 = vld [vmem:[#allocation10 + $0xc8] sm:$0xff] }
 0xfc2   :  { %8607 = vmatpush1.msra.mxu0 %v17363_v8  ;;  %8678 = vmatpush1.msra.mxu1 %v17364_v24  ;;  %v8815_v8 = vld [vmem:[#allocation10 + $0x48] sm:$0xff]  ;;  %v8830_v24 = vld [vmem:[#allocation10 + $0xc0] sm:$0xff] }
 0xfc3   :  { %8608 = vmatprep.subr.mxu0 %v17365_v15  ;;  %8679 = vmatprep.subr.mxu1 %v17366_v45  ;;  %v8814_v15 = vld [vmem:[#allocation10 + $0x40] sm:$0xff]  ;;  %v8829_v45 = vld [vmem:[#allocation10 + $0xb8] sm:$0xff] }
 0xfc4   :  { %8609 = vmatpush1.msra.mxu0 %v17367_v41  ;;  %8680 = vmatpush1.msra.mxu1 %v17368_v57  ;;  %v8813_v41 = vld [vmem:[#allocation10 + $0x38] sm:$0xff]  ;;  %v8828_v57 = vld [vmem:[#allocation10 + $0xb0] sm:$0xff] }
 0xfc5   :  { %8610 = vmatprep.subr.mxu0 %v17369_v30  ;;  %8681 = vmatprep.subr.mxu1 %v17370_v2  ;;  %v8812_v30 = vld [vmem:[#allocation10 + $0x30] sm:$0xff]  ;;  %v8827_v2 = vld [vmem:[#allocation10 + $0xa8] sm:$0xff] }
 0xfc6   :  { %8611 = vmatpush1.msra.mxu0 %v17371_v56  ;;  %8682 = vmatpush1.msra.mxu1 %v17372_v20  ;;  %v8826_v56 = vld [vmem:[#allocation10 + $0xa0] sm:$0xff] }
 0xfc7   :  { %v9566_v54 = vpop.eup %9565  ;;  %8612 = vmatprep.subr.mxu0 %v17373_v13  ;;  %8683 = vmatprep.subr.mxu1 %v17374_v29  ;;  %v8810_v20 = vld [vmem:[#allocation10 + $0x20] sm:$0xff]  ;;  %v8809_v13 = vld [vmem:[#allocation10 + $0x18] sm:$0xff]  ;;  %v8824_v29 = vld [vmem:[#allocation10 + $0x90] sm:$0xff] }
 0xfc8   :  { %v9568_v44 = vpop.eup %9567  ;;  %8613 = vmatpush1.msra.mxu0 %v17375_v21  ;;  %8684 = vmatpush1.msra.mxu1 %v17376_v16  ;;  %v8807_v21 = vld [vmem:[#allocation10 + $0x8] sm:$0xff]  ;;  %v8822_v16 = vld [vmem:[#allocation10 + $0x80] sm:$0xff] }
 0xfc9   :  { %v9570_v27 = vpop.eup %9569  ;;  %8614 = vmatprep.subr.mxu0 %v17377_v58  ;;  %8685 = vmatprep.subr.mxu1 %v17378_v0  ;;  %v8294_v14 = vmul.f32 %v9568_v44, %v9566_v54  ;;  %v8825_v54 = vld [vmem:[#allocation10 + $0x98] sm:$0xff]  ;;  %v8808_v44 = vld [vmem:[#allocation10 + $0x10] sm:$0xff]  ;;  %v8300_v0 = vld [vmem:[#allocation3 + $0x40] sm:$0xc0] }
 0xfca   :  { %v8293_v60 = vmul.f32 %v9570_v27, %v8291_v55  ;;  %8615 = vmatpush1.msra.mxu0 %v15560_v28  ;;  %8686 = vmatpush1.msra.mxu1 %v15562_v63  ;;  %v17382_v28 = vld [vmem:[#allocation60_spill] sm:$0xff]  ;;  %v17384_v63 = vld [vmem:[#allocation62_spill] sm:$0xff]  ;;  %v9572_v38 = vpop.eup %9571  ;;  %v8806_v27 = vld [vmem:[#allocation10] sm:$0xff] }
 0xfcb   :  { %8616 = vmatprep.subr.mxu0 %v15567_v42  ;;  %8687 = vmatprep.subr.mxu1 %v15569_v40  ;;  %v17383_v42 = vld [vmem:[#allocation61_spill] sm:$0xff]  ;;  %v17385_v40 = vld [vmem:[#allocation63_spill] sm:$0xff]  ;;  %v8823_v55 = vld [vmem:[#allocation10 + $0x88] sm:$0xff] }
 0xfcc   :  { %v15777_v26 = vadd.f32 %v8294_v14, %v8293_v60  ;;  %8617 = vmatpush1.msra.mxu0 %v15573_v25  ;;  %8688 = vmatpush1.msra.mxu1 %v15575_v34  ;;  %v17386_v25 = vld [vmem:[#allocation64_spill] sm:$0xff]  ;;  %v17387_v34 = vld [vmem:[#allocation65_spill] sm:$0xff] }
 0xfcd   :  { %8618 = vmatprep.subr.mxu0 %v17379_v5  ;;  %8689 = vmatprep.subr.mxu1 %v17380_v35 }
 0xfce   :  { %8619 = vmatpush1.msra.mxu0 %v17381_v52  ;;  %8690 = vmatpush1.msra.mxu1 %v17382_v28  ;;  %9573 = vtanh.f32 %v15777_v26  ;;  %v8301_v52 = vld [vmem:[#allocation3 + $0x30] sm:$0xc0] }
 0xfcf   :  { %8620 = vmatprep.subr.mxu0 %v17383_v42  ;;  %8691 = vmatprep.subr.mxu1 %v17384_v63 }
 0xfd0   :  { %8621 = vmatpush1.msra.mxu0 %v17385_v40  ;;  %8692 = vmatpush1.msra.mxu1 %v17386_v25 }
 0xfd1   :  { %8622 = vmatprep.subr.mxu0 %v17387_v34  ;;  %8693 = vmatprep.subr.mxu1 %v17388_v59  ;;  %v8303_v34 = vld [vmem:[#allocation3 + $0x28] sm:$0xc0] }
 0xfd2   :  { %8623 = vmatpush1.msra.mxu0 %v17389_v48  ;;  %8694 = vmatpush1.msra.mxu1 %v17390_v46 }
 0xfd3   :  { %8624 = vmatprep.subr.mxu0 %v17391_v62  ;;  %8695 = vmatprep.subr.mxu1 %v17392_v7  ;;  %v8302_v62 = vld [vmem:[#allocation3 + $0x68] sm:$0xc0] }
 0xfd4   :  { %8625 = vmatpush1.msra.mxu0 %v17393_v50  ;;  %8696 = vmatpush1.msra.mxu1 %v17394_v18 }
 0xfd5   :  { %8626 = vmatprep.subr.mxu0 %v15630_v37  ;;  %8697 = vmatprep.subr.mxu1 %v17395_v61 }
 0xfd6   :  { %8627 = vmatpush1.msra.mxu0 %v15636_v10  ;;  %8698 = vmatpush1.msra.mxu1 %v17396_v3 }
 0xfd7   :  { %8628 = vmatprep.subr.mxu0 %v17397_v47  ;;  %8699 = vmatprep.subr.mxu1 %v17398_v31 }
 0xfd8   :  { %8629 = vmatpush1.msra.mxu0 %v15648_v9  ;;  %8700 = vmatpush1.msra.mxu1 %v17399_v36  ;;  %v8837_v9 = vld [vmem:[#allocation10 + $0xf8] sm:$0xff] }
 0xfd9   :  { %8630 = vmatprep.subr.mxu0 %v15654_v17  ;;  %8701 = vmatprep.subr.mxu1 %v15656_v51  ;;  %v8821_v17 = vld [vmem:[#allocation10 + $0x78] sm:$0xff]  ;;  %v8836_v51 = vld [vmem:[#allocation10 + $0xf0] sm:$0xff] }
 0xfda   :  { %8631 = vmatpush1.msra.mxu0 %v15660_v11  ;;  %8664 = vmatprep.mubr.f32.mxu0 %v16384_v33  ;;  %v8835_v11 = vld [vmem:[#allocation10 + $0xe8] sm:$0xff] }
 0xfdb   :  { %v9574_v37 = vpop.eup %9573  ;;  %8702 = vmatpush1.msra.mxu1 %v15664_v1  ;;  %8735 = vmatprep.mubr.f32.mxu1 %v16384_v33  ;;  %v8834_v1 = vld [vmem:[#allocation10 + $0xe0] sm:$0xff] }
 0xfdc   :  { %v8297_v10 = vmul.f32 %v9574_v37, %v9572_v38  ;;  %9046 = vmatprep.subr.mxu0 %v8837_v9  ;;  %v8818_v33 = vld [vmem:[#allocation10 + $0x60] sm:$0xff]  ;;  %v8766_v38 = vrot.slane %v15741_v19, 6  ;;  %v8532_v19 = vld [vmem:[#allocation3 + $0x10] sm:$0x3] }
 0xfde   :  { %8299 = vst [vmem:[#allocation4 + $0x8] sm:$0xc] %v8297_v10  ;;  %v8598_v23 = vrot.slane %v8297_v10, 2  ;;  %v8529_v10 = vld [vmem:[#allocation3 + $0x20] sm:$0x3] }
 0xfe0   :  { %8665 = vmatmul.mubr.f32.vlgmr.msra.gmra.mxu0 %v8598_v23  ;;  %8736 = vmatmul.mubr.f32.vlgmr.msra.gmra.mxu1 %v8598_v23 }
 0xfe1   :  { %9047 = vmatpush3.msra.mxu0 %v8821_v17 }
 0xfe2   :  { %9048 = vmatprep.subr.mxu0 %v8836_v51 }
 0xfe3   :  { %9049 = vmatpush3.msra.mxu0 %v8820_v49 }
 0xfe4   :  { %9050 = vmatprep.subr.mxu0 %v8835_v11  ;;  %v8530_v11 = vld [vmem:[#allocation3 + $0x8] sm:$0x3] }
 0xfe5   :  { %9051 = vmatpush3.msra.mxu0 %v8819_v53 }
 0xfe6   :  { %9052 = vmatprep.subr.mxu0 %v8834_v1 }
 0xfe7   :  { %9053 = vmatpush3.msra.mxu0 %v8818_v33 }
 0xfe8   :  { %9054 = vmatprep.subr.mxu0 %v8833_v39 }
 0xfe9   :  { %9055 = vmatpush3.msra.mxu0 %v8817_v32 }
 0xfea   :  { %9056 = vmatprep.subr.mxu0 %v8832_v6 }
 0xfeb   :  { %9057 = vmatpush3.msra.mxu0 %v8816_v22 }
 0xfec   :  { %9058 = vmatprep.subr.mxu0 %v8831_v43 }
 0xfed   :  { %9059 = vmatpush3.msra.mxu0 %v8815_v8 }
 0xfee   :  { %9060 = vmatprep.subr.mxu0 %v8830_v24 }
 0xfef   :  { %9061 = vmatpush3.msra.mxu0 %v8814_v15  ;;  %v8531_v15 = vld [vmem:[#allocation3 + $0x70] sm:$0x3] }
 0xff0   :  { %9062 = vmatprep.subr.mxu0 %v8829_v45 }
 0xff1   :  { %9063 = vmatpush3.msra.mxu0 %v8813_v41 }
 0xff2   :  { %9064 = vmatprep.subr.mxu0 %v8828_v57 }
 0xff3   :  { %9065 = vmatpush3.msra.mxu0 %v8812_v30 }
 0xff4   :  { %9066 = vmatprep.subr.mxu0 %v8827_v2 }
 0xff5   :  { %9067 = vmatpush3.msra.mxu0 %v8811_v12 }
 0xff6   :  { %9068 = vmatprep.subr.mxu0 %v8826_v56 }
 0xff7   :  { %9069 = vmatpush3.msra.mxu0 %v8810_v20 }
 0xff8   :  { %9070 = vmatprep.subr.mxu0 %v8825_v54 }
 0xff9   :  { %9071 = vmatpush3.msra.mxu0 %v8809_v13 }
 0xffa   :  { %9072 = vmatprep.subr.mxu0 %v8824_v29  ;;  %v8793_v29 = vrot.slane %v15777_v26, 2 }
 0xffb   :  { %9073 = vmatpush3.msra.mxu0 %v8808_v44 }
 0xffc   :  { %9074 = vmatprep.subr.mxu0 %v8823_v55 }
 0xffd   :  { %9075 = vmatpush3.msra.mxu0 %v8807_v21 }
 0xffe   :  { %9076 = vmatprep.subr.mxu0 %v8822_v16 }
 0xfff   :  { %9077 = vmatpush3.msra.mxu0 %v8806_v27 }
0x107b   :  { %v8437_v4 = vpop.f32.mrf.mxu0  ;;  %v8508_v14 = vpop.f32.mrf.mxu1 }
0x107c   :  { %v8517_v58 = vrot.slane %v8437_v4, 2  ;;  %v8519_v48 = vrot.slane %v8508_v14, 2 }
0x107d   :  { %v8439_v60 = vpop.f32.mrf.mxu0  ;;  %v8510_v63 = vpop.f32.mrf.mxu1 }
0x107e   :  { %v8525_v5 = vadd.f32 %v8517_v58, %v8300_v0  ;;  %v8518_v35 = vrot.slane %v8439_v60, 2  ;;  %v8520_v25 = vrot.slane %v8510_v63, 2  ;;  %v8527_v50 = vadd.f32 %v8519_v48, %v8302_v62  ;;  %v8802_v60 = vld [vmem:[#allocation4 + $0x18] sm:$0xff] }
0x1080   :  { %v9039_v28 = vmul.f32 -1.442695, %v8525_v5  ;;  %v8526_v42 = vadd.f32 %v8518_v35, %v8301_v52  ;;  %v8528_v59 = vadd.f32 %v8520_v25, %v8303_v34  ;;  %v8805_v5 = vld [vmem:[#allocation4] sm:$0xff] }
0x1082   :  { %9575 = vpow2.f32 %v9039_v28  ;;  %v9040_v40 = vmul.f32 -1.442695, %v8526_v42  ;;  %v9041_v46 = vmul.f32 -1.442695, %v8528_v59  ;;  %v9045_v28 = vld [vmem:[%s15832_s9] ss:$0 sm:$0xff] }
0x1084   :  { %9577 = vpow2.f32 %v9040_v40 }
0x1085   :  { %9579 = vpow2.f32 %v9041_v46 }
0x108f   :  { %v9576_v7 = vpop.eup %9575 }
0x1090   :  { %v8749_v18 = vadd.f32 1.0, %v9576_v7 }
0x1091   :  { %v9578_v61 = vpop.eup %9577 }
0x1092   :  { %9581 = vrcp.f32 %v8749_v18  ;;  %v8755_v3 = vadd.f32 1.0, %v9578_v61  ;;  %v9580_v47 = vpop.eup %9579 }
0x1093   :  { %9583 = vtanh.f32 %v8527_v50  ;;  %v8762_v37 = vadd.f32 1.0, %v9580_v47 }
0x1094   :  { %9585 = vrcp.f32 %v8755_v3 }
0x1095   :  { %9587 = vrcp.f32 %v8762_v37 }
0x109f   :  { %v9582_v31 = vpop.eup %9581 }
0x10a0   :  { %v9584_v36 = vpop.eup %9583  ;;  %v8666_v23 = vpop.f32.mrf.mxu0 }
0x10a1   :  { %v9586_v9 = vpop.eup %9585  ;;  %v8742_v17 = vadd.f32 %v8666_v23, %v8529_v10  ;;  %v8769_v51 = vmul.f32 %v9584_v36, %v9582_v31  ;;  %v8737_v32 = vpop.f32.mrf.mxu1 }
0x10a2   :  { %v8768_v49 = vmul.f32 %v9586_v9, %v8766_v38  ;;  %v8668_v53 = vpop.f32.mrf.mxu0  ;;  %v9588_v24 = vpop.eup %9587  ;;  %v8744_v41 = vadd.f32 %v8737_v32, %v8531_v15 }
0x10a3   :  { %v9042_v1 = vmul.f32 -1.442695, %v8742_v17  ;;  %v8743_v33 = vadd.f32 %v8668_v53, %v8530_v11  ;;  %v8739_v22 = vpop.f32.mrf.mxu1 }
0x10a4   :  { %v8770_v39 = vadd.f32 %v8769_v51, %v8768_v49  ;;  %v8745_v43 = vadd.f32 %v8739_v22, %v8532_v19 }
0x10a5   :  { %9589 = vpow2.f32 %v9042_v1  ;;  %v9043_v6 = vmul.f32 -1.442695, %v8743_v33 }
0x10a6   :  { %9591 = vtanh.f32 %v8770_v39  ;;  %v9044_v8 = vmul.f32 -1.442695, %v8745_v43 }
0x10a7   :  { %9593 = vpow2.f32 %v9043_v6 }
0x10a8   :  { %9595 = vpow2.f32 %v9044_v8 }
0x10b2   :  { %v9590_v45 = vpop.eup %9589 }
0x10b3   :  { %v9592_v57 = vpop.eup %9591  ;;  %v8776_v30 = vadd.f32 1.0, %v9590_v45 }
0x10b4   :  { %v9594_v2 = vpop.eup %9593  ;;  %v8772_v12 = vmul.f32 %v9592_v57, %v9588_v24 }
0x10b5   :  { %9597 = vrcp.f32 %v8776_v30  ;;  %v8782_v56 = vadd.f32 1.0, %v9594_v2  ;;  %v9596_v20 = vpop.eup %9595 }
0x10b6   :  { %8800 = vst [vmem:[#allocation4 + $0x10] sm:$0xc0] %v8772_v12  ;;  %9599 = vtanh.f32 %v8744_v41  ;;  %v8789_v55 = vadd.f32 1.0, %v9596_v20 }
0x10b7   :  { %9601 = vrcp.f32 %v8782_v56 }
0x10b8   :  { %9603 = vrcp.f32 %v8789_v55 }
0x10bd   :  { %v8804_v35 = vld [vmem:[#allocation4 + $0x10] sm:$0xff] }
0x10c2   :  { %v9598_v54 = vpop.eup %9597 }
0x10c3   :  { %v9600_v13 = vpop.eup %9599 }
0x10c4   :  { %v9602_v44 = vpop.eup %9601  ;;  %v8796_v21 = vmul.f32 %v9600_v13, %v9598_v54 }
0x10c5   :  { %v8795_v16 = vmul.f32 %v9602_v44, %v8793_v29  ;;  %v9604_v4 = vpop.eup %9603 }
0x10c7   :  { %v8797_v27 = vadd.f32 %v8796_v21, %v8795_v16 }
0x10c9   :  { %9605 = vtanh.f32 %v8797_v27 }
0x10d6   :  { %v9606_v58 = vpop.eup %9605 }
0x10d7   :  { %v8799_v0 = vmul.f32 %v9606_v58, %v9604_v4 }
0x10d9   :  { %8801 = vst [vmem:[#allocation4 + $0x8] sm:$0x3] %v8799_v0 }
0x10e0   :  { %v8803_v14 = vld [vmem:[#allocation4 + $0x8] sm:$0xff] }
0x10e1   :  { %8909 = vmatprep.mubr.f32.mxu0 %v8803_v14 }
0x10e2   :  { %8910 = vmatmul.mubr.f32.vlgmr.msra.gmra.mxu0 %v8802_v60 }
0x10e3   :  { %8914 = vmatprep.mubr.f32.mxu0 %v8805_v5 }
0x10e6   :  { %8915 = vmatmul.mubr.f32.gmra.mxu0 %v8804_v35 }
0x11a2   :  { %v9078_v26 = vpop.f32.mrf.mxu0 }
0x11a4   :  { %v9079_v52 = vpop.f32.mrf.mxu0 }
0x11a5   :  { %v9080_v42 = vadd.f32 %v9079_v52, %v9078_v26 }
0x11a6   :  { %v9081_v63 = vpop.f32.mrf.mxu0 }
0x11a7   :  { %v8912_v40 = vadd.f32 %v9080_v42, %v9045_v28 }
0x11a8   :  { %v9082_v25 = vpop.f32.mrf.mxu0 }
0x11a9   :  { %v9083_v34 = vadd.f32 %v9082_v25, %v9081_v63  ;;  %8920 = vmax.xlane.f32.xlu0 %v8912_v40 }
0x11ab   :  { %v8917_v59 = vadd.f32 %v9083_v34, %v9045_v28 }
0x11ad   :  { %8922 = vmax.xlane.f32.xlu0 %v8917_v59 }
0x1232   :  { %v8921_v48 = vpop.xlane.xlu0 %8920 }
0x1233   :  { %v8924_v46 = vsub.f32 %v8912_v40, %v8921_v48 }
0x1235   :  { %v8926_v62 = vmul.f32 1.442695, %v8924_v46 }
0x1236   :  { %v8923_v7 = vpop.xlane.xlu0 %8922 }
0x1237   :  { %v8925_v50 = vsub.f32 %v8917_v59, %v8923_v7  ;;  %9607 = vpow2.f32 %v8926_v62 }
0x1239   :  { %v8928_v18 = vmul.f32 1.442695, %v8925_v50 }
0x123b   :  { %9609 = vpow2.f32 %v8928_v18 }
0x1244   :  { %v9608_v61 = vpop.eup %9607 }
0x1245   :  { %8930 = vadd.xlane.f32.xlu1 %v9608_v61 }
0x1248   :  { %v9610_v3 = vpop.eup %9609 }
0x1249   :  { %8932 = vadd.xlane.f32.xlu1 %v9610_v3 }
0x12ce   :  { %v8931_v47 = vpop.xlane.xlu1 %8930 }
0x12cf   :  { %9611 = vlog2.f32 %v8931_v47 }
0x12d2   :  { %v8933_v31 = vpop.xlane.xlu1 %8932 }
0x12d3   :  { %9613 = vlog2.f32 %v8933_v31 }
0x12dc   :  { %v9612_v36 = vpop.eup %9611 }
0x12dd   :  { %v8935_v38 = vmul.f32 0.6931472, %v9612_v36 }
0x12df   :  { %v8938_v37 = vsub.f32 %v8924_v46, %v8935_v38 }
0x12e0   :  { %v9614_v10 = vpop.eup %9613 }
0x12e1   :  { %8940 = vst [vmem:[%s15833_s10] sm:$0xff] %v8938_v37  ;;  %v8937_v23 = vmul.f32 0.6931472, %v9614_v10 }
0x12e3   :  { %v8939_v9 = vsub.f32 %v8925_v50, %v8937_v23 }
0x12e5   :  { %8941 = vst [vmem:[%s15833_s10 + $0x8] sm:$0xff] %v8939_v9 }
0x12e6   :  { %8946 = vsyncpa [#allocation6], 1 }
0x12e7   :  { %8947 = vsyncpa [#allocation8], 1 }
0x12e8   :  { %8948 = vsyncpa [#allocation11], 1 }

</bundles_post_ra>
